<compile_context>
chip_gen: v7x
topology: tpu7x:2x2x1
jax: 0.10.0
libtpu: 0.0.40
codegen_flags: <defaults>
</compile_context>

<pallas_src>
import warnings
from dataclasses import dataclass
from enum import Enum

import numpy as np
import jax
import jax.numpy as jnp
from jax.experimental import pallas as pl
from jax.experimental.pallas import tpu as pltpu


# ------------------------------------------------------------------ metadata
class FeatureType(Enum):
    VISUAL = "visual"
    STATE = "state"
    ACTION = "action"


class NormalizationMode(Enum):
    MEAN_STD = "mean_std"
    MIN_MAX = "min_max"
    IDENTITY = "identity"


@dataclass(frozen=True)
class PolicyFeature:
    type: FeatureType
    shape: tuple


def _no_stats_error_str(name: str) -> str:
    return (f"`{name}` is infinity. You should either initialize with `stats` as "
            "an argument, or use a pretrained model.")


# ------------------------------------------------------------------ kernel
def _scale_bias_kernel(x_ref, scale_ref, bias_ref, o_ref):
    # out = x * scale + bias ; the stat blocks broadcast along whichever of
    # their dims is size 1 (rows for visual stats, cols for vector stats).
    x = x_ref[...].astype(jnp.float32)
    o_ref[...] = (x * scale_ref[...] + bias_ref[...]).astype(o_ref.dtype)


# Dispatch threshold: below ~2 MiB the fixed pallas_call cost loses to a
# fused XLA broadcast FMA on every generation.
_PALLAS_MIN_BYTES = 2 << 20
# Tile caps: up to 512x4096 f32 = 8 MiB per block (per perf review) to
# amortize per-grid-step overhead; VMEM need is covered by an explicit
# vmem_limit_bytes computed per call.
_ROW_TILE_CAP = 512      # multiple of 8   (sublanes)
_COL_TILE_CAP = 4096     # multiple of 128 (lanes)


def _pick_tile(dim, cap, quantum):
    """Largest tile <= cap that is the full dim or a `quantum` multiple.

    Prefers a divisor of `dim` so the last block is not a masked partial
    store (lane/sublane-dense vst, no DMA of padded garbage)."""
    if dim <= cap:
        return dim
    fallback = (cap // quantum) * quantum
    t = fallback
    while t >= quantum:
        if dim % t == 0:
            return t
        t -= quantum
    return fallback


def _pallas_scale_bias(x2d, scale2d, bias2d, out_dtype, donate_input=False):
    rows, cols = x2d.shape
    rt = _pick_tile(rows, _ROW_TILE_CAP, 8)
    ct = _pick_tile(cols, _COL_TILE_CAP, 128)

    # v7x has 2 TensorCores per chip: keep the "parallel" grid >= 2 points so
    # both cores stream HBM.  Prefer splitting rows (keeps output lane-dense).
    if pl.cdiv(rows, rt) * pl.cdiv(cols, ct) < 2:
        if rows >= 16:
            rt = (((rows + 1) // 2) + 7) // 8 * 8
        elif cols >= 256:
            ct = (((cols + 1) // 2) + 127) // 128 * 128

    grid = (pl.cdiv(rows, rt), pl.cdiv(cols, ct))

    s_rows, s_cols = scale2d.shape
    row_follow = s_rows != 1
    col_follow = s_cols != 1
    stat_block = (rt if row_follow else 1, ct if col_follow else 1)

    def stat_index_map(i, j):
        return (i if row_follow else 0, j if col_follow else 0)

    data_spec = pl.BlockSpec((rt, ct), lambda i, j: (i, j))
    stat_spec = pl.BlockSpec(stat_block, stat_index_map)

    # Explicit scoped-VMEM budget: double-buffered input + output blocks plus
    # the (tiny) stat blocks, with slack.  Keeps the large tiles safe on v5e
    # (16 MiB default scoped limit) and within v7x's 64 MiB physical VMEM.
    in_bytes = rt * ct * x2d.dtype.itemsize
    out_bytes = rt * ct * jnp.dtype(out_dtype).itemsize
    stat_bytes = 2 * stat_block[0] * stat_block[1] * 4
    vmem_limit = min(max(2 * (in_bytes + out_bytes + stat_bytes) + (4 << 20),
                         32 << 20), 60 << 20)

    # Optional buffer donation: avoids a second full-size HBM allocation for
    # large image batches.  Off by default because callers may still hold the
    # (reshaped) input array.
    io_aliases = {0: 0} if (donate_input and x2d.dtype == jnp.dtype(out_dtype)) else {}

    return pl.pallas_call(
        _scale_bias_kernel,
        out_shape=jax.ShapeDtypeStruct((rows, cols), out_dtype),
        grid=grid,
        in_specs=[data_spec, stat_spec, stat_spec],
        out_specs=pl.BlockSpec((rt, ct), lambda i, j: (i, j)),
        input_output_aliases=io_aliases,
        compiler_params=pltpu.CompilerParams(
            dimension_semantics=("parallel", "parallel"),
            vmem_limit_bytes=vmem_limit),
    )(x2d, scale2d, bias2d)


def _apply_scale_bias_2d(x2d, scale2d, bias2d, out_dtype=jnp.float32,
                         donate_input=False):
    rows, cols = x2d.shape
    nbytes = rows * cols * x2d.dtype.itemsize
    if cols >= 128 and nbytes >= _PALLAS_MIN_BYTES:
        return _pallas_scale_bias(x2d, scale2d, bias2d, out_dtype, donate_input)
    # Small feature (e.g. an action vector or a small image batch): pallas
    # dispatch + per-step overhead dwarfs the DMA of a sub-MiB tensor, so let
    # XLA emit (and fuse) the broadcast FMA directly.
    return (x2d.astype(jnp.float32) * scale2d + bias2d).astype(out_dtype)


# ------------------------------------------------------------------ module
class Unnormalize:
    """JAX/Pallas port of the PyTorch `Unnormalize` module (forward only).

    out_dtype defaults to float32 (torch promotion vs the f32 stat buffers);
    pass jnp.bfloat16 to cut HBM write traffic when consumers accept bf16.
    """

    def __init__(self, features, norm_map, stats=None, *,
                 out_dtype=jnp.float32, donate_input=False):
        self.features = features
        self.norm_map = norm_map
        self.out_dtype = out_dtype
        self.donate_input = donate_input
        self.buffers = {}
        self._visual_stat_cache = {}   # (key, leading batch size) -> (s2, b2)

        for key, ft in features.items():
            mode = norm_map.get(ft.type, NormalizationMode.IDENTITY)
            if mode is NormalizationMode.IDENTITY:
                continue
            if mode not in (NormalizationMode.MEAN_STD, NormalizationMode.MIN_MAX):
                raise ValueError(mode)

            shape = tuple(ft.shape)
            is_visual = ft.type is FeatureType.VISUAL
            if is_visual:
                assert len(shape) == 3, f"number of dimensions of {key} != 3 (shape={shape!r})"
                c, h, w = shape
                assert c < h and c < w, f"{key} is not channel first (shape={shape!r})"
                shape = (c, 1, 1)

            names = (("mean", "std") if mode is NormalizationMode.MEAN_STD
                     else ("min", "max"))
            if stats is not None and key in stats:
                a = jnp.asarray(stats[key][names[0]], jnp.float32).reshape(shape)
                b = jnp.asarray(stats[key][names[1]], jnp.float32).reshape(shape)
            else:
                # default buffers mirror the torch module: +inf until loaded
                a = jnp.full(shape, jnp.inf, jnp.float32)
                b = jnp.full(shape, jnp.inf, jnp.float32)

            # Validity check ONCE at construction (host side); avoids a
            # device->host sync per feature per forward call.
            invalid = None
            for name, arr in zip(names, (a, b)):
                if bool(np.isinf(np.asarray(arr)).any()):
                    invalid = name
                    break

            if mode is NormalizationMode.MEAN_STD:
                scale, bias = b, a                    # scale = std, bias = mean
            else:
                if invalid is None and bool(np.any(np.asarray(b) == np.asarray(a))):
                    warnings.warn(
                        f"min == max for some entries of `{key}`: unnormalize will "
                        "collapse those feature dimensions to the constant min value.")
                scale = (b - a) * 0.5                 # (max - min) / 2
                bias = (b + a) * 0.5                  # (max + min) / 2

            entry = {"invalid": invalid, "is_visual": is_visual}
            if is_visual:
                c = shape[0]
                entry["channels"] = c
                entry["scale_col"] = scale.reshape(c, 1)   # per-row stats seed
                entry["bias_col"] = bias.reshape(c, 1)
            else:
                feat = int(np.prod(shape))
                entry["ndim"] = len(shape)
                entry["scale_row"] = scale.reshape(1, feat)  # per-col stats
                entry["bias_row"] = bias.reshape(1, feat)
                entry["feat"] = feat
            self.buffers[key] = entry

    def _visual_stats(self, key, n):
        """Tiled (N*C, 1) stats, cached per (key, leading batch size)."""
        ck = (key, n)
        cached = self._visual_stat_cache.get(ck)
        if cached is None:
            buf = self.buffers[key]
            s2 = jnp.tile(buf["scale_col"], (n, 1))
            b2 = jnp.tile(buf["bias_col"], (n, 1))
            cached = (s2, b2)
            self._visual_stat_cache[ck] = cached
        return cached

    def __call__(self, batch):
        batch = dict(batch)
        for key, ft in self.features.items():
            if key not in batch:
                continue
            mode = self.norm_map.get(ft.type, NormalizationMode.IDENTITY)
            if mode is NormalizationMode.IDENTITY:
                continue
            buf = self.buffers[key]
            if buf["invalid"] is not None:
                raise AssertionError(_no_stats_error_str(buf["invalid"]))

            x = batch[key]
            if buf["is_visual"]:
                *lead, c, h, w = x.shape
                n = 1
                for d in lead:
                    n *= d
                s2, b2 = self._visual_stats(key, n)
                x2 = x.reshape(n * c, h * w)           # lane-dense layout
                out2 = _apply_scale_bias_2d(x2, s2, b2, self.out_dtype,
                                            self.donate_input)
                batch[key] = out2.reshape(*lead, c, h, w)
            else:
                feat = buf["feat"]
                lead = x.shape[: x.ndim - buf["ndim"]]
                n = 1
                for d in lead:
                    n *= d
                x2 = x.reshape(n, feat)
                out2 = _apply_scale_bias_2d(x2, buf["scale_row"], buf["bias_row"],
                                            self.out_dtype, self.donate_input)
                batch[key] = out2.reshape(x.shape)
        return batch


# ------------------------------------------------------------------ demo
if __name__ == "__main__":
    key = jax.random.PRNGKey(0)
    (k_img, k_state, k_act, k_m, k_s, k_smn, k_smx, k_amn, k_amx,
     k_big, k_bs, k_bb, k_big2, k_bs2, k_bb2) = jax.random.split(key, 15)

    # ---- module demo at small, policy-like shapes (XLA fallback path) ----
    B, C, H, W = 2, 4, 16, 16
    S = 32      # state dim
    D = 8       # action dim

    features = {
        "observation.image": PolicyFeature(FeatureType.VISUAL, (C, H, W)),
        "observation.state": PolicyFeature(FeatureType.STATE, (S,)),
        "action": PolicyFeature(FeatureType.ACTION, (D,)),
    }
    norm_map = {
        FeatureType.VISUAL: NormalizationMode.MEAN_STD,
        FeatureType.STATE: NormalizationMode.MIN_MAX,
        FeatureType.ACTION: NormalizationMode.MIN_MAX,
    }

    img_mean = jax.random.normal(k_m, (C, 1, 1), jnp.float32)
    img_std = jnp.abs(jax.random.normal(k_s, (C, 1, 1), jnp.float32)) + 0.5
    st_min = jax.random.normal(k_smn, (S,), jnp.float32)
    st_max = st_min + jnp.abs(jax.random.normal(k_smx, (S,), jnp.float32)) + 0.1
    act_min = jax.random.normal(k_amn, (D,), jnp.float32)
    act_max = act_min + jnp.abs(jax.random.normal(k_amx, (D,), jnp.float32)) + 0.1

    stats = {
        "observation.image": {"mean": img_mean, "std": img_std},
        "observation.state": {"min": st_min, "max": st_max},
        "action": {"min": act_min, "max": act_max},
    }

    unnorm = Unnormalize(features, norm_map, stats)

    batch = {
        "observation.image": jax.random.normal(k_img, (B, C, H, W), jnp.float32),
        "observation.state": jax.random.normal(k_state, (B, S), jnp.float32),
        "action": jax.random.normal(k_act, (B, D), jnp.float32),
    }

    out = unnorm(batch)
    for v in out.values():
        jax.block_until_ready(v)

    # pure-JAX reference using the exact PyTorch formulas
    ref_img = batch["observation.image"] * img_std[None] + img_mean[None]
    ref_state = ((batch["observation.state"] + 1.0) / 2.0
                 * (st_max - st_min)[None] + st_min[None])
    ref_act = ((batch["action"] + 1.0) / 2.0
               * (act_max - act_min)[None] + act_min[None])

    assert jnp.allclose(out["observation.image"], ref_img, atol=1e-5, rtol=1e-5)
    assert jnp.allclose(out["observation.state"], ref_state, atol=1e-5, rtol=1e-5)
    assert jnp.allclose(out["action"], ref_act, atol=1e-5, rtol=1e-5)

    # ---- direct Pallas-path checks (large enough to clear the size gate) ----
    # Per-row stats (visual-style layout): (512, 4096) -> grid split (2, 1).
    xr = jax.random.normal(k_big, (512, 4096), jnp.float32)
    sr = jnp.abs(jax.random.normal(k_bs, (512, 1), jnp.float32)) + 0.5
    br = jax.random.normal(k_bb, (512, 1), jnp.float32)
    out_r = _apply_scale_bias_2d(xr, sr, br)
    jax.block_until_ready(out_r)
    assert jnp.allclose(out_r, xr * sr + br, atol=1e-5, rtol=1e-5)

    # Per-column stats (vector-style layout): (1024, 2048) -> grid (2, 1).
    xc = jax.random.normal(k_big2, (1024, 2048), jnp.float32)
    sc = jnp.abs(jax.random.normal(k_bs2, (1, 2048), jnp.float32)) + 0.5
    bc = jax.random.normal(k_bb2, (1, 2048), jnp.float32)
    out_c = _apply_scale_bias_2d(xc, sc, bc)
    jax.block_until_ready(out_c)
    assert jnp.allclose(out_c, xc * sc + bc, atol=1e-5, rtol=1e-5)

    print("KERNEL_OK")
</pallas_src>

<mosaic_0001>
module attributes {stable_mosaic.version = 11 : i64} {
  func.func @_scale_bias_kernel(%arg0: i32, %arg1: i32, %arg2: memref<256x4096xf32, #tpu.memory_space<vmem>>, %arg3: memref<256x1xf32, #tpu.memory_space<vmem>>, %arg4: memref<256x1xf32, #tpu.memory_space<vmem>>, %arg5: memref<256x4096xf32, #tpu.memory_space<vmem>>) attributes {dimension_semantics = [#tpu.dimension_semantics<parallel>, #tpu.dimension_semantics<parallel>], iteration_bounds = array<i64: 2, 1>, scalar_prefetch = 0 : i64, scratch_operands = 0 : i64, tpu.core_type = #tpu.core_type<tc>, window_params = [{transform_indices = @transform_0, window_bounds = array<i64: 256, 4096>}, {transform_indices = @transform_1, window_bounds = array<i64: 256, 1>}, {transform_indices = @transform_2, window_bounds = array<i64: 256, 1>}, {transform_indices = @transform_3, window_bounds = array<i64: 256, 4096>}]} {
    %c0 = arith.constant 0 : index
    %c0_0 = arith.constant 0 : index
    %0 = vector.load %arg2[%c0, %c0_0] : memref<256x4096xf32, #tpu.memory_space<vmem>>, vector<256x4096xf32>
    %c0_1 = arith.constant 0 : index
    %c0_2 = arith.constant 0 : index
    %1 = vector.load %arg3[%c0_1, %c0_2] : memref<256x1xf32, #tpu.memory_space<vmem>>, vector<256x1xf32>
    %2 = vector.broadcast %1 : vector<256x1xf32> to vector<256x4096xf32>
    %3 = arith.mulf %0, %2 : vector<256x4096xf32>
    %c0_3 = arith.constant 0 : index
    %c0_4 = arith.constant 0 : index
    %4 = vector.load %arg4[%c0_3, %c0_4] : memref<256x1xf32, #tpu.memory_space<vmem>>, vector<256x1xf32>
    %5 = vector.broadcast %4 : vector<256x1xf32> to vector<256x4096xf32>
    %6 = arith.addf %3, %5 : vector<256x4096xf32>
    %c0_5 = arith.constant 0 : index
    %c0_6 = arith.constant 0 : index
    %7 = vector.load %arg5[%c0_5, %c0_6] : memref<256x4096xf32, #tpu.memory_space<vmem>>, vector<256x4096xf32>
    tpu.vector_store %arg5[%c0_5, %c0_6], %6 {strides = array<i32>} : memref<256x4096xf32, #tpu.memory_space<vmem>>, vector<256x4096xf32>,
    return
  }
  func.func @transform_0(%arg0: i32, %arg1: i32) -> (i32, i32) {
    %c0_i32 = arith.constant 0 : i32
    return %arg0, %arg1 : i32, i32
  }
  func.func @transform_1(%arg0: i32, %arg1: i32) -> (i32, i32) {
    %c0_i32 = arith.constant 0 : i32
    %c0_i32_0 = arith.constant 0 : i32
    return %arg0, %c0_i32 : i32, i32
  }
  func.func @transform_2(%arg0: i32, %arg1: i32) -> (i32, i32) {
    %c0_i32 = arith.constant 0 : i32
    %c0_i32_0 = arith.constant 0 : i32
    return %arg0, %c0_i32 : i32, i32
  }
  func.func @transform_3(%arg0: i32, %arg1: i32) -> (i32, i32) {
    %c0_i32 = arith.constant 0 : i32
    return %arg0, %arg1 : i32, i32
  }
}

</mosaic_0001>

<bundles_post_ra>
// kernel: tpu_custom_call.1
= control target key start
LH: loop header
LB: loop body
LE: loop exit
PB: predicated region body
PF: predicated region fallthrough
CT: control target
= control target key end

     0   :  { %8 = vsyncpa [#allocation3], 0  ;;  %s12481_s0 = inlined_call_operand.hbm [shape: f32[512,4096], index: 0, kind: input, shape index: {}]   ;;  %s12482_s1 = inlined_call_operand.vmem [shape: f32[512,1], index: 1, kind: input, shape index: {}]   ;;  %s12483_s2 = inlined_call_operand.vmem [shape: f32[512,1], index: 2, kind: input, shape index: {}]   ;;  %s12484_s3 = inlined_call_operand.hbm [shape: f32[512,4096], index: 3, kind: output, shape index: {}]  }
   0x1   :  { %10 = vsyncpa [#allocation3 + $0x1], 0 }
   0x2   :  { %11 = vsyncpa [#allocation4], 0 }
   0x3   :  { %13 = vsyncpa [#allocation4 + $0x1], 0  ;;  %s5099_s12 = smov 0   ;;  %s5101_s13 = smov 0  }
   0x4   :  { %s5103_s14 = smov 0   ;;  %s5105_s15 = smov 0  }
   0x5   :  { %s5107_s16 = smov 0   ;;  %s5109_s17 = smov 0  }
   0x6 LB: > { %s4864_s18 = sadd.s32 4294967295, %s5070_s17   ;;  %s4865_s19 = sadd.s32 4294967294, %s5070_s17   ;;  %s5070_s17 = sphi %s5109_s17, %s19_s17   ;;  %s5066_s16 = sphi %s5107_s16, %s14312_s16   ;;  %s5062_s15 = sphi %s5105_s15, %s14311_s15   ;;  %s5058_s14 = sphi %s5103_s14, %s14310_s14   ;;  %s5054_s13 = sphi %s5101_s13, %s14309_s13   ;;  %s5050_s12 = sphi %s5099_s12, %s14308_s12  }
   0x7   : > { %s31_s20 = sadd.s32 1, %s5066_s16  ;;  %s40_s21 = sadd.s32 1, %s5058_s14 }
   0x8   : > { %p33_p0 = scmp.ge.s32.totalorder %s31_s20, 2  ;;  %p47_p1 = scmp.ne.s32.totalorder %s5058_s14, %s5054_s13 }
   0x9   : > { %p48_p2 = scmp.eq.s32.totalorder %s5070_s17, 0  ;;  %p53_p3 = scmp.ne.s32.totalorder %s5054_s13, %s5050_s12 }
   0xa   : > { %s14314_s20 = smov (%p33_p0, %s31_s20), 0  ;;  %p54_p5 = scmp.eq.s32.totalorder %s4864_s18, 0 }
   0xb   : > { %p5140_p4 = por %p48_p2, %p47_p1  ;;  %s35_s23 = ssub.s32 %s5066_s16, %s14314_s20 }
   0xc   : > { %p131_p6 = scmp.eq.s32.totalorder %s4864_s18, 1  ;;  %p38_p7 = scmp.eq.s32.totalorder %s35_s23, 0 }
   0xd   : > { %p5146_p8 = por %p54_p5, %p53_p3  ;;  %p137_p10 = scmp.eq.s32.totalorder %s4865_s19, 1 }
   0xe   : > { %p5150_p9 = por %p131_p6, %p47_p1  ;;  %p4901_p13 = scmp.lt.s32.totalorder %s5070_s17, 2 }
   0xf   : > { %s5155_s26 = scalar_select %p38_p7, %s5058_s14, %s40_s21  }
  0x10   : > { %s12489_s25 = scalar_select %p5150_p9, 1, 0 }
  0x11   : > { %p5157_p11 = por %p137_p10, %p53_p3  ;;  %s157_s28 = sand.u32 1, %s5058_s14  }
  0x12   : > { %s4868_s29 = sshll.u32 %s157_s28, 13  ;;  %s4886_s30 = sshll.u32 %s5066_s16, 17 }
  0x13   : > { %s12490_s27 = scalar_select %p5157_p11, 1, 0 }
  0x14   : > { %s5168_s6 = scalar_lea.hbm %s12481_s0, %s4886_s30  ;;  %s161_s7 = scalar_lea.vmem [#allocation2], %s4868_s29 }
  0x15   : > { %s171_s8 = sshll.u32 %s161_s7, 4  ;;  %p5174_p0 = pnand %p4901_p13, %p5140_p4  ;;  %s5170_s8 = int_to_ptr.vmem [resolvable:$true] %s171_s8 }
  0x16   : > { %s5179_s10 = scalar_lea.sflag [#allocation3], %s157_s28  ;;  %s4958_s11 = scalar_lea.hbm %s5168_s6, 131072 }
  0x17   : > { %p4959_p2 = scmp.ne.s32.totalorder %s5168_s6, %s4958_s11  ;;  %p4960_p3 = pneg %p5174_p0 }
  0x18   : > { %s4963_s21 = scalar_lea.hbm %s12481_s0, 262144  ;;  %p4964_p4 = scmp.lt.u32.totalorder %s5168_s6, %s12481_s0 }
  0x19   : > { %p4961_p5 = pnand %p4960_p3, %p4959_p2  ;;  %p4965_p7 = scmp.lt.u32.totalorder %s4963_s21, %s4958_s11 }
  0x1a   : > { %p4967_p13 = scmp.lt.u32.totalorder %s4958_s11, %s5168_s6 }
  0x1b   : > { %p4962_p6 = pneg %p4961_p5  ;;  %p4966_p10 = por %p4965_p7, %p4964_p4 }
  0x1d   : > { %p4968_p12 = por %p4967_p13, %p4966_p10 }
  0x1f   : > { %p4969_p1 = pnand %p4968_p12, %p4962_p6 }
  0x21   : > { %4972 = shalt.err (!%p4969_p1)
}
  0x22   : > { %s4973_s28 = scalar_lea.vmem %s5170_s8, 131072  ;;  %s5072_s29 = smov [#allocation2]  }
  0x23   : > { %p4974_p2 = scmp.ne.s32.totalorder %s5170_s8, %s4973_s28  ;;  %s4978_s30 = sshll.u32 %s5072_s29, 4  ;;  %s4979_s30 = int_to_ptr.vmem [resolvable:$false] %s4978_s30 }
  0x24   : > { %s4980_s4 = scalar_lea.vmem %s4979_s30, 262144  ;;  %p4981_p9 = scmp.lt.s32.totalorder %s5170_s8, %s4979_s30 }
  0x25   : > { %p4976_p5 = pnand %p4974_p2, %p4960_p3  ;;  %p4982_p4 = scmp.lt.s32.totalorder %s4980_s4, %s4973_s28 }
  0x27   : > { %p4977_p11 = pneg %p4976_p5  ;;  %p4983_p7 = por %p4982_p4, %p4981_p9 }
  0x29   : > { %p4984_p10 = pnand %p4983_p7, %p4977_p11 }
  0x2b   : > { %4987 = shalt.err (!%p4984_p10)
}
  0x2c   : > { %s5073_s5 = smov 4096   ;;  %s5074_s7 = smov 256  }
  0x2d   : > { %4896 = dma.hbm_to_vmem [thread:$0]  (!%p5174_p0), %s5168_s6, 131072, %s5170_s8, %s5179_s10, %s5073_s5, %s5073_s5, %s5074_s7  }
  0x2e   : > { %p197_p12 = scmp.lt.s32.totalorder %s5070_s17, 3  ;;  %p12492_p1 = scmp.ge.s32.totalorder %s5070_s17, 1 }
  0x30   : > { %p198_p3 = pnand %p12492_p1, %p197_p12 }
  0x32   : > { %201 = sbr.rel (%p198_p3) target bundleno = 1190 (0x4a6), region = 32 }
  0x39   : > { %s5211_s11 = sand.u32 1, %s5054_s13  }
  0x3a   : > { %s4873_s18 = sshll.u32 %s5211_s11, 13  ;;  %s204_s19 = scalar_lea.sflag [#allocation3], %s5211_s11 }
  0x3b   : > { %s5217_s21 = scalar_lea.vmem [#allocation2], %s4873_s18 }
  0x3c   : > { %5041 = dma.done.wait (%p5146_p8), %s204_s19, 131072  }
  0x3d   : > { %5043 = vsyncadd (%p5146_p8), %s204_s19, 4294836224  ;;  %s4875_s6 = sshll.u32 %s5062_s15, 5  ;;  %v5075_v0 = vmov 0   ;;  %s9237_s29 = scalar_lea.vmem [#allocation5], %s4873_s18 }
  0x3e   : > { %4957 = vset.pattern.permute.xlu1 %v5075_v0  ;;  %4956 = vset.pattern.permute.xlu0 %v5075_v0  ;;  %p243_p9 = scmp.lt.s32.totalorder %s4875_s6, 63  ;;  %s4888_s30 = sshll.u32 %s5062_s15, 17 }
  0x3f   : > { %s4753_s4 = sshll.u32 %s9237_s29, 4  ;;  %s12414_s7 = scalar_lea.hbm %s12484_s3, %s4888_s30  ;;  %s12416_s4 = int_to_ptr.vmem [resolvable:$true] %s4753_s4 }
  0x40   : > { %s14316_s6 = smov (!%p243_p9, %s4875_s6), 63  ;;  %s4737_s18 = scalar_lea.sflag [#allocation4], %s5211_s11 }
  0x41   : > { %s4876_s8 = sshll.u32 %s14316_s6, 3  ;;  %s4988_s19 = scalar_lea.vmem %s12416_s4, 131072 }
  0x42   : > { %s5232_s22 = scalar_lea.vmem %s12482_s1, %s4876_s8  ;;  %s5271_s28 = scalar_lea.vmem %s12483_s2, %s4876_s8 }
  0x43   : > { %v1282_v1 = vld [vmem:[%s5232_s22 + $0x10] sm:$0xff]  ;;  %v1280_v2 = vld [vmem:[%s5232_s22] sm:$0xff]  ;;  %v1283_v3 = vld [vmem:[%s5232_s22 + $0x18] sm:$0xff]  ;;  %p4989_p8 = scmp.ne.s32.totalorder %s12416_s4, %s4988_s19  ;;  %p14305_p11 = scmp.ne.s32.totalorder %s12489_s25, 0 }
  0x44   : > { %1324 = vperm.xlu1 %4957, %v1282_v1   ;;  %1314 = vperm.xlu0 %4956, %v1280_v2   ;;  %v1281_v4 = vld [vmem:[%s5232_s22 + $0x8] sm:$0xff]  ;;  %v1284_v6 = vld [vmem:[%s5232_s22 + $0x20] sm:$0xff]  ;;  %v1287_v7 = vld [vmem:[%s5232_s22 + $0x38] sm:$0xff] }
  0x45   : > { %v1285_v5 = vld [vmem:[%s5232_s22 + $0x28] sm:$0xff]  ;;  %v1286_v8 = vld [vmem:[%s5232_s22 + $0x30] sm:$0xff]  ;;  %v1288_v10 = vld [vmem:[%s5232_s22 + $0x40] sm:$0xff]  ;;  %p4990_p0 = pnand %p4989_p8, %p14305_p11 }
  0x46   : > { %v1289_v9 = vld [vmem:[%s5232_s22 + $0x48] sm:$0xff]  ;;  %v1291_v11 = vld [vmem:[%s5232_s22 + $0x58] sm:$0xff]  ;;  %v1290_v12 = vld [vmem:[%s5232_s22 + $0x50] sm:$0xff] }
  0x47   : > { %v1293_v13 = vld [vmem:[%s5232_s22 + $0x68] sm:$0xff]  ;;  %v1292_v14 = vld [vmem:[%s5232_s22 + $0x60] sm:$0xff]  ;;  %v1295_v15 = vld [vmem:[%s5232_s22 + $0x78] sm:$0xff]  ;;  %p4991_p6 = pneg %p4990_p0 }
  0x48   : > { %1329 = vperm.xlu1 %4957, %v1283_v3   ;;  %1319 = vperm.xlu0 %4956, %v1281_v4   ;;  %v1294_v16 = vld [vmem:[%s5232_s22 + $0x70] sm:$0xff]  ;;  %v1297_v17 = vld [vmem:[%s5232_s22 + $0x88] sm:$0xff]  ;;  %v1296_v18 = vld [vmem:[%s5232_s22 + $0x80] sm:$0xff] }
  0x49   : > { %v1299_v19 = vld [vmem:[%s5232_s22 + $0x98] sm:$0xff]  ;;  %v1298_v20 = vld [vmem:[%s5232_s22 + $0x90] sm:$0xff]  ;;  %v1301_v21 = vld [vmem:[%s5232_s22 + $0xa8] sm:$0xff] }
  0x4a   : > { %v1300_v22 = vld [vmem:[%s5232_s22 + $0xa0] sm:$0xff]  ;;  %v1303_v23 = vld [vmem:[%s5232_s22 + $0xb8] sm:$0xff]  ;;  %v1302_v24 = vld [vmem:[%s5232_s22 + $0xb0] sm:$0xff] }
  0x4b   : > { %v1305_v25 = vld [vmem:[%s5232_s22 + $0xc8] sm:$0xff]  ;;  %v1304_v26 = vld [vmem:[%s5232_s22 + $0xc0] sm:$0xff]  ;;  %v1307_v27 = vld [vmem:[%s5232_s22 + $0xd8] sm:$0xff] }
  0x4c   : > { %1339 = vperm.xlu1 %4957, %v1285_v5   ;;  %1334 = vperm.xlu0 %4956, %v1284_v6   ;;  %v1306_v28 = vld [vmem:[%s5232_s22 + $0xd0] sm:$0xff]  ;;  %v1309_v29 = vld [vmem:[%s5232_s22 + $0xe8] sm:$0xff]  ;;  %v1308_v30 = vld [vmem:[%s5232_s22 + $0xe0] sm:$0xff] }
  0x4d   : > { %v1311_v31 = vld [vmem:[%s5232_s22 + $0xf8] sm:$0xff]  ;;  %v1310_v32 = vld [vmem:[%s5232_s22 + $0xf0] sm:$0xff]  ;;  %v2497_v33 = vld [vmem:[%s5271_s28 + $0x8] sm:$0xff] }
  0x4e   : > { %v2496_v34 = vld [vmem:[%s5271_s28] sm:$0xff]  ;;  %v2499_v35 = vld [vmem:[%s5271_s28 + $0x18] sm:$0xff]  ;;  %v2498_v36 = vld [vmem:[%s5271_s28 + $0x10] sm:$0xff] }
  0x4f   : > { %v2501_v37 = vld [vmem:[%s5271_s28 + $0x28] sm:$0xff]  ;;  %v2500_v38 = vld [vmem:[%s5271_s28 + $0x20] sm:$0xff]  ;;  %v2503_v39 = vld [vmem:[%s5271_s28 + $0x38] sm:$0xff] }
  0x50   : > { %1349 = vperm.xlu1 %4957, %v1287_v7   ;;  %1344 = vperm.xlu0 %4956, %v1286_v8   ;;  %v2502_v40 = vld [vmem:[%s5271_s28 + $0x30] sm:$0xff]  ;;  %v2505_v41 = vld [vmem:[%s5271_s28 + $0x48] sm:$0xff]  ;;  %v2504_v42 = vld [vmem:[%s5271_s28 + $0x40] sm:$0xff] }
  0x51   : > { %v2507_v43 = vld [vmem:[%s5271_s28 + $0x58] sm:$0xff]  ;;  %v2506_v44 = vld [vmem:[%s5271_s28 + $0x50] sm:$0xff]  ;;  %v2509_v45 = vld [vmem:[%s5271_s28 + $0x68] sm:$0xff] }
  0x52   : > { %v2508_v46 = vld [vmem:[%s5271_s28 + $0x60] sm:$0xff]  ;;  %v2511_v47 = vld [vmem:[%s5271_s28 + $0x78] sm:$0xff]  ;;  %v2510_v48 = vld [vmem:[%s5271_s28 + $0x70] sm:$0xff] }
  0x53   : > { %v2513_v49 = vld [vmem:[%s5271_s28 + $0x88] sm:$0xff]  ;;  %v2512_v50 = vld [vmem:[%s5271_s28 + $0x80] sm:$0xff]  ;;  %v2515_v51 = vld [vmem:[%s5271_s28 + $0x98] sm:$0xff] }
  0x54   : > { %1359 = vperm.xlu1 %4957, %v1289_v9   ;;  %1354 = vperm.xlu0 %4956, %v1288_v10   ;;  %v2514_v52 = vld [vmem:[%s5271_s28 + $0x90] sm:$0xff]  ;;  %v2517_v53 = vld [vmem:[%s5271_s28 + $0xa8] sm:$0xff]  ;;  %v2516_v54 = vld [vmem:[%s5271_s28 + $0xa0] sm:$0xff] }
  0x55   : > { %v2519_v55 = vld [vmem:[%s5271_s28 + $0xb8] sm:$0xff]  ;;  %v2518_v56 = vld [vmem:[%s5271_s28 + $0xb0] sm:$0xff]  ;;  %v2521_v57 = vld [vmem:[%s5271_s28 + $0xc8] sm:$0xff] }
  0x56   : > { %v2520_v58 = vld [vmem:[%s5271_s28 + $0xc0] sm:$0xff]  ;;  %v2523_v59 = vld [vmem:[%s5271_s28 + $0xd8] sm:$0xff]  ;;  %v2522_v60 = vld [vmem:[%s5271_s28 + $0xd0] sm:$0xff] }
  0x57   : > { %v2525_v61 = vld [vmem:[%s5271_s28 + $0xe8] sm:$0xff]  ;;  %v2524_v62 = vld [vmem:[%s5271_s28 + $0xe0] sm:$0xff]  ;;  %v2527_v63 = vld [vmem:[%s5271_s28 + $0xf8] sm:$0xff] }
  0x58   : > { %1369 = vperm.xlu1 %4957, %v1291_v11   ;;  %1364 = vperm.xlu0 %4956, %v1290_v12   ;;  %v2526_v0 = vld [vmem:[%s5271_s28 + $0xf0] sm:$0xff]  ;;  %v320_v1 = vld [vmem:[%s5217_s21 + $0x200] sm:$0xff]  ;;  %v321_v2 = vld [vmem:[%s5217_s21 + $0x208] sm:$0xff] }
  0x59   : > { %v322_v3 = vld [vmem:[%s5217_s21 + $0x210] sm:$0xff]  ;;  %v323_v4 = vld [vmem:[%s5217_s21 + $0x218] sm:$0xff]  ;;  %v324_v5 = vld [vmem:[%s5217_s21 + $0x220] sm:$0xff] }
  0x5a   : > { %v325_v6 = vld [vmem:[%s5217_s21 + $0x228] sm:$0xff]  ;;  %v326_v7 = vld [vmem:[%s5217_s21 + $0x230] sm:$0xff]  ;;  %v327_v8 = vld [vmem:[%s5217_s21 + $0x238] sm:$0xff] }
  0x5b   : > { %v328_v9 = vld [vmem:[%s5217_s21 + $0x240] sm:$0xff]  ;;  %v329_v10 = vld [vmem:[%s5217_s21 + $0x248] sm:$0xff]  ;;  %v330_v11 = vld [vmem:[%s5217_s21 + $0x250] sm:$0xff] }
  0x5c   : > { %1379 = vperm.xlu1 %4957, %v1293_v13   ;;  %1374 = vperm.xlu0 %4956, %v1292_v14   ;;  %v331_v12 = vld [vmem:[%s5217_s21 + $0x258] sm:$0xff]  ;;  %v332_v13 = vld [vmem:[%s5217_s21 + $0x260] sm:$0xff]  ;;  %v333_v14 = vld [vmem:[%s5217_s21 + $0x268] sm:$0xff] }
  0x60   : > { %1389 = vperm.xlu1 %4957, %v1295_v15   ;;  %1384 = vperm.xlu0 %4956, %v1294_v16   ;;  %v334_v15 = vld [vmem:[%s5217_s21 + $0x270] sm:$0xff]  ;;  %v335_v16 = vld [vmem:[%s5217_s21 + $0x278] sm:$0xff] }
  0x64   : > { %1399 = vperm.xlu1 %4957, %v1297_v17   ;;  %1394 = vperm.xlu0 %4956, %v1296_v18   ;;  %v336_v18 = vld [vmem:[%s5217_s21 + $0x280] sm:$0xff] }
  0x68   : > { %1409 = vperm.xlu1 %4957, %v1299_v19   ;;  %1404 = vperm.xlu0 %4956, %v1298_v20   ;;  %v337_v19 = vld [vmem:[%s5217_s21 + $0x288] sm:$0xff]  ;;  %v338_v20 = vld [vmem:[%s5217_s21 + $0x290] sm:$0xff] }
  0x6c   : > { %1419 = vperm.xlu1 %4957, %v1301_v21   ;;  %1414 = vperm.xlu0 %4956, %v1300_v22   ;;  %v339_v21 = vld [vmem:[%s5217_s21 + $0x298] sm:$0xff]  ;;  %v340_v22 = vld [vmem:[%s5217_s21 + $0x2a0] sm:$0xff] }
  0x70   : > { %1429 = vperm.xlu1 %4957, %v1303_v23   ;;  %1424 = vperm.xlu0 %4956, %v1302_v24   ;;  %v341_v23 = vld [vmem:[%s5217_s21 + $0x2a8] sm:$0xff]  ;;  %v342_v24 = vld [vmem:[%s5217_s21 + $0x2b0] sm:$0xff] }
  0x74   : > { %1439 = vperm.xlu1 %4957, %v1305_v25   ;;  %1434 = vperm.xlu0 %4956, %v1304_v26   ;;  %v343_v25 = vld [vmem:[%s5217_s21 + $0x2b8] sm:$0xff] }
  0x78   : > { %1449 = vperm.xlu1 %4957, %v1307_v27   ;;  %1444 = vperm.xlu0 %4956, %v1306_v28  }
  0x7c   : > { %1459 = vperm.xlu1 %4957, %v1309_v29   ;;  %1454 = vperm.xlu0 %4956, %v1308_v30   ;;  %v344_v30 = vld [vmem:[%s5217_s21 + $0x2c0] sm:$0xff] }
  0x80   : > { %1469 = vperm.xlu1 %4957, %v1311_v31   ;;  %1464 = vperm.xlu0 %4956, %v1310_v32   ;;  %v345_v31 = vld [vmem:[%s5217_s21 + $0x2c8] sm:$0xff]  ;;  %v346_v32 = vld [vmem:[%s5217_s21 + $0x2d0] sm:$0xff] }
  0x84   : > { %2535 = vperm.xlu1 %4957, %v2497_v33   ;;  %2530 = vperm.xlu0 %4956, %v2496_v34   ;;  %v347_v33 = vld [vmem:[%s5217_s21 + $0x2d8] sm:$0xff] }
  0x88   : > { %2545 = vperm.xlu1 %4957, %v2499_v35   ;;  %2540 = vperm.xlu0 %4956, %v2498_v36  }
  0x8c   : > { %2555 = vperm.xlu1 %4957, %v2501_v37   ;;  %2550 = vperm.xlu0 %4956, %v2500_v38   ;;  %v348_v38 = vld [vmem:[%s5217_s21 + $0x2e0] sm:$0xff] }
  0x90   : > { %2565 = vperm.xlu1 %4957, %v2503_v39   ;;  %2560 = vperm.xlu0 %4956, %v2502_v40   ;;  %v349_v39 = vld [vmem:[%s5217_s21 + $0x2e8] sm:$0xff]  ;;  %v350_v40 = vld [vmem:[%s5217_s21 + $0x2f0] sm:$0xff] }
  0x94   : > { %2575 = vperm.xlu1 %4957, %v2505_v41   ;;  %2570 = vperm.xlu0 %4956, %v2504_v42   ;;  %v351_v41 = vld [vmem:[%s5217_s21 + $0x2f8] sm:$0xff] }
  0x98   : > { %2585 = vperm.xlu1 %4957, %v2507_v43   ;;  %2580 = vperm.xlu0 %4956, %v2506_v44  }
  0x9c   : > { %2595 = vperm.xlu1 %4957, %v2509_v45   ;;  %2590 = vperm.xlu0 %4956, %v2508_v46  }
  0xa0   : > { %2605 = vperm.xlu1 %4957, %v2511_v47   ;;  %2600 = vperm.xlu0 %4956, %v2510_v48  }
  0xa4   : > { %2615 = vperm.xlu1 %4957, %v2513_v49   ;;  %2610 = vperm.xlu0 %4956, %v2512_v50   ;;  %v256_v50 = vld [vmem:[%s5217_s21] sm:$0xff] }
  0xa8   : > { %2625 = vperm.xlu1 %4957, %v2515_v51   ;;  %2620 = vperm.xlu0 %4956, %v2514_v52   ;;  %v257_v51 = vld [vmem:[%s5217_s21 + $0x8] sm:$0xff]  ;;  %v258_v52 = vld [vmem:[%s5217_s21 + $0x10] sm:$0xff] }
  0xac   : > { %2635 = vperm.xlu1 %4957, %v2517_v53   ;;  %2630 = vperm.xlu0 %4956, %v2516_v54   ;;  %v259_v53 = vld [vmem:[%s5217_s21 + $0x18] sm:$0xff] }
  0xb0   : > { %2645 = vperm.xlu1 %4957, %v2519_v55   ;;  %2640 = vperm.xlu0 %4956, %v2518_v56  }
  0xb4   : > { %2655 = vperm.xlu1 %4957, %v2521_v57   ;;  %2650 = vperm.xlu0 %4956, %v2520_v58   ;;  %v260_v58 = vld [vmem:[%s5217_s21 + $0x20] sm:$0xff] }
  0xb8   : > { %2665 = vperm.xlu1 %4957, %v2523_v59   ;;  %2660 = vperm.xlu0 %4956, %v2522_v60   ;;  %v261_v59 = vld [vmem:[%s5217_s21 + $0x28] sm:$0xff]  ;;  %v262_v60 = vld [vmem:[%s5217_s21 + $0x30] sm:$0xff] }
  0xbc   : > { %2675 = vperm.xlu1 %4957, %v2525_v61   ;;  %2670 = vperm.xlu0 %4956, %v2524_v62   ;;  %v263_v61 = vld [vmem:[%s5217_s21 + $0x38] sm:$0xff] }
  0xc0   : > { %2685 = vperm.xlu1 %4957, %v2527_v63   ;;  %2680 = vperm.xlu0 %4956, %v2526_v0  }
  0xc3   : > { %v5321_v17 = vpop.permute.xlu1 %1324 }
  0xc4   : > { %v5332_v26 = vmul.f32 %v5321_v17, %v320_v1  ;;  %v5335_v27 = vmul.f32 %v5321_v17, %v321_v2  ;;  %v5338_v28 = vmul.f32 %v5321_v17, %v322_v3  ;;  %v5341_v29 = vmul.f32 %v5321_v17, %v323_v4  ;;  %v5419_v2 = vpop.permute.xlu0 %1314  ;;  %v264_v3 = vld [vmem:[%s5217_s21 + $0x40] sm:$0xff]  ;;  %v265_v4 = vld [vmem:[%s5217_s21 + $0x48] sm:$0xff] }
  0xc5   : > { %v5348_v34 = vmul.f32 %v5321_v17, %v324_v5  ;;  %v5351_v35 = vmul.f32 %v5321_v17, %v325_v6  ;;  %v5354_v36 = vmul.f32 %v5321_v17, %v326_v7  ;;  %v5357_v37 = vmul.f32 %v5321_v17, %v327_v8  ;;  %v266_v5 = vld [vmem:[%s5217_s21 + $0x50] sm:$0xff]  ;;  %v267_v6 = vld [vmem:[%s5217_s21 + $0x58] sm:$0xff] }
  0xc6   : > { %12493 = vst [vmem:[#allocation8_spill] sm:$0xff] %v5332_v26  ;;  %12494 = vst [vmem:[#allocation9_spill] sm:$0xff] %v5335_v27  ;;  %v5364_v42 = vmul.f32 %v5321_v17, %v328_v9  ;;  %v5367_v43 = vmul.f32 %v5321_v17, %v329_v10  ;;  %v5370_v44 = vmul.f32 %v5321_v17, %v330_v11  ;;  %v268_v11 = vld [vmem:[%s5217_s21 + $0x60] sm:$0xff]  ;;  %v377_v27 = vld [vmem:[%s5217_s21 + $0x3c8] sm:$0xff] }
  0xc7   : > { %12495 = vst [vmem:[#allocation10_spill] sm:$0xff] %v5338_v28  ;;  %12496 = vst [vmem:[#allocation11_spill] sm:$0xff] %v5341_v29  ;;  %v5373_v45 = vmul.f32 %v5321_v17, %v331_v12  ;;  %v5376_v46 = vmul.f32 %v5321_v17, %v332_v13  ;;  %v5379_v47 = vmul.f32 %v5321_v17, %v333_v14  ;;  %v269_v12 = vld [vmem:[%s5217_s21 + $0x68] sm:$0xff]  ;;  %v270_v13 = vld [vmem:[%s5217_s21 + $0x70] sm:$0xff] }
  0xc8   : > { %12497 = vst [vmem:[#allocation12_spill] sm:$0xff] %v5348_v34  ;;  %12498 = vst [vmem:[#allocation13_spill] sm:$0xff] %v5351_v35  ;;  %v5382_v48 = vmul.f32 %v5321_v17, %v334_v15  ;;  %v5385_v49 = vmul.f32 %v5321_v17, %v335_v16  ;;  %v5392_v54 = vmul.f32 %v5321_v17, %v336_v18  ;;  %v271_v14 = vld [vmem:[%s5217_s21 + $0x78] sm:$0xff]  ;;  %v372_v35 = vld [vmem:[%s5217_s21 + $0x3a0] sm:$0xff] }
  0xc9   : > { %12499 = vst [vmem:[#allocation14_spill] sm:$0xff] %v5354_v36  ;;  %12500 = vst [vmem:[#allocation15_spill] sm:$0xff] %v5357_v37  ;;  %v5395_v55 = vmul.f32 %v5321_v17, %v337_v19  ;;  %v5398_v56 = vmul.f32 %v5321_v17, %v338_v20  ;;  %v5401_v57 = vmul.f32 %v5321_v17, %v339_v21  ;;  %v272_v20 = vld [vmem:[%s5217_s21 + $0x80] sm:$0xff]  ;;  %v273_v21 = vld [vmem:[%s5217_s21 + $0x88] sm:$0xff] }
  0xca   : > { %12501 = vst [vmem:[#allocation16_spill] sm:$0xff] %v5364_v42  ;;  %12502 = vst [vmem:[#allocation17_spill] sm:$0xff] %v5367_v43  ;;  %v5408_v62 = vmul.f32 %v5321_v17, %v340_v22  ;;  %v5411_v63 = vmul.f32 %v5321_v17, %v341_v23  ;;  %v5414_v0 = vmul.f32 %v5321_v17, %v342_v24  ;;  %v274_v22 = vld [vmem:[%s5217_s21 + $0x90] sm:$0xff]  ;;  %v275_v23 = vld [vmem:[%s5217_s21 + $0x98] sm:$0xff] }
  0xcb   : > { %12503 = vst [vmem:[#allocation18_spill] sm:$0xff] %v5370_v44  ;;  %12504 = vst [vmem:[#allocation19_spill] sm:$0xff] %v5373_v45  ;;  %v5417_v1 = vmul.f32 %v5321_v17, %v343_v25  ;;  %v5426_v7 = vmul.f32 %v5321_v17, %v344_v30  ;;  %v5429_v8 = vmul.f32 %v5321_v17, %v345_v31  ;;  %v276_v24 = vld [vmem:[%s5217_s21 + $0xa0] sm:$0xff]  ;;  %v277_v25 = vld [vmem:[%s5217_s21 + $0xa8] sm:$0xff] }
  0xcc   : > { %12505 = vst [vmem:[#allocation20_spill] sm:$0xff] %v5376_v46  ;;  %12506 = vst [vmem:[#allocation21_spill] sm:$0xff] %v5379_v47  ;;  %v5432_v9 = vmul.f32 %v5321_v17, %v346_v32  ;;  %v5435_v10 = vmul.f32 %v5321_v17, %v347_v33  ;;  %v5442_v15 = vmul.f32 %v5321_v17, %v348_v38  ;;  %v278_v30 = vld [vmem:[%s5217_s21 + $0xb0] sm:$0xff]  ;;  %v279_v31 = vld [vmem:[%s5217_s21 + $0xb8] sm:$0xff] }
  0xcd   : > { %12507 = vst [vmem:[#allocation22_spill] sm:$0xff] %v5382_v48  ;;  %12508 = vst [vmem:[#allocation23_spill] sm:$0xff] %v5385_v49  ;;  %v5445_v16 = vmul.f32 %v5321_v17, %v349_v39  ;;  %v5448_v18 = vmul.f32 %v5321_v17, %v350_v40  ;;  %v5451_v19 = vmul.f32 %v5321_v17, %v351_v41  ;;  %v280_v39 = vld [vmem:[%s5217_s21 + $0xc0] sm:$0xff]  ;;  %v281_v40 = vld [vmem:[%s5217_s21 + $0xc8] sm:$0xff] }
  0xce   : > { %12509 = vst [vmem:[#allocation24_spill] sm:$0xff] %v5392_v54  ;;  %12510 = vst [vmem:[#allocation25_spill] sm:$0xff] %v5395_v55  ;;  %v5462_v32 = vmul.f32 %v5419_v2, %v256_v50  ;;  %v5465_v33 = vmul.f32 %v5419_v2, %v257_v51  ;;  %v5468_v17 = vmul.f32 %v5419_v2, %v258_v52  ;;  %v282_v41 = vld [vmem:[%s5217_s21 + $0xd0] sm:$0xff]  ;;  %v360_v55 = vld [vmem:[%s5217_s21 + $0x340] sm:$0xff] }
  0xcf   : > { %12511 = vst [vmem:[#allocation26_spill] sm:$0xff] %v5398_v56  ;;  %12512 = vst [vmem:[#allocation27_spill] sm:$0xff] %v5401_v57  ;;  %v5471_v38 = vmul.f32 %v5419_v2, %v259_v53  ;;  %v5481_v50 = vmul.f32 %v5419_v2, %v261_v59  ;;  %v5484_v51 = vmul.f32 %v5419_v2, %v262_v60  ;;  %v284_v53 = vld [vmem:[%s5217_s21 + $0xe0] sm:$0xff]  ;;  %v359_v57 = vld [vmem:[%s5217_s21 + $0x338] sm:$0xff]  ;;  %v5549_v56 = vpop.permute.xlu1 %1329 }
  0xd0   : > { %12513 = vst [vmem:[#allocation28_spill] sm:$0xff] %v5408_v62  ;;  %12514 = vst [vmem:[#allocation29_spill] sm:$0xff] %v5411_v63  ;;  %v5487_v52 = vmul.f32 %v5419_v2, %v263_v61  ;;  %v5497_v59 = vmul.f32 %v5419_v2, %v265_v4  ;;  %v5500_v60 = vmul.f32 %v5419_v2, %v266_v5  ;;  %v353_v5 = vld [vmem:[%s5217_s21 + $0x308] sm:$0xff]  ;;  %v358_v62 = vld [vmem:[%s5217_s21 + $0x330] sm:$0xff] }
  0xd1   : > { %12515 = vst [vmem:[#allocation30_spill] sm:$0xff] %v5414_v0  ;;  %12516 = vst [vmem:[#allocation31_spill] sm:$0xff] %v5417_v1  ;;  %v5503_v61 = vmul.f32 %v5419_v2, %v267_v6  ;;  %v5515_v4 = vmul.f32 %v5419_v2, %v271_v14  ;;  %v354_v1 = vld [vmem:[%s5217_s21 + $0x310] sm:$0xff]  ;;  %v355_v6 = vld [vmem:[%s5217_s21 + $0x318] sm:$0xff]  ;;  %v5522_v0 = vmul.f32 %v5419_v2, %v272_v20 }
  0xd2   : > { %12517 = vst [vmem:[#allocation32_spill] sm:$0xff] %v5426_v7  ;;  %12518 = vst [vmem:[#allocation33_spill] sm:$0xff] %v5429_v8  ;;  %v5509_v8 = vmul.f32 %v5419_v2, %v269_v12  ;;  %v352_v7 = vld [vmem:[%s5217_s21 + $0x300] sm:$0xff]  ;;  %v5528_v12 = vmul.f32 %v5419_v2, %v274_v22  ;;  %v357_v63 = vld [vmem:[%s5217_s21 + $0x328] sm:$0xff]  ;;  %v5538_v20 = vmul.f32 %v5419_v2, %v276_v24 }
  0xd3   : > { %12519 = vst [vmem:[#allocation34_spill] sm:$0xff] %v5432_v9  ;;  %12520 = vst [vmem:[#allocation35_spill] sm:$0xff] %v5435_v10  ;;  %v287_v10 = vld [vmem:[%s5217_s21 + $0xf8] sm:$0xff]  ;;  %v5506_v9 = vmul.f32 %v5419_v2, %v268_v11  ;;  %v5525_v11 = vmul.f32 %v5419_v2, %v273_v21  ;;  %v356_v14 = vld [vmem:[%s5217_s21 + $0x320] sm:$0xff]  ;;  %v5541_v21 = vmul.f32 %v5419_v2, %v277_v25 }
  0xd4   : > { %12521 = vst [vmem:[#allocation36_spill] sm:$0xff] %v5442_v15  ;;  %12522 = vst [vmem:[#allocation37_spill] sm:$0xff] %v5445_v16  ;;  %v285_v16 = vld [vmem:[%s5217_s21 + $0xe8] sm:$0xff]  ;;  %v286_v15 = vld [vmem:[%s5217_s21 + $0xf0] sm:$0xff]  ;;  %v5544_v22 = vmul.f32 %v5419_v2, %v278_v30  ;;  %v5556_v48 = vmul.f32 %v5419_v2, %v280_v39  ;;  %v5559_v25 = vmul.f32 %v5419_v2, %v281_v40 }
  0xd5   : > { %12523 = vst [vmem:[#allocation38_spill] sm:$0xff] %v5448_v18  ;;  %12524 = vst [vmem:[#allocation39_spill] sm:$0xff] %v5451_v19  ;;  %v283_v19 = vld [vmem:[%s5217_s21 + $0xd8] sm:$0xff]  ;;  %v5478_v18 = vmul.f32 %v5419_v2, %v260_v58  ;;  %v5494_v58 = vmul.f32 %v5419_v2, %v264_v3  ;;  %v5512_v3 = vmul.f32 %v5419_v2, %v270_v13  ;;  %v361_v54 = vld [vmem:[%s5217_s21 + $0x348] sm:$0xff] }
  0xd6   : > { %12525 = vst [vmem:[#allocation40_spill] sm:$0xff] %v5462_v32  ;;  %12526 = vst [vmem:[#allocation41_spill] sm:$0xff] %v5465_v33  ;;  %v5531_v13 = vmul.f32 %v5419_v2, %v275_v23  ;;  %v5547_v23 = vmul.f32 %v5419_v2, %v279_v31  ;;  %v362_v49 = vld [vmem:[%s5217_s21 + $0x350] sm:$0xff]  ;;  %v363_v24 = vld [vmem:[%s5217_s21 + $0x358] sm:$0xff]  ;;  %v5562_v30 = vmul.f32 %v5419_v2, %v282_v41 }
  0xd7   : > { %12527 = vst [vmem:[#allocation42_spill] sm:$0xff] %v5468_v17  ;;  %12528 = vst [vmem:[#allocation43_spill] sm:$0xff] %v5471_v38  ;;  %v5565_v31 = vmul.f32 %v5419_v2, %v283_v19  ;;  %v364_v47 = vld [vmem:[%s5217_s21 + $0x360] sm:$0xff]  ;;  %v365_v46 = vld [vmem:[%s5217_s21 + $0x368] sm:$0xff]  ;;  %v5572_v39 = vmul.f32 %v5419_v2, %v284_v53  ;;  %v5575_v40 = vmul.f32 %v5419_v2, %v285_v16 }
  0xd8   : > { %12529 = vst [vmem:[#allocation44_spill] sm:$0xff] %v5478_v18  ;;  %12530 = vst [vmem:[#allocation45_spill] sm:$0xff] %v5481_v50  ;;  %v366_v45 = vld [vmem:[%s5217_s21 + $0x370] sm:$0xff]  ;;  %v367_v44 = vld [vmem:[%s5217_s21 + $0x378] sm:$0xff]  ;;  %v5578_v41 = vmul.f32 %v5419_v2, %v286_v15  ;;  %v5581_v19 = vmul.f32 %v5419_v2, %v287_v10  ;;  %v5592_v15 = vmul.f32 %v5549_v56, %v352_v7 }
  0xd9   : > { %12531 = vst [vmem:[#allocation46_spill] sm:$0xff] %v5484_v51  ;;  %12532 = vst [vmem:[#allocation47_spill] sm:$0xff] %v5487_v52  ;;  %v368_v43 = vld [vmem:[%s5217_s21 + $0x380] sm:$0xff]  ;;  %v369_v42 = vld [vmem:[%s5217_s21 + $0x388] sm:$0xff]  ;;  %v5595_v29 = vmul.f32 %v5549_v56, %v353_v5  ;;  %v5598_v2 = vmul.f32 %v5549_v56, %v354_v1  ;;  %v5601_v10 = vmul.f32 %v5549_v56, %v355_v6 }
  0xda   : > { %12533 = vst [vmem:[#allocation48_spill] sm:$0xff] %v5494_v58  ;;  %12534 = vst [vmem:[#allocation49_spill] sm:$0xff] %v5497_v59  ;;  %v370_v37 = vld [vmem:[%s5217_s21 + $0x390] sm:$0xff]  ;;  %v371_v36 = vld [vmem:[%s5217_s21 + $0x398] sm:$0xff]  ;;  %v5611_v7 = vmul.f32 %v5549_v56, %v357_v63  ;;  %v5614_v5 = vmul.f32 %v5549_v56, %v358_v62  ;;  %v5617_v1 = vmul.f32 %v5549_v56, %v359_v57 }
  0xdb   : > { %12535 = vst [vmem:[#allocation50_spill] sm:$0xff] %v5500_v60  ;;  %12536 = vst [vmem:[#allocation51_spill] sm:$0xff] %v5503_v61  ;;  %v373_v53 = vld [vmem:[%s5217_s21 + $0x3a8] sm:$0xff]  ;;  %v374_v34 = vld [vmem:[%s5217_s21 + $0x3b0] sm:$0xff]  ;;  %v5627_v63 = vmul.f32 %v5549_v56, %v361_v54  ;;  %v5630_v62 = vmul.f32 %v5549_v56, %v362_v49  ;;  %v5633_v57 = vmul.f32 %v5549_v56, %v363_v24 }
  0xdc   : > { %12537 = vst [vmem:[#allocation52_spill] sm:$0xff] %v5506_v9  ;;  %12538 = vst [vmem:[#allocation53_spill] sm:$0xff] %v5509_v8  ;;  %v375_v16 = vld [vmem:[%s5217_s21 + $0x3b8] sm:$0xff]  ;;  %v376_v28 = vld [vmem:[%s5217_s21 + $0x3c0] sm:$0xff]  ;;  %v5645_v54 = vmul.f32 %v5549_v56, %v367_v44  ;;  %v5661_v44 = vmul.f32 %v5549_v56, %v371_v36 }
  0xdd   : > { %12539 = vst [vmem:[#allocation54_spill] sm:$0xff] %v5512_v3  ;;  %12540 = vst [vmem:[#allocation55_spill] sm:$0xff] %v5515_v4  ;;  %v378_v26 = vld [vmem:[%s5217_s21 + $0x3d0] sm:$0xff]  ;;  %v380_v6 = vld [vmem:[%s5217_s21 + $0x3e0] sm:$0xff]  ;;  %v5677_v36 = vmul.f32 %v5549_v56, %v375_v16 }
  0xde   : > { %12541 = vst [vmem:[#allocation56_spill] sm:$0xff] %v5522_v0  ;;  %12542 = vst [vmem:[#allocation57_spill] sm:$0xff] %v5525_v11  ;;  %v289_v49 = vld [vmem:[%s5217_s21 + $0x108] sm:$0xff]  ;;  %v291_v24 = vld [vmem:[%s5217_s21 + $0x118] sm:$0xff] }
  0xdf   : > { %12543 = vst [vmem:[#allocation58_spill] sm:$0xff] %v5528_v12  ;;  %12544 = vst [vmem:[#allocation59_spill] sm:$0xff] %v5531_v13  ;;  %v423_v13 = vld [vmem:[%s5217_s21 + $0x538] sm:$0xff]  ;;  %v5809_v12 = vpop.permute.xlu1 %1339  ;;  %v424_v11 = vld [vmem:[%s5217_s21 + $0x540] sm:$0xff] }
  0xe0   : > { %12545 = vst [vmem:[#allocation60_spill] sm:$0xff] %v5538_v20  ;;  %12546 = vst [vmem:[#allocation61_spill] sm:$0xff] %v5541_v21  ;;  %v421_v21 = vld [vmem:[%s5217_s21 + $0x528] sm:$0xff]  ;;  %v422_v20 = vld [vmem:[%s5217_s21 + $0x530] sm:$0xff] }
  0xe1   : > { %12547 = vst [vmem:[#allocation62_spill] sm:$0xff] %v5544_v22  ;;  %12548 = vst [vmem:[#allocation63_spill] sm:$0xff] %v5547_v23  ;;  %v418_v23 = vld [vmem:[%s5217_s21 + $0x510] sm:$0xff]  ;;  %v425_v0 = vld [vmem:[%s5217_s21 + $0x548] sm:$0xff] }
  0xe2   : > { %12549 = vst [vmem:[#allocation64_spill] sm:$0xff] %v5556_v48  ;;  %12550 = vst [vmem:[#allocation65_spill] sm:$0xff] %v5559_v25  ;;  %v416_v48 = vld [vmem:[%s5217_s21 + $0x500] sm:$0xff]  ;;  %v426_v4 = vld [vmem:[%s5217_s21 + $0x550] sm:$0xff] }
  0xe3   : > { %12551 = vst [vmem:[#allocation66_spill] sm:$0xff] %v5562_v30  ;;  %12552 = vst [vmem:[#allocation67_spill] sm:$0xff] %v5565_v31  ;;  %v319_v31 = vld [vmem:[%s5217_s21 + $0x1f8] sm:$0xff]  ;;  %v428_v8 = vld [vmem:[%s5217_s21 + $0x560] sm:$0xff] }
  0xe4   : > { %12553 = vst [vmem:[#allocation68_spill] sm:$0xff] %v5572_v39  ;;  %12554 = vst [vmem:[#allocation69_spill] sm:$0xff] %v5575_v40  ;;  %v317_v40 = vld [vmem:[%s5217_s21 + $0x1e8] sm:$0xff]  ;;  %v318_v39 = vld [vmem:[%s5217_s21 + $0x1f0] sm:$0xff] }
  0xe5   : > { %12555 = vst [vmem:[#allocation70_spill] sm:$0xff] %v5578_v41  ;;  %12556 = vst [vmem:[#allocation71_spill] sm:$0xff] %v5581_v19  ;;  %v379_v19 = vld [vmem:[%s5217_s21 + $0x3d8] sm:$0xff]  ;;  %v5608_v41 = vmul.f32 %v5549_v56, %v356_v14  ;;  %v5624_v14 = vmul.f32 %v5549_v56, %v360_v55  ;;  %v5642_v55 = vmul.f32 %v5549_v56, %v366_v45  ;;  %v429_v9 = vld [vmem:[%s5217_s21 + $0x568] sm:$0xff] }
  0xe6   : > { %12557 = vst [vmem:[#allocation72_spill] sm:$0xff] %v5592_v15  ;;  %12558 = vst [vmem:[#allocation73_spill] sm:$0xff] %v5595_v29  ;;  %v383_v29 = vld [vmem:[%s5217_s21 + $0x3f8] sm:$0xff]  ;;  %v5658_v45 = vmul.f32 %v5549_v56, %v370_v37  ;;  %v5674_v37 = vmul.f32 %v5549_v56, %v374_v34  ;;  %v5689_v34 = vmul.f32 %v5549_v56, %v377_v27  ;;  %v430_v61 = vld [vmem:[%s5217_s21 + $0x570] sm:$0xff] }
  0xe7   : > { %12559 = vst [vmem:[#allocation74_spill] sm:$0xff] %v5598_v2  ;;  %12560 = vst [vmem:[#allocation75_spill] sm:$0xff] %v5601_v10  ;;  %v381_v10 = vld [vmem:[%s5217_s21 + $0x3e8] sm:$0xff]  ;;  %v382_v2 = vld [vmem:[%s5217_s21 + $0x3f0] sm:$0xff]  ;;  %v5695_v16 = vmul.f32 %v5549_v56, %v379_v19  ;;  %v5711_v19 = vmul.f32 %v5549_v56, %v383_v29 }
  0xe8   : > { %12561 = vst [vmem:[#allocation76_spill] sm:$0xff] %v5608_v41  ;;  %12562 = vst [vmem:[#allocation77_spill] sm:$0xff] %v5611_v7  ;;  %v5705_v27 = vmul.f32 %v5549_v56, %v381_v10  ;;  %v311_v10 = vld [vmem:[%s5217_s21 + $0x1b8] sm:$0xff]  ;;  %v314_v7 = vld [vmem:[%s5217_s21 + $0x1d0] sm:$0xff] }
  0xe9   : > { %12563 = vst [vmem:[#allocation78_spill] sm:$0xff] %v5614_v5  ;;  %12564 = vst [vmem:[#allocation79_spill] sm:$0xff] %v5617_v1  ;;  %v5636_v1 = vmul.f32 %v5549_v56, %v364_v47  ;;  %v5639_v5 = vmul.f32 %v5549_v56, %v365_v46  ;;  %v5655_v46 = vmul.f32 %v5549_v56, %v369_v42  ;;  %v292_v47 = vld [vmem:[%s5217_s21 + $0x120] sm:$0xff]  ;;  %v315_v41 = vld [vmem:[%s5217_s21 + $0x1d8] sm:$0xff] }
  0xea   : > { %12565 = vst [vmem:[#allocation80_spill] sm:$0xff] %v5624_v14  ;;  %12566 = vst [vmem:[#allocation81_spill] sm:$0xff] %v5627_v63  ;;  %v288_v63 = vld [vmem:[%s5217_s21 + $0x100] sm:$0xff]  ;;  %v5671_v42 = vmul.f32 %v5549_v56, %v373_v53  ;;  %v5692_v53 = vmul.f32 %v5549_v56, %v378_v26  ;;  %v5708_v26 = vmul.f32 %v5549_v56, %v382_v2  ;;  %v431_v60 = vld [vmem:[%s5217_s21 + $0x578] sm:$0xff] }
  0xeb   : > { %12567 = vst [vmem:[#allocation82_spill] sm:$0xff] %v5630_v62  ;;  %12568 = vst [vmem:[#allocation83_spill] sm:$0xff] %v5633_v57  ;;  %v290_v62 = vld [vmem:[%s5217_s21 + $0x110] sm:$0xff]  ;;  %v5652_v57 = vmul.f32 %v5549_v56, %v368_v43  ;;  %v5668_v43 = vmul.f32 %v5549_v56, %v372_v35  ;;  %v299_v35 = vld [vmem:[%s5217_s21 + $0x158] sm:$0xff] }
  0xec   : > { %12569 = vst [vmem:[#allocation84_spill] sm:$0xff] %v5636_v1  ;;  %12570 = vst [vmem:[#allocation85_spill] sm:$0xff] %v5639_v5  ;;  %v295_v5 = vld [vmem:[%s5217_s21 + $0x138] sm:$0xff]  ;;  %v308_v14 = vld [vmem:[%s5217_s21 + $0x1a0] sm:$0xff] }
  0xed   : > { %12571 = vst [vmem:[#allocation86_spill] sm:$0xff] %v5642_v55  ;;  %12572 = vst [vmem:[#allocation87_spill] sm:$0xff] %v5645_v54  ;;  %v293_v54 = vld [vmem:[%s5217_s21 + $0x128] sm:$0xff]  ;;  %v294_v55 = vld [vmem:[%s5217_s21 + $0x130] sm:$0xff] }
  0xee   : > { %12573 = vst [vmem:[#allocation88_spill] sm:$0xff] %v5652_v57  ;;  %12574 = vst [vmem:[#allocation89_spill] sm:$0xff] %v5655_v46  ;;  %v297_v46 = vld [vmem:[%s5217_s21 + $0x148] sm:$0xff]  ;;  %v298_v57 = vld [vmem:[%s5217_s21 + $0x150] sm:$0xff] }
  0xef   : > { %12575 = vst [vmem:[#allocation90_spill] sm:$0xff] %v5658_v45  ;;  %12576 = vst [vmem:[#allocation91_spill] sm:$0xff] %v5661_v44  ;;  %v5679_v44 = vpop.permute.xlu0 %1319  ;;  %v296_v45 = vld [vmem:[%s5217_s21 + $0x140] sm:$0xff]  ;;  %v303_v1 = vld [vmem:[%s5217_s21 + $0x178] sm:$0xff] }
  0xf0   : > { %12577 = vst [vmem:[#allocation92_spill] sm:$0xff] %v5668_v43  ;;  %12578 = vst [vmem:[#allocation93_spill] sm:$0xff] %v5671_v42  ;;  %v5686_v43 = vmul.f32 %v5549_v56, %v376_v28  ;;  %v302_v42 = vld [vmem:[%s5217_s21 + $0x170] sm:$0xff]  ;;  %v5702_v28 = vmul.f32 %v5549_v56, %v380_v6  ;;  %v309_v6 = vld [vmem:[%s5217_s21 + $0x1a8] sm:$0xff]  ;;  %v5722_v2 = vmul.f32 %v5679_v44, %v288_v63 }
  0xf1   : > { %12579 = vst [vmem:[#allocation94_spill] sm:$0xff] %v5674_v37  ;;  %12580 = vst [vmem:[#allocation95_spill] sm:$0xff] %v5677_v36  ;;  %v300_v36 = vld [vmem:[%s5217_s21 + $0x160] sm:$0xff]  ;;  %v301_v37 = vld [vmem:[%s5217_s21 + $0x168] sm:$0xff]  ;;  %v5728_v29 = vmul.f32 %v5679_v44, %v290_v62  ;;  %v5731_v56 = vmul.f32 %v5679_v44, %v291_v24  ;;  %v5738_v15 = vmul.f32 %v5679_v44, %v292_v47 }
  0xf2   : > { %12581 = vst [vmem:[#allocation96_spill] sm:$0xff] %v5686_v43  ;;  %12582 = vst [vmem:[#allocation97_spill] sm:$0xff] %v5689_v34  ;;  %v306_v34 = vld [vmem:[%s5217_s21 + $0x190] sm:$0xff]  ;;  %v307_v43 = vld [vmem:[%s5217_s21 + $0x198] sm:$0xff]  ;;  %v5741_v63 = vmul.f32 %v5679_v44, %v293_v54  ;;  %v5747_v62 = vmul.f32 %v5679_v44, %v295_v5  ;;  %v5754_v47 = vmul.f32 %v5679_v44, %v296_v45 }
  0xf3   : > { %12583 = vst [vmem:[#allocation98_spill] sm:$0xff] %v5692_v53  ;;  %12584 = vst [vmem:[#allocation99_spill] sm:$0xff] %v5695_v16  ;;  %v304_v16 = vld [vmem:[%s5217_s21 + $0x180] sm:$0xff]  ;;  %v305_v53 = vld [vmem:[%s5217_s21 + $0x188] sm:$0xff]  ;;  %v5757_v54 = vmul.f32 %v5679_v44, %v297_v46  ;;  %v5763_v5 = vmul.f32 %v5679_v44, %v299_v35  ;;  %v5766_v30 = vmul.f32 %v5679_v44, %v300_v36 }
  0xf4   : > { %12585 = vst [vmem:[#allocation100_spill] sm:$0xff] %v5702_v28  ;;  %12586 = vst [vmem:[#allocation101_spill] sm:$0xff] %v5705_v27  ;;  %v310_v28 = vld [vmem:[%s5217_s21 + $0x1b0] sm:$0xff]  ;;  %v313_v27 = vld [vmem:[%s5217_s21 + $0x1c8] sm:$0xff]  ;;  %v5769_v25 = vmul.f32 %v5679_v44, %v301_v37  ;;  %v5772_v45 = vmul.f32 %v5679_v44, %v302_v42  ;;  %v5775_v46 = vmul.f32 %v5679_v44, %v303_v1 }
  0xf5   : > { %12587 = vst [vmem:[#allocation102_spill] sm:$0xff] %v5708_v26  ;;  %12588 = vst [vmem:[#allocation103_spill] sm:$0xff] %v5711_v19  ;;  %v5725_v26 = vmul.f32 %v5679_v44, %v289_v49  ;;  %v312_v19 = vld [vmem:[%s5217_s21 + $0x1c0] sm:$0xff]  ;;  %v5744_v49 = vmul.f32 %v5679_v44, %v294_v55  ;;  %v5760_v55 = vmul.f32 %v5679_v44, %v298_v57  ;;  %v417_v57 = vld [vmem:[%s5217_s21 + $0x508] sm:$0xff] }
  0xf6   : > { %v316_v24 = vld [vmem:[%s5217_s21 + $0x1e0] sm:$0xff]  ;;  %v419_v35 = vld [vmem:[%s5217_s21 + $0x518] sm:$0xff]  ;;  %v5782_v22 = vmul.f32 %v5679_v44, %v304_v16  ;;  %v5785_v37 = vmul.f32 %v5679_v44, %v305_v53  ;;  %v5788_v42 = vmul.f32 %v5679_v44, %v306_v34  ;;  %v5791_v1 = vmul.f32 %v5679_v44, %v307_v43  ;;  %v433_v58 = vld [vmem:[%s5217_s21 + $0x588] sm:$0xff] }
  0xf7   : > { %v420_v36 = vld [vmem:[%s5217_s21 + $0x520] sm:$0xff]  ;;  %v5798_v16 = vmul.f32 %v5679_v44, %v308_v14  ;;  %v5801_v53 = vmul.f32 %v5679_v44, %v309_v6  ;;  %v5804_v34 = vmul.f32 %v5679_v44, %v310_v28  ;;  %v5807_v43 = vmul.f32 %v5679_v44, %v311_v10  ;;  %v427_v14 = vld [vmem:[%s5217_s21 + $0x558] sm:$0xff]  ;;  %v434_v52 = vld [vmem:[%s5217_s21 + $0x590] sm:$0xff] }
  0xf8   : > { %v5816_v3 = vmul.f32 %v5679_v44, %v312_v19  ;;  %v5819_v28 = vmul.f32 %v5679_v44, %v313_v27  ;;  %v5822_v6 = vmul.f32 %v5679_v44, %v314_v7  ;;  %v5825_v10 = vmul.f32 %v5679_v44, %v315_v41  ;;  %v432_v59 = vld [vmem:[%s5217_s21 + $0x580] sm:$0xff]  ;;  %v435_v51 = vld [vmem:[%s5217_s21 + $0x598] sm:$0xff]  ;;  %v438_v18 = vld [vmem:[%s5217_s21 + $0x5b0] sm:$0xff] }
  0xf9   : > { %v5832_v19 = vmul.f32 %v5679_v44, %v316_v24  ;;  %v5835_v27 = vmul.f32 %v5679_v44, %v317_v40  ;;  %v5838_v7 = vmul.f32 %v5679_v44, %v318_v39  ;;  %v5841_v41 = vmul.f32 %v5679_v44, %v319_v31  ;;  %v436_v50 = vld [vmem:[%s5217_s21 + $0x5a0] sm:$0xff]  ;;  %v437_v24 = vld [vmem:[%s5217_s21 + $0x5a8] sm:$0xff]  ;;  %v439_v40 = vld [vmem:[%s5217_s21 + $0x5b8] sm:$0xff] }
  0xfa   : > { %v5852_v39 = vmul.f32 %v5809_v12, %v416_v48  ;;  %v5855_v38 = vmul.f32 %v5809_v12, %v417_v57  ;;  %v5858_v31 = vmul.f32 %v5809_v12, %v418_v23  ;;  %v5861_v44 = vmul.f32 %v5809_v12, %v419_v35  ;;  %v440_v17 = vld [vmem:[%s5217_s21 + $0x5c0] sm:$0xff]  ;;  %v441_v33 = vld [vmem:[%s5217_s21 + $0x5c8] sm:$0xff]  ;;  %v442_v32 = vld [vmem:[%s5217_s21 + $0x5d0] sm:$0xff] }
  0xfb   : > { %12589 = vst [vmem:[#allocation104_spill] sm:$0xff] %v5838_v7  ;;  %12590 = vst [vmem:[#allocation105_spill] sm:$0xff] %v5841_v41  ;;  %v443_v41 = vld [vmem:[%s5217_s21 + $0x5d8] sm:$0xff]  ;;  %v5868_v7 = vmul.f32 %v5809_v12, %v420_v36  ;;  %v5871_v48 = vmul.f32 %v5809_v12, %v421_v21  ;;  %v5874_v57 = vmul.f32 %v5809_v12, %v422_v20  ;;  %v444_v35 = vld [vmem:[%s5217_s21 + $0x5e0] sm:$0xff] }
  0xfc   : > { %12591 = vst [vmem:[#allocation106_spill] sm:$0xff] %v5852_v39  ;;  %12592 = vst [vmem:[#allocation107_spill] sm:$0xff] %v5855_v38  ;;  %v5877_v23 = vmul.f32 %v5809_v12, %v423_v13  ;;  %v447_v38 = vld [vmem:[%s5217_s21 + $0x5f8] sm:$0xff]  ;;  %v5884_v36 = vmul.f32 %v5809_v12, %v424_v11  ;;  %v5887_v21 = vmul.f32 %v5809_v12, %v425_v0 }
  0xfd   : > { %12593 = vst [vmem:[#allocation108_spill] sm:$0xff] %v5858_v31  ;;  %12594 = vst [vmem:[#allocation109_spill] sm:$0xff] %v5861_v44  ;;  %v445_v44 = vld [vmem:[%s5217_s21 + $0x5e8] sm:$0xff]  ;;  %v446_v31 = vld [vmem:[%s5217_s21 + $0x5f0] sm:$0xff]  ;;  %v5890_v20 = vmul.f32 %v5809_v12, %v426_v4  ;;  %v5893_v13 = vmul.f32 %v5809_v12, %v427_v14  ;;  %v5902_v11 = vmul.f32 %v5809_v12, %v430_v61 }
  0xfe   : > { %12595 = vst [vmem:[#allocation110_spill] sm:$0xff] %v5868_v7  ;;  %12596 = vst [vmem:[#allocation111_spill] sm:$0xff] %v5871_v48  ;;  %v5905_v0 = vmul.f32 %v5809_v12, %v431_v60  ;;  %v385_v4 = vld [vmem:[%s5217_s21 + $0x408] sm:$0xff]  ;;  %v387_v14 = vld [vmem:[%s5217_s21 + $0x418] sm:$0xff]  ;;  %v5921_v60 = vmul.f32 %v5809_v12, %v435_v51  ;;  %v5937_v51 = vmul.f32 %v5809_v12, %v439_v40 }
  0xff   : > { %12597 = vst [vmem:[#allocation112_spill] sm:$0xff] %v5874_v57  ;;  %12598 = vst [vmem:[#allocation113_spill] sm:$0xff] %v5877_v23  ;;  %v5896_v23 = vmul.f32 %v5809_v12, %v428_v8  ;;  %v5899_v57 = vmul.f32 %v5809_v12, %v429_v9  ;;  %v5915_v8 = vmul.f32 %v5809_v12, %v433_v58  ;;  %v388_v61 = vld [vmem:[%s5217_s21 + $0x420] sm:$0xff]  ;;  %v410_v48 = vld [vmem:[%s5217_s21 + $0x4d0] sm:$0xff] }
 0x100   : > { %12599 = vst [vmem:[#allocation114_spill] sm:$0xff] %v5884_v36  ;;  %12600 = vst [vmem:[#allocation115_spill] sm:$0xff] %v5887_v21  ;;  %v384_v21 = vld [vmem:[%s5217_s21 + $0x400] sm:$0xff]  ;;  %v5918_v9 = vmul.f32 %v5809_v12, %v434_v52  ;;  %v5931_v58 = vmul.f32 %v5809_v12, %v437_v24  ;;  %v5934_v52 = vmul.f32 %v5809_v12, %v438_v18  ;;  %v411_v7 = vld [vmem:[%s5217_s21 + $0x4d8] sm:$0xff] }
 0x101   : > { %12601 = vst [vmem:[#allocation116_spill] sm:$0xff] %v5890_v20  ;;  %12602 = vst [vmem:[#allocation117_spill] sm:$0xff] %v5893_v13  ;;  %v386_v20 = vld [vmem:[%s5217_s21 + $0x410] sm:$0xff]  ;;  %v5912_v13 = vmul.f32 %v5809_v12, %v432_v59  ;;  %v5928_v59 = vmul.f32 %v5809_v12, %v436_v50  ;;  %v395_v50 = vld [vmem:[%s5217_s21 + $0x458] sm:$0xff]  ;;  %v5949_v18 = vmul.f32 %v5809_v12, %v441_v33 }
 0x102   : > { %12603 = vst [vmem:[#allocation118_spill] sm:$0xff] %v5896_v23  ;;  %12604 = vst [vmem:[#allocation119_spill] sm:$0xff] %v5899_v57  ;;  %v391_v57 = vld [vmem:[%s5217_s21 + $0x438] sm:$0xff]  ;;  %v5952_v24 = vmul.f32 %v5809_v12, %v442_v32  ;;  %v5955_v40 = vmul.f32 %v5809_v12, %v443_v41  ;;  %v5965_v33 = vmul.f32 %v5809_v12, %v445_v44  ;;  %v404_v36 = vld [vmem:[%s5217_s21 + $0x4a0] sm:$0xff] }
 0x103   : > { %12605 = vst [vmem:[#allocation120_spill] sm:$0xff] %v5902_v11  ;;  %12606 = vst [vmem:[#allocation121_spill] sm:$0xff] %v5905_v0  ;;  %v389_v0 = vld [vmem:[%s5217_s21 + $0x428] sm:$0xff]  ;;  %v390_v11 = vld [vmem:[%s5217_s21 + $0x430] sm:$0xff]  ;;  %v5968_v32 = vmul.f32 %v5809_v12, %v446_v31  ;;  %v5971_v41 = vmul.f32 %v5809_v12, %v447_v38 }
 0x104   : > { %12607 = vst [vmem:[#allocation122_spill] sm:$0xff] %v5912_v13  ;;  %12608 = vst [vmem:[#allocation123_spill] sm:$0xff] %v5915_v8  ;;  %v393_v8 = vld [vmem:[%s5217_s21 + $0x448] sm:$0xff]  ;;  %v394_v13 = vld [vmem:[%s5217_s21 + $0x450] sm:$0xff] }
 0x105   : > { %12609 = vst [vmem:[#allocation124_spill] sm:$0xff] %v5918_v9  ;;  %12610 = vst [vmem:[#allocation125_spill] sm:$0xff] %v5921_v60  ;;  %v5939_v60 = vpop.permute.xlu0 %1334  ;;  %v392_v9 = vld [vmem:[%s5217_s21 + $0x440] sm:$0xff]  ;;  %v399_v23 = vld [vmem:[%s5217_s21 + $0x478] sm:$0xff] }
 0x106   : > { %12611 = vst [vmem:[#allocation126_spill] sm:$0xff] %v5928_v59  ;;  %12612 = vst [vmem:[#allocation127_spill] sm:$0xff] %v5931_v58  ;;  %v5946_v59 = vmul.f32 %v5809_v12, %v440_v17  ;;  %v398_v58 = vld [vmem:[%s5217_s21 + $0x470] sm:$0xff]  ;;  %v5962_v17 = vmul.f32 %v5809_v12, %v444_v35  ;;  %v405_v35 = vld [vmem:[%s5217_s21 + $0x4a8] sm:$0xff]  ;;  %v5982_v31 = vmul.f32 %v5939_v60, %v384_v21 }
 0x107   : > { %12613 = vst [vmem:[#allocation128_spill] sm:$0xff] %v5934_v52  ;;  %12614 = vst [vmem:[#allocation129_spill] sm:$0xff] %v5937_v51  ;;  %v396_v51 = vld [vmem:[%s5217_s21 + $0x460] sm:$0xff]  ;;  %v397_v52 = vld [vmem:[%s5217_s21 + $0x468] sm:$0xff]  ;;  %v5988_v38 = vmul.f32 %v5939_v60, %v386_v20  ;;  %v5991_v12 = vmul.f32 %v5939_v60, %v387_v14  ;;  %v5998_v39 = vmul.f32 %v5939_v60, %v388_v61 }
 0x108   : > { %12615 = vst [vmem:[#allocation130_spill] sm:$0xff] %v5946_v59  ;;  %12616 = vst [vmem:[#allocation131_spill] sm:$0xff] %v5949_v18  ;;  %v402_v18 = vld [vmem:[%s5217_s21 + $0x490] sm:$0xff]  ;;  %v403_v59 = vld [vmem:[%s5217_s21 + $0x498] sm:$0xff]  ;;  %v6001_v21 = vmul.f32 %v5939_v60, %v389_v0  ;;  %v6007_v20 = vmul.f32 %v5939_v60, %v391_v57  ;;  %v6014_v61 = vmul.f32 %v5939_v60, %v392_v9 }
 0x109   : > { %12617 = vst [vmem:[#allocation132_spill] sm:$0xff] %v5952_v24  ;;  %12618 = vst [vmem:[#allocation133_spill] sm:$0xff] %v5955_v40  ;;  %v400_v40 = vld [vmem:[%s5217_s21 + $0x480] sm:$0xff]  ;;  %v401_v24 = vld [vmem:[%s5217_s21 + $0x488] sm:$0xff]  ;;  %v6017_v0 = vmul.f32 %v5939_v60, %v393_v8  ;;  %v6023_v57 = vmul.f32 %v5939_v60, %v395_v50  ;;  %v6032_v9 = vmul.f32 %v5939_v60, %v398_v58 }
 0x10a   : > { %12619 = vst [vmem:[#allocation134_spill] sm:$0xff] %v5962_v17  ;;  %12620 = vst [vmem:[#allocation135_spill] sm:$0xff] %v5965_v33  ;;  %v406_v17 = vld [vmem:[%s5217_s21 + $0x4b0] sm:$0xff]  ;;  %v407_v44 = vld [vmem:[%s5217_s21 + $0x4b8] sm:$0xff]  ;;  %v6035_v8 = vmul.f32 %v5939_v60, %v399_v23  ;;  %v6048_v58 = vmul.f32 %v5939_v60, %v402_v18  ;;  %v6051_v23 = vmul.f32 %v5939_v60, %v403_v59 }
 0x10b   : > { %12621 = vst [vmem:[#allocation136_spill] sm:$0xff] %v5968_v32  ;;  %12622 = vst [vmem:[#allocation137_spill] sm:$0xff] %v5971_v41  ;;  %v5985_v32 = vmul.f32 %v5939_v60, %v385_v4  ;;  %v408_v41 = vld [vmem:[%s5217_s21 + $0x4c0] sm:$0xff]  ;;  %v409_v33 = vld [vmem:[%s5217_s21 + $0x4c8] sm:$0xff]  ;;  %v6004_v4 = vmul.f32 %v5939_v60, %v390_v11  ;;  %v6020_v11 = vmul.f32 %v5939_v60, %v394_v13 }
 0x10c   : > { %12623 = vst [vmem:[#allocation138_spill] sm:$0xff] %v5982_v31  ;;  %12625 = vst [vmem:[#allocation140_spill] sm:$0xff] %v5988_v38  ;;  %v412_v14 = vld [vmem:[%s5217_s21 + $0x4e0] sm:$0xff]  ;;  %v414_v38 = vld [vmem:[%s5217_s21 + $0x4f0] sm:$0xff]  ;;  %v6064_v18 = vmul.f32 %v5939_v60, %v406_v17  ;;  %v6067_v59 = vmul.f32 %v5939_v60, %v407_v44  ;;  %v6079_v17 = vmul.f32 %v5939_v60, %v409_v33 }
 0x10d   : > { %12624 = vst [vmem:[#allocation139_spill] sm:$0xff] %v5985_v32  ;;  %12626 = vst [vmem:[#allocation141_spill] sm:$0xff] %v5991_v12  ;;  %v413_v12 = vld [vmem:[%s5217_s21 + $0x4e8] sm:$0xff]  ;;  %v415_v32 = vld [vmem:[%s5217_s21 + $0x4f8] sm:$0xff]  ;;  %v6085_v44 = vmul.f32 %v5939_v60, %v411_v7 }
 0x10e   : > { %12627 = vst [vmem:[#allocation142_spill] sm:$0xff] %v5998_v39  ;;  %12628 = vst [vmem:[#allocation143_spill] sm:$0xff] %v6001_v21  ;;  %v481_v13 = vld [vmem:[%s5217_s21 + $0x708] sm:$0xff]  ;;  %v483_v50 = vld [vmem:[%s5217_s21 + $0x718] sm:$0xff]  ;;  %v6095_v33 = vmul.f32 %v5939_v60, %v413_v12  ;;  %v6101_v7 = vmul.f32 %v5939_v60, %v415_v32 }
 0x10f   : > { %12629 = vst [vmem:[#allocation144_spill] sm:$0xff] %v6004_v4  ;;  %12630 = vst [vmem:[#allocation145_spill] sm:$0xff] %v6007_v20  ;;  %v6026_v20 = vmul.f32 %v5939_v60, %v396_v51  ;;  %v6029_v4 = vmul.f32 %v5939_v60, %v397_v52  ;;  %v6045_v52 = vmul.f32 %v5939_v60, %v401_v24  ;;  %v484_v51 = vld [vmem:[%s5217_s21 + $0x720] sm:$0xff]  ;;  %v503_v12 = vld [vmem:[%s5217_s21 + $0x7b8] sm:$0xff] }
 0x110   : > { %12631 = vst [vmem:[#allocation146_spill] sm:$0xff] %v6014_v61  ;;  %12632 = vst [vmem:[#allocation147_spill] sm:$0xff] %v6017_v0  ;;  %v480_v0 = vld [vmem:[%s5217_s21 + $0x700] sm:$0xff]  ;;  %v6061_v24 = vmul.f32 %v5939_v60, %v405_v35  ;;  %v6082_v35 = vmul.f32 %v5939_v60, %v410_v48  ;;  %v6098_v48 = vmul.f32 %v5939_v60, %v414_v38  ;;  %v506_v21 = vld [vmem:[%s5217_s21 + $0x7d0] sm:$0xff] }
 0x111   : > { %12633 = vst [vmem:[#allocation148_spill] sm:$0xff] %v6020_v11  ;;  %12634 = vst [vmem:[#allocation149_spill] sm:$0xff] %v6023_v57  ;;  %v482_v11 = vld [vmem:[%s5217_s21 + $0x710] sm:$0xff]  ;;  %v6042_v57 = vmul.f32 %v5939_v60, %v400_v40  ;;  %v6058_v40 = vmul.f32 %v5939_v60, %v404_v36  ;;  %v491_v36 = vld [vmem:[%s5217_s21 + $0x758] sm:$0xff] }
 0x112   : > { %12635 = vst [vmem:[#allocation150_spill] sm:$0xff] %v6026_v20  ;;  %12636 = vst [vmem:[#allocation151_spill] sm:$0xff] %v6029_v4  ;;  %v487_v4 = vld [vmem:[%s5217_s21 + $0x738] sm:$0xff]  ;;  %v500_v61 = vld [vmem:[%s5217_s21 + $0x7a0] sm:$0xff] }
 0x113   : > { %12637 = vst [vmem:[#allocation152_spill] sm:$0xff] %v6032_v9  ;;  %12638 = vst [vmem:[#allocation153_spill] sm:$0xff] %v6035_v8  ;;  %v485_v8 = vld [vmem:[%s5217_s21 + $0x728] sm:$0xff]  ;;  %v486_v9 = vld [vmem:[%s5217_s21 + $0x730] sm:$0xff] }
 0x114   : > { %12639 = vst [vmem:[#allocation154_spill] sm:$0xff] %v6042_v57  ;;  %12640 = vst [vmem:[#allocation155_spill] sm:$0xff] %v6045_v52  ;;  %v489_v52 = vld [vmem:[%s5217_s21 + $0x748] sm:$0xff]  ;;  %v490_v57 = vld [vmem:[%s5217_s21 + $0x750] sm:$0xff] }
 0x115   : > { %12641 = vst [vmem:[#allocation156_spill] sm:$0xff] %v6048_v58  ;;  %12642 = vst [vmem:[#allocation157_spill] sm:$0xff] %v6051_v23  ;;  %v6069_v23 = vpop.permute.xlu1 %1349  ;;  %v488_v58 = vld [vmem:[%s5217_s21 + $0x740] sm:$0xff]  ;;  %v495_v20 = vld [vmem:[%s5217_s21 + $0x778] sm:$0xff] }
 0x116   : > { %12643 = vst [vmem:[#allocation158_spill] sm:$0xff] %v6058_v40  ;;  %12644 = vst [vmem:[#allocation159_spill] sm:$0xff] %v6061_v24  ;;  %v6076_v40 = vmul.f32 %v5939_v60, %v408_v41  ;;  %v494_v24 = vld [vmem:[%s5217_s21 + $0x770] sm:$0xff]  ;;  %v6092_v41 = vmul.f32 %v5939_v60, %v412_v14  ;;  %v501_v14 = vld [vmem:[%s5217_s21 + $0x7a8] sm:$0xff]  ;;  %v6112_v38 = vmul.f32 %v6069_v23, %v480_v0 }
 0x117   : > { %12645 = vst [vmem:[#allocation160_spill] sm:$0xff] %v6064_v18  ;;  %12646 = vst [vmem:[#allocation161_spill] sm:$0xff] %v6067_v59  ;;  %v492_v59 = vld [vmem:[%s5217_s21 + $0x760] sm:$0xff]  ;;  %v493_v18 = vld [vmem:[%s5217_s21 + $0x768] sm:$0xff]  ;;  %v6118_v60 = vmul.f32 %v6069_v23, %v482_v11  ;;  %v6121_v32 = vmul.f32 %v6069_v23, %v483_v50  ;;  %v6128_v31 = vmul.f32 %v6069_v23, %v484_v51 }
 0x118   : > { %12647 = vst [vmem:[#allocation162_spill] sm:$0xff] %v6076_v40  ;;  %12648 = vst [vmem:[#allocation163_spill] sm:$0xff] %v6079_v17  ;;  %v498_v17 = vld [vmem:[%s5217_s21 + $0x790] sm:$0xff]  ;;  %v499_v40 = vld [vmem:[%s5217_s21 + $0x798] sm:$0xff]  ;;  %v6131_v0 = vmul.f32 %v6069_v23, %v485_v8  ;;  %v6137_v11 = vmul.f32 %v6069_v23, %v487_v4  ;;  %v6144_v51 = vmul.f32 %v6069_v23, %v488_v58 }
 0x119   : > { %12649 = vst [vmem:[#allocation164_spill] sm:$0xff] %v6082_v35  ;;  %12650 = vst [vmem:[#allocation165_spill] sm:$0xff] %v6085_v44  ;;  %v496_v44 = vld [vmem:[%s5217_s21 + $0x780] sm:$0xff]  ;;  %v497_v35 = vld [vmem:[%s5217_s21 + $0x788] sm:$0xff]  ;;  %v6147_v8 = vmul.f32 %v6069_v23, %v489_v52  ;;  %v6153_v4 = vmul.f32 %v6069_v23, %v491_v36  ;;  %v6162_v58 = vmul.f32 %v6069_v23, %v494_v24 }
 0x11a   : > { %12651 = vst [vmem:[#allocation166_spill] sm:$0xff] %v6092_v41  ;;  %12652 = vst [vmem:[#allocation167_spill] sm:$0xff] %v6095_v33  ;;  %v502_v41 = vld [vmem:[%s5217_s21 + $0x7b0] sm:$0xff]  ;;  %v505_v33 = vld [vmem:[%s5217_s21 + $0x7c8] sm:$0xff]  ;;  %v6165_v52 = vmul.f32 %v6069_v23, %v495_v20  ;;  %v6178_v24 = vmul.f32 %v6069_v23, %v498_v17  ;;  %v6181_v20 = vmul.f32 %v6069_v23, %v499_v40 }
 0x11b   : > { %12653 = vst [vmem:[#allocation168_spill] sm:$0xff] %v6098_v48  ;;  %12654 = vst [vmem:[#allocation169_spill] sm:$0xff] %v6101_v7  ;;  %v6115_v48 = vmul.f32 %v6069_v23, %v481_v13  ;;  %v504_v7 = vld [vmem:[%s5217_s21 + $0x7c0] sm:$0xff]  ;;  %v507_v39 = vld [vmem:[%s5217_s21 + $0x7d8] sm:$0xff]  ;;  %v6134_v13 = vmul.f32 %v6069_v23, %v486_v9  ;;  %v6150_v9 = vmul.f32 %v6069_v23, %v490_v57 }
 0x11c   : > { %12655 = vst [vmem:[#allocation170_spill] sm:$0xff] %v6112_v38  ;;  %12657 = vst [vmem:[#allocation172_spill] sm:$0xff] %v6118_v60  ;;  %v508_v50 = vld [vmem:[%s5217_s21 + $0x7e0] sm:$0xff]  ;;  %v510_v60 = vld [vmem:[%s5217_s21 + $0x7f0] sm:$0xff]  ;;  %v6194_v17 = vmul.f32 %v6069_v23, %v502_v41  ;;  %v6197_v40 = vmul.f32 %v6069_v23, %v503_v12  ;;  %v6209_v41 = vmul.f32 %v6069_v23, %v505_v33 }
 0x11d   : > { %12656 = vst [vmem:[#allocation171_spill] sm:$0xff] %v6115_v48  ;;  %12658 = vst [vmem:[#allocation173_spill] sm:$0xff] %v6121_v32  ;;  %v509_v32 = vld [vmem:[%s5217_s21 + $0x7e8] sm:$0xff]  ;;  %v511_v48 = vld [vmem:[%s5217_s21 + $0x7f8] sm:$0xff]  ;;  %v6215_v12 = vmul.f32 %v6069_v23, %v507_v39 }
 0x11e   : > { %12659 = vst [vmem:[#allocation174_spill] sm:$0xff] %v6128_v31  ;;  %12660 = vst [vmem:[#allocation175_spill] sm:$0xff] %v6131_v0  ;;  %v449_v57 = vld [vmem:[%s5217_s21 + $0x608] sm:$0xff]  ;;  %v451_v36 = vld [vmem:[%s5217_s21 + $0x618] sm:$0xff]  ;;  %v6225_v33 = vmul.f32 %v6069_v23, %v509_v32  ;;  %v6231_v39 = vmul.f32 %v6069_v23, %v511_v48 }
 0x11f   : > { %12661 = vst [vmem:[#allocation176_spill] sm:$0xff] %v6134_v13  ;;  %12662 = vst [vmem:[#allocation177_spill] sm:$0xff] %v6137_v11  ;;  %v6156_v11 = vmul.f32 %v6069_v23, %v492_v59  ;;  %v6159_v13 = vmul.f32 %v6069_v23, %v493_v18  ;;  %v6175_v18 = vmul.f32 %v6069_v23, %v497_v35  ;;  %v452_v59 = vld [vmem:[%s5217_s21 + $0x620] sm:$0xff]  ;;  %v471_v32 = vld [vmem:[%s5217_s21 + $0x6b8] sm:$0xff] }
 0x120   : > { %12663 = vst [vmem:[#allocation178_spill] sm:$0xff] %v6144_v51  ;;  %12664 = vst [vmem:[#allocation179_spill] sm:$0xff] %v6147_v8  ;;  %v448_v8 = vld [vmem:[%s5217_s21 + $0x600] sm:$0xff]  ;;  %v6191_v35 = vmul.f32 %v6069_v23, %v501_v14  ;;  %v6212_v14 = vmul.f32 %v6069_v23, %v506_v21  ;;  %v6228_v21 = vmul.f32 %v6069_v23, %v510_v60  ;;  %v474_v0 = vld [vmem:[%s5217_s21 + $0x6d0] sm:$0xff] }
 0x121   : > { %12665 = vst [vmem:[#allocation180_spill] sm:$0xff] %v6150_v9  ;;  %12666 = vst [vmem:[#allocation181_spill] sm:$0xff] %v6153_v4  ;;  %v450_v9 = vld [vmem:[%s5217_s21 + $0x610] sm:$0xff]  ;;  %v6172_v4 = vmul.f32 %v6069_v23, %v496_v44  ;;  %v6188_v44 = vmul.f32 %v6069_v23, %v500_v61  ;;  %v459_v61 = vld [vmem:[%s5217_s21 + $0x658] sm:$0xff] }
 0x122   : > { %12667 = vst [vmem:[#allocation182_spill] sm:$0xff] %v6156_v11  ;;  %12668 = vst [vmem:[#allocation183_spill] sm:$0xff] %v6159_v13  ;;  %v455_v13 = vld [vmem:[%s5217_s21 + $0x638] sm:$0xff]  ;;  %v468_v51 = vld [vmem:[%s5217_s21 + $0x6a0] sm:$0xff] }
 0x123   : > { %12669 = vst [vmem:[#allocation184_spill] sm:$0xff] %v6162_v58  ;;  %12670 = vst [vmem:[#allocation185_spill] sm:$0xff] %v6165_v52  ;;  %v453_v52 = vld [vmem:[%s5217_s21 + $0x628] sm:$0xff]  ;;  %v454_v58 = vld [vmem:[%s5217_s21 + $0x630] sm:$0xff] }
 0x124   : > { %12671 = vst [vmem:[#allocation186_spill] sm:$0xff] %v6172_v4  ;;  %12672 = vst [vmem:[#allocation187_spill] sm:$0xff] %v6175_v18  ;;  %v457_v18 = vld [vmem:[%s5217_s21 + $0x648] sm:$0xff]  ;;  %v458_v4 = vld [vmem:[%s5217_s21 + $0x650] sm:$0xff] }
 0x125   : > { %12673 = vst [vmem:[#allocation188_spill] sm:$0xff] %v6178_v24  ;;  %12674 = vst [vmem:[#allocation189_spill] sm:$0xff] %v6181_v20  ;;  %v6199_v20 = vpop.permute.xlu0 %1344  ;;  %v456_v24 = vld [vmem:[%s5217_s21 + $0x640] sm:$0xff]  ;;  %v463_v11 = vld [vmem:[%s5217_s21 + $0x678] sm:$0xff] }
 0x126   : > { %12675 = vst [vmem:[#allocation190_spill] sm:$0xff] %v6188_v44  ;;  %12676 = vst [vmem:[#allocation191_spill] sm:$0xff] %v6191_v35  ;;  %v6206_v44 = vmul.f32 %v6069_v23, %v504_v7  ;;  %v462_v35 = vld [vmem:[%s5217_s21 + $0x670] sm:$0xff]  ;;  %v6222_v7 = vmul.f32 %v6069_v23, %v508_v50  ;;  %v469_v50 = vld [vmem:[%s5217_s21 + $0x6a8] sm:$0xff]  ;;  %v6242_v60 = vmul.f32 %v6199_v20, %v448_v8 }
 0x127   : > { %12677 = vst [vmem:[#allocation192_spill] sm:$0xff] %v6194_v17  ;;  %12678 = vst [vmem:[#allocation193_spill] sm:$0xff] %v6197_v40  ;;  %v460_v40 = vld [vmem:[%s5217_s21 + $0x660] sm:$0xff]  ;;  %v461_v17 = vld [vmem:[%s5217_s21 + $0x668] sm:$0xff]  ;;  %v6248_v23 = vmul.f32 %v6199_v20, %v450_v9  ;;  %v6251_v48 = vmul.f32 %v6199_v20, %v451_v36  ;;  %v6258_v38 = vmul.f32 %v6199_v20, %v452_v59 }
 0x128   : > { %12679 = vst [vmem:[#allocation194_spill] sm:$0xff] %v6206_v44  ;;  %12680 = vst [vmem:[#allocation195_spill] sm:$0xff] %v6209_v41  ;;  %v466_v41 = vld [vmem:[%s5217_s21 + $0x690] sm:$0xff]  ;;  %v467_v44 = vld [vmem:[%s5217_s21 + $0x698] sm:$0xff]  ;;  %v6261_v8 = vmul.f32 %v6199_v20, %v453_v52  ;;  %v6267_v9 = vmul.f32 %v6199_v20, %v455_v13  ;;  %v6274_v59 = vmul.f32 %v6199_v20, %v456_v24 }
 0x129   : > { %12681 = vst [vmem:[#allocation196_spill] sm:$0xff] %v6212_v14  ;;  %12682 = vst [vmem:[#allocation197_spill] sm:$0xff] %v6215_v12  ;;  %v464_v12 = vld [vmem:[%s5217_s21 + $0x680] sm:$0xff]  ;;  %v465_v14 = vld [vmem:[%s5217_s21 + $0x688] sm:$0xff]  ;;  %v6277_v52 = vmul.f32 %v6199_v20, %v457_v18  ;;  %v6283_v13 = vmul.f32 %v6199_v20, %v459_v61  ;;  %v6292_v24 = vmul.f32 %v6199_v20, %v462_v35 }
 0x12a   : > { %12683 = vst [vmem:[#allocation198_spill] sm:$0xff] %v6222_v7  ;;  %12684 = vst [vmem:[#allocation199_spill] sm:$0xff] %v6225_v33  ;;  %v470_v7 = vld [vmem:[%s5217_s21 + $0x6b0] sm:$0xff]  ;;  %v473_v33 = vld [vmem:[%s5217_s21 + $0x6c8] sm:$0xff]  ;;  %v6295_v18 = vmul.f32 %v6199_v20, %v463_v11  ;;  %v6308_v35 = vmul.f32 %v6199_v20, %v466_v41  ;;  %v6311_v11 = vmul.f32 %v6199_v20, %v467_v44 }
 0x12b   : > { %12685 = vst [vmem:[#allocation200_spill] sm:$0xff] %v6228_v21  ;;  %12686 = vst [vmem:[#allocation201_spill] sm:$0xff] %v6231_v39  ;;  %v6245_v21 = vmul.f32 %v6199_v20, %v449_v57  ;;  %v472_v39 = vld [vmem:[%s5217_s21 + $0x6c0] sm:$0xff]  ;;  %v475_v31 = vld [vmem:[%s5217_s21 + $0x6d8] sm:$0xff]  ;;  %v6264_v57 = vmul.f32 %v6199_v20, %v454_v58  ;;  %v6280_v58 = vmul.f32 %v6199_v20, %v458_v4 }
 0x12c   : > { %12687 = vst [vmem:[#allocation202_spill] sm:$0xff] %v6242_v60  ;;  %12689 = vst [vmem:[#allocation204_spill] sm:$0xff] %v6248_v23  ;;  %v476_v36 = vld [vmem:[%s5217_s21 + $0x6e0] sm:$0xff]  ;;  %v478_v23 = vld [vmem:[%s5217_s21 + $0x6f0] sm:$0xff]  ;;  %v6324_v41 = vmul.f32 %v6199_v20, %v470_v7  ;;  %v6327_v44 = vmul.f32 %v6199_v20, %v471_v32  ;;  %v6339_v7 = vmul.f32 %v6199_v20, %v473_v33 }
 0x12d   : > { %12688 = vst [vmem:[#allocation203_spill] sm:$0xff] %v6245_v21  ;;  %12690 = vst [vmem:[#allocation205_spill] sm:$0xff] %v6251_v48  ;;  %v477_v48 = vld [vmem:[%s5217_s21 + $0x6e8] sm:$0xff]  ;;  %v479_v21 = vld [vmem:[%s5217_s21 + $0x6f8] sm:$0xff]  ;;  %v6345_v32 = vmul.f32 %v6199_v20, %v475_v31 }
 0x12e   : > { %12691 = vst [vmem:[#allocation206_spill] sm:$0xff] %v6258_v38  ;;  %12692 = vst [vmem:[#allocation207_spill] sm:$0xff] %v6261_v8  ;;  %v545_v4 = vld [vmem:[%s5217_s21 + $0x908] sm:$0xff]  ;;  %v547_v61 = vld [vmem:[%s5217_s21 + $0x918] sm:$0xff]  ;;  %v6355_v33 = vmul.f32 %v6199_v20, %v477_v48  ;;  %v6361_v31 = vmul.f32 %v6199_v20, %v479_v21 }
 0x12f   : > { %12693 = vst [vmem:[#allocation208_spill] sm:$0xff] %v6264_v57  ;;  %12694 = vst [vmem:[#allocation209_spill] sm:$0xff] %v6267_v9  ;;  %v6286_v9 = vmul.f32 %v6199_v20, %v460_v40  ;;  %v6289_v57 = vmul.f32 %v6199_v20, %v461_v17  ;;  %v6305_v17 = vmul.f32 %v6199_v20, %v465_v14  ;;  %v548_v40 = vld [vmem:[%s5217_s21 + $0x920] sm:$0xff]  ;;  %v567_v48 = vld [vmem:[%s5217_s21 + $0x9b8] sm:$0xff] }
 0x130   : > { %12695 = vst [vmem:[#allocation210_spill] sm:$0xff] %v6274_v59  ;;  %12696 = vst [vmem:[#allocation211_spill] sm:$0xff] %v6277_v52  ;;  %v544_v52 = vld [vmem:[%s5217_s21 + $0x900] sm:$0xff]  ;;  %v6321_v14 = vmul.f32 %v6199_v20, %v469_v50  ;;  %v6342_v50 = vmul.f32 %v6199_v20, %v474_v0  ;;  %v6358_v0 = vmul.f32 %v6199_v20, %v478_v23  ;;  %v570_v8 = vld [vmem:[%s5217_s21 + $0x9d0] sm:$0xff] }
 0x131   : > { %12697 = vst [vmem:[#allocation212_spill] sm:$0xff] %v6280_v58  ;;  %12698 = vst [vmem:[#allocation213_spill] sm:$0xff] %v6283_v13  ;;  %v546_v58 = vld [vmem:[%s5217_s21 + $0x910] sm:$0xff]  ;;  %v6302_v13 = vmul.f32 %v6199_v20, %v464_v12  ;;  %v6318_v12 = vmul.f32 %v6199_v20, %v468_v51  ;;  %v555_v51 = vld [vmem:[%s5217_s21 + $0x958] sm:$0xff] }
 0x132   : > { %12699 = vst [vmem:[#allocation214_spill] sm:$0xff] %v6286_v9  ;;  %12700 = vst [vmem:[#allocation215_spill] sm:$0xff] %v6289_v57  ;;  %v551_v57 = vld [vmem:[%s5217_s21 + $0x938] sm:$0xff]  ;;  %v564_v59 = vld [vmem:[%s5217_s21 + $0x9a0] sm:$0xff] }
 0x133   : > { %12701 = vst [vmem:[#allocation216_spill] sm:$0xff] %v6292_v24  ;;  %12702 = vst [vmem:[#allocation217_spill] sm:$0xff] %v6295_v18  ;;  %v549_v18 = vld [vmem:[%s5217_s21 + $0x928] sm:$0xff]  ;;  %v550_v24 = vld [vmem:[%s5217_s21 + $0x930] sm:$0xff] }
 0x134   : > { %12703 = vst [vmem:[#allocation218_spill] sm:$0xff] %v6302_v13  ;;  %12704 = vst [vmem:[#allocation219_spill] sm:$0xff] %v6305_v17  ;;  %v553_v17 = vld [vmem:[%s5217_s21 + $0x948] sm:$0xff]  ;;  %v554_v13 = vld [vmem:[%s5217_s21 + $0x950] sm:$0xff] }
 0x135   : > { %12705 = vst [vmem:[#allocation220_spill] sm:$0xff] %v6308_v35  ;;  %12706 = vst [vmem:[#allocation221_spill] sm:$0xff] %v6311_v11  ;;  %v6329_v11 = vpop.permute.xlu1 %1359  ;;  %v552_v35 = vld [vmem:[%s5217_s21 + $0x940] sm:$0xff]  ;;  %v559_v9 = vld [vmem:[%s5217_s21 + $0x978] sm:$0xff] }
 0x136   : > { %12707 = vst [vmem:[#allocation222_spill] sm:$0xff] %v6318_v12  ;;  %12708 = vst [vmem:[#allocation223_spill] sm:$0xff] %v6321_v14  ;;  %v6336_v12 = vmul.f32 %v6199_v20, %v472_v39  ;;  %v558_v14 = vld [vmem:[%s5217_s21 + $0x970] sm:$0xff]  ;;  %v6352_v39 = vmul.f32 %v6199_v20, %v476_v36  ;;  %v565_v36 = vld [vmem:[%s5217_s21 + $0x9a8] sm:$0xff]  ;;  %v6372_v23 = vmul.f32 %v6329_v11, %v544_v52 }
 0x137   : > { %12709 = vst [vmem:[#allocation224_spill] sm:$0xff] %v6324_v41  ;;  %12710 = vst [vmem:[#allocation225_spill] sm:$0xff] %v6327_v44  ;;  %v556_v44 = vld [vmem:[%s5217_s21 + $0x960] sm:$0xff]  ;;  %v557_v41 = vld [vmem:[%s5217_s21 + $0x968] sm:$0xff]  ;;  %v6378_v20 = vmul.f32 %v6329_v11, %v546_v58  ;;  %v6381_v21 = vmul.f32 %v6329_v11, %v547_v61  ;;  %v6388_v60 = vmul.f32 %v6329_v11, %v548_v40 }
 0x138   : > { %12711 = vst [vmem:[#allocation226_spill] sm:$0xff] %v6336_v12  ;;  %12712 = vst [vmem:[#allocation227_spill] sm:$0xff] %v6339_v7  ;;  %v562_v7 = vld [vmem:[%s5217_s21 + $0x990] sm:$0xff]  ;;  %v563_v12 = vld [vmem:[%s5217_s21 + $0x998] sm:$0xff]  ;;  %v6391_v52 = vmul.f32 %v6329_v11, %v549_v18  ;;  %v6397_v58 = vmul.f32 %v6329_v11, %v551_v57  ;;  %v6404_v40 = vmul.f32 %v6329_v11, %v552_v35 }
 0x139   : > { %12713 = vst [vmem:[#allocation228_spill] sm:$0xff] %v6342_v50  ;;  %12714 = vst [vmem:[#allocation229_spill] sm:$0xff] %v6345_v32  ;;  %v560_v32 = vld [vmem:[%s5217_s21 + $0x980] sm:$0xff]  ;;  %v561_v50 = vld [vmem:[%s5217_s21 + $0x988] sm:$0xff]  ;;  %v6407_v18 = vmul.f32 %v6329_v11, %v553_v17  ;;  %v6413_v57 = vmul.f32 %v6329_v11, %v555_v51  ;;  %v6422_v35 = vmul.f32 %v6329_v11, %v558_v14 }
 0x13a   : > { %12715 = vst [vmem:[#allocation230_spill] sm:$0xff] %v6352_v39  ;;  %12716 = vst [vmem:[#allocation231_spill] sm:$0xff] %v6355_v33  ;;  %v566_v39 = vld [vmem:[%s5217_s21 + $0x9b0] sm:$0xff]  ;;  %v569_v33 = vld [vmem:[%s5217_s21 + $0x9c8] sm:$0xff]  ;;  %v6425_v17 = vmul.f32 %v6329_v11, %v559_v9  ;;  %v6438_v14 = vmul.f32 %v6329_v11, %v562_v7  ;;  %v6441_v9 = vmul.f32 %v6329_v11, %v563_v12 }
 0x13b   : > { %12717 = vst [vmem:[#allocation232_spill] sm:$0xff] %v6358_v0  ;;  %12718 = vst [vmem:[#allocation233_spill] sm:$0xff] %v6361_v31  ;;  %v6375_v0 = vmul.f32 %v6329_v11, %v545_v4  ;;  %v568_v31 = vld [vmem:[%s5217_s21 + $0x9c0] sm:$0xff]  ;;  %v571_v38 = vld [vmem:[%s5217_s21 + $0x9d8] sm:$0xff]  ;;  %v6394_v4 = vmul.f32 %v6329_v11, %v550_v24  ;;  %v6410_v24 = vmul.f32 %v6329_v11, %v554_v13 }
 0x13c   : > { %12719 = vst [vmem:[#allocation234_spill] sm:$0xff] %v6372_v23  ;;  %12721 = vst [vmem:[#allocation236_spill] sm:$0xff] %v6378_v20  ;;  %v572_v61 = vld [vmem:[%s5217_s21 + $0x9e0] sm:$0xff]  ;;  %v574_v20 = vld [vmem:[%s5217_s21 + $0x9f0] sm:$0xff]  ;;  %v6454_v7 = vmul.f32 %v6329_v11, %v566_v39  ;;  %v6457_v12 = vmul.f32 %v6329_v11, %v567_v48  ;;  %v6469_v39 = vmul.f32 %v6329_v11, %v569_v33 }
 0x13d   : > { %12720 = vst [vmem:[#allocation235_spill] sm:$0xff] %v6375_v0  ;;  %12722 = vst [vmem:[#allocation237_spill] sm:$0xff] %v6381_v21  ;;  %v573_v21 = vld [vmem:[%s5217_s21 + $0x9e8] sm:$0xff]  ;;  %v575_v0 = vld [vmem:[%s5217_s21 + $0x9f8] sm:$0xff]  ;;  %v6475_v48 = vmul.f32 %v6329_v11, %v571_v38 }
 0x13e   : > { %12723 = vst [vmem:[#allocation238_spill] sm:$0xff] %v6388_v60  ;;  %12724 = vst [vmem:[#allocation239_spill] sm:$0xff] %v6391_v52  ;;  %v513_v13 = vld [vmem:[%s5217_s21 + $0x808] sm:$0xff]  ;;  %v515_v51 = vld [vmem:[%s5217_s21 + $0x818] sm:$0xff]  ;;  %v6485_v33 = vmul.f32 %v6329_v11, %v573_v21  ;;  %v6491_v38 = vmul.f32 %v6329_v11, %v575_v0 }
 0x13f   : > { %12725 = vst [vmem:[#allocation240_spill] sm:$0xff] %v6394_v4  ;;  %12726 = vst [vmem:[#allocation241_spill] sm:$0xff] %v6397_v58  ;;  %v6416_v58 = vmul.f32 %v6329_v11, %v556_v44  ;;  %v6419_v4 = vmul.f32 %v6329_v11, %v557_v41  ;;  %v6435_v41 = vmul.f32 %v6329_v11, %v561_v50  ;;  %v516_v44 = vld [vmem:[%s5217_s21 + $0x820] sm:$0xff]  ;;  %v535_v21 = vld [vmem:[%s5217_s21 + $0x8b8] sm:$0xff] }
 0x140   : > { %12727 = vst [vmem:[#allocation242_spill] sm:$0xff] %v6404_v40  ;;  %12728 = vst [vmem:[#allocation243_spill] sm:$0xff] %v6407_v18  ;;  %v512_v18 = vld [vmem:[%s5217_s21 + $0x800] sm:$0xff]  ;;  %v6451_v50 = vmul.f32 %v6329_v11, %v565_v36  ;;  %v6472_v36 = vmul.f32 %v6329_v11, %v570_v8  ;;  %v6488_v8 = vmul.f32 %v6329_v11, %v574_v20  ;;  %v538_v52 = vld [vmem:[%s5217_s21 + $0x8d0] sm:$0xff] }
 0x141   : > { %12729 = vst [vmem:[#allocation244_spill] sm:$0xff] %v6410_v24  ;;  %12730 = vst [vmem:[#allocation245_spill] sm:$0xff] %v6413_v57  ;;  %v514_v24 = vld [vmem:[%s5217_s21 + $0x810] sm:$0xff]  ;;  %v6432_v57 = vmul.f32 %v6329_v11, %v560_v32  ;;  %v6448_v32 = vmul.f32 %v6329_v11, %v564_v59  ;;  %v523_v59 = vld [vmem:[%s5217_s21 + $0x858] sm:$0xff] }
 0x142   : > { %12731 = vst [vmem:[#allocation246_spill] sm:$0xff] %v6416_v58  ;;  %12732 = vst [vmem:[#allocation247_spill] sm:$0xff] %v6419_v4  ;;  %v519_v4 = vld [vmem:[%s5217_s21 + $0x838] sm:$0xff]  ;;  %v532_v40 = vld [vmem:[%s5217_s21 + $0x8a0] sm:$0xff] }
 0x143   : > { %12733 = vst [vmem:[#allocation248_spill] sm:$0xff] %v6422_v35  ;;  %12734 = vst [vmem:[#allocation249_spill] sm:$0xff] %v6425_v17  ;;  %v517_v17 = vld [vmem:[%s5217_s21 + $0x828] sm:$0xff]  ;;  %v518_v35 = vld [vmem:[%s5217_s21 + $0x830] sm:$0xff] }
 0x144   : > { %12735 = vst [vmem:[#allocation250_spill] sm:$0xff] %v6432_v57  ;;  %12736 = vst [vmem:[#allocation251_spill] sm:$0xff] %v6435_v41  ;;  %v521_v41 = vld [vmem:[%s5217_s21 + $0x848] sm:$0xff]  ;;  %v522_v57 = vld [vmem:[%s5217_s21 + $0x850] sm:$0xff] }
 0x145   : > { %12737 = vst [vmem:[#allocation252_spill] sm:$0xff] %v6438_v14  ;;  %12738 = vst [vmem:[#allocation253_spill] sm:$0xff] %v6441_v9  ;;  %v6459_v9 = vpop.permute.xlu0 %1354  ;;  %v520_v14 = vld [vmem:[%s5217_s21 + $0x840] sm:$0xff]  ;;  %v527_v58 = vld [vmem:[%s5217_s21 + $0x878] sm:$0xff] }
 0x146   : > { %12739 = vst [vmem:[#allocation254_spill] sm:$0xff] %v6448_v32  ;;  %12740 = vst [vmem:[#allocation255_spill] sm:$0xff] %v6451_v50  ;;  %v6466_v32 = vmul.f32 %v6329_v11, %v568_v31  ;;  %v526_v50 = vld [vmem:[%s5217_s21 + $0x870] sm:$0xff]  ;;  %v6482_v31 = vmul.f32 %v6329_v11, %v572_v61  ;;  %v533_v61 = vld [vmem:[%s5217_s21 + $0x8a8] sm:$0xff]  ;;  %v6502_v20 = vmul.f32 %v6459_v9, %v512_v18 }
 0x147   : > { %12741 = vst [vmem:[#allocation256_spill] sm:$0xff] %v6454_v7  ;;  %12742 = vst [vmem:[#allocation257_spill] sm:$0xff] %v6457_v12  ;;  %v524_v12 = vld [vmem:[%s5217_s21 + $0x860] sm:$0xff]  ;;  %v525_v7 = vld [vmem:[%s5217_s21 + $0x868] sm:$0xff]  ;;  %v6508_v11 = vmul.f32 %v6459_v9, %v514_v24  ;;  %v6511_v0 = vmul.f32 %v6459_v9, %v515_v51  ;;  %v6518_v23 = vmul.f32 %v6459_v9, %v516_v44 }
 0x148   : > { %12743 = vst [vmem:[#allocation258_spill] sm:$0xff] %v6466_v32  ;;  %12744 = vst [vmem:[#allocation259_spill] sm:$0xff] %v6469_v39  ;;  %v530_v39 = vld [vmem:[%s5217_s21 + $0x890] sm:$0xff]  ;;  %v531_v32 = vld [vmem:[%s5217_s21 + $0x898] sm:$0xff]  ;;  %v6521_v18 = vmul.f32 %v6459_v9, %v517_v17  ;;  %v6527_v24 = vmul.f32 %v6459_v9, %v519_v4  ;;  %v6534_v44 = vmul.f32 %v6459_v9, %v520_v14 }
 0x149   : > { %12745 = vst [vmem:[#allocation260_spill] sm:$0xff] %v6472_v36  ;;  %12746 = vst [vmem:[#allocation261_spill] sm:$0xff] %v6475_v48  ;;  %v528_v48 = vld [vmem:[%s5217_s21 + $0x880] sm:$0xff]  ;;  %v529_v36 = vld [vmem:[%s5217_s21 + $0x888] sm:$0xff]  ;;  %v6537_v17 = vmul.f32 %v6459_v9, %v521_v41  ;;  %v6543_v4 = vmul.f32 %v6459_v9, %v523_v59  ;;  %v6552_v14 = vmul.f32 %v6459_v9, %v526_v50 }
 0x14a   : > { %12747 = vst [vmem:[#allocation262_spill] sm:$0xff] %v6482_v31  ;;  %12748 = vst [vmem:[#allocation263_spill] sm:$0xff] %v6485_v33  ;;  %v534_v31 = vld [vmem:[%s5217_s21 + $0x8b0] sm:$0xff]  ;;  %v537_v33 = vld [vmem:[%s5217_s21 + $0x8c8] sm:$0xff]  ;;  %v6555_v41 = vmul.f32 %v6459_v9, %v527_v58  ;;  %v6568_v50 = vmul.f32 %v6459_v9, %v530_v39  ;;  %v6571_v58 = vmul.f32 %v6459_v9, %v531_v32 }
 0x14b   : > { %12749 = vst [vmem:[#allocation264_spill] sm:$0xff] %v6488_v8  ;;  %12750 = vst [vmem:[#allocation265_spill] sm:$0xff] %v6491_v38  ;;  %v6505_v8 = vmul.f32 %v6459_v9, %v513_v13  ;;  %v536_v38 = vld [vmem:[%s5217_s21 + $0x8c0] sm:$0xff]  ;;  %v539_v60 = vld [vmem:[%s5217_s21 + $0x8d8] sm:$0xff]  ;;  %v6524_v13 = vmul.f32 %v6459_v9, %v518_v35  ;;  %v6540_v35 = vmul.f32 %v6459_v9, %v522_v57 }
 0x14c   : > { %12751 = vst [vmem:[#allocation266_spill] sm:$0xff] %v6502_v20  ;;  %12753 = vst [vmem:[#allocation268_spill] sm:$0xff] %v6508_v11  ;;  %v540_v51 = vld [vmem:[%s5217_s21 + $0x8e0] sm:$0xff]  ;;  %v542_v11 = vld [vmem:[%s5217_s21 + $0x8f0] sm:$0xff]  ;;  %v6584_v39 = vmul.f32 %v6459_v9, %v534_v31  ;;  %v6587_v32 = vmul.f32 %v6459_v9, %v535_v21  ;;  %v6599_v31 = vmul.f32 %v6459_v9, %v537_v33 }
 0x14d   : > { %12752 = vst [vmem:[#allocation267_spill] sm:$0xff] %v6505_v8  ;;  %12754 = vst [vmem:[#allocation269_spill] sm:$0xff] %v6511_v0  ;;  %v541_v0 = vld [vmem:[%s5217_s21 + $0x8e8] sm:$0xff]  ;;  %v543_v8 = vld [vmem:[%s5217_s21 + $0x8f8] sm:$0xff]  ;;  %v6605_v21 = vmul.f32 %v6459_v9, %v539_v60 }
 0x14e   : > { %12755 = vst [vmem:[#allocation270_spill] sm:$0xff] %v6518_v23  ;;  %12756 = vst [vmem:[#allocation271_spill] sm:$0xff] %v6521_v18  ;;  %v609_v57 = vld [vmem:[%s5217_s21 + $0xb08] sm:$0xff]  ;;  %v611_v59 = vld [vmem:[%s5217_s21 + $0xb18] sm:$0xff]  ;;  %v6615_v33 = vmul.f32 %v6459_v9, %v541_v0  ;;  %v6621_v60 = vmul.f32 %v6459_v9, %v543_v8 }
 0x14f   : > { %12757 = vst [vmem:[#allocation272_spill] sm:$0xff] %v6524_v13  ;;  %12758 = vst [vmem:[#allocation273_spill] sm:$0xff] %v6527_v24  ;;  %v6546_v24 = vmul.f32 %v6459_v9, %v524_v12  ;;  %v6549_v13 = vmul.f32 %v6459_v9, %v525_v7  ;;  %v6565_v7 = vmul.f32 %v6459_v9, %v529_v36  ;;  %v612_v12 = vld [vmem:[%s5217_s21 + $0xb20] sm:$0xff]  ;;  %v631_v0 = vld [vmem:[%s5217_s21 + $0xbb8] sm:$0xff] }
 0x150   : > { %12759 = vst [vmem:[#allocation274_spill] sm:$0xff] %v6534_v44  ;;  %12760 = vst [vmem:[#allocation275_spill] sm:$0xff] %v6537_v17  ;;  %v608_v17 = vld [vmem:[%s5217_s21 + $0xb00] sm:$0xff]  ;;  %v6581_v36 = vmul.f32 %v6459_v9, %v533_v61  ;;  %v6602_v61 = vmul.f32 %v6459_v9, %v538_v52  ;;  %v6618_v52 = vmul.f32 %v6459_v9, %v542_v11  ;;  %v634_v18 = vld [vmem:[%s5217_s21 + $0xbd0] sm:$0xff] }
 0x151   : > { %12761 = vst [vmem:[#allocation276_spill] sm:$0xff] %v6540_v35  ;;  %12762 = vst [vmem:[#allocation277_spill] sm:$0xff] %v6543_v4  ;;  %v610_v35 = vld [vmem:[%s5217_s21 + $0xb10] sm:$0xff]  ;;  %v6562_v4 = vmul.f32 %v6459_v9, %v528_v48  ;;  %v6578_v48 = vmul.f32 %v6459_v9, %v532_v40  ;;  %v619_v40 = vld [vmem:[%s5217_s21 + $0xb58] sm:$0xff] }
 0x152   : > { %12763 = vst [vmem:[#allocation278_spill] sm:$0xff] %v6546_v24  ;;  %12764 = vst [vmem:[#allocation279_spill] sm:$0xff] %v6549_v13  ;;  %v615_v13 = vld [vmem:[%s5217_s21 + $0xb38] sm:$0xff]  ;;  %v628_v44 = vld [vmem:[%s5217_s21 + $0xba0] sm:$0xff] }
 0x153   : > { %12765 = vst [vmem:[#allocation280_spill] sm:$0xff] %v6552_v14  ;;  %12766 = vst [vmem:[#allocation281_spill] sm:$0xff] %v6555_v41  ;;  %v613_v41 = vld [vmem:[%s5217_s21 + $0xb28] sm:$0xff]  ;;  %v614_v14 = vld [vmem:[%s5217_s21 + $0xb30] sm:$0xff] }
 0x154   : > { %12767 = vst [vmem:[#allocation282_spill] sm:$0xff] %v6562_v4  ;;  %12768 = vst [vmem:[#allocation283_spill] sm:$0xff] %v6565_v7  ;;  %v617_v7 = vld [vmem:[%s5217_s21 + $0xb48] sm:$0xff]  ;;  %v618_v4 = vld [vmem:[%s5217_s21 + $0xb50] sm:$0xff] }
 0x155   : > { %12769 = vst [vmem:[#allocation284_spill] sm:$0xff] %v6568_v50  ;;  %12770 = vst [vmem:[#allocation285_spill] sm:$0xff] %v6571_v58  ;;  %v6589_v58 = vpop.permute.xlu1 %1369  ;;  %v616_v50 = vld [vmem:[%s5217_s21 + $0xb40] sm:$0xff]  ;;  %v623_v24 = vld [vmem:[%s5217_s21 + $0xb78] sm:$0xff] }
 0x156   : > { %12771 = vst [vmem:[#allocation286_spill] sm:$0xff] %v6578_v48  ;;  %12772 = vst [vmem:[#allocation287_spill] sm:$0xff] %v6581_v36  ;;  %v6596_v48 = vmul.f32 %v6459_v9, %v536_v38  ;;  %v622_v36 = vld [vmem:[%s5217_s21 + $0xb70] sm:$0xff]  ;;  %v6612_v38 = vmul.f32 %v6459_v9, %v540_v51  ;;  %v629_v51 = vld [vmem:[%s5217_s21 + $0xba8] sm:$0xff]  ;;  %v6632_v11 = vmul.f32 %v6589_v58, %v608_v17 }
 0x157   : > { %12773 = vst [vmem:[#allocation288_spill] sm:$0xff] %v6584_v39  ;;  %12774 = vst [vmem:[#allocation289_spill] sm:$0xff] %v6587_v32  ;;  %v620_v32 = vld [vmem:[%s5217_s21 + $0xb60] sm:$0xff]  ;;  %v621_v39 = vld [vmem:[%s5217_s21 + $0xb68] sm:$0xff]  ;;  %v6638_v9 = vmul.f32 %v6589_v58, %v610_v35  ;;  %v6641_v8 = vmul.f32 %v6589_v58, %v611_v59  ;;  %v6648_v20 = vmul.f32 %v6589_v58, %v612_v12 }
 0x158   : > { %12775 = vst [vmem:[#allocation290_spill] sm:$0xff] %v6596_v48  ;;  %12776 = vst [vmem:[#allocation291_spill] sm:$0xff] %v6599_v31  ;;  %v626_v31 = vld [vmem:[%s5217_s21 + $0xb90] sm:$0xff]  ;;  %v627_v48 = vld [vmem:[%s5217_s21 + $0xb98] sm:$0xff]  ;;  %v6651_v17 = vmul.f32 %v6589_v58, %v613_v41  ;;  %v6657_v35 = vmul.f32 %v6589_v58, %v615_v13  ;;  %v6664_v12 = vmul.f32 %v6589_v58, %v616_v50 }
 0x159   : > { %12777 = vst [vmem:[#allocation292_spill] sm:$0xff] %v6602_v61  ;;  %12778 = vst [vmem:[#allocation293_spill] sm:$0xff] %v6605_v21  ;;  %v624_v21 = vld [vmem:[%s5217_s21 + $0xb80] sm:$0xff]  ;;  %v625_v61 = vld [vmem:[%s5217_s21 + $0xb88] sm:$0xff]  ;;  %v6667_v41 = vmul.f32 %v6589_v58, %v617_v7  ;;  %v6673_v13 = vmul.f32 %v6589_v58, %v619_v40  ;;  %v6682_v50 = vmul.f32 %v6589_v58, %v622_v36 }
 0x15a   : > { %12779 = vst [vmem:[#allocation294_spill] sm:$0xff] %v6612_v38  ;;  %12780 = vst [vmem:[#allocation295_spill] sm:$0xff] %v6615_v33  ;;  %v630_v38 = vld [vmem:[%s5217_s21 + $0xbb0] sm:$0xff]  ;;  %v633_v33 = vld [vmem:[%s5217_s21 + $0xbc8] sm:$0xff]  ;;  %v6685_v7 = vmul.f32 %v6589_v58, %v623_v24  ;;  %v6698_v36 = vmul.f32 %v6589_v58, %v626_v31  ;;  %v6701_v24 = vmul.f32 %v6589_v58, %v627_v48 }
 0x15b   : > { %12781 = vst [vmem:[#allocation296_spill] sm:$0xff] %v6618_v52  ;;  %12782 = vst [vmem:[#allocation297_spill] sm:$0xff] %v6621_v60  ;;  %v6635_v52 = vmul.f32 %v6589_v58, %v609_v57  ;;  %v632_v60 = vld [vmem:[%s5217_s21 + $0xbc0] sm:$0xff]  ;;  %v635_v23 = vld [vmem:[%s5217_s21 + $0xbd8] sm:$0xff]  ;;  %v6654_v57 = vmul.f32 %v6589_v58, %v614_v14  ;;  %v6670_v14 = vmul.f32 %v6589_v58, %v618_v4 }
 0x15c   : > { %12783 = vst [vmem:[#allocation298_spill] sm:$0xff] %v6632_v11  ;;  %12785 = vst [vmem:[#allocation300_spill] sm:$0xff] %v6638_v9  ;;  %v636_v59 = vld [vmem:[%s5217_s21 + $0xbe0] sm:$0xff]  ;;  %v638_v9 = vld [vmem:[%s5217_s21 + $0xbf0] sm:$0xff]  ;;  %v6714_v31 = vmul.f32 %v6589_v58, %v630_v38  ;;  %v6717_v48 = vmul.f32 %v6589_v58, %v631_v0  ;;  %v6729_v38 = vmul.f32 %v6589_v58, %v633_v33 }
 0x15d   : > { %12784 = vst [vmem:[#allocation299_spill] sm:$0xff] %v6635_v52  ;;  %12786 = vst [vmem:[#allocation301_spill] sm:$0xff] %v6641_v8  ;;  %v637_v8 = vld [vmem:[%s5217_s21 + $0xbe8] sm:$0xff]  ;;  %v639_v52 = vld [vmem:[%s5217_s21 + $0xbf8] sm:$0xff]  ;;  %v6735_v0 = vmul.f32 %v6589_v58, %v635_v23 }
 0x15e   : > { %12787 = vst [vmem:[#allocation302_spill] sm:$0xff] %v6648_v20  ;;  %12788 = vst [vmem:[#allocation303_spill] sm:$0xff] %v6651_v17  ;;  %v577_v4 = vld [vmem:[%s5217_s21 + $0xa08] sm:$0xff]  ;;  %v579_v40 = vld [vmem:[%s5217_s21 + $0xa18] sm:$0xff]  ;;  %v6745_v33 = vmul.f32 %v6589_v58, %v637_v8  ;;  %v6751_v23 = vmul.f32 %v6589_v58, %v639_v52 }
 0x15f   : > { %12789 = vst [vmem:[#allocation304_spill] sm:$0xff] %v6654_v57  ;;  %12790 = vst [vmem:[#allocation305_spill] sm:$0xff] %v6657_v35  ;;  %v6676_v35 = vmul.f32 %v6589_v58, %v620_v32  ;;  %v6679_v57 = vmul.f32 %v6589_v58, %v621_v39  ;;  %v6695_v39 = vmul.f32 %v6589_v58, %v625_v61  ;;  %v580_v32 = vld [vmem:[%s5217_s21 + $0xa20] sm:$0xff]  ;;  %v599_v8 = vld [vmem:[%s5217_s21 + $0xab8] sm:$0xff] }
 0x160   : > { %12791 = vst [vmem:[#allocation306_spill] sm:$0xff] %v6664_v12  ;;  %12792 = vst [vmem:[#allocation307_spill] sm:$0xff] %v6667_v41  ;;  %v576_v41 = vld [vmem:[%s5217_s21 + $0xa00] sm:$0xff]  ;;  %v6711_v61 = vmul.f32 %v6589_v58, %v629_v51  ;;  %v6732_v51 = vmul.f32 %v6589_v58, %v634_v18  ;;  %v6748_v18 = vmul.f32 %v6589_v58, %v638_v9  ;;  %v602_v17 = vld [vmem:[%s5217_s21 + $0xad0] sm:$0xff] }
 0x161   : > { %12793 = vst [vmem:[#allocation308_spill] sm:$0xff] %v6670_v14  ;;  %12794 = vst [vmem:[#allocation309_spill] sm:$0xff] %v6673_v13  ;;  %v578_v14 = vld [vmem:[%s5217_s21 + $0xa10] sm:$0xff]  ;;  %v6692_v13 = vmul.f32 %v6589_v58, %v624_v21  ;;  %v6708_v21 = vmul.f32 %v6589_v58, %v628_v44  ;;  %v587_v44 = vld [vmem:[%s5217_s21 + $0xa58] sm:$0xff] }
 0x162   : > { %12795 = vst [vmem:[#allocation310_spill] sm:$0xff] %v6676_v35  ;;  %12796 = vst [vmem:[#allocation311_spill] sm:$0xff] %v6679_v57  ;;  %v583_v57 = vld [vmem:[%s5217_s21 + $0xa38] sm:$0xff]  ;;  %v596_v12 = vld [vmem:[%s5217_s21 + $0xaa0] sm:$0xff] }
 0x163   : > { %12797 = vst [vmem:[#allocation312_spill] sm:$0xff] %v6682_v50  ;;  %12798 = vst [vmem:[#allocation313_spill] sm:$0xff] %v6685_v7  ;;  %v581_v7 = vld [vmem:[%s5217_s21 + $0xa28] sm:$0xff]  ;;  %v582_v50 = vld [vmem:[%s5217_s21 + $0xa30] sm:$0xff] }
 0x164   : > { %12799 = vst [vmem:[#allocation314_spill] sm:$0xff] %v6692_v13  ;;  %12800 = vst [vmem:[#allocation315_spill] sm:$0xff] %v6695_v39  ;;  %v585_v39 = vld [vmem:[%s5217_s21 + $0xa48] sm:$0xff]  ;;  %v586_v13 = vld [vmem:[%s5217_s21 + $0xa50] sm:$0xff] }
 0x165   : > { %12801 = vst [vmem:[#allocation316_spill] sm:$0xff] %v6698_v36  ;;  %12802 = vst [vmem:[#allocation317_spill] sm:$0xff] %v6701_v24  ;;  %v6719_v24 = vpop.permute.xlu0 %1364  ;;  %v584_v36 = vld [vmem:[%s5217_s21 + $0xa40] sm:$0xff]  ;;  %v591_v35 = vld [vmem:[%s5217_s21 + $0xa78] sm:$0xff] }
 0x166   : > { %12803 = vst [vmem:[#allocation318_spill] sm:$0xff] %v6708_v21  ;;  %12804 = vst [vmem:[#allocation319_spill] sm:$0xff] %v6711_v61  ;;  %v6726_v21 = vmul.f32 %v6589_v58, %v632_v60  ;;  %v590_v61 = vld [vmem:[%s5217_s21 + $0xa70] sm:$0xff]  ;;  %v6742_v60 = vmul.f32 %v6589_v58, %v636_v59  ;;  %v597_v59 = vld [vmem:[%s5217_s21 + $0xaa8] sm:$0xff]  ;;  %v6762_v9 = vmul.f32 %v6719_v24, %v576_v41 }
 0x167   : > { %12805 = vst [vmem:[#allocation320_spill] sm:$0xff] %v6714_v31  ;;  %12806 = vst [vmem:[#allocation321_spill] sm:$0xff] %v6717_v48  ;;  %v588_v48 = vld [vmem:[%s5217_s21 + $0xa60] sm:$0xff]  ;;  %v589_v31 = vld [vmem:[%s5217_s21 + $0xa68] sm:$0xff]  ;;  %v6768_v58 = vmul.f32 %v6719_v24, %v578_v14  ;;  %v6771_v52 = vmul.f32 %v6719_v24, %v579_v40  ;;  %v6778_v11 = vmul.f32 %v6719_v24, %v580_v32 }
 0x168   : > { %12807 = vst [vmem:[#allocation322_spill] sm:$0xff] %v6726_v21  ;;  %12808 = vst [vmem:[#allocation323_spill] sm:$0xff] %v6729_v38  ;;  %v594_v38 = vld [vmem:[%s5217_s21 + $0xa90] sm:$0xff]  ;;  %v595_v21 = vld [vmem:[%s5217_s21 + $0xa98] sm:$0xff]  ;;  %v6781_v41 = vmul.f32 %v6719_v24, %v581_v7  ;;  %v6787_v14 = vmul.f32 %v6719_v24, %v583_v57  ;;  %v6794_v32 = vmul.f32 %v6719_v24, %v584_v36 }
 0x169   : > { %12809 = vst [vmem:[#allocation324_spill] sm:$0xff] %v6732_v51  ;;  %12810 = vst [vmem:[#allocation325_spill] sm:$0xff] %v6735_v0  ;;  %v592_v0 = vld [vmem:[%s5217_s21 + $0xa80] sm:$0xff]  ;;  %v593_v51 = vld [vmem:[%s5217_s21 + $0xa88] sm:$0xff]  ;;  %v6797_v7 = vmul.f32 %v6719_v24, %v585_v39  ;;  %v6803_v57 = vmul.f32 %v6719_v24, %v587_v44  ;;  %v6812_v36 = vmul.f32 %v6719_v24, %v590_v61 }
 0x16a   : > { %12811 = vst [vmem:[#allocation326_spill] sm:$0xff] %v6742_v60  ;;  %12812 = vst [vmem:[#allocation327_spill] sm:$0xff] %v6745_v33  ;;  %v598_v60 = vld [vmem:[%s5217_s21 + $0xab0] sm:$0xff]  ;;  %v601_v33 = vld [vmem:[%s5217_s21 + $0xac8] sm:$0xff]  ;;  %v6815_v39 = vmul.f32 %v6719_v24, %v591_v35  ;;  %v6828_v61 = vmul.f32 %v6719_v24, %v594_v38  ;;  %v6831_v35 = vmul.f32 %v6719_v24, %v595_v21 }
 0x16b   : > { %12813 = vst [vmem:[#allocation328_spill] sm:$0xff] %v6748_v18  ;;  %12814 = vst [vmem:[#allocation329_spill] sm:$0xff] %v6751_v23  ;;  %v6765_v18 = vmul.f32 %v6719_v24, %v577_v4  ;;  %v600_v23 = vld [vmem:[%s5217_s21 + $0xac0] sm:$0xff]  ;;  %v603_v20 = vld [vmem:[%s5217_s21 + $0xad8] sm:$0xff]  ;;  %v6784_v4 = vmul.f32 %v6719_v24, %v582_v50  ;;  %v6800_v50 = vmul.f32 %v6719_v24, %v586_v13 }
 0x16c   : > { %12815 = vst [vmem:[#allocation330_spill] sm:$0xff] %v6762_v9  ;;  %12817 = vst [vmem:[#allocation332_spill] sm:$0xff] %v6768_v58  ;;  %v604_v40 = vld [vmem:[%s5217_s21 + $0xae0] sm:$0xff]  ;;  %v606_v58 = vld [vmem:[%s5217_s21 + $0xaf0] sm:$0xff]  ;;  %v6844_v38 = vmul.f32 %v6719_v24, %v598_v60  ;;  %v6847_v21 = vmul.f32 %v6719_v24, %v599_v8  ;;  %v6859_v60 = vmul.f32 %v6719_v24, %v601_v33 }
 0x16d   : > { %12816 = vst [vmem:[#allocation331_spill] sm:$0xff] %v6765_v18  ;;  %12818 = vst [vmem:[#allocation333_spill] sm:$0xff] %v6771_v52  ;;  %v605_v52 = vld [vmem:[%s5217_s21 + $0xae8] sm:$0xff]  ;;  %v607_v18 = vld [vmem:[%s5217_s21 + $0xaf8] sm:$0xff]  ;;  %v6865_v8 = vmul.f32 %v6719_v24, %v603_v20 }
 0x16e   : > { %12819 = vst [vmem:[#allocation334_spill] sm:$0xff] %v6778_v11  ;;  %12820 = vst [vmem:[#allocation335_spill] sm:$0xff] %v6781_v41  ;;  %v673_v13 = vld [vmem:[%s5217_s21 + $0xd08] sm:$0xff]  ;;  %v675_v44 = vld [vmem:[%s5217_s21 + $0xd18] sm:$0xff]  ;;  %v6875_v33 = vmul.f32 %v6719_v24, %v605_v52  ;;  %v6881_v20 = vmul.f32 %v6719_v24, %v607_v18 }
 0x16f   : > { %12821 = vst [vmem:[#allocation336_spill] sm:$0xff] %v6784_v4  ;;  %12822 = vst [vmem:[#allocation337_spill] sm:$0xff] %v6787_v14  ;;  %v6806_v14 = vmul.f32 %v6719_v24, %v588_v48  ;;  %v6809_v4 = vmul.f32 %v6719_v24, %v589_v31  ;;  %v6825_v31 = vmul.f32 %v6719_v24, %v593_v51  ;;  %v676_v48 = vld [vmem:[%s5217_s21 + $0xd20] sm:$0xff]  ;;  %v695_v52 = vld [vmem:[%s5217_s21 + $0xdb8] sm:$0xff] }
 0x170   : > { %12823 = vst [vmem:[#allocation338_spill] sm:$0xff] %v6794_v32  ;;  %12824 = vst [vmem:[#allocation339_spill] sm:$0xff] %v6797_v7  ;;  %v672_v7 = vld [vmem:[%s5217_s21 + $0xd00] sm:$0xff]  ;;  %v6841_v51 = vmul.f32 %v6719_v24, %v597_v59  ;;  %v6862_v59 = vmul.f32 %v6719_v24, %v602_v17  ;;  %v6878_v17 = vmul.f32 %v6719_v24, %v606_v58  ;;  %v698_v41 = vld [vmem:[%s5217_s21 + $0xdd0] sm:$0xff] }
 0x171   : > { %12825 = vst [vmem:[#allocation340_spill] sm:$0xff] %v6800_v50  ;;  %12826 = vst [vmem:[#allocation341_spill] sm:$0xff] %v6803_v57  ;;  %v674_v50 = vld [vmem:[%s5217_s21 + $0xd10] sm:$0xff]  ;;  %v6822_v57 = vmul.f32 %v6719_v24, %v592_v0  ;;  %v6838_v0 = vmul.f32 %v6719_v24, %v596_v12  ;;  %v683_v12 = vld [vmem:[%s5217_s21 + $0xd58] sm:$0xff] }
 0x172   : > { %12827 = vst [vmem:[#allocation342_spill] sm:$0xff] %v6806_v14  ;;  %12828 = vst [vmem:[#allocation343_spill] sm:$0xff] %v6809_v4  ;;  %v679_v4 = vld [vmem:[%s5217_s21 + $0xd38] sm:$0xff]  ;;  %v692_v32 = vld [vmem:[%s5217_s21 + $0xda0] sm:$0xff] }
 0x173   : > { %12829 = vst [vmem:[#allocation344_spill] sm:$0xff] %v6812_v36  ;;  %12830 = vst [vmem:[#allocation345_spill] sm:$0xff] %v6815_v39  ;;  %v677_v39 = vld [vmem:[%s5217_s21 + $0xd28] sm:$0xff]  ;;  %v678_v36 = vld [vmem:[%s5217_s21 + $0xd30] sm:$0xff] }
 0x174   : > { %12831 = vst [vmem:[#allocation346_spill] sm:$0xff] %v6822_v57  ;;  %12832 = vst [vmem:[#allocation347_spill] sm:$0xff] %v6825_v31  ;;  %v681_v31 = vld [vmem:[%s5217_s21 + $0xd48] sm:$0xff]  ;;  %v682_v57 = vld [vmem:[%s5217_s21 + $0xd50] sm:$0xff] }
 0x175   : > { %12833 = vst [vmem:[#allocation348_spill] sm:$0xff] %v6828_v61  ;;  %12834 = vst [vmem:[#allocation349_spill] sm:$0xff] %v6831_v35  ;;  %v6849_v35 = vpop.permute.xlu1 %1379  ;;  %v680_v61 = vld [vmem:[%s5217_s21 + $0xd40] sm:$0xff]  ;;  %v687_v14 = vld [vmem:[%s5217_s21 + $0xd78] sm:$0xff] }
 0x176   : > { %12835 = vst [vmem:[#allocation350_spill] sm:$0xff] %v6838_v0  ;;  %12836 = vst [vmem:[#allocation351_spill] sm:$0xff] %v6841_v51  ;;  %v6856_v0 = vmul.f32 %v6719_v24, %v600_v23  ;;  %v686_v51 = vld [vmem:[%s5217_s21 + $0xd70] sm:$0xff]  ;;  %v6872_v23 = vmul.f32 %v6719_v24, %v604_v40  ;;  %v693_v40 = vld [vmem:[%s5217_s21 + $0xda8] sm:$0xff]  ;;  %v6892_v58 = vmul.f32 %v6849_v35, %v672_v7 }
 0x177   : > { %12837 = vst [vmem:[#allocation352_spill] sm:$0xff] %v6844_v38  ;;  %12838 = vst [vmem:[#allocation353_spill] sm:$0xff] %v6847_v21  ;;  %v684_v21 = vld [vmem:[%s5217_s21 + $0xd60] sm:$0xff]  ;;  %v685_v38 = vld [vmem:[%s5217_s21 + $0xd68] sm:$0xff]  ;;  %v6898_v24 = vmul.f32 %v6849_v35, %v674_v50  ;;  %v6901_v18 = vmul.f32 %v6849_v35, %v675_v44  ;;  %v6908_v9 = vmul.f32 %v6849_v35, %v676_v48 }
 0x178   : > { %12839 = vst [vmem:[#allocation354_spill] sm:$0xff] %v6856_v0  ;;  %12840 = vst [vmem:[#allocation355_spill] sm:$0xff] %v6859_v60  ;;  %v690_v60 = vld [vmem:[%s5217_s21 + $0xd90] sm:$0xff]  ;;  %v691_v0 = vld [vmem:[%s5217_s21 + $0xd98] sm:$0xff]  ;;  %v6911_v7 = vmul.f32 %v6849_v35, %v677_v39  ;;  %v6917_v50 = vmul.f32 %v6849_v35, %v679_v4  ;;  %v6924_v48 = vmul.f32 %v6849_v35, %v680_v61 }
 0x179   : > { %12841 = vst [vmem:[#allocation356_spill] sm:$0xff] %v6862_v59  ;;  %12842 = vst [vmem:[#allocation357_spill] sm:$0xff] %v6865_v8  ;;  %v688_v8 = vld [vmem:[%s5217_s21 + $0xd80] sm:$0xff]  ;;  %v689_v59 = vld [vmem:[%s5217_s21 + $0xd88] sm:$0xff]  ;;  %v6927_v39 = vmul.f32 %v6849_v35, %v681_v31  ;;  %v6933_v4 = vmul.f32 %v6849_v35, %v683_v12  ;;  %v6942_v61 = vmul.f32 %v6849_v35, %v686_v51 }
 0x17a   : > { %12843 = vst [vmem:[#allocation358_spill] sm:$0xff] %v6872_v23  ;;  %12844 = vst [vmem:[#allocation359_spill] sm:$0xff] %v6875_v33  ;;  %v694_v23 = vld [vmem:[%s5217_s21 + $0xdb0] sm:$0xff]  ;;  %v697_v33 = vld [vmem:[%s5217_s21 + $0xdc8] sm:$0xff]  ;;  %v6945_v31 = vmul.f32 %v6849_v35, %v687_v14  ;;  %v6958_v51 = vmul.f32 %v6849_v35, %v690_v60  ;;  %v6961_v14 = vmul.f32 %v6849_v35, %v691_v0 }
 0x17b   : > { %12845 = vst [vmem:[#allocation360_spill] sm:$0xff] %v6878_v17  ;;  %12846 = vst [vmem:[#allocation361_spill] sm:$0xff] %v6881_v20  ;;  %v6895_v17 = vmul.f32 %v6849_v35, %v673_v13  ;;  %v696_v20 = vld [vmem:[%s5217_s21 + $0xdc0] sm:$0xff]  ;;  %v699_v11 = vld [vmem:[%s5217_s21 + $0xdd8] sm:$0xff]  ;;  %v6914_v13 = vmul.f32 %v6849_v35, %v678_v36  ;;  %v6930_v36 = vmul.f32 %v6849_v35, %v682_v57 }
 0x17c   : > { %12847 = vst [vmem:[#allocation362_spill] sm:$0xff] %v6892_v58  ;;  %12849 = vst [vmem:[#allocation364_spill] sm:$0xff] %v6898_v24  ;;  %v700_v44 = vld [vmem:[%s5217_s21 + $0xde0] sm:$0xff]  ;;  %v702_v24 = vld [vmem:[%s5217_s21 + $0xdf0] sm:$0xff]  ;;  %v6974_v60 = vmul.f32 %v6849_v35, %v694_v23  ;;  %v6977_v0 = vmul.f32 %v6849_v35, %v695_v52  ;;  %v6989_v23 = vmul.f32 %v6849_v35, %v697_v33 }
 0x17d   : > { %12848 = vst [vmem:[#allocation363_spill] sm:$0xff] %v6895_v17  ;;  %12850 = vst [vmem:[#allocation365_spill] sm:$0xff] %v6901_v18  ;;  %v701_v18 = vld [vmem:[%s5217_s21 + $0xde8] sm:$0xff]  ;;  %v703_v17 = vld [vmem:[%s5217_s21 + $0xdf8] sm:$0xff]  ;;  %v6995_v52 = vmul.f32 %v6849_v35, %v699_v11 }
 0x17e   : > { %12851 = vst [vmem:[#allocation366_spill] sm:$0xff] %v6908_v9  ;;  %12852 = vst [vmem:[#allocation367_spill] sm:$0xff] %v6911_v7  ;;  %v641_v57 = vld [vmem:[%s5217_s21 + $0xc08] sm:$0xff]  ;;  %v643_v12 = vld [vmem:[%s5217_s21 + $0xc18] sm:$0xff]  ;;  %v7005_v33 = vmul.f32 %v6849_v35, %v701_v18  ;;  %v7011_v11 = vmul.f32 %v6849_v35, %v703_v17 }
 0x17f   : > { %12853 = vst [vmem:[#allocation368_spill] sm:$0xff] %v6914_v13  ;;  %12854 = vst [vmem:[#allocation369_spill] sm:$0xff] %v6917_v50  ;;  %v6936_v50 = vmul.f32 %v6849_v35, %v684_v21  ;;  %v6939_v13 = vmul.f32 %v6849_v35, %v685_v38  ;;  %v6955_v38 = vmul.f32 %v6849_v35, %v689_v59  ;;  %v644_v21 = vld [vmem:[%s5217_s21 + $0xc20] sm:$0xff]  ;;  %v663_v18 = vld [vmem:[%s5217_s21 + $0xcb8] sm:$0xff] }
 0x180   : > { %12855 = vst [vmem:[#allocation370_spill] sm:$0xff] %v6924_v48  ;;  %12856 = vst [vmem:[#allocation371_spill] sm:$0xff] %v6927_v39  ;;  %v640_v39 = vld [vmem:[%s5217_s21 + $0xc00] sm:$0xff]  ;;  %v6971_v59 = vmul.f32 %v6849_v35, %v693_v40  ;;  %v6992_v40 = vmul.f32 %v6849_v35, %v698_v41  ;;  %v7008_v41 = vmul.f32 %v6849_v35, %v702_v24  ;;  %v666_v7 = vld [vmem:[%s5217_s21 + $0xcd0] sm:$0xff] }
 0x181   : > { %12857 = vst [vmem:[#allocation372_spill] sm:$0xff] %v6930_v36  ;;  %12858 = vst [vmem:[#allocation373_spill] sm:$0xff] %v6933_v4  ;;  %v642_v36 = vld [vmem:[%s5217_s21 + $0xc10] sm:$0xff]  ;;  %v6952_v4 = vmul.f32 %v6849_v35, %v688_v8  ;;  %v6968_v8 = vmul.f32 %v6849_v35, %v692_v32  ;;  %v651_v32 = vld [vmem:[%s5217_s21 + $0xc58] sm:$0xff] }
 0x182   : > { %12859 = vst [vmem:[#allocation374_spill] sm:$0xff] %v6936_v50  ;;  %12860 = vst [vmem:[#allocation375_spill] sm:$0xff] %v6939_v13  ;;  %v647_v13 = vld [vmem:[%s5217_s21 + $0xc38] sm:$0xff]  ;;  %v660_v48 = vld [vmem:[%s5217_s21 + $0xca0] sm:$0xff] }
 0x183   : > { %12861 = vst [vmem:[#allocation376_spill] sm:$0xff] %v6942_v61  ;;  %12862 = vst [vmem:[#allocation377_spill] sm:$0xff] %v6945_v31  ;;  %v645_v31 = vld [vmem:[%s5217_s21 + $0xc28] sm:$0xff]  ;;  %v646_v61 = vld [vmem:[%s5217_s21 + $0xc30] sm:$0xff] }
 0x184   : > { %12863 = vst [vmem:[#allocation378_spill] sm:$0xff] %v6952_v4  ;;  %12864 = vst [vmem:[#allocation379_spill] sm:$0xff] %v6955_v38  ;;  %v649_v38 = vld [vmem:[%s5217_s21 + $0xc48] sm:$0xff]  ;;  %v650_v4 = vld [vmem:[%s5217_s21 + $0xc50] sm:$0xff] }
 0x185   : > { %12865 = vst [vmem:[#allocation380_spill] sm:$0xff] %v6958_v51  ;;  %12866 = vst [vmem:[#allocation381_spill] sm:$0xff] %v6961_v14  ;;  %v6979_v14 = vpop.permute.xlu0 %1374  ;;  %v648_v51 = vld [vmem:[%s5217_s21 + $0xc40] sm:$0xff]  ;;  %v655_v50 = vld [vmem:[%s5217_s21 + $0xc78] sm:$0xff] }
 0x186   : > { %12867 = vst [vmem:[#allocation382_spill] sm:$0xff] %v6968_v8  ;;  %12868 = vst [vmem:[#allocation383_spill] sm:$0xff] %v6971_v59  ;;  %v6986_v8 = vmul.f32 %v6849_v35, %v696_v20  ;;  %v654_v59 = vld [vmem:[%s5217_s21 + $0xc70] sm:$0xff]  ;;  %v7002_v20 = vmul.f32 %v6849_v35, %v700_v44  ;;  %v661_v44 = vld [vmem:[%s5217_s21 + $0xca8] sm:$0xff]  ;;  %v7022_v24 = vmul.f32 %v6979_v14, %v640_v39 }
 0x187   : > { %12869 = vst [vmem:[#allocation384_spill] sm:$0xff] %v6974_v60  ;;  %12870 = vst [vmem:[#allocation385_spill] sm:$0xff] %v6977_v0  ;;  %v652_v0 = vld [vmem:[%s5217_s21 + $0xc60] sm:$0xff]  ;;  %v653_v60 = vld [vmem:[%s5217_s21 + $0xc68] sm:$0xff]  ;;  %v7028_v35 = vmul.f32 %v6979_v14, %v642_v36  ;;  %v7031_v17 = vmul.f32 %v6979_v14, %v643_v12  ;;  %v7038_v58 = vmul.f32 %v6979_v14, %v644_v21 }
 0x188   : > { %12871 = vst [vmem:[#allocation386_spill] sm:$0xff] %v6986_v8  ;;  %12872 = vst [vmem:[#allocation387_spill] sm:$0xff] %v6989_v23  ;;  %v658_v23 = vld [vmem:[%s5217_s21 + $0xc90] sm:$0xff]  ;;  %v659_v8 = vld [vmem:[%s5217_s21 + $0xc98] sm:$0xff]  ;;  %v7041_v39 = vmul.f32 %v6979_v14, %v645_v31  ;;  %v7047_v36 = vmul.f32 %v6979_v14, %v647_v13  ;;  %v7054_v21 = vmul.f32 %v6979_v14, %v648_v51 }
 0x189   : > { %12873 = vst [vmem:[#allocation388_spill] sm:$0xff] %v6992_v40  ;;  %12874 = vst [vmem:[#allocation389_spill] sm:$0xff] %v6995_v52  ;;  %v656_v52 = vld [vmem:[%s5217_s21 + $0xc80] sm:$0xff]  ;;  %v657_v40 = vld [vmem:[%s5217_s21 + $0xc88] sm:$0xff]  ;;  %v7057_v31 = vmul.f32 %v6979_v14, %v649_v38  ;;  %v7063_v13 = vmul.f32 %v6979_v14, %v651_v32  ;;  %v7072_v51 = vmul.f32 %v6979_v14, %v654_v59 }
 0x18a   : > { %12875 = vst [vmem:[#allocation390_spill] sm:$0xff] %v7002_v20  ;;  %12876 = vst [vmem:[#allocation391_spill] sm:$0xff] %v7005_v33  ;;  %v662_v20 = vld [vmem:[%s5217_s21 + $0xcb0] sm:$0xff]  ;;  %v665_v33 = vld [vmem:[%s5217_s21 + $0xcc8] sm:$0xff]  ;;  %v7075_v38 = vmul.f32 %v6979_v14, %v655_v50  ;;  %v7088_v59 = vmul.f32 %v6979_v14, %v658_v23  ;;  %v7091_v50 = vmul.f32 %v6979_v14, %v659_v8 }
 0x18b   : > { %12877 = vst [vmem:[#allocation392_spill] sm:$0xff] %v7008_v41  ;;  %12878 = vst [vmem:[#allocation393_spill] sm:$0xff] %v7011_v11  ;;  %v7025_v41 = vmul.f32 %v6979_v14, %v641_v57  ;;  %v664_v11 = vld [vmem:[%s5217_s21 + $0xcc0] sm:$0xff]  ;;  %v667_v9 = vld [vmem:[%s5217_s21 + $0xcd8] sm:$0xff]  ;;  %v7044_v57 = vmul.f32 %v6979_v14, %v646_v61  ;;  %v7060_v61 = vmul.f32 %v6979_v14, %v650_v4 }
 0x18c   : > { %12879 = vst [vmem:[#allocation394_spill] sm:$0xff] %v7022_v24  ;;  %12881 = vst [vmem:[#allocation396_spill] sm:$0xff] %v7028_v35  ;;  %v668_v12 = vld [vmem:[%s5217_s21 + $0xce0] sm:$0xff]  ;;  %v670_v35 = vld [vmem:[%s5217_s21 + $0xcf0] sm:$0xff]  ;;  %v7104_v23 = vmul.f32 %v6979_v14, %v662_v20  ;;  %v7107_v8 = vmul.f32 %v6979_v14, %v663_v18  ;;  %v7119_v20 = vmul.f32 %v6979_v14, %v665_v33 }
 0x18d   : > { %12880 = vst [vmem:[#allocation395_spill] sm:$0xff] %v7025_v41  ;;  %12882 = vst [vmem:[#allocation397_spill] sm:$0xff] %v7031_v17  ;;  %v669_v17 = vld [vmem:[%s5217_s21 + $0xce8] sm:$0xff]  ;;  %v671_v41 = vld [vmem:[%s5217_s21 + $0xcf8] sm:$0xff]  ;;  %v7125_v18 = vmul.f32 %v6979_v14, %v667_v9 }
 0x18e   : > { %12883 = vst [vmem:[#allocation398_spill] sm:$0xff] %v7038_v58  ;;  %12884 = vst [vmem:[#allocation399_spill] sm:$0xff] %v7041_v39  ;;  %v737_v4 = vld [vmem:[%s5217_s21 + $0xf08] sm:$0xff]  ;;  %v739_v32 = vld [vmem:[%s5217_s21 + $0xf18] sm:$0xff]  ;;  %v7135_v33 = vmul.f32 %v6979_v14, %v669_v17  ;;  %v7141_v9 = vmul.f32 %v6979_v14, %v671_v41 }
 0x18f   : > { %12885 = vst [vmem:[#allocation400_spill] sm:$0xff] %v7044_v57  ;;  %12886 = vst [vmem:[#allocation401_spill] sm:$0xff] %v7047_v36  ;;  %v7066_v36 = vmul.f32 %v6979_v14, %v652_v0  ;;  %v7069_v57 = vmul.f32 %v6979_v14, %v653_v60  ;;  %v7085_v60 = vmul.f32 %v6979_v14, %v657_v40  ;;  %v740_v0 = vld [vmem:[%s5217_s21 + $0xf20] sm:$0xff]  ;;  %v759_v17 = vld [vmem:[%s5217_s21 + $0xfb8] sm:$0xff] }
 0x190   : > { %12887 = vst [vmem:[#allocation402_spill] sm:$0xff] %v7054_v21  ;;  %12888 = vst [vmem:[#allocation403_spill] sm:$0xff] %v7057_v31  ;;  %v736_v31 = vld [vmem:[%s5217_s21 + $0xf00] sm:$0xff]  ;;  %v7101_v40 = vmul.f32 %v6979_v14, %v661_v44  ;;  %v7122_v44 = vmul.f32 %v6979_v14, %v666_v7  ;;  %v7138_v7 = vmul.f32 %v6979_v14, %v670_v35  ;;  %v762_v39 = vld [vmem:[%s5217_s21 + $0xfd0] sm:$0xff] }
 0x191   : > { %12889 = vst [vmem:[#allocation404_spill] sm:$0xff] %v7060_v61  ;;  %12890 = vst [vmem:[#allocation405_spill] sm:$0xff] %v7063_v13  ;;  %v738_v61 = vld [vmem:[%s5217_s21 + $0xf10] sm:$0xff]  ;;  %v7082_v13 = vmul.f32 %v6979_v14, %v656_v52  ;;  %v7098_v52 = vmul.f32 %v6979_v14, %v660_v48  ;;  %v747_v48 = vld [vmem:[%s5217_s21 + $0xf58] sm:$0xff] }
 0x192   : > { %12891 = vst [vmem:[#allocation406_spill] sm:$0xff] %v7066_v36  ;;  %12892 = vst [vmem:[#allocation407_spill] sm:$0xff] %v7069_v57  ;;  %v743_v57 = vld [vmem:[%s5217_s21 + $0xf38] sm:$0xff]  ;;  %v756_v21 = vld [vmem:[%s5217_s21 + $0xfa0] sm:$0xff] }
 0x193   : > { %12893 = vst [vmem:[#allocation408_spill] sm:$0xff] %v7072_v51  ;;  %12894 = vst [vmem:[#allocation409_spill] sm:$0xff] %v7075_v38  ;;  %v741_v38 = vld [vmem:[%s5217_s21 + $0xf28] sm:$0xff]  ;;  %v742_v51 = vld [vmem:[%s5217_s21 + $0xf30] sm:$0xff] }
 0x194   : > { %12895 = vst [vmem:[#allocation410_spill] sm:$0xff] %v7082_v13  ;;  %12896 = vst [vmem:[#allocation411_spill] sm:$0xff] %v7085_v60  ;;  %v745_v60 = vld [vmem:[%s5217_s21 + $0xf48] sm:$0xff]  ;;  %v746_v13 = vld [vmem:[%s5217_s21 + $0xf50] sm:$0xff] }
 0x195   : > { %12897 = vst [vmem:[#allocation412_spill] sm:$0xff] %v7088_v59  ;;  %12898 = vst [vmem:[#allocation413_spill] sm:$0xff] %v7091_v50  ;;  %v7109_v50 = vpop.permute.xlu1 %1389  ;;  %v744_v59 = vld [vmem:[%s5217_s21 + $0xf40] sm:$0xff]  ;;  %v751_v36 = vld [vmem:[%s5217_s21 + $0xf78] sm:$0xff] }
 0x196   : > { %12899 = vst [vmem:[#allocation414_spill] sm:$0xff] %v7098_v52  ;;  %12900 = vst [vmem:[#allocation415_spill] sm:$0xff] %v7101_v40  ;;  %v7116_v52 = vmul.f32 %v6979_v14, %v664_v11  ;;  %v750_v40 = vld [vmem:[%s5217_s21 + $0xf70] sm:$0xff]  ;;  %v7132_v11 = vmul.f32 %v6979_v14, %v668_v12  ;;  %v757_v12 = vld [vmem:[%s5217_s21 + $0xfa8] sm:$0xff]  ;;  %v7152_v35 = vmul.f32 %v7109_v50, %v736_v31 }
 0x197   : > { %12901 = vst [vmem:[#allocation416_spill] sm:$0xff] %v7104_v23  ;;  %12902 = vst [vmem:[#allocation417_spill] sm:$0xff] %v7107_v8  ;;  %v748_v8 = vld [vmem:[%s5217_s21 + $0xf60] sm:$0xff]  ;;  %v749_v23 = vld [vmem:[%s5217_s21 + $0xf68] sm:$0xff]  ;;  %v7158_v14 = vmul.f32 %v7109_v50, %v738_v61  ;;  %v7161_v41 = vmul.f32 %v7109_v50, %v739_v32  ;;  %v7168_v24 = vmul.f32 %v7109_v50, %v740_v0 }
 0x198   : > { %12903 = vst [vmem:[#allocation418_spill] sm:$0xff] %v7116_v52  ;;  %12904 = vst [vmem:[#allocation419_spill] sm:$0xff] %v7119_v20  ;;  %v754_v20 = vld [vmem:[%s5217_s21 + $0xf90] sm:$0xff]  ;;  %v755_v52 = vld [vmem:[%s5217_s21 + $0xf98] sm:$0xff]  ;;  %v7171_v31 = vmul.f32 %v7109_v50, %v741_v38  ;;  %v7177_v61 = vmul.f32 %v7109_v50, %v743_v57  ;;  %v7184_v0 = vmul.f32 %v7109_v50, %v744_v59 }
 0x199   : > { %12905 = vst [vmem:[#allocation420_spill] sm:$0xff] %v7122_v44  ;;  %12906 = vst [vmem:[#allocation421_spill] sm:$0xff] %v7125_v18  ;;  %v752_v18 = vld [vmem:[%s5217_s21 + $0xf80] sm:$0xff]  ;;  %v753_v44 = vld [vmem:[%s5217_s21 + $0xf88] sm:$0xff]  ;;  %v7187_v38 = vmul.f32 %v7109_v50, %v745_v60  ;;  %v7193_v57 = vmul.f32 %v7109_v50, %v747_v48  ;;  %v7202_v59 = vmul.f32 %v7109_v50, %v750_v40 }
 0x19a   : > { %12907 = vst [vmem:[#allocation422_spill] sm:$0xff] %v7132_v11  ;;  %12908 = vst [vmem:[#allocation423_spill] sm:$0xff] %v7135_v33  ;;  %v758_v11 = vld [vmem:[%s5217_s21 + $0xfb0] sm:$0xff]  ;;  %v761_v33 = vld [vmem:[%s5217_s21 + $0xfc8] sm:$0xff]  ;;  %v7205_v60 = vmul.f32 %v7109_v50, %v751_v36  ;;  %v7218_v40 = vmul.f32 %v7109_v50, %v754_v20  ;;  %v7221_v36 = vmul.f32 %v7109_v50, %v755_v52 }
 0x19b   : > { %12909 = vst [vmem:[#allocation424_spill] sm:$0xff] %v7138_v7  ;;  %12910 = vst [vmem:[#allocation425_spill] sm:$0xff] %v7141_v9  ;;  %v7155_v7 = vmul.f32 %v7109_v50, %v737_v4  ;;  %v760_v9 = vld [vmem:[%s5217_s21 + $0xfc0] sm:$0xff]  ;;  %v763_v58 = vld [vmem:[%s5217_s21 + $0xfd8] sm:$0xff]  ;;  %v7174_v4 = vmul.f32 %v7109_v50, %v742_v51  ;;  %v7190_v51 = vmul.f32 %v7109_v50, %v746_v13 }
 0x19c   : > { %12911 = vst [vmem:[#allocation426_spill] sm:$0xff] %v7152_v35  ;;  %12913 = vst [vmem:[#allocation428_spill] sm:$0xff] %v7158_v14  ;;  %v764_v32 = vld [vmem:[%s5217_s21 + $0xfe0] sm:$0xff]  ;;  %v766_v14 = vld [vmem:[%s5217_s21 + $0xff0] sm:$0xff]  ;;  %v7234_v20 = vmul.f32 %v7109_v50, %v758_v11  ;;  %v7237_v52 = vmul.f32 %v7109_v50, %v759_v17  ;;  %v7249_v11 = vmul.f32 %v7109_v50, %v761_v33 }
 0x19d   : > { %12912 = vst [vmem:[#allocation427_spill] sm:$0xff] %v7155_v7  ;;  %12914 = vst [vmem:[#allocation429_spill] sm:$0xff] %v7161_v41  ;;  %v765_v41 = vld [vmem:[%s5217_s21 + $0xfe8] sm:$0xff]  ;;  %v767_v7 = vld [vmem:[%s5217_s21 + $0xff8] sm:$0xff]  ;;  %v7255_v17 = vmul.f32 %v7109_v50, %v763_v58 }
 0x19e   : > { %12915 = vst [vmem:[#allocation430_spill] sm:$0xff] %v7168_v24  ;;  %12916 = vst [vmem:[#allocation431_spill] sm:$0xff] %v7171_v31  ;;  %v705_v13 = vld [vmem:[%s5217_s21 + $0xe08] sm:$0xff]  ;;  %v707_v48 = vld [vmem:[%s5217_s21 + $0xe18] sm:$0xff]  ;;  %v7265_v33 = vmul.f32 %v7109_v50, %v765_v41  ;;  %v7271_v58 = vmul.f32 %v7109_v50, %v767_v7 }
 0x19f   : > { %12917 = vst [vmem:[#allocation432_spill] sm:$0xff] %v7174_v4  ;;  %12918 = vst [vmem:[#allocation433_spill] sm:$0xff] %v7177_v61  ;;  %v7196_v61 = vmul.f32 %v7109_v50, %v748_v8  ;;  %v7199_v4 = vmul.f32 %v7109_v50, %v749_v23  ;;  %v7215_v23 = vmul.f32 %v7109_v50, %v753_v44  ;;  %v708_v8 = vld [vmem:[%s5217_s21 + $0xe20] sm:$0xff]  ;;  %v727_v41 = vld [vmem:[%s5217_s21 + $0xeb8] sm:$0xff] }
 0x1a0   : > { %12919 = vst [vmem:[#allocation434_spill] sm:$0xff] %v7184_v0  ;;  %12920 = vst [vmem:[#allocation435_spill] sm:$0xff] %v7187_v38  ;;  %v704_v38 = vld [vmem:[%s5217_s21 + $0xe00] sm:$0xff]  ;;  %v7231_v44 = vmul.f32 %v7109_v50, %v757_v12  ;;  %v7252_v12 = vmul.f32 %v7109_v50, %v762_v39  ;;  %v7268_v39 = vmul.f32 %v7109_v50, %v766_v14  ;;  %v730_v31 = vld [vmem:[%s5217_s21 + $0xed0] sm:$0xff] }
 0x1a1   : > { %12921 = vst [vmem:[#allocation436_spill] sm:$0xff] %v7190_v51  ;;  %12922 = vst [vmem:[#allocation437_spill] sm:$0xff] %v7193_v57  ;;  %v706_v51 = vld [vmem:[%s5217_s21 + $0xe10] sm:$0xff]  ;;  %v7212_v57 = vmul.f32 %v7109_v50, %v752_v18  ;;  %v7228_v18 = vmul.f32 %v7109_v50, %v756_v21  ;;  %v715_v21 = vld [vmem:[%s5217_s21 + $0xe58] sm:$0xff] }
 0x1a2   : > { %12923 = vst [vmem:[#allocation438_spill] sm:$0xff] %v7196_v61  ;;  %12924 = vst [vmem:[#allocation439_spill] sm:$0xff] %v7199_v4  ;;  %v711_v4 = vld [vmem:[%s5217_s21 + $0xe38] sm:$0xff]  ;;  %v724_v0 = vld [vmem:[%s5217_s21 + $0xea0] sm:$0xff] }
 0x1a3   : > { %12925 = vst [vmem:[#allocation440_spill] sm:$0xff] %v7202_v59  ;;  %12926 = vst [vmem:[#allocation441_spill] sm:$0xff] %v7205_v60  ;;  %v709_v60 = vld [vmem:[%s5217_s21 + $0xe28] sm:$0xff]  ;;  %v710_v59 = vld [vmem:[%s5217_s21 + $0xe30] sm:$0xff] }
 0x1a4   : > { %12927 = vst [vmem:[#allocation442_spill] sm:$0xff] %v7212_v57  ;;  %12928 = vst [vmem:[#allocation443_spill] sm:$0xff] %v7215_v23  ;;  %v713_v23 = vld [vmem:[%s5217_s21 + $0xe48] sm:$0xff]  ;;  %v714_v57 = vld [vmem:[%s5217_s21 + $0xe50] sm:$0xff] }
 0x1a5   : > { %12929 = vst [vmem:[#allocation444_spill] sm:$0xff] %v7218_v40  ;;  %12930 = vst [vmem:[#allocation445_spill] sm:$0xff] %v7221_v36  ;;  %v7239_v36 = vpop.permute.xlu0 %1384  ;;  %v712_v40 = vld [vmem:[%s5217_s21 + $0xe40] sm:$0xff]  ;;  %v719_v61 = vld [vmem:[%s5217_s21 + $0xe78] sm:$0xff] }
 0x1a6   : > { %12931 = vst [vmem:[#allocation446_spill] sm:$0xff] %v7228_v18  ;;  %12932 = vst [vmem:[#allocation447_spill] sm:$0xff] %v7231_v44  ;;  %v7246_v18 = vmul.f32 %v7109_v50, %v760_v9  ;;  %v718_v44 = vld [vmem:[%s5217_s21 + $0xe70] sm:$0xff]  ;;  %v7262_v9 = vmul.f32 %v7109_v50, %v764_v32  ;;  %v725_v32 = vld [vmem:[%s5217_s21 + $0xea8] sm:$0xff]  ;;  %v7282_v14 = vmul.f32 %v7239_v36, %v704_v38 }
 0x1a7   : > { %12933 = vst [vmem:[#allocation448_spill] sm:$0xff] %v7234_v20  ;;  %12934 = vst [vmem:[#allocation449_spill] sm:$0xff] %v7237_v52  ;;  %v716_v52 = vld [vmem:[%s5217_s21 + $0xe60] sm:$0xff]  ;;  %v717_v20 = vld [vmem:[%s5217_s21 + $0xe68] sm:$0xff]  ;;  %v7288_v50 = vmul.f32 %v7239_v36, %v706_v51  ;;  %v7291_v7 = vmul.f32 %v7239_v36, %v707_v48  ;;  %v7298_v35 = vmul.f32 %v7239_v36, %v708_v8 }
 0x1a8   : > { %12935 = vst [vmem:[#allocation450_spill] sm:$0xff] %v7246_v18  ;;  %12936 = vst [vmem:[#allocation451_spill] sm:$0xff] %v7249_v11  ;;  %v722_v11 = vld [vmem:[%s5217_s21 + $0xe90] sm:$0xff]  ;;  %v723_v18 = vld [vmem:[%s5217_s21 + $0xe98] sm:$0xff]  ;;  %v7301_v38 = vmul.f32 %v7239_v36, %v709_v60  ;;  %v7307_v51 = vmul.f32 %v7239_v36, %v711_v4  ;;  %v7314_v8 = vmul.f32 %v7239_v36, %v712_v40 }
 0x1a9   : > { %12937 = vst [vmem:[#allocation452_spill] sm:$0xff] %v7252_v12  ;;  %12938 = vst [vmem:[#allocation453_spill] sm:$0xff] %v7255_v17  ;;  %v720_v17 = vld [vmem:[%s5217_s21 + $0xe80] sm:$0xff]  ;;  %v721_v12 = vld [vmem:[%s5217_s21 + $0xe88] sm:$0xff]  ;;  %v7317_v60 = vmul.f32 %v7239_v36, %v713_v23  ;;  %v7323_v4 = vmul.f32 %v7239_v36, %v715_v21  ;;  %v7332_v40 = vmul.f32 %v7239_v36, %v718_v44 }
 0x1aa   : > { %12939 = vst [vmem:[#allocation454_spill] sm:$0xff] %v7262_v9  ;;  %12940 = vst [vmem:[#allocation455_spill] sm:$0xff] %v7265_v33  ;;  %v726_v9 = vld [vmem:[%s5217_s21 + $0xeb0] sm:$0xff]  ;;  %v729_v33 = vld [vmem:[%s5217_s21 + $0xec8] sm:$0xff]  ;;  %v7335_v23 = vmul.f32 %v7239_v36, %v719_v61  ;;  %v7348_v44 = vmul.f32 %v7239_v36, %v722_v11  ;;  %v7351_v61 = vmul.f32 %v7239_v36, %v723_v18 }
 0x1ab   : > { %12941 = vst [vmem:[#allocation456_spill] sm:$0xff] %v7268_v39  ;;  %12942 = vst [vmem:[#allocation457_spill] sm:$0xff] %v7271_v58  ;;  %v7285_v39 = vmul.f32 %v7239_v36, %v705_v13  ;;  %v728_v58 = vld [vmem:[%s5217_s21 + $0xec0] sm:$0xff]  ;;  %v731_v24 = vld [vmem:[%s5217_s21 + $0xed8] sm:$0xff]  ;;  %v7304_v13 = vmul.f32 %v7239_v36, %v710_v59  ;;  %v7320_v59 = vmul.f32 %v7239_v36, %v714_v57 }
 0x1ac   : > { %12943 = vst [vmem:[#allocation458_spill] sm:$0xff] %v7282_v14  ;;  %12945 = vst [vmem:[#allocation460_spill] sm:$0xff] %v7288_v50  ;;  %v732_v48 = vld [vmem:[%s5217_s21 + $0xee0] sm:$0xff]  ;;  %v734_v50 = vld [vmem:[%s5217_s21 + $0xef0] sm:$0xff]  ;;  %v7364_v11 = vmul.f32 %v7239_v36, %v726_v9  ;;  %v7367_v18 = vmul.f32 %v7239_v36, %v727_v41  ;;  %v7379_v9 = vmul.f32 %v7239_v36, %v729_v33 }
 0x1ad   : > { %12944 = vst [vmem:[#allocation459_spill] sm:$0xff] %v7285_v39  ;;  %12946 = vst [vmem:[#allocation461_spill] sm:$0xff] %v7291_v7  ;;  %v733_v7 = vld [vmem:[%s5217_s21 + $0xee8] sm:$0xff]  ;;  %v735_v39 = vld [vmem:[%s5217_s21 + $0xef8] sm:$0xff]  ;;  %v7385_v41 = vmul.f32 %v7239_v36, %v731_v24 }
 0x1ae   : > { %12947 = vst [vmem:[#allocation462_spill] sm:$0xff] %v7298_v35  ;;  %12948 = vst [vmem:[#allocation463_spill] sm:$0xff] %v7301_v38  ;;  %v801_v57 = vld [vmem:[%s5217_s21 + $0x1108] sm:$0xff]  ;;  %v803_v21 = vld [vmem:[%s5217_s21 + $0x1118] sm:$0xff]  ;;  %v7395_v33 = vmul.f32 %v7239_v36, %v733_v7  ;;  %v7401_v24 = vmul.f32 %v7239_v36, %v735_v39 }
 0x1af   : > { %12949 = vst [vmem:[#allocation464_spill] sm:$0xff] %v7304_v13  ;;  %12950 = vst [vmem:[#allocation465_spill] sm:$0xff] %v7307_v51  ;;  %v7326_v51 = vmul.f32 %v7239_v36, %v716_v52  ;;  %v7329_v13 = vmul.f32 %v7239_v36, %v717_v20  ;;  %v7345_v20 = vmul.f32 %v7239_v36, %v721_v12  ;;  %v804_v52 = vld [vmem:[%s5217_s21 + $0x1120] sm:$0xff]  ;;  %v823_v7 = vld [vmem:[%s5217_s21 + $0x11b8] sm:$0xff] }
 0x1b0   : > { %12951 = vst [vmem:[#allocation466_spill] sm:$0xff] %v7314_v8  ;;  %12952 = vst [vmem:[#allocation467_spill] sm:$0xff] %v7317_v60  ;;  %v800_v60 = vld [vmem:[%s5217_s21 + $0x1100] sm:$0xff]  ;;  %v7361_v12 = vmul.f32 %v7239_v36, %v725_v32  ;;  %v7382_v32 = vmul.f32 %v7239_v36, %v730_v31  ;;  %v7398_v31 = vmul.f32 %v7239_v36, %v734_v50  ;;  %v826_v38 = vld [vmem:[%s5217_s21 + $0x11d0] sm:$0xff] }
 0x1b1   : > { %12953 = vst [vmem:[#allocation468_spill] sm:$0xff] %v7320_v59  ;;  %12954 = vst [vmem:[#allocation469_spill] sm:$0xff] %v7323_v4  ;;  %v802_v59 = vld [vmem:[%s5217_s21 + $0x1110] sm:$0xff]  ;;  %v7342_v4 = vmul.f32 %v7239_v36, %v720_v17  ;;  %v7358_v17 = vmul.f32 %v7239_v36, %v724_v0  ;;  %v811_v0 = vld [vmem:[%s5217_s21 + $0x1158] sm:$0xff] }
 0x1b2   : > { %12955 = vst [vmem:[#allocation470_spill] sm:$0xff] %v7326_v51  ;;  %12956 = vst [vmem:[#allocation471_spill] sm:$0xff] %v7329_v13  ;;  %v807_v13 = vld [vmem:[%s5217_s21 + $0x1138] sm:$0xff]  ;;  %v820_v8 = vld [vmem:[%s5217_s21 + $0x11a0] sm:$0xff] }
 0x1b3   : > { %12957 = vst [vmem:[#allocation472_spill] sm:$0xff] %v7332_v40  ;;  %12958 = vst [vmem:[#allocation473_spill] sm:$0xff] %v7335_v23  ;;  %v805_v23 = vld [vmem:[%s5217_s21 + $0x1128] sm:$0xff]  ;;  %v806_v40 = vld [vmem:[%s5217_s21 + $0x1130] sm:$0xff] }
 0x1b4   : > { %12959 = vst [vmem:[#allocation474_spill] sm:$0xff] %v7342_v4  ;;  %12960 = vst [vmem:[#allocation475_spill] sm:$0xff] %v7345_v20  ;;  %v809_v20 = vld [vmem:[%s5217_s21 + $0x1148] sm:$0xff]  ;;  %v810_v4 = vld [vmem:[%s5217_s21 + $0x1150] sm:$0xff] }
 0x1b5   : > { %12961 = vst [vmem:[#allocation476_spill] sm:$0xff] %v7348_v44  ;;  %12962 = vst [vmem:[#allocation477_spill] sm:$0xff] %v7351_v61  ;;  %v7369_v61 = vpop.permute.xlu1 %1399  ;;  %v808_v44 = vld [vmem:[%s5217_s21 + $0x1140] sm:$0xff]  ;;  %v815_v51 = vld [vmem:[%s5217_s21 + $0x1178] sm:$0xff] }
 0x1b6   : > { %12963 = vst [vmem:[#allocation478_spill] sm:$0xff] %v7358_v17  ;;  %12964 = vst [vmem:[#allocation479_spill] sm:$0xff] %v7361_v12  ;;  %v7376_v17 = vmul.f32 %v7239_v36, %v728_v58  ;;  %v814_v12 = vld [vmem:[%s5217_s21 + $0x1170] sm:$0xff]  ;;  %v7392_v58 = vmul.f32 %v7239_v36, %v732_v48  ;;  %v821_v48 = vld [vmem:[%s5217_s21 + $0x11a8] sm:$0xff]  ;;  %v7412_v50 = vmul.f32 %v7369_v61, %v800_v60 }
 0x1b7   : > { %12965 = vst [vmem:[#allocation480_spill] sm:$0xff] %v7364_v11  ;;  %12966 = vst [vmem:[#allocation481_spill] sm:$0xff] %v7367_v18  ;;  %v812_v18 = vld [vmem:[%s5217_s21 + $0x1160] sm:$0xff]  ;;  %v813_v11 = vld [vmem:[%s5217_s21 + $0x1168] sm:$0xff]  ;;  %v7418_v36 = vmul.f32 %v7369_v61, %v802_v59  ;;  %v7421_v39 = vmul.f32 %v7369_v61, %v803_v21  ;;  %v7428_v14 = vmul.f32 %v7369_v61, %v804_v52 }
 0x1b8   : > { %12967 = vst [vmem:[#allocation482_spill] sm:$0xff] %v7376_v17  ;;  %12968 = vst [vmem:[#allocation483_spill] sm:$0xff] %v7379_v9  ;;  %v818_v9 = vld [vmem:[%s5217_s21 + $0x1190] sm:$0xff]  ;;  %v819_v17 = vld [vmem:[%s5217_s21 + $0x1198] sm:$0xff]  ;;  %v7431_v60 = vmul.f32 %v7369_v61, %v805_v23  ;;  %v7437_v59 = vmul.f32 %v7369_v61, %v807_v13  ;;  %v7444_v52 = vmul.f32 %v7369_v61, %v808_v44 }
 0x1b9   : > { %12969 = vst [vmem:[#allocation484_spill] sm:$0xff] %v7382_v32  ;;  %12970 = vst [vmem:[#allocation485_spill] sm:$0xff] %v7385_v41  ;;  %v816_v41 = vld [vmem:[%s5217_s21 + $0x1180] sm:$0xff]  ;;  %v817_v32 = vld [vmem:[%s5217_s21 + $0x1188] sm:$0xff]  ;;  %v7447_v23 = vmul.f32 %v7369_v61, %v809_v20  ;;  %v7453_v13 = vmul.f32 %v7369_v61, %v811_v0  ;;  %v7462_v44 = vmul.f32 %v7369_v61, %v814_v12 }
 0x1ba   : > { %12971 = vst [vmem:[#allocation486_spill] sm:$0xff] %v7392_v58  ;;  %12972 = vst [vmem:[#allocation487_spill] sm:$0xff] %v7395_v33  ;;  %v822_v58 = vld [vmem:[%s5217_s21 + $0x11b0] sm:$0xff]  ;;  %v825_v33 = vld [vmem:[%s5217_s21 + $0x11c8] sm:$0xff]  ;;  %v7465_v20 = vmul.f32 %v7369_v61, %v815_v51  ;;  %v7478_v12 = vmul.f32 %v7369_v61, %v818_v9  ;;  %v7481_v51 = vmul.f32 %v7369_v61, %v819_v17 }
 0x1bb   : > { %12973 = vst [vmem:[#allocation488_spill] sm:$0xff] %v7398_v31  ;;  %12974 = vst [vmem:[#allocation489_spill] sm:$0xff] %v7401_v24  ;;  %v7415_v31 = vmul.f32 %v7369_v61, %v801_v57  ;;  %v824_v24 = vld [vmem:[%s5217_s21 + $0x11c0] sm:$0xff]  ;;  %v827_v35 = vld [vmem:[%s5217_s21 + $0x11d8] sm:$0xff]  ;;  %v7434_v57 = vmul.f32 %v7369_v61, %v806_v40  ;;  %v7450_v40 = vmul.f32 %v7369_v61, %v810_v4 }
 0x1bc   : > { %12975 = vst [vmem:[#allocation490_spill] sm:$0xff] %v7412_v50  ;;  %12977 = vst [vmem:[#allocation492_spill] sm:$0xff] %v7418_v36  ;;  %v828_v21 = vld [vmem:[%s5217_s21 + $0x11e0] sm:$0xff]  ;;  %v830_v36 = vld [vmem:[%s5217_s21 + $0x11f0] sm:$0xff]  ;;  %v7494_v9 = vmul.f32 %v7369_v61, %v822_v58  ;;  %v7497_v17 = vmul.f32 %v7369_v61, %v823_v7  ;;  %v7509_v58 = vmul.f32 %v7369_v61, %v825_v33 }
 0x1bd   : > { %12976 = vst [vmem:[#allocation491_spill] sm:$0xff] %v7415_v31  ;;  %12978 = vst [vmem:[#allocation493_spill] sm:$0xff] %v7421_v39  ;;  %v829_v39 = vld [vmem:[%s5217_s21 + $0x11e8] sm:$0xff]  ;;  %v831_v31 = vld [vmem:[%s5217_s21 + $0x11f8] sm:$0xff]  ;;  %v7515_v7 = vmul.f32 %v7369_v61, %v827_v35 }
 0x1be   : > { %12979 = vst [vmem:[#allocation494_spill] sm:$0xff] %v7428_v14  ;;  %12980 = vst [vmem:[#allocation495_spill] sm:$0xff] %v7431_v60  ;;  %v769_v4 = vld [vmem:[%s5217_s21 + $0x1008] sm:$0xff]  ;;  %v771_v0 = vld [vmem:[%s5217_s21 + $0x1018] sm:$0xff]  ;;  %v7525_v33 = vmul.f32 %v7369_v61, %v829_v39  ;;  %v7531_v35 = vmul.f32 %v7369_v61, %v831_v31 }
 0x1bf   : > { %12981 = vst [vmem:[#allocation496_spill] sm:$0xff] %v7434_v57  ;;  %12982 = vst [vmem:[#allocation497_spill] sm:$0xff] %v7437_v59  ;;  %v7456_v59 = vmul.f32 %v7369_v61, %v812_v18  ;;  %v7459_v57 = vmul.f32 %v7369_v61, %v813_v11  ;;  %v7475_v11 = vmul.f32 %v7369_v61, %v817_v32  ;;  %v772_v18 = vld [vmem:[%s5217_s21 + $0x1020] sm:$0xff]  ;;  %v791_v39 = vld [vmem:[%s5217_s21 + $0x10b8] sm:$0xff] }
 0x1c0   : > { %12983 = vst [vmem:[#allocation498_spill] sm:$0xff] %v7444_v52  ;;  %12984 = vst [vmem:[#allocation499_spill] sm:$0xff] %v7447_v23  ;;  %v768_v23 = vld [vmem:[%s5217_s21 + $0x1000] sm:$0xff]  ;;  %v7491_v32 = vmul.f32 %v7369_v61, %v821_v48  ;;  %v7512_v48 = vmul.f32 %v7369_v61, %v826_v38  ;;  %v7528_v38 = vmul.f32 %v7369_v61, %v830_v36  ;;  %v794_v60 = vld [vmem:[%s5217_s21 + $0x10d0] sm:$0xff] }
 0x1c1   : > { %12985 = vst [vmem:[#allocation500_spill] sm:$0xff] %v7450_v40  ;;  %12986 = vst [vmem:[#allocation501_spill] sm:$0xff] %v7453_v13  ;;  %v770_v40 = vld [vmem:[%s5217_s21 + $0x1010] sm:$0xff]  ;;  %v7472_v13 = vmul.f32 %v7369_v61, %v816_v41  ;;  %v7488_v41 = vmul.f32 %v7369_v61, %v820_v8  ;;  %v779_v8 = vld [vmem:[%s5217_s21 + $0x1058] sm:$0xff] }
 0x1c2   : > { %12987 = vst [vmem:[#allocation502_spill] sm:$0xff] %v7456_v59  ;;  %12988 = vst [vmem:[#allocation503_spill] sm:$0xff] %v7459_v57  ;;  %v775_v57 = vld [vmem:[%s5217_s21 + $0x1038] sm:$0xff]  ;;  %v788_v52 = vld [vmem:[%s5217_s21 + $0x10a0] sm:$0xff] }
 0x1c3   : > { %12989 = vst [vmem:[#allocation504_spill] sm:$0xff] %v7462_v44  ;;  %12990 = vst [vmem:[#allocation505_spill] sm:$0xff] %v7465_v20  ;;  %v773_v20 = vld [vmem:[%s5217_s21 + $0x1028] sm:$0xff]  ;;  %v774_v44 = vld [vmem:[%s5217_s21 + $0x1030] sm:$0xff] }
 0x1c4   : > { %12991 = vst [vmem:[#allocation506_spill] sm:$0xff] %v7472_v13  ;;  %12992 = vst [vmem:[#allocation507_spill] sm:$0xff] %v7475_v11  ;;  %v777_v11 = vld [vmem:[%s5217_s21 + $0x1048] sm:$0xff]  ;;  %v778_v13 = vld [vmem:[%s5217_s21 + $0x1050] sm:$0xff] }
 0x1c5   : > { %12993 = vst [vmem:[#allocation508_spill] sm:$0xff] %v7478_v12  ;;  %12994 = vst [vmem:[#allocation509_spill] sm:$0xff] %v7481_v51  ;;  %v7499_v51 = vpop.permute.xlu0 %1394  ;;  %v776_v12 = vld [vmem:[%s5217_s21 + $0x1040] sm:$0xff]  ;;  %v783_v59 = vld [vmem:[%s5217_s21 + $0x1078] sm:$0xff] }
 0x1c6   : > { %12995 = vst [vmem:[#allocation510_spill] sm:$0xff] %v7488_v41  ;;  %12996 = vst [vmem:[#allocation511_spill] sm:$0xff] %v7491_v32  ;;  %v7506_v41 = vmul.f32 %v7369_v61, %v824_v24  ;;  %v782_v32 = vld [vmem:[%s5217_s21 + $0x1070] sm:$0xff]  ;;  %v7522_v24 = vmul.f32 %v7369_v61, %v828_v21  ;;  %v789_v21 = vld [vmem:[%s5217_s21 + $0x10a8] sm:$0xff]  ;;  %v7542_v36 = vmul.f32 %v7499_v51, %v768_v23 }
 0x1c7   : > { %12997 = vst [vmem:[#allocation512_spill] sm:$0xff] %v7494_v9  ;;  %12998 = vst [vmem:[#allocation513_spill] sm:$0xff] %v7497_v17  ;;  %v780_v17 = vld [vmem:[%s5217_s21 + $0x1060] sm:$0xff]  ;;  %v781_v9 = vld [vmem:[%s5217_s21 + $0x1068] sm:$0xff]  ;;  %v7548_v61 = vmul.f32 %v7499_v51, %v770_v40  ;;  %v7551_v31 = vmul.f32 %v7499_v51, %v771_v0  ;;  %v7558_v50 = vmul.f32 %v7499_v51, %v772_v18 }
 0x1c8   : > { %12999 = vst [vmem:[#allocation514_spill] sm:$0xff] %v7506_v41  ;;  %13000 = vst [vmem:[#allocation515_spill] sm:$0xff] %v7509_v58  ;;  %v786_v58 = vld [vmem:[%s5217_s21 + $0x1090] sm:$0xff]  ;;  %v787_v41 = vld [vmem:[%s5217_s21 + $0x1098] sm:$0xff]  ;;  %v7561_v23 = vmul.f32 %v7499_v51, %v773_v20  ;;  %v7567_v40 = vmul.f32 %v7499_v51, %v775_v57  ;;  %v7574_v18 = vmul.f32 %v7499_v51, %v776_v12 }
 0x1c9   : > { %13001 = vst [vmem:[#allocation516_spill] sm:$0xff] %v7512_v48  ;;  %13002 = vst [vmem:[#allocation517_spill] sm:$0xff] %v7515_v7  ;;  %v784_v7 = vld [vmem:[%s5217_s21 + $0x1080] sm:$0xff]  ;;  %v785_v48 = vld [vmem:[%s5217_s21 + $0x1088] sm:$0xff]  ;;  %v7577_v20 = vmul.f32 %v7499_v51, %v777_v11  ;;  %v7583_v57 = vmul.f32 %v7499_v51, %v779_v8  ;;  %v7592_v12 = vmul.f32 %v7499_v51, %v782_v32 }
 0x1ca   : > { %13003 = vst [vmem:[#allocation518_spill] sm:$0xff] %v7522_v24  ;;  %13004 = vst [vmem:[#allocation519_spill] sm:$0xff] %v7525_v33  ;;  %v790_v24 = vld [vmem:[%s5217_s21 + $0x10b0] sm:$0xff]  ;;  %v793_v33 = vld [vmem:[%s5217_s21 + $0x10c8] sm:$0xff]  ;;  %v7595_v11 = vmul.f32 %v7499_v51, %v783_v59  ;;  %v7608_v32 = vmul.f32 %v7499_v51, %v786_v58  ;;  %v7611_v59 = vmul.f32 %v7499_v51, %v787_v41 }
 0x1cb   : > { %13005 = vst [vmem:[#allocation520_spill] sm:$0xff] %v7528_v38  ;;  %13006 = vst [vmem:[#allocation521_spill] sm:$0xff] %v7531_v35  ;;  %v7545_v38 = vmul.f32 %v7499_v51, %v769_v4  ;;  %v792_v35 = vld [vmem:[%s5217_s21 + $0x10c0] sm:$0xff]  ;;  %v795_v14 = vld [vmem:[%s5217_s21 + $0x10d8] sm:$0xff]  ;;  %v7564_v4 = vmul.f32 %v7499_v51, %v774_v44  ;;  %v7580_v44 = vmul.f32 %v7499_v51, %v778_v13 }
 0x1cc   : > { %13007 = vst [vmem:[#allocation522_spill] sm:$0xff] %v7542_v36  ;;  %13009 = vst [vmem:[#allocation524_spill] sm:$0xff] %v7548_v61  ;;  %v796_v0 = vld [vmem:[%s5217_s21 + $0x10e0] sm:$0xff]  ;;  %v798_v61 = vld [vmem:[%s5217_s21 + $0x10f0] sm:$0xff]  ;;  %v7624_v58 = vmul.f32 %v7499_v51, %v790_v24  ;;  %v7627_v41 = vmul.f32 %v7499_v51, %v791_v39  ;;  %v7639_v24 = vmul.f32 %v7499_v51, %v793_v33 }
 0x1cd   : > { %13008 = vst [vmem:[#allocation523_spill] sm:$0xff] %v7545_v38  ;;  %13010 = vst [vmem:[#allocation525_spill] sm:$0xff] %v7551_v31  ;;  %v797_v31 = vld [vmem:[%s5217_s21 + $0x10e8] sm:$0xff]  ;;  %v799_v38 = vld [vmem:[%s5217_s21 + $0x10f8] sm:$0xff]  ;;  %v7645_v39 = vmul.f32 %v7499_v51, %v795_v14 }
 0x1ce   : > { %13011 = vst [vmem:[#allocation526_spill] sm:$0xff] %v7558_v50  ;;  %13012 = vst [vmem:[#allocation527_spill] sm:$0xff] %v7561_v23  ;;  %v865_v13 = vld [vmem:[%s5217_s21 + $0x1308] sm:$0xff]  ;;  %v867_v8 = vld [vmem:[%s5217_s21 + $0x1318] sm:$0xff]  ;;  %v7655_v33 = vmul.f32 %v7499_v51, %v797_v31  ;;  %v7661_v14 = vmul.f32 %v7499_v51, %v799_v38 }
 0x1cf   : > { %13013 = vst [vmem:[#allocation528_spill] sm:$0xff] %v7564_v4  ;;  %13014 = vst [vmem:[#allocation529_spill] sm:$0xff] %v7567_v40  ;;  %v7586_v40 = vmul.f32 %v7499_v51, %v780_v17  ;;  %v7589_v4 = vmul.f32 %v7499_v51, %v781_v9  ;;  %v7605_v9 = vmul.f32 %v7499_v51, %v785_v48  ;;  %v868_v17 = vld [vmem:[%s5217_s21 + $0x1320] sm:$0xff]  ;;  %v887_v31 = vld [vmem:[%s5217_s21 + $0x13b8] sm:$0xff] }
 0x1d0   : > { %13015 = vst [vmem:[#allocation530_spill] sm:$0xff] %v7574_v18  ;;  %13016 = vst [vmem:[#allocation531_spill] sm:$0xff] %v7577_v20  ;;  %v864_v20 = vld [vmem:[%s5217_s21 + $0x1300] sm:$0xff]  ;;  %v7621_v48 = vmul.f32 %v7499_v51, %v789_v21  ;;  %v7642_v21 = vmul.f32 %v7499_v51, %v794_v60  ;;  %v7658_v60 = vmul.f32 %v7499_v51, %v798_v61  ;;  %v890_v23 = vld [vmem:[%s5217_s21 + $0x13d0] sm:$0xff] }
 0x1d1   : > { %13017 = vst [vmem:[#allocation532_spill] sm:$0xff] %v7580_v44  ;;  %13018 = vst [vmem:[#allocation533_spill] sm:$0xff] %v7583_v57  ;;  %v866_v44 = vld [vmem:[%s5217_s21 + $0x1310] sm:$0xff]  ;;  %v7602_v57 = vmul.f32 %v7499_v51, %v784_v7  ;;  %v7618_v7 = vmul.f32 %v7499_v51, %v788_v52  ;;  %v875_v52 = vld [vmem:[%s5217_s21 + $0x1358] sm:$0xff] }
 0x1d2   : > { %13019 = vst [vmem:[#allocation534_spill] sm:$0xff] %v7586_v40  ;;  %13020 = vst [vmem:[#allocation535_spill] sm:$0xff] %v7589_v4  ;;  %v871_v4 = vld [vmem:[%s5217_s21 + $0x1338] sm:$0xff]  ;;  %v884_v18 = vld [vmem:[%s5217_s21 + $0x13a0] sm:$0xff] }
 0x1d3   : > { %13021 = vst [vmem:[#allocation536_spill] sm:$0xff] %v7592_v12  ;;  %13022 = vst [vmem:[#allocation537_spill] sm:$0xff] %v7595_v11  ;;  %v869_v11 = vld [vmem:[%s5217_s21 + $0x1328] sm:$0xff]  ;;  %v870_v12 = vld [vmem:[%s5217_s21 + $0x1330] sm:$0xff] }
 0x1d4   : > { %13023 = vst [vmem:[#allocation538_spill] sm:$0xff] %v7602_v57  ;;  %13024 = vst [vmem:[#allocation539_spill] sm:$0xff] %v7605_v9  ;;  %v873_v9 = vld [vmem:[%s5217_s21 + $0x1348] sm:$0xff]  ;;  %v874_v57 = vld [vmem:[%s5217_s21 + $0x1350] sm:$0xff] }
 0x1d5   : > { %13025 = vst [vmem:[#allocation540_spill] sm:$0xff] %v7608_v32  ;;  %13026 = vst [vmem:[#allocation541_spill] sm:$0xff] %v7611_v59  ;;  %v7629_v59 = vpop.permute.xlu1 %1409  ;;  %v872_v32 = vld [vmem:[%s5217_s21 + $0x1340] sm:$0xff]  ;;  %v879_v40 = vld [vmem:[%s5217_s21 + $0x1378] sm:$0xff] }
 0x1d6   : > { %13027 = vst [vmem:[#allocation542_spill] sm:$0xff] %v7618_v7  ;;  %13028 = vst [vmem:[#allocation543_spill] sm:$0xff] %v7621_v48  ;;  %v7636_v7 = vmul.f32 %v7499_v51, %v792_v35  ;;  %v878_v48 = vld [vmem:[%s5217_s21 + $0x1370] sm:$0xff]  ;;  %v7652_v35 = vmul.f32 %v7499_v51, %v796_v0  ;;  %v885_v0 = vld [vmem:[%s5217_s21 + $0x13a8] sm:$0xff]  ;;  %v7672_v61 = vmul.f32 %v7629_v59, %v864_v20 }
 0x1d7   : > { %13029 = vst [vmem:[#allocation544_spill] sm:$0xff] %v7624_v58  ;;  %13030 = vst [vmem:[#allocation545_spill] sm:$0xff] %v7627_v41  ;;  %v876_v41 = vld [vmem:[%s5217_s21 + $0x1360] sm:$0xff]  ;;  %v877_v58 = vld [vmem:[%s5217_s21 + $0x1368] sm:$0xff]  ;;  %v7678_v51 = vmul.f32 %v7629_v59, %v866_v44  ;;  %v7681_v38 = vmul.f32 %v7629_v59, %v867_v8  ;;  %v7688_v36 = vmul.f32 %v7629_v59, %v868_v17 }
 0x1d8   : > { %13031 = vst [vmem:[#allocation546_spill] sm:$0xff] %v7636_v7  ;;  %13032 = vst [vmem:[#allocation547_spill] sm:$0xff] %v7639_v24  ;;  %v882_v24 = vld [vmem:[%s5217_s21 + $0x1390] sm:$0xff]  ;;  %v883_v7 = vld [vmem:[%s5217_s21 + $0x1398] sm:$0xff]  ;;  %v7691_v20 = vmul.f32 %v7629_v59, %v869_v11  ;;  %v7697_v44 = vmul.f32 %v7629_v59, %v871_v4  ;;  %v7704_v17 = vmul.f32 %v7629_v59, %v872_v32 }
 0x1d9   : > { %13033 = vst [vmem:[#allocation548_spill] sm:$0xff] %v7642_v21  ;;  %13034 = vst [vmem:[#allocation549_spill] sm:$0xff] %v7645_v39  ;;  %v880_v39 = vld [vmem:[%s5217_s21 + $0x1380] sm:$0xff]  ;;  %v881_v21 = vld [vmem:[%s5217_s21 + $0x1388] sm:$0xff]  ;;  %v7707_v11 = vmul.f32 %v7629_v59, %v873_v9  ;;  %v7713_v4 = vmul.f32 %v7629_v59, %v875_v52  ;;  %v7722_v32 = vmul.f32 %v7629_v59, %v878_v48 }
 0x1da   : > { %13035 = vst [vmem:[#allocation550_spill] sm:$0xff] %v7652_v35  ;;  %13036 = vst [vmem:[#allocation551_spill] sm:$0xff] %v7655_v33  ;;  %v886_v35 = vld [vmem:[%s5217_s21 + $0x13b0] sm:$0xff]  ;;  %v889_v33 = vld [vmem:[%s5217_s21 + $0x13c8] sm:$0xff]  ;;  %v7725_v9 = vmul.f32 %v7629_v59, %v879_v40  ;;  %v7738_v48 = vmul.f32 %v7629_v59, %v882_v24  ;;  %v7741_v40 = vmul.f32 %v7629_v59, %v883_v7 }
 0x1db   : > { %13037 = vst [vmem:[#allocation552_spill] sm:$0xff] %v7658_v60  ;;  %13038 = vst [vmem:[#allocation553_spill] sm:$0xff] %v7661_v14  ;;  %v7675_v60 = vmul.f32 %v7629_v59, %v865_v13  ;;  %v888_v14 = vld [vmem:[%s5217_s21 + $0x13c0] sm:$0xff]  ;;  %v891_v50 = vld [vmem:[%s5217_s21 + $0x13d8] sm:$0xff]  ;;  %v7694_v13 = vmul.f32 %v7629_v59, %v870_v12  ;;  %v7710_v12 = vmul.f32 %v7629_v59, %v874_v57 }
 0x1dc   : > { %13039 = vst [vmem:[#allocation554_spill] sm:$0xff] %v7672_v61  ;;  %13041 = vst [vmem:[#allocation556_spill] sm:$0xff] %v7678_v51  ;;  %v892_v8 = vld [vmem:[%s5217_s21 + $0x13e0] sm:$0xff]  ;;  %v894_v51 = vld [vmem:[%s5217_s21 + $0x13f0] sm:$0xff]  ;;  %v7754_v24 = vmul.f32 %v7629_v59, %v886_v35  ;;  %v7757_v7 = vmul.f32 %v7629_v59, %v887_v31  ;;  %v7769_v35 = vmul.f32 %v7629_v59, %v889_v33 }
 0x1dd   : > { %13040 = vst [vmem:[#allocation555_spill] sm:$0xff] %v7675_v60  ;;  %13042 = vst [vmem:[#allocation557_spill] sm:$0xff] %v7681_v38  ;;  %v893_v38 = vld [vmem:[%s5217_s21 + $0x13e8] sm:$0xff]  ;;  %v895_v60 = vld [vmem:[%s5217_s21 + $0x13f8] sm:$0xff]  ;;  %v7775_v31 = vmul.f32 %v7629_v59, %v891_v50 }
 0x1de   : > { %13043 = vst [vmem:[#allocation558_spill] sm:$0xff] %v7688_v36  ;;  %13044 = vst [vmem:[#allocation559_spill] sm:$0xff] %v7691_v20  ;;  %v833_v57 = vld [vmem:[%s5217_s21 + $0x1208] sm:$0xff]  ;;  %v835_v52 = vld [vmem:[%s5217_s21 + $0x1218] sm:$0xff]  ;;  %v7785_v33 = vmul.f32 %v7629_v59, %v893_v38  ;;  %v7791_v50 = vmul.f32 %v7629_v59, %v895_v60 }
 0x1df   : > { %13045 = vst [vmem:[#allocation560_spill] sm:$0xff] %v7694_v13  ;;  %13046 = vst [vmem:[#allocation561_spill] sm:$0xff] %v7697_v44  ;;  %v7716_v44 = vmul.f32 %v7629_v59, %v876_v41  ;;  %v7719_v13 = vmul.f32 %v7629_v59, %v877_v58  ;;  %v7735_v58 = vmul.f32 %v7629_v59, %v881_v21  ;;  %v836_v41 = vld [vmem:[%s5217_s21 + $0x1220] sm:$0xff]  ;;  %v855_v38 = vld [vmem:[%s5217_s21 + $0x12b8] sm:$0xff] }
 0x1e0   : > { %13047 = vst [vmem:[#allocation562_spill] sm:$0xff] %v7704_v17  ;;  %13048 = vst [vmem:[#allocation563_spill] sm:$0xff] %v7707_v11  ;;  %v832_v11 = vld [vmem:[%s5217_s21 + $0x1200] sm:$0xff]  ;;  %v7751_v21 = vmul.f32 %v7629_v59, %v885_v0  ;;  %v7772_v0 = vmul.f32 %v7629_v59, %v890_v23  ;;  %v7788_v23 = vmul.f32 %v7629_v59, %v894_v51  ;;  %v858_v20 = vld [vmem:[%s5217_s21 + $0x12d0] sm:$0xff] }
 0x1e1   : > { %13049 = vst [vmem:[#allocation564_spill] sm:$0xff] %v7710_v12  ;;  %13050 = vst [vmem:[#allocation565_spill] sm:$0xff] %v7713_v4  ;;  %v834_v12 = vld [vmem:[%s5217_s21 + $0x1210] sm:$0xff]  ;;  %v7732_v4 = vmul.f32 %v7629_v59, %v880_v39  ;;  %v7748_v39 = vmul.f32 %v7629_v59, %v884_v18  ;;  %v843_v18 = vld [vmem:[%s5217_s21 + $0x1258] sm:$0xff] }
 0x1e2   : > { %13051 = vst [vmem:[#allocation566_spill] sm:$0xff] %v7716_v44  ;;  %13052 = vst [vmem:[#allocation567_spill] sm:$0xff] %v7719_v13  ;;  %v839_v13 = vld [vmem:[%s5217_s21 + $0x1238] sm:$0xff]  ;;  %v852_v17 = vld [vmem:[%s5217_s21 + $0x12a0] sm:$0xff] }
 0x1e3   : > { %13053 = vst [vmem:[#allocation568_spill] sm:$0xff] %v7722_v32  ;;  %13054 = vst [vmem:[#allocation569_spill] sm:$0xff] %v7725_v9  ;;  %v837_v9 = vld [vmem:[%s5217_s21 + $0x1228] sm:$0xff]  ;;  %v838_v32 = vld [vmem:[%s5217_s21 + $0x1230] sm:$0xff] }
 0x1e4   : > { %13055 = vst [vmem:[#allocation570_spill] sm:$0xff] %v7732_v4  ;;  %13056 = vst [vmem:[#allocation571_spill] sm:$0xff] %v7735_v58  ;;  %v841_v58 = vld [vmem:[%s5217_s21 + $0x1248] sm:$0xff]  ;;  %v842_v4 = vld [vmem:[%s5217_s21 + $0x1250] sm:$0xff] }
 0x1e5   : > { %13057 = vst [vmem:[#allocation572_spill] sm:$0xff] %v7738_v48  ;;  %13058 = vst [vmem:[#allocation573_spill] sm:$0xff] %v7741_v40  ;;  %v7759_v40 = vpop.permute.xlu0 %1404  ;;  %v840_v48 = vld [vmem:[%s5217_s21 + $0x1240] sm:$0xff]  ;;  %v847_v44 = vld [vmem:[%s5217_s21 + $0x1278] sm:$0xff] }
 0x1e6   : > { %13059 = vst [vmem:[#allocation574_spill] sm:$0xff] %v7748_v39  ;;  %13060 = vst [vmem:[#allocation575_spill] sm:$0xff] %v7751_v21  ;;  %v7766_v39 = vmul.f32 %v7629_v59, %v888_v14  ;;  %v846_v21 = vld [vmem:[%s5217_s21 + $0x1270] sm:$0xff]  ;;  %v7782_v14 = vmul.f32 %v7629_v59, %v892_v8  ;;  %v853_v8 = vld [vmem:[%s5217_s21 + $0x12a8] sm:$0xff]  ;;  %v7802_v51 = vmul.f32 %v7759_v40, %v832_v11 }
 0x1e7   : > { %13061 = vst [vmem:[#allocation576_spill] sm:$0xff] %v7754_v24  ;;  %13062 = vst [vmem:[#allocation577_spill] sm:$0xff] %v7757_v7  ;;  %v844_v7 = vld [vmem:[%s5217_s21 + $0x1260] sm:$0xff]  ;;  %v845_v24 = vld [vmem:[%s5217_s21 + $0x1268] sm:$0xff]  ;;  %v7808_v59 = vmul.f32 %v7759_v40, %v834_v12  ;;  %v7811_v60 = vmul.f32 %v7759_v40, %v835_v52  ;;  %v7818_v61 = vmul.f32 %v7759_v40, %v836_v41 }
 0x1e8   : > { %13063 = vst [vmem:[#allocation578_spill] sm:$0xff] %v7766_v39  ;;  %13064 = vst [vmem:[#allocation579_spill] sm:$0xff] %v7769_v35  ;;  %v850_v35 = vld [vmem:[%s5217_s21 + $0x1290] sm:$0xff]  ;;  %v851_v39 = vld [vmem:[%s5217_s21 + $0x1298] sm:$0xff]  ;;  %v7821_v11 = vmul.f32 %v7759_v40, %v837_v9  ;;  %v7827_v12 = vmul.f32 %v7759_v40, %v839_v13  ;;  %v7834_v41 = vmul.f32 %v7759_v40, %v840_v48 }
 0x1e9   : > { %13065 = vst [vmem:[#allocation580_spill] sm:$0xff] %v7772_v0  ;;  %13066 = vst [vmem:[#allocation581_spill] sm:$0xff] %v7775_v31  ;;  %v848_v31 = vld [vmem:[%s5217_s21 + $0x1280] sm:$0xff]  ;;  %v849_v0 = vld [vmem:[%s5217_s21 + $0x1288] sm:$0xff]  ;;  %v7837_v9 = vmul.f32 %v7759_v40, %v841_v58  ;;  %v7843_v13 = vmul.f32 %v7759_v40, %v843_v18  ;;  %v7852_v48 = vmul.f32 %v7759_v40, %v846_v21 }
 0x1ea   : > { %13067 = vst [vmem:[#allocation582_spill] sm:$0xff] %v7782_v14  ;;  %13068 = vst [vmem:[#allocation583_spill] sm:$0xff] %v7785_v33  ;;  %v854_v14 = vld [vmem:[%s5217_s21 + $0x12b0] sm:$0xff]  ;;  %v857_v33 = vld [vmem:[%s5217_s21 + $0x12c8] sm:$0xff]  ;;  %v7855_v58 = vmul.f32 %v7759_v40, %v847_v44  ;;  %v7868_v21 = vmul.f32 %v7759_v40, %v850_v35  ;;  %v7871_v44 = vmul.f32 %v7759_v40, %v851_v39 }
 0x1eb   : > { %13069 = vst [vmem:[#allocation584_spill] sm:$0xff] %v7788_v23  ;;  %13070 = vst [vmem:[#allocation585_spill] sm:$0xff] %v7791_v50  ;;  %v7805_v23 = vmul.f32 %v7759_v40, %v833_v57  ;;  %v856_v50 = vld [vmem:[%s5217_s21 + $0x12c0] sm:$0xff]  ;;  %v859_v36 = vld [vmem:[%s5217_s21 + $0x12d8] sm:$0xff]  ;;  %v7824_v57 = vmul.f32 %v7759_v40, %v838_v32  ;;  %v7840_v32 = vmul.f32 %v7759_v40, %v842_v4 }
 0x1ec   : > { %13071 = vst [vmem:[#allocation586_spill] sm:$0xff] %v7802_v51  ;;  %13073 = vst [vmem:[#allocation588_spill] sm:$0xff] %v7808_v59  ;;  %v860_v52 = vld [vmem:[%s5217_s21 + $0x12e0] sm:$0xff]  ;;  %v862_v59 = vld [vmem:[%s5217_s21 + $0x12f0] sm:$0xff]  ;;  %v7884_v35 = vmul.f32 %v7759_v40, %v854_v14  ;;  %v7887_v39 = vmul.f32 %v7759_v40, %v855_v38  ;;  %v7899_v14 = vmul.f32 %v7759_v40, %v857_v33 }
 0x1ed   : > { %13072 = vst [vmem:[#allocation587_spill] sm:$0xff] %v7805_v23  ;;  %13074 = vst [vmem:[#allocation589_spill] sm:$0xff] %v7811_v60  ;;  %v861_v60 = vld [vmem:[%s5217_s21 + $0x12e8] sm:$0xff]  ;;  %v863_v23 = vld [vmem:[%s5217_s21 + $0x12f8] sm:$0xff]  ;;  %v7905_v38 = vmul.f32 %v7759_v40, %v859_v36 }
 0x1ee   : > { %13075 = vst [vmem:[#allocation590_spill] sm:$0xff] %v7818_v61  ;;  %13076 = vst [vmem:[#allocation591_spill] sm:$0xff] %v7821_v11  ;;  %v929_v4 = vld [vmem:[%s5217_s21 + $0x1508] sm:$0xff]  ;;  %v931_v18 = vld [vmem:[%s5217_s21 + $0x1518] sm:$0xff]  ;;  %v7915_v33 = vmul.f32 %v7759_v40, %v861_v60  ;;  %v7921_v36 = vmul.f32 %v7759_v40, %v863_v23 }
 0x1ef   : > { %13077 = vst [vmem:[#allocation592_spill] sm:$0xff] %v7824_v57  ;;  %13078 = vst [vmem:[#allocation593_spill] sm:$0xff] %v7827_v12  ;;  %v7846_v12 = vmul.f32 %v7759_v40, %v844_v7  ;;  %v7849_v57 = vmul.f32 %v7759_v40, %v845_v24  ;;  %v7865_v24 = vmul.f32 %v7759_v40, %v849_v0  ;;  %v932_v7 = vld [vmem:[%s5217_s21 + $0x1520] sm:$0xff]  ;;  %v951_v60 = vld [vmem:[%s5217_s21 + $0x15b8] sm:$0xff] }
 0x1f0   : > { %13079 = vst [vmem:[#allocation594_spill] sm:$0xff] %v7834_v41  ;;  %13080 = vst [vmem:[#allocation595_spill] sm:$0xff] %v7837_v9  ;;  %v928_v9 = vld [vmem:[%s5217_s21 + $0x1500] sm:$0xff]  ;;  %v7881_v0 = vmul.f32 %v7759_v40, %v853_v8  ;;  %v7902_v8 = vmul.f32 %v7759_v40, %v858_v20  ;;  %v7918_v20 = vmul.f32 %v7759_v40, %v862_v59  ;;  %v954_v11 = vld [vmem:[%s5217_s21 + $0x15d0] sm:$0xff] }
 0x1f1   : > { %13081 = vst [vmem:[#allocation596_spill] sm:$0xff] %v7840_v32  ;;  %13082 = vst [vmem:[#allocation597_spill] sm:$0xff] %v7843_v13  ;;  %v930_v32 = vld [vmem:[%s5217_s21 + $0x1510] sm:$0xff]  ;;  %v7862_v13 = vmul.f32 %v7759_v40, %v848_v31  ;;  %v7878_v31 = vmul.f32 %v7759_v40, %v852_v17  ;;  %v939_v17 = vld [vmem:[%s5217_s21 + $0x1558] sm:$0xff] }
 0x1f2   : > { %13083 = vst [vmem:[#allocation598_spill] sm:$0xff] %v7846_v12  ;;  %13084 = vst [vmem:[#allocation599_spill] sm:$0xff] %v7849_v57  ;;  %v935_v57 = vld [vmem:[%s5217_s21 + $0x1538] sm:$0xff]  ;;  %v948_v41 = vld [vmem:[%s5217_s21 + $0x15a0] sm:$0xff] }
 0x1f3   : > { %13085 = vst [vmem:[#allocation600_spill] sm:$0xff] %v7852_v48  ;;  %13086 = vst [vmem:[#allocation601_spill] sm:$0xff] %v7855_v58  ;;  %v933_v58 = vld [vmem:[%s5217_s21 + $0x1528] sm:$0xff]  ;;  %v934_v48 = vld [vmem:[%s5217_s21 + $0x1530] sm:$0xff] }
 0x1f4   : > { %13087 = vst [vmem:[#allocation602_spill] sm:$0xff] %v7862_v13  ;;  %13088 = vst [vmem:[#allocation603_spill] sm:$0xff] %v7865_v24  ;;  %v937_v24 = vld [vmem:[%s5217_s21 + $0x1548] sm:$0xff]  ;;  %v938_v13 = vld [vmem:[%s5217_s21 + $0x1550] sm:$0xff] }
 0x1f5   : > { %13089 = vst [vmem:[#allocation604_spill] sm:$0xff] %v7868_v21  ;;  %13090 = vst [vmem:[#allocation605_spill] sm:$0xff] %v7871_v44  ;;  %v7889_v44 = vpop.permute.xlu1 %1419  ;;  %v936_v21 = vld [vmem:[%s5217_s21 + $0x1540] sm:$0xff]  ;;  %v943_v12 = vld [vmem:[%s5217_s21 + $0x1578] sm:$0xff] }
 0x1f6   : > { %13091 = vst [vmem:[#allocation606_spill] sm:$0xff] %v7878_v31  ;;  %13092 = vst [vmem:[#allocation607_spill] sm:$0xff] %v7881_v0  ;;  %v7896_v31 = vmul.f32 %v7759_v40, %v856_v50  ;;  %v942_v0 = vld [vmem:[%s5217_s21 + $0x1570] sm:$0xff]  ;;  %v7912_v50 = vmul.f32 %v7759_v40, %v860_v52  ;;  %v949_v52 = vld [vmem:[%s5217_s21 + $0x15a8] sm:$0xff]  ;;  %v7932_v59 = vmul.f32 %v7889_v44, %v928_v9 }
 0x1f7   : > { %13093 = vst [vmem:[#allocation608_spill] sm:$0xff] %v7884_v35  ;;  %13094 = vst [vmem:[#allocation609_spill] sm:$0xff] %v7887_v39  ;;  %v940_v39 = vld [vmem:[%s5217_s21 + $0x1560] sm:$0xff]  ;;  %v941_v35 = vld [vmem:[%s5217_s21 + $0x1568] sm:$0xff]  ;;  %v7938_v40 = vmul.f32 %v7889_v44, %v930_v32  ;;  %v7941_v23 = vmul.f32 %v7889_v44, %v931_v18  ;;  %v7948_v51 = vmul.f32 %v7889_v44, %v932_v7 }
 0x1f8   : > { %13095 = vst [vmem:[#allocation610_spill] sm:$0xff] %v7896_v31  ;;  %13096 = vst [vmem:[#allocation611_spill] sm:$0xff] %v7899_v14  ;;  %v946_v14 = vld [vmem:[%s5217_s21 + $0x1590] sm:$0xff]  ;;  %v947_v31 = vld [vmem:[%s5217_s21 + $0x1598] sm:$0xff]  ;;  %v7951_v9 = vmul.f32 %v7889_v44, %v933_v58  ;;  %v7957_v32 = vmul.f32 %v7889_v44, %v935_v57  ;;  %v7964_v7 = vmul.f32 %v7889_v44, %v936_v21 }
 0x1f9   : > { %13097 = vst [vmem:[#allocation612_spill] sm:$0xff] %v7902_v8  ;;  %13098 = vst [vmem:[#allocation613_spill] sm:$0xff] %v7905_v38  ;;  %v944_v38 = vld [vmem:[%s5217_s21 + $0x1580] sm:$0xff]  ;;  %v945_v8 = vld [vmem:[%s5217_s21 + $0x1588] sm:$0xff]  ;;  %v7967_v58 = vmul.f32 %v7889_v44, %v937_v24  ;;  %v7973_v57 = vmul.f32 %v7889_v44, %v939_v17  ;;  %v7982_v21 = vmul.f32 %v7889_v44, %v942_v0 }
 0x1fa   : > { %13099 = vst [vmem:[#allocation614_spill] sm:$0xff] %v7912_v50  ;;  %13100 = vst [vmem:[#allocation615_spill] sm:$0xff] %v7915_v33  ;;  %v950_v50 = vld [vmem:[%s5217_s21 + $0x15b0] sm:$0xff]  ;;  %v953_v33 = vld [vmem:[%s5217_s21 + $0x15c8] sm:$0xff]  ;;  %v7985_v24 = vmul.f32 %v7889_v44, %v943_v12  ;;  %v7998_v0 = vmul.f32 %v7889_v44, %v946_v14  ;;  %v8001_v12 = vmul.f32 %v7889_v44, %v947_v31 }
 0x1fb   : > { %13101 = vst [vmem:[#allocation616_spill] sm:$0xff] %v7918_v20  ;;  %13102 = vst [vmem:[#allocation617_spill] sm:$0xff] %v7921_v36  ;;  %v7935_v20 = vmul.f32 %v7889_v44, %v929_v4  ;;  %v952_v36 = vld [vmem:[%s5217_s21 + $0x15c0] sm:$0xff]  ;;  %v955_v61 = vld [vmem:[%s5217_s21 + $0x15d8] sm:$0xff]  ;;  %v7954_v4 = vmul.f32 %v7889_v44, %v934_v48  ;;  %v7970_v48 = vmul.f32 %v7889_v44, %v938_v13 }
 0x1fc   : > { %13103 = vst [vmem:[#allocation618_spill] sm:$0xff] %v7932_v59  ;;  %13105 = vst [vmem:[#allocation620_spill] sm:$0xff] %v7938_v40  ;;  %v956_v18 = vld [vmem:[%s5217_s21 + $0x15e0] sm:$0xff]  ;;  %v958_v40 = vld [vmem:[%s5217_s21 + $0x15f0] sm:$0xff]  ;;  %v8014_v14 = vmul.f32 %v7889_v44, %v950_v50  ;;  %v8017_v31 = vmul.f32 %v7889_v44, %v951_v60  ;;  %v8029_v50 = vmul.f32 %v7889_v44, %v953_v33 }
 0x1fd   : > { %13104 = vst [vmem:[#allocation619_spill] sm:$0xff] %v7935_v20  ;;  %13106 = vst [vmem:[#allocation621_spill] sm:$0xff] %v7941_v23  ;;  %v957_v23 = vld [vmem:[%s5217_s21 + $0x15e8] sm:$0xff]  ;;  %v959_v20 = vld [vmem:[%s5217_s21 + $0x15f8] sm:$0xff]  ;;  %v8035_v60 = vmul.f32 %v7889_v44, %v955_v61 }
 0x1fe   : > { %13107 = vst [vmem:[#allocation622_spill] sm:$0xff] %v7948_v51  ;;  %13108 = vst [vmem:[#allocation623_spill] sm:$0xff] %v7951_v9  ;;  %v897_v13 = vld [vmem:[%s5217_s21 + $0x1408] sm:$0xff]  ;;  %v899_v17 = vld [vmem:[%s5217_s21 + $0x1418] sm:$0xff]  ;;  %v8045_v33 = vmul.f32 %v7889_v44, %v957_v23  ;;  %v8051_v61 = vmul.f32 %v7889_v44, %v959_v20 }
 0x1ff   : > { %13109 = vst [vmem:[#allocation624_spill] sm:$0xff] %v7954_v4  ;;  %13110 = vst [vmem:[#allocation625_spill] sm:$0xff] %v7957_v32  ;;  %v7976_v32 = vmul.f32 %v7889_v44, %v940_v39  ;;  %v7979_v4 = vmul.f32 %v7889_v44, %v941_v35  ;;  %v7995_v35 = vmul.f32 %v7889_v44, %v945_v8  ;;  %v900_v39 = vld [vmem:[%s5217_s21 + $0x1420] sm:$0xff]  ;;  %v919_v23 = vld [vmem:[%s5217_s21 + $0x14b8] sm:$0xff] }
 0x200   : > { %13111 = vst [vmem:[#allocation626_spill] sm:$0xff] %v7964_v7  ;;  %13112 = vst [vmem:[#allocation627_spill] sm:$0xff] %v7967_v58  ;;  %v896_v58 = vld [vmem:[%s5217_s21 + $0x1400] sm:$0xff]  ;;  %v8011_v8 = vmul.f32 %v7889_v44, %v949_v52  ;;  %v8032_v52 = vmul.f32 %v7889_v44, %v954_v11  ;;  %v8048_v11 = vmul.f32 %v7889_v44, %v958_v40  ;;  %v922_v9 = vld [vmem:[%s5217_s21 + $0x14d0] sm:$0xff] }
 0x201   : > { %13113 = vst [vmem:[#allocation628_spill] sm:$0xff] %v7970_v48  ;;  %13114 = vst [vmem:[#allocation629_spill] sm:$0xff] %v7973_v57  ;;  %v898_v48 = vld [vmem:[%s5217_s21 + $0x1410] sm:$0xff]  ;;  %v7992_v57 = vmul.f32 %v7889_v44, %v944_v38  ;;  %v8008_v38 = vmul.f32 %v7889_v44, %v948_v41  ;;  %v907_v41 = vld [vmem:[%s5217_s21 + $0x1458] sm:$0xff] }
 0x202   : > { %13115 = vst [vmem:[#allocation630_spill] sm:$0xff] %v7976_v32  ;;  %13116 = vst [vmem:[#allocation631_spill] sm:$0xff] %v7979_v4  ;;  %v903_v4 = vld [vmem:[%s5217_s21 + $0x1438] sm:$0xff]  ;;  %v916_v7 = vld [vmem:[%s5217_s21 + $0x14a0] sm:$0xff] }
 0x203   : > { %13117 = vst [vmem:[#allocation632_spill] sm:$0xff] %v7982_v21  ;;  %13118 = vst [vmem:[#allocation633_spill] sm:$0xff] %v7985_v24  ;;  %v901_v24 = vld [vmem:[%s5217_s21 + $0x1428] sm:$0xff]  ;;  %v902_v21 = vld [vmem:[%s5217_s21 + $0x1430] sm:$0xff] }
 0x204   : > { %13119 = vst [vmem:[#allocation634_spill] sm:$0xff] %v7992_v57  ;;  %13120 = vst [vmem:[#allocation635_spill] sm:$0xff] %v7995_v35  ;;  %v905_v35 = vld [vmem:[%s5217_s21 + $0x1448] sm:$0xff]  ;;  %v906_v57 = vld [vmem:[%s5217_s21 + $0x1450] sm:$0xff] }
 0x205   : > { %13121 = vst [vmem:[#allocation636_spill] sm:$0xff] %v7998_v0  ;;  %13122 = vst [vmem:[#allocation637_spill] sm:$0xff] %v8001_v12  ;;  %v8019_v12 = vpop.permute.xlu0 %1414  ;;  %v904_v0 = vld [vmem:[%s5217_s21 + $0x1440] sm:$0xff]  ;;  %v911_v32 = vld [vmem:[%s5217_s21 + $0x1478] sm:$0xff] }
 0x206   : > { %13123 = vst [vmem:[#allocation638_spill] sm:$0xff] %v8008_v38  ;;  %13124 = vst [vmem:[#allocation639_spill] sm:$0xff] %v8011_v8  ;;  %v8026_v38 = vmul.f32 %v7889_v44, %v952_v36  ;;  %v910_v8 = vld [vmem:[%s5217_s21 + $0x1470] sm:$0xff]  ;;  %v8042_v36 = vmul.f32 %v7889_v44, %v956_v18  ;;  %v917_v18 = vld [vmem:[%s5217_s21 + $0x14a8] sm:$0xff]  ;;  %v8062_v40 = vmul.f32 %v8019_v12, %v896_v58 }
 0x207   : > { %13125 = vst [vmem:[#allocation640_spill] sm:$0xff] %v8014_v14  ;;  %13126 = vst [vmem:[#allocation641_spill] sm:$0xff] %v8017_v31  ;;  %v908_v31 = vld [vmem:[%s5217_s21 + $0x1460] sm:$0xff]  ;;  %v909_v14 = vld [vmem:[%s5217_s21 + $0x1468] sm:$0xff]  ;;  %v8068_v44 = vmul.f32 %v8019_v12, %v898_v48  ;;  %v8071_v20 = vmul.f32 %v8019_v12, %v899_v17  ;;  %v8078_v59 = vmul.f32 %v8019_v12, %v900_v39 }
 0x208   : > { %13127 = vst [vmem:[#allocation642_spill] sm:$0xff] %v8026_v38  ;;  %13128 = vst [vmem:[#allocation643_spill] sm:$0xff] %v8029_v50  ;;  %v914_v50 = vld [vmem:[%s5217_s21 + $0x1490] sm:$0xff]  ;;  %v915_v38 = vld [vmem:[%s5217_s21 + $0x1498] sm:$0xff]  ;;  %v8081_v58 = vmul.f32 %v8019_v12, %v901_v24  ;;  %v8087_v48 = vmul.f32 %v8019_v12, %v903_v4  ;;  %v8094_v39 = vmul.f32 %v8019_v12, %v904_v0 }
 0x209   : > { %13129 = vst [vmem:[#allocation644_spill] sm:$0xff] %v8032_v52  ;;  %13130 = vst [vmem:[#allocation645_spill] sm:$0xff] %v8035_v60  ;;  %v912_v60 = vld [vmem:[%s5217_s21 + $0x1480] sm:$0xff]  ;;  %v913_v52 = vld [vmem:[%s5217_s21 + $0x1488] sm:$0xff]  ;;  %v8097_v24 = vmul.f32 %v8019_v12, %v905_v35  ;;  %v8103_v4 = vmul.f32 %v8019_v12, %v907_v41  ;;  %v8112_v0 = vmul.f32 %v8019_v12, %v910_v8 }
 0x20a   : > { %13131 = vst [vmem:[#allocation646_spill] sm:$0xff] %v8042_v36  ;;  %13132 = vst [vmem:[#allocation647_spill] sm:$0xff] %v8045_v33  ;;  %v918_v36 = vld [vmem:[%s5217_s21 + $0x14b0] sm:$0xff]  ;;  %v921_v33 = vld [vmem:[%s5217_s21 + $0x14c8] sm:$0xff]  ;;  %v8115_v35 = vmul.f32 %v8019_v12, %v911_v32  ;;  %v8128_v8 = vmul.f32 %v8019_v12, %v914_v50  ;;  %v8131_v32 = vmul.f32 %v8019_v12, %v915_v38 }
 0x20b   : > { %13133 = vst [vmem:[#allocation648_spill] sm:$0xff] %v8048_v11  ;;  %13134 = vst [vmem:[#allocation649_spill] sm:$0xff] %v8051_v61  ;;  %v8065_v11 = vmul.f32 %v8019_v12, %v897_v13  ;;  %v920_v61 = vld [vmem:[%s5217_s21 + $0x14c0] sm:$0xff]  ;;  %v923_v51 = vld [vmem:[%s5217_s21 + $0x14d8] sm:$0xff]  ;;  %v8084_v13 = vmul.f32 %v8019_v12, %v902_v21  ;;  %v8100_v21 = vmul.f32 %v8019_v12, %v906_v57 }
 0x20c   : > { %13135 = vst [vmem:[#allocation650_spill] sm:$0xff] %v8062_v40  ;;  %13137 = vst [vmem:[#allocation652_spill] sm:$0xff] %v8068_v44  ;;  %v924_v17 = vld [vmem:[%s5217_s21 + $0x14e0] sm:$0xff]  ;;  %v926_v44 = vld [vmem:[%s5217_s21 + $0x14f0] sm:$0xff]  ;;  %v8144_v50 = vmul.f32 %v8019_v12, %v918_v36  ;;  %v8147_v38 = vmul.f32 %v8019_v12, %v919_v23  ;;  %v8159_v36 = vmul.f32 %v8019_v12, %v921_v33 }
 0x20d   : > { %13136 = vst [vmem:[#allocation651_spill] sm:$0xff] %v8065_v11  ;;  %13138 = vst [vmem:[#allocation653_spill] sm:$0xff] %v8071_v20  ;;  %v925_v20 = vld [vmem:[%s5217_s21 + $0x14e8] sm:$0xff]  ;;  %v927_v11 = vld [vmem:[%s5217_s21 + $0x14f8] sm:$0xff]  ;;  %v8165_v23 = vmul.f32 %v8019_v12, %v923_v51 }
 0x20e   : > { %13139 = vst [vmem:[#allocation654_spill] sm:$0xff] %v8078_v59  ;;  %13140 = vst [vmem:[#allocation655_spill] sm:$0xff] %v8081_v58  ;;  %v993_v57 = vld [vmem:[%s5217_s21 + $0x1708] sm:$0xff]  ;;  %v995_v41 = vld [vmem:[%s5217_s21 + $0x1718] sm:$0xff]  ;;  %v8175_v33 = vmul.f32 %v8019_v12, %v925_v20  ;;  %v8181_v51 = vmul.f32 %v8019_v12, %v927_v11 }
 0x20f   : > { %13141 = vst [vmem:[#allocation656_spill] sm:$0xff] %v8084_v13  ;;  %13142 = vst [vmem:[#allocation657_spill] sm:$0xff] %v8087_v48  ;;  %v8106_v48 = vmul.f32 %v8019_v12, %v908_v31  ;;  %v8109_v13 = vmul.f32 %v8019_v12, %v909_v14  ;;  %v8125_v14 = vmul.f32 %v8019_v12, %v913_v52  ;;  %v996_v31 = vld [vmem:[%s5217_s21 + $0x1720] sm:$0xff]  ;;  %v1015_v20 = vld [vmem:[%s5217_s21 + $0x17b8] sm:$0xff] }
 0x210   : > { %13143 = vst [vmem:[#allocation658_spill] sm:$0xff] %v8094_v39  ;;  %13144 = vst [vmem:[#allocation659_spill] sm:$0xff] %v8097_v24  ;;  %v992_v24 = vld [vmem:[%s5217_s21 + $0x1700] sm:$0xff]  ;;  %v8141_v52 = vmul.f32 %v8019_v12, %v917_v18  ;;  %v8162_v18 = vmul.f32 %v8019_v12, %v922_v9  ;;  %v8178_v9 = vmul.f32 %v8019_v12, %v926_v44  ;;  %v1018_v58 = vld [vmem:[%s5217_s21 + $0x17d0] sm:$0xff] }
 0x211   : > { %13145 = vst [vmem:[#allocation660_spill] sm:$0xff] %v8100_v21  ;;  %13146 = vst [vmem:[#allocation661_spill] sm:$0xff] %v8103_v4  ;;  %v994_v21 = vld [vmem:[%s5217_s21 + $0x1710] sm:$0xff]  ;;  %v8122_v4 = vmul.f32 %v8019_v12, %v912_v60  ;;  %v8138_v60 = vmul.f32 %v8019_v12, %v916_v7  ;;  %v1003_v7 = vld [vmem:[%s5217_s21 + $0x1758] sm:$0xff] }
 0x212   : > { %13147 = vst [vmem:[#allocation662_spill] sm:$0xff] %v8106_v48  ;;  %13148 = vst [vmem:[#allocation663_spill] sm:$0xff] %v8109_v13  ;;  %v999_v13 = vld [vmem:[%s5217_s21 + $0x1738] sm:$0xff]  ;;  %v1012_v39 = vld [vmem:[%s5217_s21 + $0x17a0] sm:$0xff] }
 0x213   : > { %13149 = vst [vmem:[#allocation664_spill] sm:$0xff] %v8112_v0  ;;  %13150 = vst [vmem:[#allocation665_spill] sm:$0xff] %v8115_v35  ;;  %v997_v35 = vld [vmem:[%s5217_s21 + $0x1728] sm:$0xff]  ;;  %v998_v0 = vld [vmem:[%s5217_s21 + $0x1730] sm:$0xff] }
 0x214   : > { %13151 = vst [vmem:[#allocation666_spill] sm:$0xff] %v8122_v4  ;;  %13152 = vst [vmem:[#allocation667_spill] sm:$0xff] %v8125_v14  ;;  %v1001_v14 = vld [vmem:[%s5217_s21 + $0x1748] sm:$0xff]  ;;  %v1002_v4 = vld [vmem:[%s5217_s21 + $0x1750] sm:$0xff] }
 0x215   : > { %13153 = vst [vmem:[#allocation668_spill] sm:$0xff] %v8128_v8  ;;  %13154 = vst [vmem:[#allocation669_spill] sm:$0xff] %v8131_v32  ;;  %v8149_v32 = vpop.permute.xlu1 %1429  ;;  %v1000_v8 = vld [vmem:[%s5217_s21 + $0x1740] sm:$0xff]  ;;  %v1007_v48 = vld [vmem:[%s5217_s21 + $0x1778] sm:$0xff] }
 0x216   : > { %13155 = vst [vmem:[#allocation670_spill] sm:$0xff] %v8138_v60  ;;  %13156 = vst [vmem:[#allocation671_spill] sm:$0xff] %v8141_v52  ;;  %v8156_v60 = vmul.f32 %v8019_v12, %v920_v61  ;;  %v1006_v52 = vld [vmem:[%s5217_s21 + $0x1770] sm:$0xff]  ;;  %v8172_v61 = vmul.f32 %v8019_v12, %v924_v17  ;;  %v1013_v17 = vld [vmem:[%s5217_s21 + $0x17a8] sm:$0xff]  ;;  %v8192_v44 = vmul.f32 %v8149_v32, %v992_v24 }
 0x217   : > { %13157 = vst [vmem:[#allocation672_spill] sm:$0xff] %v8144_v50  ;;  %13158 = vst [vmem:[#allocation673_spill] sm:$0xff] %v8147_v38  ;;  %v1004_v38 = vld [vmem:[%s5217_s21 + $0x1760] sm:$0xff]  ;;  %v1005_v50 = vld [vmem:[%s5217_s21 + $0x1768] sm:$0xff]  ;;  %v8198_v12 = vmul.f32 %v8149_v32, %v994_v21  ;;  %v8201_v11 = vmul.f32 %v8149_v32, %v995_v41  ;;  %v8208_v40 = vmul.f32 %v8149_v32, %v996_v31 }
 0x218   : > { %13159 = vst [vmem:[#allocation674_spill] sm:$0xff] %v8156_v60  ;;  %13160 = vst [vmem:[#allocation675_spill] sm:$0xff] %v8159_v36  ;;  %v1010_v36 = vld [vmem:[%s5217_s21 + $0x1790] sm:$0xff]  ;;  %v1011_v60 = vld [vmem:[%s5217_s21 + $0x1798] sm:$0xff]  ;;  %v8211_v24 = vmul.f32 %v8149_v32, %v997_v35  ;;  %v8217_v21 = vmul.f32 %v8149_v32, %v999_v13  ;;  %v8224_v31 = vmul.f32 %v8149_v32, %v1000_v8 }
 0x219   : > { %13161 = vst [vmem:[#allocation676_spill] sm:$0xff] %v8162_v18  ;;  %13162 = vst [vmem:[#allocation677_spill] sm:$0xff] %v8165_v23  ;;  %v1008_v23 = vld [vmem:[%s5217_s21 + $0x1780] sm:$0xff]  ;;  %v1009_v18 = vld [vmem:[%s5217_s21 + $0x1788] sm:$0xff]  ;;  %v8227_v35 = vmul.f32 %v8149_v32, %v1001_v14  ;;  %v8233_v13 = vmul.f32 %v8149_v32, %v1003_v7  ;;  %v8242_v8 = vmul.f32 %v8149_v32, %v1006_v52 }
 0x21a   : > { %13163 = vst [vmem:[#allocation678_spill] sm:$0xff] %v8172_v61  ;;  %13164 = vst [vmem:[#allocation679_spill] sm:$0xff] %v8175_v33  ;;  %v1014_v61 = vld [vmem:[%s5217_s21 + $0x17b0] sm:$0xff]  ;;  %v1017_v33 = vld [vmem:[%s5217_s21 + $0x17c8] sm:$0xff]  ;;  %v8245_v14 = vmul.f32 %v8149_v32, %v1007_v48  ;;  %v8258_v52 = vmul.f32 %v8149_v32, %v1010_v36  ;;  %v8261_v48 = vmul.f32 %v8149_v32, %v1011_v60 }
 0x21b   : > { %13165 = vst [vmem:[#allocation680_spill] sm:$0xff] %v8178_v9  ;;  %13166 = vst [vmem:[#allocation681_spill] sm:$0xff] %v8181_v51  ;;  %v8195_v9 = vmul.f32 %v8149_v32, %v993_v57  ;;  %v1016_v51 = vld [vmem:[%s5217_s21 + $0x17c0] sm:$0xff]  ;;  %v1019_v59 = vld [vmem:[%s5217_s21 + $0x17d8] sm:$0xff]  ;;  %v8214_v57 = vmul.f32 %v8149_v32, %v998_v0  ;;  %v8230_v0 = vmul.f32 %v8149_v32, %v1002_v4 }
 0x21c   : > { %13167 = vst [vmem:[#allocation682_spill] sm:$0xff] %v8192_v44  ;;  %13169 = vst [vmem:[#allocation684_spill] sm:$0xff] %v8198_v12  ;;  %v1020_v41 = vld [vmem:[%s5217_s21 + $0x17e0] sm:$0xff]  ;;  %v1022_v12 = vld [vmem:[%s5217_s21 + $0x17f0] sm:$0xff]  ;;  %v8274_v36 = vmul.f32 %v8149_v32, %v1014_v61  ;;  %v8277_v60 = vmul.f32 %v8149_v32, %v1015_v20  ;;  %v8289_v61 = vmul.f32 %v8149_v32, %v1017_v33 }
 0x21d   : > { %13168 = vst [vmem:[#allocation683_spill] sm:$0xff] %v8195_v9  ;;  %13170 = vst [vmem:[#allocation685_spill] sm:$0xff] %v8201_v11  ;;  %v1021_v11 = vld [vmem:[%s5217_s21 + $0x17e8] sm:$0xff]  ;;  %v1023_v9 = vld [vmem:[%s5217_s21 + $0x17f8] sm:$0xff]  ;;  %v8295_v20 = vmul.f32 %v8149_v32, %v1019_v59 }
 0x21e   : > { %13171 = vst [vmem:[#allocation686_spill] sm:$0xff] %v8208_v40  ;;  %13172 = vst [vmem:[#allocation687_spill] sm:$0xff] %v8211_v24  ;;  %v961_v4 = vld [vmem:[%s5217_s21 + $0x1608] sm:$0xff]  ;;  %v963_v7 = vld [vmem:[%s5217_s21 + $0x1618] sm:$0xff]  ;;  %v8305_v33 = vmul.f32 %v8149_v32, %v1021_v11  ;;  %v8311_v59 = vmul.f32 %v8149_v32, %v1023_v9 }
 0x21f   : > { %13173 = vst [vmem:[#allocation688_spill] sm:$0xff] %v8214_v57  ;;  %13174 = vst [vmem:[#allocation689_spill] sm:$0xff] %v8217_v21  ;;  %v8236_v21 = vmul.f32 %v8149_v32, %v1004_v38  ;;  %v8239_v57 = vmul.f32 %v8149_v32, %v1005_v50  ;;  %v8255_v50 = vmul.f32 %v8149_v32, %v1009_v18  ;;  %v964_v38 = vld [vmem:[%s5217_s21 + $0x1620] sm:$0xff]  ;;  %v983_v11 = vld [vmem:[%s5217_s21 + $0x16b8] sm:$0xff] }
 0x220   : > { %13175 = vst [vmem:[#allocation690_spill] sm:$0xff] %v8224_v31  ;;  %13176 = vst [vmem:[#allocation691_spill] sm:$0xff] %v8227_v35  ;;  %v960_v35 = vld [vmem:[%s5217_s21 + $0x1600] sm:$0xff]  ;;  %v8271_v18 = vmul.f32 %v8149_v32, %v1013_v17  ;;  %v8292_v17 = vmul.f32 %v8149_v32, %v1018_v58  ;;  %v8308_v58 = vmul.f32 %v8149_v32, %v1022_v12  ;;  %v986_v24 = vld [vmem:[%s5217_s21 + $0x16d0] sm:$0xff] }
 0x221   : > { %13177 = vst [vmem:[#allocation692_spill] sm:$0xff] %v8230_v0  ;;  %13178 = vst [vmem:[#allocation693_spill] sm:$0xff] %v8233_v13  ;;  %v962_v0 = vld [vmem:[%s5217_s21 + $0x1610] sm:$0xff]  ;;  %v8252_v13 = vmul.f32 %v8149_v32, %v1008_v23  ;;  %v8268_v23 = vmul.f32 %v8149_v32, %v1012_v39  ;;  %v971_v39 = vld [vmem:[%s5217_s21 + $0x1658] sm:$0xff] }
 0x222   : > { %13179 = vst [vmem:[#allocation694_spill] sm:$0xff] %v8236_v21  ;;  %13180 = vst [vmem:[#allocation695_spill] sm:$0xff] %v8239_v57  ;;  %v967_v57 = vld [vmem:[%s5217_s21 + $0x1638] sm:$0xff]  ;;  %v980_v31 = vld [vmem:[%s5217_s21 + $0x16a0] sm:$0xff] }
 0x223   : > { %13181 = vst [vmem:[#allocation696_spill] sm:$0xff] %v8242_v8  ;;  %13182 = vst [vmem:[#allocation697_spill] sm:$0xff] %v8245_v14  ;;  %v965_v14 = vld [vmem:[%s5217_s21 + $0x1628] sm:$0xff]  ;;  %v966_v8 = vld [vmem:[%s5217_s21 + $0x1630] sm:$0xff] }
 0x224   : > { %13183 = vst [vmem:[#allocation698_spill] sm:$0xff] %v8252_v13  ;;  %13184 = vst [vmem:[#allocation699_spill] sm:$0xff] %v8255_v50  ;;  %v969_v50 = vld [vmem:[%s5217_s21 + $0x1648] sm:$0xff]  ;;  %v970_v13 = vld [vmem:[%s5217_s21 + $0x1650] sm:$0xff] }
 0x225   : > { %13185 = vst [vmem:[#allocation700_spill] sm:$0xff] %v8258_v52  ;;  %13186 = vst [vmem:[#allocation701_spill] sm:$0xff] %v8261_v48  ;;  %v8279_v48 = vpop.permute.xlu0 %1424  ;;  %v968_v52 = vld [vmem:[%s5217_s21 + $0x1640] sm:$0xff]  ;;  %v975_v21 = vld [vmem:[%s5217_s21 + $0x1678] sm:$0xff] }
 0x226   : > { %13187 = vst [vmem:[#allocation702_spill] sm:$0xff] %v8268_v23  ;;  %13188 = vst [vmem:[#allocation703_spill] sm:$0xff] %v8271_v18  ;;  %v8286_v23 = vmul.f32 %v8149_v32, %v1016_v51  ;;  %v974_v18 = vld [vmem:[%s5217_s21 + $0x1670] sm:$0xff]  ;;  %v8302_v51 = vmul.f32 %v8149_v32, %v1020_v41  ;;  %v981_v41 = vld [vmem:[%s5217_s21 + $0x16a8] sm:$0xff]  ;;  %v8322_v12 = vmul.f32 %v8279_v48, %v960_v35 }
 0x227   : > { %13189 = vst [vmem:[#allocation704_spill] sm:$0xff] %v8274_v36  ;;  %13190 = vst [vmem:[#allocation705_spill] sm:$0xff] %v8277_v60  ;;  %v972_v60 = vld [vmem:[%s5217_s21 + $0x1660] sm:$0xff]  ;;  %v973_v36 = vld [vmem:[%s5217_s21 + $0x1668] sm:$0xff]  ;;  %v8328_v32 = vmul.f32 %v8279_v48, %v962_v0  ;;  %v8331_v9 = vmul.f32 %v8279_v48, %v963_v7  ;;  %v8338_v44 = vmul.f32 %v8279_v48, %v964_v38 }
 0x228   : > { %13191 = vst [vmem:[#allocation706_spill] sm:$0xff] %v8286_v23  ;;  %13192 = vst [vmem:[#allocation707_spill] sm:$0xff] %v8289_v61  ;;  %v978_v61 = vld [vmem:[%s5217_s21 + $0x1690] sm:$0xff]  ;;  %v979_v23 = vld [vmem:[%s5217_s21 + $0x1698] sm:$0xff]  ;;  %v8341_v35 = vmul.f32 %v8279_v48, %v965_v14  ;;  %v8347_v0 = vmul.f32 %v8279_v48, %v967_v57  ;;  %v8354_v38 = vmul.f32 %v8279_v48, %v968_v52 }
 0x229   : > { %13193 = vst [vmem:[#allocation708_spill] sm:$0xff] %v8292_v17  ;;  %13194 = vst [vmem:[#allocation709_spill] sm:$0xff] %v8295_v20  ;;  %v976_v20 = vld [vmem:[%s5217_s21 + $0x1680] sm:$0xff]  ;;  %v977_v17 = vld [vmem:[%s5217_s21 + $0x1688] sm:$0xff]  ;;  %v8357_v14 = vmul.f32 %v8279_v48, %v969_v50  ;;  %v8363_v57 = vmul.f32 %v8279_v48, %v971_v39  ;;  %v8372_v52 = vmul.f32 %v8279_v48, %v974_v18 }
 0x22a   : > { %13195 = vst [vmem:[#allocation710_spill] sm:$0xff] %v8302_v51  ;;  %13196 = vst [vmem:[#allocation711_spill] sm:$0xff] %v8305_v33  ;;  %v982_v51 = vld [vmem:[%s5217_s21 + $0x16b0] sm:$0xff]  ;;  %v985_v33 = vld [vmem:[%s5217_s21 + $0x16c8] sm:$0xff]  ;;  %v8375_v50 = vmul.f32 %v8279_v48, %v975_v21  ;;  %v8388_v18 = vmul.f32 %v8279_v48, %v978_v61  ;;  %v8391_v21 = vmul.f32 %v8279_v48, %v979_v23 }
 0x22b   : > { %13197 = vst [vmem:[#allocation712_spill] sm:$0xff] %v8308_v58  ;;  %13198 = vst [vmem:[#allocation713_spill] sm:$0xff] %v8311_v59  ;;  %v8325_v58 = vmul.f32 %v8279_v48, %v961_v4  ;;  %v984_v59 = vld [vmem:[%s5217_s21 + $0x16c0] sm:$0xff]  ;;  %v987_v40 = vld [vmem:[%s5217_s21 + $0x16d8] sm:$0xff]  ;;  %v8344_v4 = vmul.f32 %v8279_v48, %v966_v8  ;;  %v8360_v8 = vmul.f32 %v8279_v48, %v970_v13 }
 0x22c   : > { %13199 = vst [vmem:[#allocation714_spill] sm:$0xff] %v8322_v12  ;;  %13201 = vst [vmem:[#allocation716_spill] sm:$0xff] %v8328_v32  ;;  %v988_v7 = vld [vmem:[%s5217_s21 + $0x16e0] sm:$0xff]  ;;  %v990_v32 = vld [vmem:[%s5217_s21 + $0x16f0] sm:$0xff]  ;;  %v8404_v61 = vmul.f32 %v8279_v48, %v982_v51  ;;  %v8407_v23 = vmul.f32 %v8279_v48, %v983_v11  ;;  %v8419_v51 = vmul.f32 %v8279_v48, %v985_v33 }
 0x22d   : > { %13200 = vst [vmem:[#allocation715_spill] sm:$0xff] %v8325_v58  ;;  %13202 = vst [vmem:[#allocation717_spill] sm:$0xff] %v8331_v9  ;;  %v989_v9 = vld [vmem:[%s5217_s21 + $0x16e8] sm:$0xff]  ;;  %v991_v58 = vld [vmem:[%s5217_s21 + $0x16f8] sm:$0xff]  ;;  %v8425_v11 = vmul.f32 %v8279_v48, %v987_v40 }
 0x22e   : > { %13203 = vst [vmem:[#allocation718_spill] sm:$0xff] %v8338_v44  ;;  %13204 = vst [vmem:[#allocation719_spill] sm:$0xff] %v8341_v35  ;;  %v1057_v13 = vld [vmem:[%s5217_s21 + $0x1908] sm:$0xff]  ;;  %v1059_v39 = vld [vmem:[%s5217_s21 + $0x1918] sm:$0xff]  ;;  %v8435_v33 = vmul.f32 %v8279_v48, %v989_v9  ;;  %v8441_v40 = vmul.f32 %v8279_v48, %v991_v58 }
 0x22f   : > { %13205 = vst [vmem:[#allocation720_spill] sm:$0xff] %v8344_v4  ;;  %13206 = vst [vmem:[#allocation721_spill] sm:$0xff] %v8347_v0  ;;  %v8366_v0 = vmul.f32 %v8279_v48, %v972_v60  ;;  %v8369_v4 = vmul.f32 %v8279_v48, %v973_v36  ;;  %v8385_v36 = vmul.f32 %v8279_v48, %v977_v17  ;;  %v1060_v60 = vld [vmem:[%s5217_s21 + $0x1920] sm:$0xff]  ;;  %v1079_v9 = vld [vmem:[%s5217_s21 + $0x19b8] sm:$0xff] }
 0x230   : > { %13207 = vst [vmem:[#allocation722_spill] sm:$0xff] %v8354_v38  ;;  %13208 = vst [vmem:[#allocation723_spill] sm:$0xff] %v8357_v14  ;;  %v1056_v14 = vld [vmem:[%s5217_s21 + $0x1900] sm:$0xff]  ;;  %v8401_v17 = vmul.f32 %v8279_v48, %v981_v41  ;;  %v8422_v41 = vmul.f32 %v8279_v48, %v986_v24  ;;  %v8438_v24 = vmul.f32 %v8279_v48, %v990_v32  ;;  %v1082_v35 = vld [vmem:[%s5217_s21 + $0x19d0] sm:$0xff] }
 0x231   : > { %13209 = vst [vmem:[#allocation724_spill] sm:$0xff] %v8360_v8  ;;  %13210 = vst [vmem:[#allocation725_spill] sm:$0xff] %v8363_v57  ;;  %v1058_v8 = vld [vmem:[%s5217_s21 + $0x1910] sm:$0xff]  ;;  %v8382_v57 = vmul.f32 %v8279_v48, %v976_v20  ;;  %v8398_v20 = vmul.f32 %v8279_v48, %v980_v31  ;;  %v1067_v31 = vld [vmem:[%s5217_s21 + $0x1958] sm:$0xff] }
 0x232   : > { %13211 = vst [vmem:[#allocation726_spill] sm:$0xff] %v8366_v0  ;;  %13212 = vst [vmem:[#allocation727_spill] sm:$0xff] %v8369_v4  ;;  %v1063_v4 = vld [vmem:[%s5217_s21 + $0x1938] sm:$0xff]  ;;  %v1076_v38 = vld [vmem:[%s5217_s21 + $0x19a0] sm:$0xff] }
 0x233   : > { %13213 = vst [vmem:[#allocation728_spill] sm:$0xff] %v8372_v52  ;;  %13214 = vst [vmem:[#allocation729_spill] sm:$0xff] %v8375_v50  ;;  %v1061_v50 = vld [vmem:[%s5217_s21 + $0x1928] sm:$0xff]  ;;  %v1062_v52 = vld [vmem:[%s5217_s21 + $0x1930] sm:$0xff] }
 0x234   : > { %13215 = vst [vmem:[#allocation730_spill] sm:$0xff] %v8382_v57  ;;  %13216 = vst [vmem:[#allocation731_spill] sm:$0xff] %v8385_v36  ;;  %v1065_v36 = vld [vmem:[%s5217_s21 + $0x1948] sm:$0xff]  ;;  %v1066_v57 = vld [vmem:[%s5217_s21 + $0x1950] sm:$0xff] }
 0x235   : > { %13217 = vst [vmem:[#allocation732_spill] sm:$0xff] %v8388_v18  ;;  %13218 = vst [vmem:[#allocation733_spill] sm:$0xff] %v8391_v21  ;;  %v8409_v21 = vpop.permute.xlu1 %1439  ;;  %v1064_v18 = vld [vmem:[%s5217_s21 + $0x1940] sm:$0xff]  ;;  %v1071_v0 = vld [vmem:[%s5217_s21 + $0x1978] sm:$0xff] }
 0x236   : > { %13219 = vst [vmem:[#allocation734_spill] sm:$0xff] %v8398_v20  ;;  %13220 = vst [vmem:[#allocation735_spill] sm:$0xff] %v8401_v17  ;;  %v8416_v20 = vmul.f32 %v8279_v48, %v984_v59  ;;  %v1070_v17 = vld [vmem:[%s5217_s21 + $0x1970] sm:$0xff]  ;;  %v8432_v59 = vmul.f32 %v8279_v48, %v988_v7  ;;  %v1077_v7 = vld [vmem:[%s5217_s21 + $0x19a8] sm:$0xff]  ;;  %v8452_v32 = vmul.f32 %v8409_v21, %v1056_v14 }
 0x237   : > { %13221 = vst [vmem:[#allocation736_spill] sm:$0xff] %v8404_v61  ;;  %13222 = vst [vmem:[#allocation737_spill] sm:$0xff] %v8407_v23  ;;  %v1068_v23 = vld [vmem:[%s5217_s21 + $0x1960] sm:$0xff]  ;;  %v1069_v61 = vld [vmem:[%s5217_s21 + $0x1968] sm:$0xff]  ;;  %v8458_v48 = vmul.f32 %v8409_v21, %v1058_v8  ;;  %v8461_v58 = vmul.f32 %v8409_v21, %v1059_v39  ;;  %v8468_v12 = vmul.f32 %v8409_v21, %v1060_v60 }
 0x238   : > { %13223 = vst [vmem:[#allocation738_spill] sm:$0xff] %v8416_v20  ;;  %13224 = vst [vmem:[#allocation739_spill] sm:$0xff] %v8419_v51  ;;  %v1074_v51 = vld [vmem:[%s5217_s21 + $0x1990] sm:$0xff]  ;;  %v1075_v20 = vld [vmem:[%s5217_s21 + $0x1998] sm:$0xff]  ;;  %v8471_v14 = vmul.f32 %v8409_v21, %v1061_v50  ;;  %v8477_v8 = vmul.f32 %v8409_v21, %v1063_v4  ;;  %v8484_v60 = vmul.f32 %v8409_v21, %v1064_v18 }
 0x239   : > { %13225 = vst [vmem:[#allocation740_spill] sm:$0xff] %v8422_v41  ;;  %13226 = vst [vmem:[#allocation741_spill] sm:$0xff] %v8425_v11  ;;  %v1072_v11 = vld [vmem:[%s5217_s21 + $0x1980] sm:$0xff]  ;;  %v1073_v41 = vld [vmem:[%s5217_s21 + $0x1988] sm:$0xff]  ;;  %v8487_v50 = vmul.f32 %v8409_v21, %v1065_v36  ;;  %v8493_v4 = vmul.f32 %v8409_v21, %v1067_v31  ;;  %v8502_v18 = vmul.f32 %v8409_v21, %v1070_v17 }
 0x23a   : > { %13227 = vst [vmem:[#allocation742_spill] sm:$0xff] %v8432_v59  ;;  %13228 = vst [vmem:[#allocation743_spill] sm:$0xff] %v8435_v33  ;;  %v1078_v59 = vld [vmem:[%s5217_s21 + $0x19b0] sm:$0xff]  ;;  %v1081_v33 = vld [vmem:[%s5217_s21 + $0x19c8] sm:$0xff]  ;;  %v8505_v36 = vmul.f32 %v8409_v21, %v1071_v0  ;;  %v8518_v17 = vmul.f32 %v8409_v21, %v1074_v51  ;;  %v8521_v0 = vmul.f32 %v8409_v21, %v1075_v20 }
 0x23b   : > { %13229 = vst [vmem:[#allocation744_spill] sm:$0xff] %v8438_v24  ;;  %13230 = vst [vmem:[#allocation745_spill] sm:$0xff] %v8441_v40  ;;  %v8455_v24 = vmul.f32 %v8409_v21, %v1057_v13  ;;  %v1080_v40 = vld [vmem:[%s5217_s21 + $0x19c0] sm:$0xff]  ;;  %v1083_v44 = vld [vmem:[%s5217_s21 + $0x19d8] sm:$0xff]  ;;  %v8474_v13 = vmul.f32 %v8409_v21, %v1062_v52  ;;  %v8490_v52 = vmul.f32 %v8409_v21, %v1066_v57 }
 0x23c   : > { %13231 = vst [vmem:[#allocation746_spill] sm:$0xff] %v8452_v32  ;;  %13233 = vst [vmem:[#allocation748_spill] sm:$0xff] %v8458_v48  ;;  %v1084_v39 = vld [vmem:[%s5217_s21 + $0x19e0] sm:$0xff]  ;;  %v1086_v48 = vld [vmem:[%s5217_s21 + $0x19f0] sm:$0xff]  ;;  %v8534_v51 = vmul.f32 %v8409_v21, %v1078_v59  ;;  %v8537_v20 = vmul.f32 %v8409_v21, %v1079_v9  ;;  %v8549_v59 = vmul.f32 %v8409_v21, %v1081_v33 }
 0x23d   : > { %13232 = vst [vmem:[#allocation747_spill] sm:$0xff] %v8455_v24  ;;  %13234 = vst [vmem:[#allocation749_spill] sm:$0xff] %v8461_v58  ;;  %v1085_v58 = vld [vmem:[%s5217_s21 + $0x19e8] sm:$0xff]  ;;  %v1087_v24 = vld [vmem:[%s5217_s21 + $0x19f8] sm:$0xff]  ;;  %v8555_v9 = vmul.f32 %v8409_v21, %v1083_v44 }
 0x23e   : > { %13235 = vst [vmem:[#allocation750_spill] sm:$0xff] %v8468_v12  ;;  %13236 = vst [vmem:[#allocation751_spill] sm:$0xff] %v8471_v14  ;;  %v1025_v57 = vld [vmem:[%s5217_s21 + $0x1808] sm:$0xff]  ;;  %v1027_v31 = vld [vmem:[%s5217_s21 + $0x1818] sm:$0xff]  ;;  %v8565_v33 = vmul.f32 %v8409_v21, %v1085_v58  ;;  %v8571_v44 = vmul.f32 %v8409_v21, %v1087_v24 }
 0x23f   : > { %13237 = vst [vmem:[#allocation752_spill] sm:$0xff] %v8474_v13  ;;  %13238 = vst [vmem:[#allocation753_spill] sm:$0xff] %v8477_v8  ;;  %v8496_v8 = vmul.f32 %v8409_v21, %v1068_v23  ;;  %v8499_v13 = vmul.f32 %v8409_v21, %v1069_v61  ;;  %v8515_v61 = vmul.f32 %v8409_v21, %v1073_v41  ;;  %v1028_v23 = vld [vmem:[%s5217_s21 + $0x1820] sm:$0xff]  ;;  %v1047_v58 = vld [vmem:[%s5217_s21 + $0x18b8] sm:$0xff] }
 0x240   : > { %13239 = vst [vmem:[#allocation754_spill] sm:$0xff] %v8484_v60  ;;  %13240 = vst [vmem:[#allocation755_spill] sm:$0xff] %v8487_v50  ;;  %v1024_v50 = vld [vmem:[%s5217_s21 + $0x1800] sm:$0xff]  ;;  %v8531_v41 = vmul.f32 %v8409_v21, %v1077_v7  ;;  %v8552_v7 = vmul.f32 %v8409_v21, %v1082_v35  ;;  %v8568_v35 = vmul.f32 %v8409_v21, %v1086_v48  ;;  %v1050_v14 = vld [vmem:[%s5217_s21 + $0x18d0] sm:$0xff] }
 0x241   : > { %13241 = vst [vmem:[#allocation756_spill] sm:$0xff] %v8490_v52  ;;  %13242 = vst [vmem:[#allocation757_spill] sm:$0xff] %v8493_v4  ;;  %v1026_v52 = vld [vmem:[%s5217_s21 + $0x1810] sm:$0xff]  ;;  %v8512_v4 = vmul.f32 %v8409_v21, %v1072_v11  ;;  %v8528_v11 = vmul.f32 %v8409_v21, %v1076_v38  ;;  %v1035_v38 = vld [vmem:[%s5217_s21 + $0x1858] sm:$0xff] }
 0x242   : > { %13243 = vst [vmem:[#allocation758_spill] sm:$0xff] %v8496_v8  ;;  %13244 = vst [vmem:[#allocation759_spill] sm:$0xff] %v8499_v13  ;;  %v1031_v13 = vld [vmem:[%s5217_s21 + $0x1838] sm:$0xff]  ;;  %v1044_v60 = vld [vmem:[%s5217_s21 + $0x18a0] sm:$0xff] }
 0x243   : > { %13245 = vst [vmem:[#allocation760_spill] sm:$0xff] %v8502_v18  ;;  %13246 = vst [vmem:[#allocation761_spill] sm:$0xff] %v8505_v36  ;;  %v1029_v36 = vld [vmem:[%s5217_s21 + $0x1828] sm:$0xff]  ;;  %v1030_v18 = vld [vmem:[%s5217_s21 + $0x1830] sm:$0xff] }
 0x244   : > { %13247 = vst [vmem:[#allocation762_spill] sm:$0xff] %v8512_v4  ;;  %13248 = vst [vmem:[#allocation763_spill] sm:$0xff] %v8515_v61  ;;  %v1033_v61 = vld [vmem:[%s5217_s21 + $0x1848] sm:$0xff]  ;;  %v1034_v4 = vld [vmem:[%s5217_s21 + $0x1850] sm:$0xff] }
 0x245   : > { %13249 = vst [vmem:[#allocation764_spill] sm:$0xff] %v8518_v17  ;;  %13250 = vst [vmem:[#allocation765_spill] sm:$0xff] %v8521_v0  ;;  %v8539_v0 = vpop.permute.xlu0 %1434  ;;  %v1032_v17 = vld [vmem:[%s5217_s21 + $0x1840] sm:$0xff]  ;;  %v1039_v8 = vld [vmem:[%s5217_s21 + $0x1878] sm:$0xff] }
 0x246   : > { %13251 = vst [vmem:[#allocation766_spill] sm:$0xff] %v8528_v11  ;;  %13252 = vst [vmem:[#allocation767_spill] sm:$0xff] %v8531_v41  ;;  %v8546_v11 = vmul.f32 %v8409_v21, %v1080_v40  ;;  %v1038_v41 = vld [vmem:[%s5217_s21 + $0x1870] sm:$0xff]  ;;  %v8562_v40 = vmul.f32 %v8409_v21, %v1084_v39  ;;  %v1045_v39 = vld [vmem:[%s5217_s21 + $0x18a8] sm:$0xff]  ;;  %v8582_v48 = vmul.f32 %v8539_v0, %v1024_v50 }
 0x247   : > { %13253 = vst [vmem:[#allocation768_spill] sm:$0xff] %v8534_v51  ;;  %13254 = vst [vmem:[#allocation769_spill] sm:$0xff] %v8537_v20  ;;  %v1036_v20 = vld [vmem:[%s5217_s21 + $0x1860] sm:$0xff]  ;;  %v1037_v51 = vld [vmem:[%s5217_s21 + $0x1868] sm:$0xff]  ;;  %v8588_v21 = vmul.f32 %v8539_v0, %v1026_v52  ;;  %v8591_v24 = vmul.f32 %v8539_v0, %v1027_v31  ;;  %v8598_v32 = vmul.f32 %v8539_v0, %v1028_v23 }
 0x248   : > { %13255 = vst [vmem:[#allocation770_spill] sm:$0xff] %v8546_v11  ;;  %13256 = vst [vmem:[#allocation771_spill] sm:$0xff] %v8549_v59  ;;  %v1042_v59 = vld [vmem:[%s5217_s21 + $0x1890] sm:$0xff]  ;;  %v1043_v11 = vld [vmem:[%s5217_s21 + $0x1898] sm:$0xff]  ;;  %v8601_v50 = vmul.f32 %v8539_v0, %v1029_v36  ;;  %v8607_v52 = vmul.f32 %v8539_v0, %v1031_v13  ;;  %v8614_v23 = vmul.f32 %v8539_v0, %v1032_v17 }
 0x249   : > { %13257 = vst [vmem:[#allocation772_spill] sm:$0xff] %v8552_v7  ;;  %13258 = vst [vmem:[#allocation773_spill] sm:$0xff] %v8555_v9  ;;  %v1040_v9 = vld [vmem:[%s5217_s21 + $0x1880] sm:$0xff]  ;;  %v1041_v7 = vld [vmem:[%s5217_s21 + $0x1888] sm:$0xff]  ;;  %v8617_v36 = vmul.f32 %v8539_v0, %v1033_v61  ;;  %v8623_v13 = vmul.f32 %v8539_v0, %v1035_v38  ;;  %v8632_v17 = vmul.f32 %v8539_v0, %v1038_v41 }
 0x24a   : > { %13259 = vst [vmem:[#allocation774_spill] sm:$0xff] %v8562_v40  ;;  %13260 = vst [vmem:[#allocation775_spill] sm:$0xff] %v8565_v33  ;;  %v1046_v40 = vld [vmem:[%s5217_s21 + $0x18b0] sm:$0xff]  ;;  %v1049_v33 = vld [vmem:[%s5217_s21 + $0x18c8] sm:$0xff]  ;;  %v8635_v61 = vmul.f32 %v8539_v0, %v1039_v8  ;;  %v8648_v41 = vmul.f32 %v8539_v0, %v1042_v59  ;;  %v8651_v8 = vmul.f32 %v8539_v0, %v1043_v11 }
 0x24b   : > { %13261 = vst [vmem:[#allocation776_spill] sm:$0xff] %v8568_v35  ;;  %13262 = vst [vmem:[#allocation777_spill] sm:$0xff] %v8571_v44  ;;  %v8585_v35 = vmul.f32 %v8539_v0, %v1025_v57  ;;  %v1048_v44 = vld [vmem:[%s5217_s21 + $0x18c0] sm:$0xff]  ;;  %v1051_v12 = vld [vmem:[%s5217_s21 + $0x18d8] sm:$0xff]  ;;  %v8604_v57 = vmul.f32 %v8539_v0, %v1030_v18  ;;  %v8620_v18 = vmul.f32 %v8539_v0, %v1034_v4 }
 0x24c   : > { %13263 = vst [vmem:[#allocation778_spill] sm:$0xff] %v8582_v48  ;;  %13265 = vst [vmem:[#allocation780_spill] sm:$0xff] %v8588_v21  ;;  %v1052_v31 = vld [vmem:[%s5217_s21 + $0x18e0] sm:$0xff]  ;;  %v1054_v21 = vld [vmem:[%s5217_s21 + $0x18f0] sm:$0xff]  ;;  %v8664_v59 = vmul.f32 %v8539_v0, %v1046_v40  ;;  %v8667_v11 = vmul.f32 %v8539_v0, %v1047_v58  ;;  %v8679_v40 = vmul.f32 %v8539_v0, %v1049_v33 }
 0x24d   : > { %13264 = vst [vmem:[#allocation779_spill] sm:$0xff] %v8585_v35  ;;  %13266 = vst [vmem:[#allocation781_spill] sm:$0xff] %v8591_v24  ;;  %v1053_v24 = vld [vmem:[%s5217_s21 + $0x18e8] sm:$0xff]  ;;  %v1055_v35 = vld [vmem:[%s5217_s21 + $0x18f8] sm:$0xff]  ;;  %v8685_v58 = vmul.f32 %v8539_v0, %v1051_v12 }
 0x24e   : > { %13267 = vst [vmem:[#allocation782_spill] sm:$0xff] %v8598_v32  ;;  %13268 = vst [vmem:[#allocation783_spill] sm:$0xff] %v8601_v50  ;;  %v1121_v4 = vld [vmem:[%s5217_s21 + $0x1b08] sm:$0xff]  ;;  %v1123_v38 = vld [vmem:[%s5217_s21 + $0x1b18] sm:$0xff]  ;;  %v8695_v33 = vmul.f32 %v8539_v0, %v1053_v24  ;;  %v8701_v12 = vmul.f32 %v8539_v0, %v1055_v35 }
 0x24f   : > { %13269 = vst [vmem:[#allocation784_spill] sm:$0xff] %v8604_v57  ;;  %13270 = vst [vmem:[#allocation785_spill] sm:$0xff] %v8607_v52  ;;  %v8626_v52 = vmul.f32 %v8539_v0, %v1036_v20  ;;  %v8629_v57 = vmul.f32 %v8539_v0, %v1037_v51  ;;  %v8645_v51 = vmul.f32 %v8539_v0, %v1041_v7  ;;  %v1124_v20 = vld [vmem:[%s5217_s21 + $0x1b20] sm:$0xff]  ;;  %v1143_v24 = vld [vmem:[%s5217_s21 + $0x1bb8] sm:$0xff] }
 0x250   : > { %13271 = vst [vmem:[#allocation786_spill] sm:$0xff] %v8614_v23  ;;  %13272 = vst [vmem:[#allocation787_spill] sm:$0xff] %v8617_v36  ;;  %v1120_v36 = vld [vmem:[%s5217_s21 + $0x1b00] sm:$0xff]  ;;  %v8661_v7 = vmul.f32 %v8539_v0, %v1045_v39  ;;  %v8682_v39 = vmul.f32 %v8539_v0, %v1050_v14  ;;  %v8698_v14 = vmul.f32 %v8539_v0, %v1054_v21  ;;  %v1146_v50 = vld [vmem:[%s5217_s21 + $0x1bd0] sm:$0xff] }
 0x251   : > { %13273 = vst [vmem:[#allocation788_spill] sm:$0xff] %v8620_v18  ;;  %13274 = vst [vmem:[#allocation789_spill] sm:$0xff] %v8623_v13  ;;  %v1122_v18 = vld [vmem:[%s5217_s21 + $0x1b10] sm:$0xff]  ;;  %v8642_v13 = vmul.f32 %v8539_v0, %v1040_v9  ;;  %v8658_v9 = vmul.f32 %v8539_v0, %v1044_v60  ;;  %v1131_v60 = vld [vmem:[%s5217_s21 + $0x1b58] sm:$0xff] }
 0x252   : > { %13275 = vst [vmem:[#allocation790_spill] sm:$0xff] %v8626_v52  ;;  %13276 = vst [vmem:[#allocation791_spill] sm:$0xff] %v8629_v57  ;;  %v1127_v57 = vld [vmem:[%s5217_s21 + $0x1b38] sm:$0xff]  ;;  %v1140_v23 = vld [vmem:[%s5217_s21 + $0x1ba0] sm:$0xff] }
 0x253   : > { %13277 = vst [vmem:[#allocation792_spill] sm:$0xff] %v8632_v17  ;;  %13278 = vst [vmem:[#allocation793_spill] sm:$0xff] %v8635_v61  ;;  %v1125_v61 = vld [vmem:[%s5217_s21 + $0x1b28] sm:$0xff]  ;;  %v1126_v17 = vld [vmem:[%s5217_s21 + $0x1b30] sm:$0xff] }
 0x254   : > { %13279 = vst [vmem:[#allocation794_spill] sm:$0xff] %v8642_v13  ;;  %13280 = vst [vmem:[#allocation795_spill] sm:$0xff] %v8645_v51  ;;  %v1129_v51 = vld [vmem:[%s5217_s21 + $0x1b48] sm:$0xff]  ;;  %v1130_v13 = vld [vmem:[%s5217_s21 + $0x1b50] sm:$0xff] }
 0x255   : > { %13281 = vst [vmem:[#allocation796_spill] sm:$0xff] %v8648_v41  ;;  %13282 = vst [vmem:[#allocation797_spill] sm:$0xff] %v8651_v8  ;;  %v8669_v8 = vpop.permute.xlu1 %1449  ;;  %v1128_v41 = vld [vmem:[%s5217_s21 + $0x1b40] sm:$0xff]  ;;  %v1135_v52 = vld [vmem:[%s5217_s21 + $0x1b78] sm:$0xff] }
 0x256   : > { %13283 = vst [vmem:[#allocation798_spill] sm:$0xff] %v8658_v9  ;;  %13284 = vst [vmem:[#allocation799_spill] sm:$0xff] %v8661_v7  ;;  %v8676_v9 = vmul.f32 %v8539_v0, %v1048_v44  ;;  %v1134_v7 = vld [vmem:[%s5217_s21 + $0x1b70] sm:$0xff]  ;;  %v8692_v44 = vmul.f32 %v8539_v0, %v1052_v31  ;;  %v1141_v31 = vld [vmem:[%s5217_s21 + $0x1ba8] sm:$0xff]  ;;  %v8712_v21 = vmul.f32 %v8669_v8, %v1120_v36 }
 0x257   : > { %13285 = vst [vmem:[#allocation800_spill] sm:$0xff] %v8664_v59  ;;  %13286 = vst [vmem:[#allocation801_spill] sm:$0xff] %v8667_v11  ;;  %v1132_v11 = vld [vmem:[%s5217_s21 + $0x1b60] sm:$0xff]  ;;  %v1133_v59 = vld [vmem:[%s5217_s21 + $0x1b68] sm:$0xff]  ;;  %v8718_v0 = vmul.f32 %v8669_v8, %v1122_v18  ;;  %v8721_v35 = vmul.f32 %v8669_v8, %v1123_v38  ;;  %v8728_v48 = vmul.f32 %v8669_v8, %v1124_v20 }
 0x258   : > { %13287 = vst [vmem:[#allocation802_spill] sm:$0xff] %v8676_v9  ;;  %13288 = vst [vmem:[#allocation803_spill] sm:$0xff] %v8679_v40  ;;  %v1138_v40 = vld [vmem:[%s5217_s21 + $0x1b90] sm:$0xff]  ;;  %v1139_v9 = vld [vmem:[%s5217_s21 + $0x1b98] sm:$0xff]  ;;  %v8731_v36 = vmul.f32 %v8669_v8, %v1125_v61  ;;  %v8737_v18 = vmul.f32 %v8669_v8, %v1127_v57  ;;  %v8744_v20 = vmul.f32 %v8669_v8, %v1128_v41 }
 0x259   : > { %13289 = vst [vmem:[#allocation804_spill] sm:$0xff] %v8682_v39  ;;  %13290 = vst [vmem:[#allocation805_spill] sm:$0xff] %v8685_v58  ;;  %v1136_v58 = vld [vmem:[%s5217_s21 + $0x1b80] sm:$0xff]  ;;  %v1137_v39 = vld [vmem:[%s5217_s21 + $0x1b88] sm:$0xff]  ;;  %v8747_v61 = vmul.f32 %v8669_v8, %v1129_v51  ;;  %v8753_v57 = vmul.f32 %v8669_v8, %v1131_v60  ;;  %v8762_v41 = vmul.f32 %v8669_v8, %v1134_v7 }
 0x25a   : > { %13291 = vst [vmem:[#allocation806_spill] sm:$0xff] %v8692_v44  ;;  %13292 = vst [vmem:[#allocation807_spill] sm:$0xff] %v8695_v33  ;;  %v1142_v44 = vld [vmem:[%s5217_s21 + $0x1bb0] sm:$0xff]  ;;  %v1145_v33 = vld [vmem:[%s5217_s21 + $0x1bc8] sm:$0xff]  ;;  %v8765_v51 = vmul.f32 %v8669_v8, %v1135_v52  ;;  %v8778_v7 = vmul.f32 %v8669_v8, %v1138_v40  ;;  %v8781_v52 = vmul.f32 %v8669_v8, %v1139_v9 }
 0x25b   : > { %13293 = vst [vmem:[#allocation808_spill] sm:$0xff] %v8698_v14  ;;  %13294 = vst [vmem:[#allocation809_spill] sm:$0xff] %v8701_v12  ;;  %v8715_v14 = vmul.f32 %v8669_v8, %v1121_v4  ;;  %v1144_v12 = vld [vmem:[%s5217_s21 + $0x1bc0] sm:$0xff]  ;;  %v1147_v32 = vld [vmem:[%s5217_s21 + $0x1bd8] sm:$0xff]  ;;  %v8734_v4 = vmul.f32 %v8669_v8, %v1126_v17  ;;  %v8750_v17 = vmul.f32 %v8669_v8, %v1130_v13 }
 0x25c   : > { %13295 = vst [vmem:[#allocation810_spill] sm:$0xff] %v8712_v21  ;;  %13297 = vst [vmem:[#allocation812_spill] sm:$0xff] %v8718_v0  ;;  %v1148_v38 = vld [vmem:[%s5217_s21 + $0x1be0] sm:$0xff]  ;;  %v1150_v0 = vld [vmem:[%s5217_s21 + $0x1bf0] sm:$0xff]  ;;  %v8794_v40 = vmul.f32 %v8669_v8, %v1142_v44  ;;  %v8797_v9 = vmul.f32 %v8669_v8, %v1143_v24  ;;  %v8809_v44 = vmul.f32 %v8669_v8, %v1145_v33 }
 0x25d   : > { %13296 = vst [vmem:[#allocation811_spill] sm:$0xff] %v8715_v14  ;;  %13298 = vst [vmem:[#allocation813_spill] sm:$0xff] %v8721_v35  ;;  %v1149_v35 = vld [vmem:[%s5217_s21 + $0x1be8] sm:$0xff]  ;;  %v1151_v14 = vld [vmem:[%s5217_s21 + $0x1bf8] sm:$0xff]  ;;  %v8815_v24 = vmul.f32 %v8669_v8, %v1147_v32 }
 0x25e   : > { %13299 = vst [vmem:[#allocation814_spill] sm:$0xff] %v8728_v48  ;;  %13300 = vst [vmem:[#allocation815_spill] sm:$0xff] %v8731_v36  ;;  %v1089_v13 = vld [vmem:[%s5217_s21 + $0x1a08] sm:$0xff]  ;;  %v1091_v60 = vld [vmem:[%s5217_s21 + $0x1a18] sm:$0xff]  ;;  %v8825_v33 = vmul.f32 %v8669_v8, %v1149_v35  ;;  %v8831_v32 = vmul.f32 %v8669_v8, %v1151_v14 }
 0x25f   : > { %13301 = vst [vmem:[#allocation816_spill] sm:$0xff] %v8734_v4  ;;  %13302 = vst [vmem:[#allocation817_spill] sm:$0xff] %v8737_v18  ;;  %v8756_v18 = vmul.f32 %v8669_v8, %v1132_v11  ;;  %v8759_v4 = vmul.f32 %v8669_v8, %v1133_v59  ;;  %v8775_v59 = vmul.f32 %v8669_v8, %v1137_v39  ;;  %v1092_v11 = vld [vmem:[%s5217_s21 + $0x1a20] sm:$0xff]  ;;  %v1111_v35 = vld [vmem:[%s5217_s21 + $0x1ab8] sm:$0xff] }
 0x260   : > { %13303 = vst [vmem:[#allocation818_spill] sm:$0xff] %v8744_v20  ;;  %13304 = vst [vmem:[#allocation819_spill] sm:$0xff] %v8747_v61  ;;  %v1088_v61 = vld [vmem:[%s5217_s21 + $0x1a00] sm:$0xff]  ;;  %v8791_v39 = vmul.f32 %v8669_v8, %v1141_v31  ;;  %v8812_v31 = vmul.f32 %v8669_v8, %v1146_v50  ;;  %v8828_v50 = vmul.f32 %v8669_v8, %v1150_v0  ;;  %v1114_v36 = vld [vmem:[%s5217_s21 + $0x1ad0] sm:$0xff] }
 0x261   : > { %13305 = vst [vmem:[#allocation820_spill] sm:$0xff] %v8750_v17  ;;  %13306 = vst [vmem:[#allocation821_spill] sm:$0xff] %v8753_v57  ;;  %v1090_v17 = vld [vmem:[%s5217_s21 + $0x1a10] sm:$0xff]  ;;  %v8772_v57 = vmul.f32 %v8669_v8, %v1136_v58  ;;  %v8788_v58 = vmul.f32 %v8669_v8, %v1140_v23  ;;  %v1099_v23 = vld [vmem:[%s5217_s21 + $0x1a58] sm:$0xff] }
 0x262   : > { %13307 = vst [vmem:[#allocation822_spill] sm:$0xff] %v8756_v18  ;;  %13308 = vst [vmem:[#allocation823_spill] sm:$0xff] %v8759_v4  ;;  %v1095_v4 = vld [vmem:[%s5217_s21 + $0x1a38] sm:$0xff]  ;;  %v1108_v20 = vld [vmem:[%s5217_s21 + $0x1aa0] sm:$0xff] }
 0x263   : > { %13309 = vst [vmem:[#allocation824_spill] sm:$0xff] %v8762_v41  ;;  %13310 = vst [vmem:[#allocation825_spill] sm:$0xff] %v8765_v51  ;;  %v1093_v51 = vld [vmem:[%s5217_s21 + $0x1a28] sm:$0xff]  ;;  %v1094_v41 = vld [vmem:[%s5217_s21 + $0x1a30] sm:$0xff] }
 0x264   : > { %13311 = vst [vmem:[#allocation826_spill] sm:$0xff] %v8772_v57  ;;  %13312 = vst [vmem:[#allocation827_spill] sm:$0xff] %v8775_v59  ;;  %v1097_v59 = vld [vmem:[%s5217_s21 + $0x1a48] sm:$0xff]  ;;  %v1098_v57 = vld [vmem:[%s5217_s21 + $0x1a50] sm:$0xff] }
 0x265   : > { %13313 = vst [vmem:[#allocation828_spill] sm:$0xff] %v8778_v7  ;;  %13314 = vst [vmem:[#allocation829_spill] sm:$0xff] %v8781_v52  ;;  %v8799_v52 = vpop.permute.xlu0 %1444  ;;  %v1096_v7 = vld [vmem:[%s5217_s21 + $0x1a40] sm:$0xff]  ;;  %v1103_v18 = vld [vmem:[%s5217_s21 + $0x1a78] sm:$0xff] }
 0x266   : > { %13315 = vst [vmem:[#allocation830_spill] sm:$0xff] %v8788_v58  ;;  %13316 = vst [vmem:[#allocation831_spill] sm:$0xff] %v8791_v39  ;;  %v8806_v58 = vmul.f32 %v8669_v8, %v1144_v12  ;;  %v1102_v39 = vld [vmem:[%s5217_s21 + $0x1a70] sm:$0xff]  ;;  %v8822_v12 = vmul.f32 %v8669_v8, %v1148_v38  ;;  %v1109_v38 = vld [vmem:[%s5217_s21 + $0x1aa8] sm:$0xff]  ;;  %v8842_v0 = vmul.f32 %v8799_v52, %v1088_v61 }
 0x267   : > { %13317 = vst [vmem:[#allocation832_spill] sm:$0xff] %v8794_v40  ;;  %13318 = vst [vmem:[#allocation833_spill] sm:$0xff] %v8797_v9  ;;  %v1100_v9 = vld [vmem:[%s5217_s21 + $0x1a60] sm:$0xff]  ;;  %v1101_v40 = vld [vmem:[%s5217_s21 + $0x1a68] sm:$0xff]  ;;  %v8848_v8 = vmul.f32 %v8799_v52, %v1090_v17  ;;  %v8851_v14 = vmul.f32 %v8799_v52, %v1091_v60  ;;  %v8858_v21 = vmul.f32 %v8799_v52, %v1092_v11 }
 0x268   : > { %13319 = vst [vmem:[#allocation834_spill] sm:$0xff] %v8806_v58  ;;  %13320 = vst [vmem:[#allocation835_spill] sm:$0xff] %v8809_v44  ;;  %v1106_v44 = vld [vmem:[%s5217_s21 + $0x1a90] sm:$0xff]  ;;  %v1107_v58 = vld [vmem:[%s5217_s21 + $0x1a98] sm:$0xff]  ;;  %v8861_v61 = vmul.f32 %v8799_v52, %v1093_v51  ;;  %v8867_v17 = vmul.f32 %v8799_v52, %v1095_v4  ;;  %v8874_v11 = vmul.f32 %v8799_v52, %v1096_v7 }
 0x269   : > { %13321 = vst [vmem:[#allocation836_spill] sm:$0xff] %v8812_v31  ;;  %13322 = vst [vmem:[#allocation837_spill] sm:$0xff] %v8815_v24  ;;  %v1104_v24 = vld [vmem:[%s5217_s21 + $0x1a80] sm:$0xff]  ;;  %v1105_v31 = vld [vmem:[%s5217_s21 + $0x1a88] sm:$0xff]  ;;  %v8877_v51 = vmul.f32 %v8799_v52, %v1097_v59  ;;  %v8883_v4 = vmul.f32 %v8799_v52, %v1099_v23  ;;  %v8892_v7 = vmul.f32 %v8799_v52, %v1102_v39 }
 0x26a   : > { %13323 = vst [vmem:[#allocation838_spill] sm:$0xff] %v8822_v12  ;;  %13324 = vst [vmem:[#allocation839_spill] sm:$0xff] %v8825_v33  ;;  %v1110_v12 = vld [vmem:[%s5217_s21 + $0x1ab0] sm:$0xff]  ;;  %v1113_v33 = vld [vmem:[%s5217_s21 + $0x1ac8] sm:$0xff]  ;;  %v8895_v59 = vmul.f32 %v8799_v52, %v1103_v18  ;;  %v8908_v39 = vmul.f32 %v8799_v52, %v1106_v44  ;;  %v8911_v18 = vmul.f32 %v8799_v52, %v1107_v58 }
 0x26b   : > { %13325 = vst [vmem:[#allocation840_spill] sm:$0xff] %v8828_v50  ;;  %13326 = vst [vmem:[#allocation841_spill] sm:$0xff] %v8831_v32  ;;  %v8845_v50 = vmul.f32 %v8799_v52, %v1089_v13  ;;  %v1112_v32 = vld [vmem:[%s5217_s21 + $0x1ac0] sm:$0xff]  ;;  %v1115_v48 = vld [vmem:[%s5217_s21 + $0x1ad8] sm:$0xff]  ;;  %v8864_v13 = vmul.f32 %v8799_v52, %v1094_v41  ;;  %v8880_v41 = vmul.f32 %v8799_v52, %v1098_v57 }
 0x26c   : > { %13327 = vst [vmem:[#allocation842_spill] sm:$0xff] %v8842_v0  ;;  %13329 = vst [vmem:[#allocation844_spill] sm:$0xff] %v8848_v8  ;;  %v1116_v60 = vld [vmem:[%s5217_s21 + $0x1ae0] sm:$0xff]  ;;  %v1118_v8 = vld [vmem:[%s5217_s21 + $0x1af0] sm:$0xff]  ;;  %v8924_v44 = vmul.f32 %v8799_v52, %v1110_v12  ;;  %v8927_v58 = vmul.f32 %v8799_v52, %v1111_v35  ;;  %v8939_v12 = vmul.f32 %v8799_v52, %v1113_v33 }
 0x26d   : > { %13328 = vst [vmem:[#allocation843_spill] sm:$0xff] %v8845_v50  ;;  %13330 = vst [vmem:[#allocation845_spill] sm:$0xff] %v8851_v14  ;;  %v1117_v14 = vld [vmem:[%s5217_s21 + $0x1ae8] sm:$0xff]  ;;  %v1119_v50 = vld [vmem:[%s5217_s21 + $0x1af8] sm:$0xff]  ;;  %v8945_v35 = vmul.f32 %v8799_v52, %v1115_v48 }
 0x26e   : > { %13331 = vst [vmem:[#allocation846_spill] sm:$0xff] %v8858_v21  ;;  %13332 = vst [vmem:[#allocation847_spill] sm:$0xff] %v8861_v61  ;;  %v1185_v57 = vld [vmem:[%s5217_s21 + $0x1d08] sm:$0xff]  ;;  %v1187_v23 = vld [vmem:[%s5217_s21 + $0x1d18] sm:$0xff]  ;;  %v8955_v33 = vmul.f32 %v8799_v52, %v1117_v14  ;;  %v8961_v48 = vmul.f32 %v8799_v52, %v1119_v50 }
 0x26f   : > { %13333 = vst [vmem:[#allocation848_spill] sm:$0xff] %v8864_v13  ;;  %13334 = vst [vmem:[#allocation849_spill] sm:$0xff] %v8867_v17  ;;  %v8886_v17 = vmul.f32 %v8799_v52, %v1100_v9  ;;  %v8889_v13 = vmul.f32 %v8799_v52, %v1101_v40  ;;  %v8905_v40 = vmul.f32 %v8799_v52, %v1105_v31  ;;  %v1188_v9 = vld [vmem:[%s5217_s21 + $0x1d20] sm:$0xff]  ;;  %v1207_v14 = vld [vmem:[%s5217_s21 + $0x1db8] sm:$0xff] }
 0x270   : > { %13335 = vst [vmem:[#allocation850_spill] sm:$0xff] %v8874_v11  ;;  %13336 = vst [vmem:[#allocation851_spill] sm:$0xff] %v8877_v51  ;;  %v1184_v51 = vld [vmem:[%s5217_s21 + $0x1d00] sm:$0xff]  ;;  %v8921_v31 = vmul.f32 %v8799_v52, %v1109_v38  ;;  %v8942_v38 = vmul.f32 %v8799_v52, %v1114_v36  ;;  %v8958_v36 = vmul.f32 %v8799_v52, %v1118_v8  ;;  %v1210_v61 = vld [vmem:[%s5217_s21 + $0x1dd0] sm:$0xff] }
 0x271   : > { %13337 = vst [vmem:[#allocation852_spill] sm:$0xff] %v8880_v41  ;;  %13338 = vst [vmem:[#allocation853_spill] sm:$0xff] %v8883_v4  ;;  %v1186_v41 = vld [vmem:[%s5217_s21 + $0x1d10] sm:$0xff]  ;;  %v8902_v4 = vmul.f32 %v8799_v52, %v1104_v24  ;;  %v8918_v24 = vmul.f32 %v8799_v52, %v1108_v20  ;;  %v1195_v20 = vld [vmem:[%s5217_s21 + $0x1d58] sm:$0xff] }
 0x272   : > { %13339 = vst [vmem:[#allocation854_spill] sm:$0xff] %v8886_v17  ;;  %13340 = vst [vmem:[#allocation855_spill] sm:$0xff] %v8889_v13  ;;  %v1191_v13 = vld [vmem:[%s5217_s21 + $0x1d38] sm:$0xff]  ;;  %v1204_v11 = vld [vmem:[%s5217_s21 + $0x1da0] sm:$0xff] }
 0x273   : > { %13341 = vst [vmem:[#allocation856_spill] sm:$0xff] %v8892_v7  ;;  %13342 = vst [vmem:[#allocation857_spill] sm:$0xff] %v8895_v59  ;;  %v1189_v59 = vld [vmem:[%s5217_s21 + $0x1d28] sm:$0xff]  ;;  %v1190_v7 = vld [vmem:[%s5217_s21 + $0x1d30] sm:$0xff] }
 0x274   : > { %13343 = vst [vmem:[#allocation858_spill] sm:$0xff] %v8902_v4  ;;  %13344 = vst [vmem:[#allocation859_spill] sm:$0xff] %v8905_v40  ;;  %v1193_v40 = vld [vmem:[%s5217_s21 + $0x1d48] sm:$0xff]  ;;  %v1194_v4 = vld [vmem:[%s5217_s21 + $0x1d50] sm:$0xff] }
 0x275   : > { %13345 = vst [vmem:[#allocation860_spill] sm:$0xff] %v8908_v39  ;;  %13346 = vst [vmem:[#allocation861_spill] sm:$0xff] %v8911_v18  ;;  %v8929_v18 = vpop.permute.xlu1 %1459  ;;  %v1192_v39 = vld [vmem:[%s5217_s21 + $0x1d40] sm:$0xff]  ;;  %v1199_v17 = vld [vmem:[%s5217_s21 + $0x1d78] sm:$0xff] }
 0x276   : > { %13347 = vst [vmem:[#allocation862_spill] sm:$0xff] %v8918_v24  ;;  %13348 = vst [vmem:[#allocation863_spill] sm:$0xff] %v8921_v31  ;;  %v8936_v24 = vmul.f32 %v8799_v52, %v1112_v32  ;;  %v1198_v31 = vld [vmem:[%s5217_s21 + $0x1d70] sm:$0xff]  ;;  %v8952_v32 = vmul.f32 %v8799_v52, %v1116_v60  ;;  %v1205_v60 = vld [vmem:[%s5217_s21 + $0x1da8] sm:$0xff]  ;;  %v8972_v8 = vmul.f32 %v8929_v18, %v1184_v51 }
 0x277   : > { %13349 = vst [vmem:[#allocation864_spill] sm:$0xff] %v8924_v44  ;;  %13350 = vst [vmem:[#allocation865_spill] sm:$0xff] %v8927_v58  ;;  %v1196_v58 = vld [vmem:[%s5217_s21 + $0x1d60] sm:$0xff]  ;;  %v1197_v44 = vld [vmem:[%s5217_s21 + $0x1d68] sm:$0xff]  ;;  %v8978_v52 = vmul.f32 %v8929_v18, %v1186_v41  ;;  %v8981_v50 = vmul.f32 %v8929_v18, %v1187_v23  ;;  %v8988_v0 = vmul.f32 %v8929_v18, %v1188_v9 }
 0x278   : > { %13351 = vst [vmem:[#allocation866_spill] sm:$0xff] %v8936_v24  ;;  %13352 = vst [vmem:[#allocation867_spill] sm:$0xff] %v8939_v12  ;;  %v1202_v12 = vld [vmem:[%s5217_s21 + $0x1d90] sm:$0xff]  ;;  %v1203_v24 = vld [vmem:[%s5217_s21 + $0x1d98] sm:$0xff]  ;;  %v8991_v51 = vmul.f32 %v8929_v18, %v1189_v59  ;;  %v8997_v41 = vmul.f32 %v8929_v18, %v1191_v13  ;;  %v9004_v9 = vmul.f32 %v8929_v18, %v1192_v39 }
 0x279   : > { %13353 = vst [vmem:[#allocation868_spill] sm:$0xff] %v8942_v38  ;;  %13354 = vst [vmem:[#allocation869_spill] sm:$0xff] %v8945_v35  ;;  %v1200_v35 = vld [vmem:[%s5217_s21 + $0x1d80] sm:$0xff]  ;;  %v1201_v38 = vld [vmem:[%s5217_s21 + $0x1d88] sm:$0xff]  ;;  %v9007_v59 = vmul.f32 %v8929_v18, %v1193_v40  ;;  %v9013_v13 = vmul.f32 %v8929_v18, %v1195_v20  ;;  %v9022_v39 = vmul.f32 %v8929_v18, %v1198_v31 }
 0x27a   : > { %13355 = vst [vmem:[#allocation870_spill] sm:$0xff] %v8952_v32  ;;  %13356 = vst [vmem:[#allocation871_spill] sm:$0xff] %v8955_v33  ;;  %v1206_v32 = vld [vmem:[%s5217_s21 + $0x1db0] sm:$0xff]  ;;  %v1209_v33 = vld [vmem:[%s5217_s21 + $0x1dc8] sm:$0xff]  ;;  %v9025_v40 = vmul.f32 %v8929_v18, %v1199_v17  ;;  %v9041_v31 = vmul.f32 %v8929_v18, %v1203_v24  ;;  %v9059_v24 = vpop.permute.xlu0 %1454 }
 0x27b   : > { %13357 = vst [vmem:[#allocation872_spill] sm:$0xff] %v8958_v36  ;;  %13358 = vst [vmem:[#allocation873_spill] sm:$0xff] %v8961_v48  ;;  %v8975_v36 = vmul.f32 %v8929_v18, %v1185_v57  ;;  %v1208_v48 = vld [vmem:[%s5217_s21 + $0x1dc0] sm:$0xff]  ;;  %v1211_v21 = vld [vmem:[%s5217_s21 + $0x1dd8] sm:$0xff]  ;;  %v8994_v57 = vmul.f32 %v8929_v18, %v1190_v7  ;;  %v9010_v7 = vmul.f32 %v8929_v18, %v1194_v4 }
 0x27c   : > { %13360 = vst [vmem:[#allocation875_spill] sm:$0xff] %v8978_v52  ;;  %13361 = vst [vmem:[#allocation876_spill] sm:$0xff] %v8981_v50  ;;  %v1212_v23 = vld [vmem:[%s5217_s21 + $0x1de0] sm:$0xff]  ;;  %v1213_v50 = vld [vmem:[%s5217_s21 + $0x1de8] sm:$0xff] }
 0x27d   : > { %13359 = vst [vmem:[#allocation874_spill] sm:$0xff] %v8975_v36  ;;  %13362 = vst [vmem:[#allocation877_spill] sm:$0xff] %v8994_v57  ;;  %v1214_v52 = vld [vmem:[%s5217_s21 + $0x1df0] sm:$0xff]  ;;  %v1215_v36 = vld [vmem:[%s5217_s21 + $0x1df8] sm:$0xff]  ;;  %v9019_v57 = vmul.f32 %v8929_v18, %v1197_v44  ;;  %v9038_v44 = vmul.f32 %v8929_v18, %v1202_v12  ;;  %v9057_v12 = vmul.f32 %v8929_v18, %v1207_v14 }
 0x27e   : > { %13363 = vst [vmem:[#allocation878_spill] sm:$0xff] %v8997_v41  ;;  %13364 = vst [vmem:[#allocation879_spill] sm:$0xff] %v9007_v59  ;;  %v9016_v41 = vmul.f32 %v8929_v18, %v1196_v58  ;;  %v1152_v59 = vld [vmem:[%s5217_s21 + $0x1c00] sm:$0xff]  ;;  %v1153_v4 = vld [vmem:[%s5217_s21 + $0x1c08] sm:$0xff]  ;;  %v9035_v58 = vmul.f32 %v8929_v18, %v1201_v38  ;;  %v9054_v38 = vmul.f32 %v8929_v18, %v1206_v32 }
 0x27f   : > { %13365 = vst [vmem:[#allocation880_spill] sm:$0xff] %v9010_v7  ;;  %13366 = vst [vmem:[#allocation881_spill] sm:$0xff] %v9013_v13  ;;  %v1154_v7 = vld [vmem:[%s5217_s21 + $0x1c10] sm:$0xff]  ;;  %v1155_v20 = vld [vmem:[%s5217_s21 + $0x1c18] sm:$0xff]  ;;  %v9032_v13 = vmul.f32 %v8929_v18, %v1200_v35  ;;  %v9051_v35 = vmul.f32 %v8929_v18, %v1205_v60  ;;  %v9068_v60 = vmul.f32 %v8929_v18, %v1209_v33 }
 0x280   : > { %13367 = vst [vmem:[#allocation882_spill] sm:$0xff] %v9016_v41  ;;  %13368 = vst [vmem:[#allocation883_spill] sm:$0xff] %v9019_v57  ;;  %v1156_v17 = vld [vmem:[%s5217_s21 + $0x1c20] sm:$0xff]  ;;  %v1159_v57 = vld [vmem:[%s5217_s21 + $0x1c38] sm:$0xff]  ;;  %v9048_v41 = vmul.f32 %v8929_v18, %v1204_v11  ;;  %v9065_v11 = vmul.f32 %v8929_v18, %v1208_v48  ;;  %v9071_v32 = vmul.f32 %v8929_v18, %v1210_v61 }
 0x281   : > { %13369 = vst [vmem:[#allocation884_spill] sm:$0xff] %v9022_v39  ;;  %13370 = vst [vmem:[#allocation885_spill] sm:$0xff] %v9025_v40  ;;  %v1157_v40 = vld [vmem:[%s5217_s21 + $0x1c28] sm:$0xff]  ;;  %v1158_v39 = vld [vmem:[%s5217_s21 + $0x1c30] sm:$0xff]  ;;  %v9074_v14 = vmul.f32 %v8929_v18, %v1211_v21  ;;  %v9083_v48 = vmul.f32 %v8929_v18, %v1213_v50  ;;  %v9086_v33 = vmul.f32 %v8929_v18, %v1214_v52 }
 0x282   : > { %13371 = vst [vmem:[#allocation886_spill] sm:$0xff] %v9035_v58  ;;  %13372 = vst [vmem:[#allocation887_spill] sm:$0xff] %v9038_v44  ;;  %v1161_v44 = vld [vmem:[%s5217_s21 + $0x1c48] sm:$0xff]  ;;  %v1162_v58 = vld [vmem:[%s5217_s21 + $0x1c50] sm:$0xff]  ;;  %v9089_v61 = vmul.f32 %v8929_v18, %v1215_v36  ;;  %v9100_v50 = vmul.f32 %v9059_v24, %v1152_v59  ;;  %v9103_v52 = vmul.f32 %v9059_v24, %v1153_v4 }
 0x283   : > { %13373 = vst [vmem:[#allocation888_spill] sm:$0xff] %v9041_v31  ;;  %13374 = vst [vmem:[#allocation889_spill] sm:$0xff] %v9048_v41  ;;  %v1160_v31 = vld [vmem:[%s5217_s21 + $0x1c40] sm:$0xff]  ;;  %v9080_v41 = vmul.f32 %v8929_v18, %v1212_v23  ;;  %v1166_v21 = vld [vmem:[%s5217_s21 + $0x1c70] sm:$0xff]  ;;  %v9106_v18 = vmul.f32 %v9059_v24, %v1154_v7  ;;  %v9109_v36 = vmul.f32 %v9059_v24, %v1155_v20 }
 0x284   : > { %13375 = vst [vmem:[#allocation890_spill] sm:$0xff] %v9051_v35  ;;  %13376 = vst [vmem:[#allocation891_spill] sm:$0xff] %v9054_v38  ;;  %v1164_v38 = vld [vmem:[%s5217_s21 + $0x1c60] sm:$0xff]  ;;  %v1165_v35 = vld [vmem:[%s5217_s21 + $0x1c68] sm:$0xff]  ;;  %v9118_v59 = vmul.f32 %v9059_v24, %v1157_v40  ;;  %v9121_v4 = vmul.f32 %v9059_v24, %v1158_v39  ;;  %v9124_v7 = vmul.f32 %v9059_v24, %v1159_v57 }
 0x285   : > { %13377 = vst [vmem:[#allocation892_spill] sm:$0xff] %v9057_v12  ;;  %13378 = vst [vmem:[#allocation893_spill] sm:$0xff] %v9065_v11  ;;  %v1163_v12 = vld [vmem:[%s5217_s21 + $0x1c58] sm:$0xff]  ;;  %v1169_v23 = vld [vmem:[%s5217_s21 + $0x1c88] sm:$0xff]  ;;  %v9136_v40 = vmul.f32 %v9059_v24, %v1162_v58 }
 0x286   : > { %13379 = vst [vmem:[#allocation894_spill] sm:$0xff] %v9068_v60  ;;  %13380 = vst [vmem:[#allocation895_spill] sm:$0xff] %v9071_v32  ;;  %v1168_v32 = vld [vmem:[%s5217_s21 + $0x1c80] sm:$0xff]  ;;  %v9094_v60 = vpop.permute.xlu1 %1469  ;;  %v1171_v11 = vld [vmem:[%s5217_s21 + $0x1c98] sm:$0xff]  ;;  %v9139_v39 = vmul.f32 %v9059_v24, %v1163_v12 }
 0x287   : > { %13381 = vst [vmem:[#allocation896_spill] sm:$0xff] %v9074_v14  ;;  %13382 = vst [vmem:[#allocation897_spill] sm:$0xff] %v9080_v41  ;;  %v1167_v14 = vld [vmem:[%s5217_s21 + $0x1c78] sm:$0xff]  ;;  %v1170_v41 = vld [vmem:[%s5217_s21 + $0x1c90] sm:$0xff]  ;;  %v9160_v12 = vmul.f32 %v9059_v24, %v1168_v32 }
 0x288   : > { %13383 = vst [vmem:[#allocation898_spill] sm:$0xff] %v9083_v48  ;;  %13384 = vst [vmem:[#allocation899_spill] sm:$0xff] %v9086_v33  ;;  %v1174_v33 = vld [vmem:[%s5217_s21 + $0x1cb0] sm:$0xff]  ;;  %v9115_v48 = vmul.f32 %v9059_v24, %v1156_v17  ;;  %v1175_v20 = vld [vmem:[%s5217_s21 + $0x1cb8] sm:$0xff]  ;;  %v9133_v17 = vmul.f32 %v9059_v24, %v1161_v44  ;;  %v9154_v44 = vmul.f32 %v9059_v24, %v1167_v14 }
 0x289   : > { %13385 = vst [vmem:[#allocation900_spill] sm:$0xff] %v9089_v61  ;;  %13386 = vst [vmem:[#allocation901_spill] sm:$0xff] %v9094_v60  ;;  %v1172_v60 = vld [vmem:[%s5217_s21 + $0x1ca0] sm:$0xff]  ;;  %v1173_v61 = vld [vmem:[%s5217_s21 + $0x1ca8] sm:$0xff]  ;;  %v9181_v32 = vmul.f32 %v9059_v24, %v1175_v20 }
 0x28a   : > { %13387 = vst [vmem:[#allocation902_spill] sm:$0xff] %v9103_v52  ;;  %13388 = vst [vmem:[#allocation903_spill] sm:$0xff] %v9106_v18  ;;  %v1177_v18 = vld [vmem:[%s5217_s21 + $0x1cc8] sm:$0xff]  ;;  %v9130_v52 = vmul.f32 %v9059_v24, %v1160_v31  ;;  %v1179_v57 = vld [vmem:[%s5217_s21 + $0x1cd8] sm:$0xff]  ;;  %v9151_v31 = vmul.f32 %v9059_v24, %v1166_v21  ;;  %v9172_v21 = vmul.f32 %v9059_v24, %v1172_v60 }
 0x28b   : > { %13389 = vst [vmem:[#allocation904_spill] sm:$0xff] %v9109_v36  ;;  %13390 = vst [vmem:[#allocation905_spill] sm:$0xff] %v9115_v48  ;;  %v1176_v36 = vld [vmem:[%s5217_s21 + $0x1cc0] sm:$0xff]  ;;  %v9148_v48 = vmul.f32 %v9059_v24, %v1165_v35  ;;  %v1181_v58 = vld [vmem:[%s5217_s21 + $0x1ce8] sm:$0xff]  ;;  %v9169_v35 = vmul.f32 %v9059_v24, %v1171_v11  ;;  %v9175_v14 = vmul.f32 %v9059_v24, %v1173_v61 }
 0x28c   : > { %13391 = vst [vmem:[#allocation906_spill] sm:$0xff] %v9118_v59  ;;  %13392 = vst [vmem:[#allocation907_spill] sm:$0xff] %v9121_v4  ;;  %v1178_v4 = vld [vmem:[%s5217_s21 + $0x1cd0] sm:$0xff]  ;;  %v9145_v59 = vmul.f32 %v9059_v24, %v1164_v38  ;;  %v9166_v38 = vmul.f32 %v9059_v24, %v1170_v41  ;;  %v9186_v41 = vmul.f32 %v9059_v24, %v1176_v36 }
 0x28d   : > { %13393 = vst [vmem:[#allocation908_spill] sm:$0xff] %v9124_v7  ;;  %13394 = vst [vmem:[#allocation909_spill] sm:$0xff] %v9133_v17  ;;  %v1180_v7 = vld [vmem:[%s5217_s21 + $0x1ce0] sm:$0xff]  ;;  %v1183_v17 = vld [vmem:[%s5217_s21 + $0x1cf8] sm:$0xff]  ;;  %v9189_v11 = vmul.f32 %v9059_v24, %v1177_v18  ;;  %v9192_v60 = vmul.f32 %v9059_v24, %v1178_v4  ;;  %v9195_v61 = vmul.f32 %v9059_v24, %v1179_v57  ;;  %v9209_v18 = vpop.permute.xlu0 %1464 }
 0x28e   : > { %13395 = vst [vmem:[#allocation910_spill] sm:$0xff] %v9136_v40  ;;  %13396 = vst [vmem:[#allocation911_spill] sm:$0xff] %v9139_v39  ;;  %v1182_v40 = vld [vmem:[%s5217_s21 + $0x1cf0] sm:$0xff]  ;;  %v9163_v39 = vmul.f32 %v9059_v24, %v1169_v23  ;;  %v9183_v23 = vpop.permute.xlu1 %2535  ;;  %v9201_v20 = vmul.f32 %v9059_v24, %v1181_v58  ;;  %v9207_v36 = vmul.f32 %v9059_v24, %v1183_v17 }
 0x28f   : > { %13397 = vst [vmem:[#allocation912_spill] sm:$0xff] %v9154_v44  ;;  %v9178_v44 = vmul.f32 %v9059_v24, %v1174_v33  ;;  %13398 = vst [vmem:[#allocation913_spill] sm:$0xff] %v9181_v32  ;;  %v9198_v33 = vmul.f32 %v9059_v24, %v1180_v7  ;;  %v9204_v32 = vmul.f32 %v9059_v24, %v1182_v40 }
 0x290   : > { %v2720_v4 = vadd.f32 %v9183_v23, %v5722_v2  ;;  %v2721_v57 = vadd.f32 %v9183_v23, %v5725_v26  ;;  %v2722_v7 = vadd.f32 %v9183_v23, %v5728_v29  ;;  %v2723_v58 = vadd.f32 %v9183_v23, %v5731_v56 }
 0x291   : > { %v2724_v40 = vadd.f32 %v9183_v23, %v5738_v15  ;;  %v2725_v24 = vadd.f32 %v9183_v23, %v5741_v63  ;;  %v2726_v17 = vadd.f32 %v9183_v23, %v5744_v49  ;;  %v2727_v2 = vadd.f32 %v9183_v23, %v5747_v62 }
 0x292   : > { %v2728_v26 = vadd.f32 %v9183_v23, %v5754_v47  ;;  %v2729_v29 = vadd.f32 %v9183_v23, %v5757_v54  ;;  %v2730_v56 = vadd.f32 %v9183_v23, %v5760_v55  ;;  %v2731_v15 = vadd.f32 %v9183_v23, %v5763_v5  ;;  %3744 = vst [vmem:[%s9237_s29 + $0x100] sm:$0xff] %v2720_v4  ;;  %v13402_v4 = vld [vmem:[#allocation41_spill] sm:$0xff] }
 0x293   : > { %3745 = vst [vmem:[%s9237_s29 + $0x108] sm:$0xff] %v2721_v57  ;;  %3746 = vst [vmem:[%s9237_s29 + $0x110] sm:$0xff] %v2722_v7  ;;  %v2732_v63 = vadd.f32 %v9183_v23, %v5766_v30  ;;  %v2733_v49 = vadd.f32 %v9183_v23, %v5769_v25  ;;  %v2734_v62 = vadd.f32 %v9183_v23, %v5772_v45  ;;  %v13403_v7 = vld [vmem:[#allocation42_spill] sm:$0xff] }
 0x294   : > { %3747 = vst [vmem:[%s9237_s29 + $0x118] sm:$0xff] %v2723_v58  ;;  %v2735_v47 = vadd.f32 %v9183_v23, %v5775_v46  ;;  %3748 = vst [vmem:[%s9237_s29 + $0x120] sm:$0xff] %v2724_v40  ;;  %v2736_v30 = vadd.f32 %v9183_v23, %v5782_v22  ;;  %v2737_v25 = vadd.f32 %v9183_v23, %v5785_v37  ;;  %v9279_v37 = vpop.permute.xlu0 %2530  ;;  %v13404_v58 = vld [vmem:[#allocation43_spill] sm:$0xff] }
 0x295   : > { %3749 = vst [vmem:[%s9237_s29 + $0x128] sm:$0xff] %v2725_v24  ;;  %3750 = vst [vmem:[%s9237_s29 + $0x130] sm:$0xff] %v2726_v17  ;;  %v2738_v54 = vadd.f32 %v9183_v23, %v5788_v42  ;;  %v2739_v55 = vadd.f32 %v9183_v23, %v5791_v1  ;;  %v2740_v5 = vadd.f32 %v9183_v23, %v5798_v16  ;;  %v13405_v24 = vld [vmem:[#allocation44_spill] sm:$0xff] }
 0x296   : > { %3751 = vst [vmem:[%s9237_s29 + $0x138] sm:$0xff] %v2727_v2  ;;  %3752 = vst [vmem:[%s9237_s29 + $0x140] sm:$0xff] %v2728_v26  ;;  %v2741_v22 = vadd.f32 %v9183_v23, %v5801_v53  ;;  %v2742_v45 = vadd.f32 %v9183_v23, %v5804_v34  ;;  %v2743_v46 = vadd.f32 %v9183_v23, %v5807_v43  ;;  %v13399_v43 = vld [vmem:[#allocation104_spill] sm:$0xff]  ;;  %v13406_v2 = vld [vmem:[#allocation45_spill] sm:$0xff] }
 0x297   : > { %3753 = vst [vmem:[%s9237_s29 + $0x148] sm:$0xff] %v2729_v29  ;;  %3754 = vst [vmem:[%s9237_s29 + $0x150] sm:$0xff] %v2730_v56  ;;  %v2744_v42 = vadd.f32 %v9183_v23, %v5816_v3  ;;  %v2745_v1 = vadd.f32 %v9183_v23, %v5819_v28  ;;  %v2746_v16 = vadd.f32 %v9183_v23, %v5822_v6  ;;  %v13400_v6 = vld [vmem:[#allocation105_spill] sm:$0xff]  ;;  %v13407_v29 = vld [vmem:[#allocation46_spill] sm:$0xff] }
 0x298   : > { %3755 = vst [vmem:[%s9237_s29 + $0x158] sm:$0xff] %v2731_v15  ;;  %3756 = vst [vmem:[%s9237_s29 + $0x160] sm:$0xff] %v2732_v63  ;;  %v2747_v53 = vadd.f32 %v9183_v23, %v5825_v10  ;;  %v2748_v3 = vadd.f32 %v9183_v23, %v5832_v19  ;;  %v2749_v34 = vadd.f32 %v9183_v23, %v5835_v27  ;;  %v13401_v19 = vld [vmem:[#allocation40_spill] sm:$0xff]  ;;  %v13408_v15 = vld [vmem:[#allocation47_spill] sm:$0xff] }
 0x299   : > { %3757 = vst [vmem:[%s9237_s29 + $0x168] sm:$0xff] %v2733_v49  ;;  %3758 = vst [vmem:[%s9237_s29 + $0x170] sm:$0xff] %v2734_v62  ;;  %v2750_v28 = vadd.f32 %v9183_v23, %v13399_v43  ;;  %v2751_v10 = vadd.f32 %v9183_v23, %v13400_v6  ;;  %v2688_v27 = vadd.f32 %v9279_v37, %v13401_v19  ;;  %v13409_v49 = vld [vmem:[#allocation48_spill] sm:$0xff] }
 0x29a   : > { %3759 = vst [vmem:[%s9237_s29 + $0x178] sm:$0xff] %v2735_v47  ;;  %3760 = vst [vmem:[%s9237_s29 + $0x180] sm:$0xff] %v2736_v30  ;;  %v2689_v57 = vadd.f32 %v9279_v37, %v13402_v4  ;;  %v2690_v23 = vadd.f32 %v9279_v37, %v13403_v7  ;;  %v2691_v40 = vadd.f32 %v9279_v37, %v13404_v58  ;;  %v13410_v47 = vld [vmem:[#allocation49_spill] sm:$0xff] }
 0x29b   : > { %3761 = vst [vmem:[%s9237_s29 + $0x188] sm:$0xff] %v2737_v25  ;;  %3762 = vst [vmem:[%s9237_s29 + $0x190] sm:$0xff] %v2738_v54  ;;  %v2692_v17 = vadd.f32 %v9279_v37, %v13405_v24  ;;  %v2693_v26 = vadd.f32 %v9279_v37, %v13406_v2  ;;  %v2694_v56 = vadd.f32 %v9279_v37, %v13407_v29  ;;  %v13411_v25 = vld [vmem:[#allocation50_spill] sm:$0xff]  ;;  %v13425_v29 = vld [vmem:[#allocation64_spill] sm:$0xff] }
 0x29c   : > { %3763 = vst [vmem:[%s9237_s29 + $0x198] sm:$0xff] %v2739_v55  ;;  %3764 = vst [vmem:[%s9237_s29 + $0x1a0] sm:$0xff] %v2740_v5  ;;  %v2695_v63 = vadd.f32 %v9279_v37, %v13408_v15  ;;  %v2696_v62 = vadd.f32 %v9279_v37, %v13409_v49  ;;  %v2697_v30 = vadd.f32 %v9279_v37, %v13410_v47  ;;  %v13412_v55 = vld [vmem:[#allocation51_spill] sm:$0xff]  ;;  %v13426_v15 = vld [vmem:[#allocation65_spill] sm:$0xff] }
 0x29d   : > { %3765 = vst [vmem:[%s9237_s29 + $0x1a8] sm:$0xff] %v2741_v22  ;;  %3766 = vst [vmem:[%s9237_s29 + $0x1b0] sm:$0xff] %v2742_v45  ;;  %v2698_v54 = vadd.f32 %v9279_v37, %v13411_v25  ;;  %v2699_v5 = vadd.f32 %v9279_v37, %v13412_v55  ;;  %v13413_v22 = vld [vmem:[#allocation52_spill] sm:$0xff]  ;;  %v13427_v49 = vld [vmem:[#allocation66_spill] sm:$0xff] }
 0x29e   : > { %3767 = vst [vmem:[%s9237_s29 + $0x1b8] sm:$0xff] %v2743_v46  ;;  %3768 = vst [vmem:[%s9237_s29 + $0x1c0] sm:$0xff] %v2744_v42  ;;  %v2700_v45 = vadd.f32 %v9279_v37, %v13413_v22  ;;  %v13414_v46 = vld [vmem:[#allocation53_spill] sm:$0xff]  ;;  %v13428_v47 = vld [vmem:[#allocation67_spill] sm:$0xff] }
 0x29f   : > { %3769 = vst [vmem:[%s9237_s29 + $0x1c8] sm:$0xff] %v2745_v1  ;;  %3770 = vst [vmem:[%s9237_s29 + $0x1d0] sm:$0xff] %v2746_v16  ;;  %v2701_v42 = vadd.f32 %v9279_v37, %v13414_v46  ;;  %v13415_v1 = vld [vmem:[#allocation54_spill] sm:$0xff]  ;;  %v13429_v25 = vld [vmem:[#allocation68_spill] sm:$0xff] }
 0x2a0   : > { %3771 = vst [vmem:[%s9237_s29 + $0x1d8] sm:$0xff] %v2747_v53  ;;  %3772 = vst [vmem:[%s9237_s29 + $0x1e0] sm:$0xff] %v2748_v3  ;;  %v2702_v16 = vadd.f32 %v9279_v37, %v13415_v1  ;;  %v13416_v53 = vld [vmem:[#allocation55_spill] sm:$0xff]  ;;  %v13430_v55 = vld [vmem:[#allocation69_spill] sm:$0xff] }
 0x2a1   : > { %3773 = vst [vmem:[%s9237_s29 + $0x1e8] sm:$0xff] %v2749_v34  ;;  %3774 = vst [vmem:[%s9237_s29 + $0x1f0] sm:$0xff] %v2750_v28  ;;  %v2703_v3 = vadd.f32 %v9279_v37, %v13416_v53  ;;  %v13417_v34 = vld [vmem:[#allocation56_spill] sm:$0xff]  ;;  %v13418_v28 = vld [vmem:[#allocation57_spill] sm:$0xff] }
 0x2a2   : > { %3775 = vst [vmem:[%s9237_s29 + $0x1f8] sm:$0xff] %v2751_v10  ;;  %3712 = vst [vmem:[%s9237_s29] sm:$0xff] %v2688_v27  ;;  %v2704_v43 = vadd.f32 %v9279_v37, %v13417_v34  ;;  %v2705_v6 = vadd.f32 %v9279_v37, %v13418_v28  ;;  %v13419_v10 = vld [vmem:[#allocation58_spill] sm:$0xff]  ;;  %v13420_v27 = vld [vmem:[#allocation59_spill] sm:$0xff] }
 0x2a3   : > { %3713 = vst [vmem:[%s9237_s29 + $0x8] sm:$0xff] %v2689_v57  ;;  %3714 = vst [vmem:[%s9237_s29 + $0x10] sm:$0xff] %v2690_v23  ;;  %v2706_v19 = vadd.f32 %v9279_v37, %v13419_v10  ;;  %v2707_v4 = vadd.f32 %v9279_v37, %v13420_v27  ;;  %v13421_v57 = vld [vmem:[#allocation60_spill] sm:$0xff]  ;;  %v13422_v23 = vld [vmem:[#allocation61_spill] sm:$0xff] }
 0x2a4   : > { %3715 = vst [vmem:[%s9237_s29 + $0x18] sm:$0xff] %v2691_v40  ;;  %3716 = vst [vmem:[%s9237_s29 + $0x20] sm:$0xff] %v2692_v17  ;;  %v2708_v7 = vadd.f32 %v9279_v37, %v13421_v57  ;;  %v2709_v58 = vadd.f32 %v9279_v37, %v13422_v23  ;;  %v13423_v40 = vld [vmem:[#allocation62_spill] sm:$0xff]  ;;  %v13424_v17 = vld [vmem:[#allocation63_spill] sm:$0xff] }
 0x2a5   : > { %3717 = vst [vmem:[%s9237_s29 + $0x28] sm:$0xff] %v2693_v26  ;;  %3718 = vst [vmem:[%s9237_s29 + $0x30] sm:$0xff] %v2694_v56  ;;  %v2710_v24 = vadd.f32 %v9279_v37, %v13423_v40  ;;  %v2711_v2 = vadd.f32 %v9279_v37, %v13424_v17  ;;  %v9377_v26 = vpop.permute.xlu1 %2545  ;;  %v2712_v56 = vadd.f32 %v9279_v37, %v13425_v29  ;;  %v13431_v22 = vld [vmem:[#allocation70_spill] sm:$0xff]  ;;  %v13432_v46 = vld [vmem:[#allocation71_spill] sm:$0xff] }
 0x2a6   : > { %3719 = vst [vmem:[%s9237_s29 + $0x38] sm:$0xff] %v2695_v63  ;;  %3720 = vst [vmem:[%s9237_s29 + $0x40] sm:$0xff] %v2696_v62  ;;  %v2713_v63 = vadd.f32 %v9279_v37, %v13426_v15  ;;  %v2714_v62 = vadd.f32 %v9279_v37, %v13427_v49  ;;  %v13433_v1 = vld [vmem:[#allocation72_spill] sm:$0xff]  ;;  %v13434_v53 = vld [vmem:[#allocation73_spill] sm:$0xff] }
 0x2a7   : > { %3721 = vst [vmem:[%s9237_s29 + $0x48] sm:$0xff] %v2697_v30  ;;  %3722 = vst [vmem:[%s9237_s29 + $0x50] sm:$0xff] %v2698_v54  ;;  %v2715_v30 = vadd.f32 %v9279_v37, %v13428_v47  ;;  %v2716_v54 = vadd.f32 %v9279_v37, %v13429_v25  ;;  %v13435_v34 = vld [vmem:[#allocation74_spill] sm:$0xff] }
 0x2a8   : > { %3723 = vst [vmem:[%s9237_s29 + $0x58] sm:$0xff] %v2699_v5  ;;  %3724 = vst [vmem:[%s9237_s29 + $0x60] sm:$0xff] %v2700_v45  ;;  %v2717_v5 = vadd.f32 %v9279_v37, %v13430_v55  ;;  %v2718_v45 = vadd.f32 %v9279_v37, %v13431_v22 }
 0x2a9   : > { %3725 = vst [vmem:[%s9237_s29 + $0x68] sm:$0xff] %v2701_v42  ;;  %3726 = vst [vmem:[%s9237_s29 + $0x70] sm:$0xff] %v2702_v16  ;;  %v2719_v42 = vadd.f32 %v9279_v37, %v13432_v46  ;;  %v2784_v16 = vadd.f32 %v9377_v26, %v13433_v1  ;;  %v2786_v37 = vadd.f32 %v9377_v26, %v13435_v34 }
 0x2aa   : > { %3727 = vst [vmem:[%s9237_s29 + $0x78] sm:$0xff] %v2703_v3  ;;  %3728 = vst [vmem:[%s9237_s29 + $0x80] sm:$0xff] %v2704_v43  ;;  %v2785_v3 = vadd.f32 %v9377_v26, %v13434_v53  ;;  %v13436_v43 = vld [vmem:[#allocation75_spill] sm:$0xff] }
 0x2ab   : > { %3729 = vst [vmem:[%s9237_s29 + $0x88] sm:$0xff] %v2705_v6  ;;  %3730 = vst [vmem:[%s9237_s29 + $0x90] sm:$0xff] %v2706_v19  ;;  %v2787_v28 = vadd.f32 %v9377_v26, %v13436_v43  ;;  %v13437_v6 = vld [vmem:[#allocation76_spill] sm:$0xff]  ;;  %v13438_v19 = vld [vmem:[#allocation77_spill] sm:$0xff] }
 0x2ac   : > { %3731 = vst [vmem:[%s9237_s29 + $0x98] sm:$0xff] %v2707_v4  ;;  %3732 = vst [vmem:[%s9237_s29 + $0xa0] sm:$0xff] %v2708_v7  ;;  %v2788_v10 = vadd.f32 %v9377_v26, %v13437_v6  ;;  %v2789_v27 = vadd.f32 %v9377_v26, %v13438_v19  ;;  %v13439_v4 = vld [vmem:[#allocation78_spill] sm:$0xff]  ;;  %v13440_v7 = vld [vmem:[#allocation79_spill] sm:$0xff] }
 0x2ad   : > { %3733 = vst [vmem:[%s9237_s29 + $0xa8] sm:$0xff] %v2709_v58  ;;  %3734 = vst [vmem:[%s9237_s29 + $0xb0] sm:$0xff] %v2710_v24  ;;  %v2790_v57 = vadd.f32 %v9377_v26, %v13439_v4  ;;  %v2791_v23 = vadd.f32 %v9377_v26, %v13440_v7  ;;  %v13441_v58 = vld [vmem:[#allocation80_spill] sm:$0xff]  ;;  %v13442_v24 = vld [vmem:[#allocation81_spill] sm:$0xff] }
 0x2ae   : > { %3735 = vst [vmem:[%s9237_s29 + $0xb8] sm:$0xff] %v2711_v2  ;;  %3736 = vst [vmem:[%s9237_s29 + $0xc0] sm:$0xff] %v2712_v56  ;;  %v2792_v40 = vadd.f32 %v9377_v26, %v13441_v58  ;;  %v2793_v17 = vadd.f32 %v9377_v26, %v13442_v24  ;;  %v13443_v2 = vld [vmem:[#allocation82_spill] sm:$0xff]  ;;  %v13444_v56 = vld [vmem:[#allocation83_spill] sm:$0xff] }
 0x2af   : > { %3737 = vst [vmem:[%s9237_s29 + $0xc8] sm:$0xff] %v2713_v63  ;;  %3738 = vst [vmem:[%s9237_s29 + $0xd0] sm:$0xff] %v2714_v62  ;;  %v2794_v29 = vadd.f32 %v9377_v26, %v13443_v2  ;;  %v2795_v15 = vadd.f32 %v9377_v26, %v13444_v56  ;;  %v13445_v63 = vld [vmem:[#allocation84_spill] sm:$0xff]  ;;  %v13446_v62 = vld [vmem:[#allocation85_spill] sm:$0xff] }
 0x2b0   : > { %3739 = vst [vmem:[%s9237_s29 + $0xd8] sm:$0xff] %v2715_v30  ;;  %3740 = vst [vmem:[%s9237_s29 + $0xe0] sm:$0xff] %v2716_v54  ;;  %v2796_v49 = vadd.f32 %v9377_v26, %v13445_v63  ;;  %v2797_v47 = vadd.f32 %v9377_v26, %v13446_v62  ;;  %v13447_v30 = vld [vmem:[#allocation86_spill] sm:$0xff]  ;;  %v13448_v54 = vld [vmem:[#allocation87_spill] sm:$0xff] }
 0x2b1   : > { %3741 = vst [vmem:[%s9237_s29 + $0xe8] sm:$0xff] %v2717_v5  ;;  %3742 = vst [vmem:[%s9237_s29 + $0xf0] sm:$0xff] %v2718_v45  ;;  %v2798_v25 = vadd.f32 %v9377_v26, %v13447_v30  ;;  %v2799_v55 = vadd.f32 %v9377_v26, %v13448_v54  ;;  %v13449_v5 = vld [vmem:[#allocation88_spill] sm:$0xff]  ;;  %v13450_v45 = vld [vmem:[#allocation89_spill] sm:$0xff] }
 0x2b2   : > { %3743 = vst [vmem:[%s9237_s29 + $0xf8] sm:$0xff] %v2719_v42  ;;  %3808 = vst [vmem:[%s9237_s29 + $0x300] sm:$0xff] %v2784_v16  ;;  %v2800_v22 = vadd.f32 %v9377_v26, %v13449_v5  ;;  %v2801_v46 = vadd.f32 %v9377_v26, %v13450_v45  ;;  %v13451_v42 = vld [vmem:[#allocation90_spill] sm:$0xff]  ;;  %v13452_v16 = vld [vmem:[#allocation91_spill] sm:$0xff] }
 0x2b3   : > { %3809 = vst [vmem:[%s9237_s29 + $0x308] sm:$0xff] %v2785_v3  ;;  %3810 = vst [vmem:[%s9237_s29 + $0x310] sm:$0xff] %v2786_v37  ;;  %v2802_v1 = vadd.f32 %v9377_v26, %v13451_v42  ;;  %v2803_v53 = vadd.f32 %v9377_v26, %v13452_v16  ;;  %v13453_v3 = vld [vmem:[#allocation92_spill] sm:$0xff]  ;;  %v13454_v37 = vld [vmem:[#allocation93_spill] sm:$0xff] }
 0x2b4   : > { %3811 = vst [vmem:[%s9237_s29 + $0x318] sm:$0xff] %v2787_v28  ;;  %3812 = vst [vmem:[%s9237_s29 + $0x320] sm:$0xff] %v2788_v10  ;;  %v2804_v34 = vadd.f32 %v9377_v26, %v13453_v3  ;;  %v2805_v43 = vadd.f32 %v9377_v26, %v13454_v37  ;;  %v13455_v28 = vld [vmem:[#allocation94_spill] sm:$0xff]  ;;  %v13456_v10 = vld [vmem:[#allocation95_spill] sm:$0xff] }
 0x2b5   : > { %3813 = vst [vmem:[%s9237_s29 + $0x328] sm:$0xff] %v2789_v27  ;;  %3814 = vst [vmem:[%s9237_s29 + $0x330] sm:$0xff] %v2790_v57  ;;  %v2806_v6 = vadd.f32 %v9377_v26, %v13455_v28  ;;  %v2807_v19 = vadd.f32 %v9377_v26, %v13456_v10  ;;  %v9475_v27 = vpop.permute.xlu0 %2540  ;;  %v13457_v4 = vld [vmem:[#allocation96_spill] sm:$0xff]  ;;  %v13458_v7 = vld [vmem:[#allocation97_spill] sm:$0xff] }
 0x2b6   : > { %3815 = vst [vmem:[%s9237_s29 + $0x338] sm:$0xff] %v2791_v23  ;;  %3816 = vst [vmem:[%s9237_s29 + $0x340] sm:$0xff] %v2792_v40  ;;  %v2808_v57 = vadd.f32 %v9377_v26, %v13457_v4  ;;  %v2809_v23 = vadd.f32 %v9377_v26, %v13458_v7  ;;  %v13459_v58 = vld [vmem:[#allocation98_spill] sm:$0xff]  ;;  %v13460_v24 = vld [vmem:[#allocation99_spill] sm:$0xff] }
 0x2b7   : > { %3817 = vst [vmem:[%s9237_s29 + $0x348] sm:$0xff] %v2793_v17  ;;  %3818 = vst [vmem:[%s9237_s29 + $0x350] sm:$0xff] %v2794_v29  ;;  %v2810_v40 = vadd.f32 %v9377_v26, %v13459_v58  ;;  %v2811_v17 = vadd.f32 %v9377_v26, %v13460_v24  ;;  %v13461_v2 = vld [vmem:[#allocation100_spill] sm:$0xff]  ;;  %v13462_v56 = vld [vmem:[#allocation101_spill] sm:$0xff] }
 0x2b8   : > { %3819 = vst [vmem:[%s9237_s29 + $0x358] sm:$0xff] %v2795_v15  ;;  %3820 = vst [vmem:[%s9237_s29 + $0x360] sm:$0xff] %v2796_v49  ;;  %v2812_v29 = vadd.f32 %v9377_v26, %v13461_v2  ;;  %v2813_v15 = vadd.f32 %v9377_v26, %v13462_v56  ;;  %v13463_v63 = vld [vmem:[#allocation102_spill] sm:$0xff]  ;;  %v13464_v62 = vld [vmem:[#allocation103_spill] sm:$0xff] }
 0x2b9   : > { %3821 = vst [vmem:[%s9237_s29 + $0x368] sm:$0xff] %v2797_v47  ;;  %3822 = vst [vmem:[%s9237_s29 + $0x370] sm:$0xff] %v2798_v25  ;;  %v2814_v49 = vadd.f32 %v9377_v26, %v13463_v63  ;;  %v2815_v47 = vadd.f32 %v9377_v26, %v13464_v62  ;;  %v13465_v30 = vld [vmem:[#allocation8_spill] sm:$0xff]  ;;  %v13466_v54 = vld [vmem:[#allocation9_spill] sm:$0xff] }
 0x2ba   : > { %3823 = vst [vmem:[%s9237_s29 + $0x378] sm:$0xff] %v2799_v55  ;;  %3824 = vst [vmem:[%s9237_s29 + $0x380] sm:$0xff] %v2800_v22  ;;  %v2752_v25 = vadd.f32 %v9475_v27, %v13465_v30  ;;  %v2753_v55 = vadd.f32 %v9475_v27, %v13466_v54  ;;  %v13467_v5 = vld [vmem:[#allocation10_spill] sm:$0xff]  ;;  %v13468_v22 = vld [vmem:[#allocation11_spill] sm:$0xff] }
 0x2bb   : > { %3825 = vst [vmem:[%s9237_s29 + $0x388] sm:$0xff] %v2801_v46  ;;  %3826 = vst [vmem:[%s9237_s29 + $0x390] sm:$0xff] %v2802_v1  ;;  %v2754_v26 = vadd.f32 %v9475_v27, %v13467_v5  ;;  %v2755_v45 = vadd.f32 %v9475_v27, %v13468_v22  ;;  %v13469_v46 = vld [vmem:[#allocation12_spill] sm:$0xff]  ;;  %v13470_v1 = vld [vmem:[#allocation13_spill] sm:$0xff] }
 0x2bc   : > { %3827 = vst [vmem:[%s9237_s29 + $0x398] sm:$0xff] %v2803_v53  ;;  %3828 = vst [vmem:[%s9237_s29 + $0x3a0] sm:$0xff] %v2804_v34  ;;  %v2756_v42 = vadd.f32 %v9475_v27, %v13469_v46  ;;  %v2757_v16 = vadd.f32 %v9475_v27, %v13470_v1  ;;  %v13471_v53 = vld [vmem:[#allocation14_spill] sm:$0xff]  ;;  %v13472_v34 = vld [vmem:[#allocation15_spill] sm:$0xff] }
 0x2bd   : > { %3829 = vst [vmem:[%s9237_s29 + $0x3a8] sm:$0xff] %v2805_v43  ;;  %3830 = vst [vmem:[%s9237_s29 + $0x3b0] sm:$0xff] %v2806_v6  ;;  %v2758_v3 = vadd.f32 %v9475_v27, %v13471_v53  ;;  %v2759_v37 = vadd.f32 %v9475_v27, %v13472_v34  ;;  %v13473_v43 = vld [vmem:[#allocation16_spill] sm:$0xff]  ;;  %v13474_v6 = vld [vmem:[#allocation17_spill] sm:$0xff] }
 0x2be   : > { %3831 = vst [vmem:[%s9237_s29 + $0x3b8] sm:$0xff] %v2807_v19  ;;  %3832 = vst [vmem:[%s9237_s29 + $0x3c0] sm:$0xff] %v2808_v57  ;;  %v2760_v28 = vadd.f32 %v9475_v27, %v13473_v43  ;;  %v2761_v10 = vadd.f32 %v9475_v27, %v13474_v6  ;;  %v13475_v19 = vld [vmem:[#allocation18_spill] sm:$0xff]  ;;  %v13476_v57 = vld [vmem:[#allocation19_spill] sm:$0xff] }
 0x2bf   : > { %3833 = vst [vmem:[%s9237_s29 + $0x3c8] sm:$0xff] %v2809_v23  ;;  %3834 = vst [vmem:[%s9237_s29 + $0x3d0] sm:$0xff] %v2810_v40  ;;  %v2762_v4 = vadd.f32 %v9475_v27, %v13475_v19  ;;  %v2763_v7 = vadd.f32 %v9475_v27, %v13476_v57  ;;  %v13477_v23 = vld [vmem:[#allocation20_spill] sm:$0xff]  ;;  %v13478_v40 = vld [vmem:[#allocation21_spill] sm:$0xff] }
 0x2c0   : > { %3835 = vst [vmem:[%s9237_s29 + $0x3d8] sm:$0xff] %v2811_v17  ;;  %3836 = vst [vmem:[%s9237_s29 + $0x3e0] sm:$0xff] %v2812_v29  ;;  %v2764_v58 = vadd.f32 %v9475_v27, %v13477_v23  ;;  %v2765_v24 = vadd.f32 %v9475_v27, %v13478_v40  ;;  %v13479_v17 = vld [vmem:[#allocation22_spill] sm:$0xff]  ;;  %v13480_v29 = vld [vmem:[#allocation23_spill] sm:$0xff] }
 0x2c1   : > { %3837 = vst [vmem:[%s9237_s29 + $0x3e8] sm:$0xff] %v2813_v15  ;;  %3838 = vst [vmem:[%s9237_s29 + $0x3f0] sm:$0xff] %v2814_v49  ;;  %v2766_v2 = vadd.f32 %v9475_v27, %v13479_v17  ;;  %v2767_v56 = vadd.f32 %v9475_v27, %v13480_v29  ;;  %v13481_v15 = vld [vmem:[#allocation24_spill] sm:$0xff]  ;;  %v13482_v49 = vld [vmem:[#allocation25_spill] sm:$0xff] }
 0x2c2   : > { %3839 = vst [vmem:[%s9237_s29 + $0x3f8] sm:$0xff] %v2815_v47  ;;  %3776 = vst [vmem:[%s9237_s29 + $0x200] sm:$0xff] %v2752_v25  ;;  %v2768_v63 = vadd.f32 %v9475_v27, %v13481_v15  ;;  %v2769_v62 = vadd.f32 %v9475_v27, %v13482_v49  ;;  %v13483_v47 = vld [vmem:[#allocation26_spill] sm:$0xff]  ;;  %v13484_v25 = vld [vmem:[#allocation27_spill] sm:$0xff] }
 0x2c3   : > { %3777 = vst [vmem:[%s9237_s29 + $0x208] sm:$0xff] %v2753_v55  ;;  %3778 = vst [vmem:[%s9237_s29 + $0x210] sm:$0xff] %v2754_v26  ;;  %v2770_v30 = vadd.f32 %v9475_v27, %v13483_v47  ;;  %v2771_v54 = vadd.f32 %v9475_v27, %v13484_v25  ;;  %v13485_v55 = vld [vmem:[#allocation28_spill] sm:$0xff]  ;;  %v13486_v26 = vld [vmem:[#allocation29_spill] sm:$0xff] }
 0x2c4   : > { %3779 = vst [vmem:[%s9237_s29 + $0x218] sm:$0xff] %v2755_v45  ;;  %3780 = vst [vmem:[%s9237_s29 + $0x220] sm:$0xff] %v2756_v42  ;;  %v2772_v5 = vadd.f32 %v9475_v27, %v13485_v55  ;;  %v2773_v22 = vadd.f32 %v9475_v27, %v13486_v26  ;;  %v13487_v45 = vld [vmem:[#allocation30_spill] sm:$0xff]  ;;  %v13488_v42 = vld [vmem:[#allocation31_spill] sm:$0xff] }
 0x2c5   : > { %3781 = vst [vmem:[%s9237_s29 + $0x228] sm:$0xff] %v2757_v16  ;;  %3782 = vst [vmem:[%s9237_s29 + $0x230] sm:$0xff] %v2758_v3  ;;  %v2774_v46 = vadd.f32 %v9475_v27, %v13487_v45  ;;  %v2775_v1 = vadd.f32 %v9475_v27, %v13488_v42  ;;  %v9573_v16 = vpop.permute.xlu1 %2555  ;;  %v13489_v53 = vld [vmem:[#allocation32_spill] sm:$0xff]  ;;  %v13490_v34 = vld [vmem:[#allocation33_spill] sm:$0xff] }
 0x2c6   : > { %3783 = vst [vmem:[%s9237_s29 + $0x238] sm:$0xff] %v2759_v37  ;;  %3784 = vst [vmem:[%s9237_s29 + $0x240] sm:$0xff] %v2760_v28  ;;  %v2776_v3 = vadd.f32 %v9475_v27, %v13489_v53  ;;  %v2777_v37 = vadd.f32 %v9475_v27, %v13490_v34  ;;  %v13491_v43 = vld [vmem:[#allocation34_spill] sm:$0xff]  ;;  %v13492_v6 = vld [vmem:[#allocation35_spill] sm:$0xff] }
 0x2c7   : > { %3785 = vst [vmem:[%s9237_s29 + $0x248] sm:$0xff] %v2761_v10  ;;  %3786 = vst [vmem:[%s9237_s29 + $0x250] sm:$0xff] %v2762_v4  ;;  %v2778_v28 = vadd.f32 %v9475_v27, %v13491_v43  ;;  %v2779_v10 = vadd.f32 %v9475_v27, %v13492_v6  ;;  %v13493_v19 = vld [vmem:[#allocation36_spill] sm:$0xff]  ;;  %v13494_v57 = vld [vmem:[#allocation37_spill] sm:$0xff] }
 0x2c8   : > { %3787 = vst [vmem:[%s9237_s29 + $0x258] sm:$0xff] %v2763_v7  ;;  %3788 = vst [vmem:[%s9237_s29 + $0x260] sm:$0xff] %v2764_v58  ;;  %v2780_v4 = vadd.f32 %v9475_v27, %v13493_v19  ;;  %v2781_v7 = vadd.f32 %v9475_v27, %v13494_v57  ;;  %v13495_v23 = vld [vmem:[#allocation38_spill] sm:$0xff]  ;;  %v13496_v40 = vld [vmem:[#allocation39_spill] sm:$0xff] }
 0x2c9   : > { %3789 = vst [vmem:[%s9237_s29 + $0x268] sm:$0xff] %v2765_v24  ;;  %3790 = vst [vmem:[%s9237_s29 + $0x270] sm:$0xff] %v2766_v2  ;;  %v2782_v58 = vadd.f32 %v9475_v27, %v13495_v23  ;;  %v2783_v24 = vadd.f32 %v9475_v27, %v13496_v40  ;;  %v13497_v17 = vld [vmem:[#allocation106_spill] sm:$0xff]  ;;  %v13498_v29 = vld [vmem:[#allocation107_spill] sm:$0xff] }
 0x2ca   : > { %3791 = vst [vmem:[%s9237_s29 + $0x278] sm:$0xff] %v2767_v56  ;;  %3792 = vst [vmem:[%s9237_s29 + $0x280] sm:$0xff] %v2768_v63  ;;  %v2848_v2 = vadd.f32 %v9573_v16, %v13497_v17  ;;  %v2849_v56 = vadd.f32 %v9573_v16, %v13498_v29  ;;  %v13499_v15 = vld [vmem:[#allocation108_spill] sm:$0xff]  ;;  %v13500_v63 = vld [vmem:[#allocation109_spill] sm:$0xff] }
 0x2cb   : > { %3793 = vst [vmem:[%s9237_s29 + $0x288] sm:$0xff] %v2769_v62  ;;  %3794 = vst [vmem:[%s9237_s29 + $0x290] sm:$0xff] %v2770_v30  ;;  %v2850_v27 = vadd.f32 %v9573_v16, %v13499_v15  ;;  %v2851_v49 = vadd.f32 %v9573_v16, %v13500_v63  ;;  %v13501_v62 = vld [vmem:[#allocation110_spill] sm:$0xff]  ;;  %v13502_v30 = vld [vmem:[#allocation111_spill] sm:$0xff] }
 0x2cc   : > { %3795 = vst [vmem:[%s9237_s29 + $0x298] sm:$0xff] %v2771_v54  ;;  %3796 = vst [vmem:[%s9237_s29 + $0x2a0] sm:$0xff] %v2772_v5  ;;  %v2852_v47 = vadd.f32 %v9573_v16, %v13501_v62  ;;  %v2853_v25 = vadd.f32 %v9573_v16, %v13502_v30  ;;  %v13503_v54 = vld [vmem:[#allocation112_spill] sm:$0xff]  ;;  %v13504_v5 = vld [vmem:[#allocation113_spill] sm:$0xff] }
 0x2cd   : > { %3797 = vst [vmem:[%s9237_s29 + $0x2a8] sm:$0xff] %v2773_v22  ;;  %3798 = vst [vmem:[%s9237_s29 + $0x2b0] sm:$0xff] %v2774_v46  ;;  %v2854_v55 = vadd.f32 %v9573_v16, %v13503_v54  ;;  %v2855_v26 = vadd.f32 %v9573_v16, %v13504_v5  ;;  %v13505_v22 = vld [vmem:[#allocation114_spill] sm:$0xff]  ;;  %v13506_v46 = vld [vmem:[#allocation115_spill] sm:$0xff] }
 0x2ce   : > { %3799 = vst [vmem:[%s9237_s29 + $0x2b8] sm:$0xff] %v2775_v1  ;;  %3800 = vst [vmem:[%s9237_s29 + $0x2c0] sm:$0xff] %v2776_v3  ;;  %v2856_v45 = vadd.f32 %v9573_v16, %v13505_v22  ;;  %v2857_v42 = vadd.f32 %v9573_v16, %v13506_v46  ;;  %v13507_v1 = vld [vmem:[#allocation116_spill] sm:$0xff]  ;;  %v13508_v3 = vld [vmem:[#allocation117_spill] sm:$0xff] }
 0x2cf   : > { %3801 = vst [vmem:[%s9237_s29 + $0x2c8] sm:$0xff] %v2777_v37  ;;  %3802 = vst [vmem:[%s9237_s29 + $0x2d0] sm:$0xff] %v2778_v28  ;;  %v2858_v53 = vadd.f32 %v9573_v16, %v13507_v1  ;;  %v2859_v34 = vadd.f32 %v9573_v16, %v13508_v3  ;;  %v13509_v37 = vld [vmem:[#allocation118_spill] sm:$0xff]  ;;  %v13510_v28 = vld [vmem:[#allocation119_spill] sm:$0xff] }
 0x2d0   : > { %3803 = vst [vmem:[%s9237_s29 + $0x2d8] sm:$0xff] %v2779_v10  ;;  %3804 = vst [vmem:[%s9237_s29 + $0x2e0] sm:$0xff] %v2780_v4  ;;  %v2860_v43 = vadd.f32 %v9573_v16, %v13509_v37  ;;  %v2861_v6 = vadd.f32 %v9573_v16, %v13510_v28  ;;  %v13511_v10 = vld [vmem:[#allocation120_spill] sm:$0xff]  ;;  %v13512_v4 = vld [vmem:[#allocation121_spill] sm:$0xff] }
 0x2d1   : > { %3805 = vst [vmem:[%s9237_s29 + $0x2e8] sm:$0xff] %v2781_v7  ;;  %3806 = vst [vmem:[%s9237_s29 + $0x2f0] sm:$0xff] %v2782_v58  ;;  %v2862_v19 = vadd.f32 %v9573_v16, %v13511_v10  ;;  %v2863_v57 = vadd.f32 %v9573_v16, %v13512_v4  ;;  %v13513_v7 = vld [vmem:[#allocation122_spill] sm:$0xff]  ;;  %v13514_v58 = vld [vmem:[#allocation123_spill] sm:$0xff] }
 0x2d2   : > { %3807 = vst [vmem:[%s9237_s29 + $0x2f8] sm:$0xff] %v2783_v24  ;;  %3872 = vst [vmem:[%s9237_s29 + $0x500] sm:$0xff] %v2848_v2  ;;  %v2864_v23 = vadd.f32 %v9573_v16, %v13513_v7  ;;  %v2865_v40 = vadd.f32 %v9573_v16, %v13514_v58  ;;  %v13515_v24 = vld [vmem:[#allocation124_spill] sm:$0xff]  ;;  %v13516_v2 = vld [vmem:[#allocation125_spill] sm:$0xff] }
 0x2d3   : > { %3873 = vst [vmem:[%s9237_s29 + $0x508] sm:$0xff] %v2849_v56  ;;  %3874 = vst [vmem:[%s9237_s29 + $0x510] sm:$0xff] %v2850_v27  ;;  %v2866_v17 = vadd.f32 %v9573_v16, %v13515_v24  ;;  %v2867_v29 = vadd.f32 %v9573_v16, %v13516_v2  ;;  %v13517_v56 = vld [vmem:[#allocation126_spill] sm:$0xff]  ;;  %v13518_v27 = vld [vmem:[#allocation127_spill] sm:$0xff] }
 0x2d4   : > { %3875 = vst [vmem:[%s9237_s29 + $0x518] sm:$0xff] %v2851_v49  ;;  %3876 = vst [vmem:[%s9237_s29 + $0x520] sm:$0xff] %v2852_v47  ;;  %v2868_v15 = vadd.f32 %v9573_v16, %v13517_v56  ;;  %v2869_v63 = vadd.f32 %v9573_v16, %v13518_v27  ;;  %v13519_v49 = vld [vmem:[#allocation128_spill] sm:$0xff]  ;;  %v13520_v47 = vld [vmem:[#allocation129_spill] sm:$0xff] }
 0x2d5   : > { %3877 = vst [vmem:[%s9237_s29 + $0x528] sm:$0xff] %v2853_v25  ;;  %3878 = vst [vmem:[%s9237_s29 + $0x530] sm:$0xff] %v2854_v55  ;;  %v2870_v62 = vadd.f32 %v9573_v16, %v13519_v49  ;;  %v2871_v30 = vadd.f32 %v9573_v16, %v13520_v47  ;;  %v9671_v25 = vpop.permute.xlu0 %2550  ;;  %v13521_v54 = vld [vmem:[#allocation130_spill] sm:$0xff]  ;;  %v13522_v5 = vld [vmem:[#allocation131_spill] sm:$0xff] }
 0x2d6   : > { %3879 = vst [vmem:[%s9237_s29 + $0x538] sm:$0xff] %v2855_v26  ;;  %3880 = vst [vmem:[%s9237_s29 + $0x540] sm:$0xff] %v2856_v45  ;;  %v2872_v55 = vadd.f32 %v9573_v16, %v13521_v54  ;;  %v2873_v26 = vadd.f32 %v9573_v16, %v13522_v5  ;;  %v13523_v22 = vld [vmem:[#allocation132_spill] sm:$0xff]  ;;  %v13524_v46 = vld [vmem:[#allocation133_spill] sm:$0xff] }
 0x2d7   : > { %3881 = vst [vmem:[%s9237_s29 + $0x548] sm:$0xff] %v2857_v42  ;;  %3882 = vst [vmem:[%s9237_s29 + $0x550] sm:$0xff] %v2858_v53  ;;  %v2874_v45 = vadd.f32 %v9573_v16, %v13523_v22  ;;  %v2875_v42 = vadd.f32 %v9573_v16, %v13524_v46  ;;  %v13525_v1 = vld [vmem:[#allocation134_spill] sm:$0xff]  ;;  %v13526_v3 = vld [vmem:[#allocation135_spill] sm:$0xff] }
 0x2d8   : > { %3883 = vst [vmem:[%s9237_s29 + $0x558] sm:$0xff] %v2859_v34  ;;  %3884 = vst [vmem:[%s9237_s29 + $0x560] sm:$0xff] %v2860_v43  ;;  %v2876_v53 = vadd.f32 %v9573_v16, %v13525_v1  ;;  %v2877_v34 = vadd.f32 %v9573_v16, %v13526_v3  ;;  %v13527_v37 = vld [vmem:[#allocation136_spill] sm:$0xff]  ;;  %v13528_v28 = vld [vmem:[#allocation137_spill] sm:$0xff] }
 0x2d9   : > { %3885 = vst [vmem:[%s9237_s29 + $0x568] sm:$0xff] %v2861_v6  ;;  %3886 = vst [vmem:[%s9237_s29 + $0x570] sm:$0xff] %v2862_v19  ;;  %v2878_v43 = vadd.f32 %v9573_v16, %v13527_v37  ;;  %v2879_v6 = vadd.f32 %v9573_v16, %v13528_v28  ;;  %v13529_v10 = vld [vmem:[#allocation138_spill] sm:$0xff]  ;;  %v13530_v4 = vld [vmem:[#allocation139_spill] sm:$0xff] }
 0x2da   : > { %3887 = vst [vmem:[%s9237_s29 + $0x578] sm:$0xff] %v2863_v57  ;;  %3888 = vst [vmem:[%s9237_s29 + $0x580] sm:$0xff] %v2864_v23  ;;  %v2816_v19 = vadd.f32 %v9671_v25, %v13529_v10  ;;  %v2817_v57 = vadd.f32 %v9671_v25, %v13530_v4  ;;  %v13531_v7 = vld [vmem:[#allocation140_spill] sm:$0xff]  ;;  %v13532_v23 = vld [vmem:[#allocation141_spill] sm:$0xff] }
 0x2db   : > { %3889 = vst [vmem:[%s9237_s29 + $0x588] sm:$0xff] %v2865_v40  ;;  %3890 = vst [vmem:[%s9237_s29 + $0x590] sm:$0xff] %v2866_v17  ;;  %v2818_v16 = vadd.f32 %v9671_v25, %v13531_v7  ;;  %v2819_v58 = vadd.f32 %v9671_v25, %v13532_v23  ;;  %v13533_v40 = vld [vmem:[#allocation142_spill] sm:$0xff]  ;;  %v13534_v17 = vld [vmem:[#allocation143_spill] sm:$0xff] }
 0x2dc   : > { %3891 = vst [vmem:[%s9237_s29 + $0x598] sm:$0xff] %v2867_v29  ;;  %3892 = vst [vmem:[%s9237_s29 + $0x5a0] sm:$0xff] %v2868_v15  ;;  %v2820_v24 = vadd.f32 %v9671_v25, %v13533_v40  ;;  %v2821_v2 = vadd.f32 %v9671_v25, %v13534_v17  ;;  %v13535_v29 = vld [vmem:[#allocation144_spill] sm:$0xff]  ;;  %v13536_v15 = vld [vmem:[#allocation145_spill] sm:$0xff] }
 0x2dd   : > { %3893 = vst [vmem:[%s9237_s29 + $0x5a8] sm:$0xff] %v2869_v63  ;;  %3894 = vst [vmem:[%s9237_s29 + $0x5b0] sm:$0xff] %v2870_v62  ;;  %v2822_v56 = vadd.f32 %v9671_v25, %v13535_v29  ;;  %v2823_v27 = vadd.f32 %v9671_v25, %v13536_v15  ;;  %v13537_v63 = vld [vmem:[#allocation146_spill] sm:$0xff]  ;;  %v13538_v62 = vld [vmem:[#allocation147_spill] sm:$0xff] }
 0x2de   : > { %3895 = vst [vmem:[%s9237_s29 + $0x5b8] sm:$0xff] %v2871_v30  ;;  %3896 = vst [vmem:[%s9237_s29 + $0x5c0] sm:$0xff] %v2872_v55  ;;  %v2824_v49 = vadd.f32 %v9671_v25, %v13537_v63  ;;  %v2825_v47 = vadd.f32 %v9671_v25, %v13538_v62  ;;  %v13539_v30 = vld [vmem:[#allocation148_spill] sm:$0xff]  ;;  %v13540_v55 = vld [vmem:[#allocation149_spill] sm:$0xff] }
 0x2df   : > { %3897 = vst [vmem:[%s9237_s29 + $0x5c8] sm:$0xff] %v2873_v26  ;;  %3898 = vst [vmem:[%s9237_s29 + $0x5d0] sm:$0xff] %v2874_v45  ;;  %v2826_v54 = vadd.f32 %v9671_v25, %v13539_v30  ;;  %v2827_v5 = vadd.f32 %v9671_v25, %v13540_v55  ;;  %v13541_v26 = vld [vmem:[#allocation150_spill] sm:$0xff]  ;;  %v13542_v45 = vld [vmem:[#allocation151_spill] sm:$0xff] }
 0x2e0   : > { %3899 = vst [vmem:[%s9237_s29 + $0x5d8] sm:$0xff] %v2875_v42  ;;  %3900 = vst [vmem:[%s9237_s29 + $0x5e0] sm:$0xff] %v2876_v53  ;;  %v2828_v22 = vadd.f32 %v9671_v25, %v13541_v26  ;;  %v2829_v46 = vadd.f32 %v9671_v25, %v13542_v45  ;;  %v13543_v42 = vld [vmem:[#allocation152_spill] sm:$0xff]  ;;  %v13544_v53 = vld [vmem:[#allocation153_spill] sm:$0xff] }
 0x2e1   : > { %3901 = vst [vmem:[%s9237_s29 + $0x5e8] sm:$0xff] %v2877_v34  ;;  %3902 = vst [vmem:[%s9237_s29 + $0x5f0] sm:$0xff] %v2878_v43  ;;  %v2830_v1 = vadd.f32 %v9671_v25, %v13543_v42  ;;  %v2831_v3 = vadd.f32 %v9671_v25, %v13544_v53  ;;  %v13545_v34 = vld [vmem:[#allocation154_spill] sm:$0xff]  ;;  %v13546_v43 = vld [vmem:[#allocation155_spill] sm:$0xff] }
 0x2e2   : > { %3903 = vst [vmem:[%s9237_s29 + $0x5f8] sm:$0xff] %v2879_v6  ;;  %3840 = vst [vmem:[%s9237_s29 + $0x400] sm:$0xff] %v2816_v19  ;;  %v2832_v37 = vadd.f32 %v9671_v25, %v13545_v34  ;;  %v2833_v28 = vadd.f32 %v9671_v25, %v13546_v43  ;;  %v13547_v6 = vld [vmem:[#allocation156_spill] sm:$0xff]  ;;  %v13548_v19 = vld [vmem:[#allocation157_spill] sm:$0xff] }
 0x2e3   : > { %3841 = vst [vmem:[%s9237_s29 + $0x408] sm:$0xff] %v2817_v57  ;;  %3842 = vst [vmem:[%s9237_s29 + $0x410] sm:$0xff] %v2818_v16  ;;  %v2834_v10 = vadd.f32 %v9671_v25, %v13547_v6  ;;  %v2835_v4 = vadd.f32 %v9671_v25, %v13548_v19  ;;  %v13549_v57 = vld [vmem:[#allocation158_spill] sm:$0xff]  ;;  %v13550_v16 = vld [vmem:[#allocation159_spill] sm:$0xff] }
 0x2e4   : > { %3843 = vst [vmem:[%s9237_s29 + $0x418] sm:$0xff] %v2819_v58  ;;  %3844 = vst [vmem:[%s9237_s29 + $0x420] sm:$0xff] %v2820_v24  ;;  %v2836_v7 = vadd.f32 %v9671_v25, %v13549_v57  ;;  %v2837_v23 = vadd.f32 %v9671_v25, %v13550_v16  ;;  %v13551_v58 = vld [vmem:[#allocation160_spill] sm:$0xff]  ;;  %v13552_v24 = vld [vmem:[#allocation161_spill] sm:$0xff] }
 0x2e5   : > { %3845 = vst [vmem:[%s9237_s29 + $0x428] sm:$0xff] %v2821_v2  ;;  %3846 = vst [vmem:[%s9237_s29 + $0x430] sm:$0xff] %v2822_v56  ;;  %v2838_v40 = vadd.f32 %v9671_v25, %v13551_v58  ;;  %v2839_v17 = vadd.f32 %v9671_v25, %v13552_v24  ;;  %v9769_v2 = vpop.permute.xlu1 %2565  ;;  %v13553_v29 = vld [vmem:[#allocation162_spill] sm:$0xff]  ;;  %v13554_v15 = vld [vmem:[#allocation163_spill] sm:$0xff] }
 0x2e6   : > { %3847 = vst [vmem:[%s9237_s29 + $0x438] sm:$0xff] %v2823_v27  ;;  %3848 = vst [vmem:[%s9237_s29 + $0x440] sm:$0xff] %v2824_v49  ;;  %v2840_v56 = vadd.f32 %v9671_v25, %v13553_v29  ;;  %v2841_v27 = vadd.f32 %v9671_v25, %v13554_v15  ;;  %v13555_v63 = vld [vmem:[#allocation164_spill] sm:$0xff]  ;;  %v13556_v62 = vld [vmem:[#allocation165_spill] sm:$0xff] }
 0x2e7   : > { %3849 = vst [vmem:[%s9237_s29 + $0x448] sm:$0xff] %v2825_v47  ;;  %3850 = vst [vmem:[%s9237_s29 + $0x450] sm:$0xff] %v2826_v54  ;;  %v2842_v49 = vadd.f32 %v9671_v25, %v13555_v63  ;;  %v2843_v47 = vadd.f32 %v9671_v25, %v13556_v62  ;;  %v13557_v30 = vld [vmem:[#allocation166_spill] sm:$0xff]  ;;  %v13558_v55 = vld [vmem:[#allocation167_spill] sm:$0xff] }
 0x2e8   : > { %3851 = vst [vmem:[%s9237_s29 + $0x458] sm:$0xff] %v2827_v5  ;;  %3852 = vst [vmem:[%s9237_s29 + $0x460] sm:$0xff] %v2828_v22  ;;  %v2844_v54 = vadd.f32 %v9671_v25, %v13557_v30  ;;  %v2845_v5 = vadd.f32 %v9671_v25, %v13558_v55  ;;  %v13559_v26 = vld [vmem:[#allocation168_spill] sm:$0xff]  ;;  %v13560_v45 = vld [vmem:[#allocation169_spill] sm:$0xff] }
 0x2e9   : > { %3853 = vst [vmem:[%s9237_s29 + $0x468] sm:$0xff] %v2829_v46  ;;  %3854 = vst [vmem:[%s9237_s29 + $0x470] sm:$0xff] %v2830_v1  ;;  %v2846_v22 = vadd.f32 %v9671_v25, %v13559_v26  ;;  %v2847_v46 = vadd.f32 %v9671_v25, %v13560_v45  ;;  %v13561_v42 = vld [vmem:[#allocation170_spill] sm:$0xff]  ;;  %v13562_v53 = vld [vmem:[#allocation171_spill] sm:$0xff] }
 0x2ea   : > { %3855 = vst [vmem:[%s9237_s29 + $0x478] sm:$0xff] %v2831_v3  ;;  %3856 = vst [vmem:[%s9237_s29 + $0x480] sm:$0xff] %v2832_v37  ;;  %v2912_v1 = vadd.f32 %v9769_v2, %v13561_v42  ;;  %v2913_v3 = vadd.f32 %v9769_v2, %v13562_v53  ;;  %v13563_v34 = vld [vmem:[#allocation172_spill] sm:$0xff]  ;;  %v13564_v37 = vld [vmem:[#allocation173_spill] sm:$0xff] }
 0x2eb   : > { %3857 = vst [vmem:[%s9237_s29 + $0x488] sm:$0xff] %v2833_v28  ;;  %3858 = vst [vmem:[%s9237_s29 + $0x490] sm:$0xff] %v2834_v10  ;;  %v2914_v25 = vadd.f32 %v9769_v2, %v13563_v34  ;;  %v2915_v43 = vadd.f32 %v9769_v2, %v13564_v37  ;;  %v13565_v28 = vld [vmem:[#allocation174_spill] sm:$0xff]  ;;  %v13566_v10 = vld [vmem:[#allocation175_spill] sm:$0xff] }
 0x2ec   : > { %3859 = vst [vmem:[%s9237_s29 + $0x498] sm:$0xff] %v2835_v4  ;;  %3860 = vst [vmem:[%s9237_s29 + $0x4a0] sm:$0xff] %v2836_v7  ;;  %v2916_v6 = vadd.f32 %v9769_v2, %v13565_v28  ;;  %v2917_v19 = vadd.f32 %v9769_v2, %v13566_v10  ;;  %v13567_v4 = vld [vmem:[#allocation176_spill] sm:$0xff]  ;;  %v13568_v7 = vld [vmem:[#allocation177_spill] sm:$0xff] }
 0x2ed   : > { %3861 = vst [vmem:[%s9237_s29 + $0x4a8] sm:$0xff] %v2837_v23  ;;  %3862 = vst [vmem:[%s9237_s29 + $0x4b0] sm:$0xff] %v2838_v40  ;;  %v2918_v57 = vadd.f32 %v9769_v2, %v13567_v4  ;;  %v2919_v16 = vadd.f32 %v9769_v2, %v13568_v7  ;;  %v13569_v23 = vld [vmem:[#allocation178_spill] sm:$0xff]  ;;  %v13570_v40 = vld [vmem:[#allocation179_spill] sm:$0xff] }
 0x2ee   : > { %3863 = vst [vmem:[%s9237_s29 + $0x4b8] sm:$0xff] %v2839_v17  ;;  %3864 = vst [vmem:[%s9237_s29 + $0x4c0] sm:$0xff] %v2840_v56  ;;  %v2920_v58 = vadd.f32 %v9769_v2, %v13569_v23  ;;  %v2921_v24 = vadd.f32 %v9769_v2, %v13570_v40  ;;  %v13571_v17 = vld [vmem:[#allocation180_spill] sm:$0xff]  ;;  %v13572_v56 = vld [vmem:[#allocation181_spill] sm:$0xff] }
 0x2ef   : > { %3865 = vst [vmem:[%s9237_s29 + $0x4c8] sm:$0xff] %v2841_v27  ;;  %3866 = vst [vmem:[%s9237_s29 + $0x4d0] sm:$0xff] %v2842_v49  ;;  %v2922_v29 = vadd.f32 %v9769_v2, %v13571_v17  ;;  %v2923_v15 = vadd.f32 %v9769_v2, %v13572_v56  ;;  %v13573_v27 = vld [vmem:[#allocation182_spill] sm:$0xff]  ;;  %v13574_v49 = vld [vmem:[#allocation183_spill] sm:$0xff] }
 0x2f0   : > { %3867 = vst [vmem:[%s9237_s29 + $0x4d8] sm:$0xff] %v2843_v47  ;;  %3868 = vst [vmem:[%s9237_s29 + $0x4e0] sm:$0xff] %v2844_v54  ;;  %v2924_v63 = vadd.f32 %v9769_v2, %v13573_v27  ;;  %v2925_v62 = vadd.f32 %v9769_v2, %v13574_v49  ;;  %v13575_v47 = vld [vmem:[#allocation184_spill] sm:$0xff]  ;;  %v13576_v54 = vld [vmem:[#allocation185_spill] sm:$0xff] }
 0x2f1   : > { %3869 = vst [vmem:[%s9237_s29 + $0x4e8] sm:$0xff] %v2845_v5  ;;  %3870 = vst [vmem:[%s9237_s29 + $0x4f0] sm:$0xff] %v2846_v22  ;;  %v2926_v30 = vadd.f32 %v9769_v2, %v13575_v47  ;;  %v2927_v55 = vadd.f32 %v9769_v2, %v13576_v54  ;;  %v13577_v5 = vld [vmem:[#allocation186_spill] sm:$0xff]  ;;  %v13578_v22 = vld [vmem:[#allocation187_spill] sm:$0xff] }
 0x2f2   : > { %3871 = vst [vmem:[%s9237_s29 + $0x4f8] sm:$0xff] %v2847_v46  ;;  %3936 = vst [vmem:[%s9237_s29 + $0x700] sm:$0xff] %v2912_v1  ;;  %v2928_v26 = vadd.f32 %v9769_v2, %v13577_v5  ;;  %v2929_v45 = vadd.f32 %v9769_v2, %v13578_v22  ;;  %v13579_v46 = vld [vmem:[#allocation188_spill] sm:$0xff]  ;;  %v13580_v1 = vld [vmem:[#allocation189_spill] sm:$0xff] }
 0x2f3   : > { %3937 = vst [vmem:[%s9237_s29 + $0x708] sm:$0xff] %v2913_v3  ;;  %3938 = vst [vmem:[%s9237_s29 + $0x710] sm:$0xff] %v2914_v25  ;;  %v2930_v42 = vadd.f32 %v9769_v2, %v13579_v46  ;;  %v2931_v53 = vadd.f32 %v9769_v2, %v13580_v1  ;;  %v13581_v3 = vld [vmem:[#allocation190_spill] sm:$0xff]  ;;  %v13582_v25 = vld [vmem:[#allocation191_spill] sm:$0xff] }
 0x2f4   : > { %3939 = vst [vmem:[%s9237_s29 + $0x718] sm:$0xff] %v2915_v43  ;;  %3940 = vst [vmem:[%s9237_s29 + $0x720] sm:$0xff] %v2916_v6  ;;  %v2932_v34 = vadd.f32 %v9769_v2, %v13581_v3  ;;  %v2933_v37 = vadd.f32 %v9769_v2, %v13582_v25  ;;  %v13583_v43 = vld [vmem:[#allocation192_spill] sm:$0xff]  ;;  %v13584_v6 = vld [vmem:[#allocation193_spill] sm:$0xff] }
 0x2f5   : > { %3941 = vst [vmem:[%s9237_s29 + $0x728] sm:$0xff] %v2917_v19  ;;  %3942 = vst [vmem:[%s9237_s29 + $0x730] sm:$0xff] %v2918_v57  ;;  %v2934_v28 = vadd.f32 %v9769_v2, %v13583_v43  ;;  %v2935_v10 = vadd.f32 %v9769_v2, %v13584_v6  ;;  %v9867_v19 = vpop.permute.xlu0 %2560  ;;  %v13585_v4 = vld [vmem:[#allocation194_spill] sm:$0xff]  ;;  %v13586_v7 = vld [vmem:[#allocation195_spill] sm:$0xff] }
 0x2f6   : > { %3943 = vst [vmem:[%s9237_s29 + $0x738] sm:$0xff] %v2919_v16  ;;  %3944 = vst [vmem:[%s9237_s29 + $0x740] sm:$0xff] %v2920_v58  ;;  %v2936_v57 = vadd.f32 %v9769_v2, %v13585_v4  ;;  %v2937_v16 = vadd.f32 %v9769_v2, %v13586_v7  ;;  %v13587_v23 = vld [vmem:[#allocation196_spill] sm:$0xff]  ;;  %v13588_v40 = vld [vmem:[#allocation197_spill] sm:$0xff] }
 0x2f7   : > { %3945 = vst [vmem:[%s9237_s29 + $0x748] sm:$0xff] %v2921_v24  ;;  %3946 = vst [vmem:[%s9237_s29 + $0x750] sm:$0xff] %v2922_v29  ;;  %v2938_v58 = vadd.f32 %v9769_v2, %v13587_v23  ;;  %v2939_v24 = vadd.f32 %v9769_v2, %v13588_v40  ;;  %v13589_v17 = vld [vmem:[#allocation198_spill] sm:$0xff]  ;;  %v13590_v56 = vld [vmem:[#allocation199_spill] sm:$0xff] }
 0x2f8   : > { %3947 = vst [vmem:[%s9237_s29 + $0x758] sm:$0xff] %v2923_v15  ;;  %3948 = vst [vmem:[%s9237_s29 + $0x760] sm:$0xff] %v2924_v63  ;;  %v2940_v29 = vadd.f32 %v9769_v2, %v13589_v17  ;;  %v2941_v15 = vadd.f32 %v9769_v2, %v13590_v56  ;;  %v13591_v27 = vld [vmem:[#allocation200_spill] sm:$0xff]  ;;  %v13592_v49 = vld [vmem:[#allocation201_spill] sm:$0xff] }
 0x2f9   : > { %3949 = vst [vmem:[%s9237_s29 + $0x768] sm:$0xff] %v2925_v62  ;;  %3950 = vst [vmem:[%s9237_s29 + $0x770] sm:$0xff] %v2926_v30  ;;  %v2942_v63 = vadd.f32 %v9769_v2, %v13591_v27  ;;  %v2943_v62 = vadd.f32 %v9769_v2, %v13592_v49  ;;  %v13593_v47 = vld [vmem:[#allocation202_spill] sm:$0xff]  ;;  %v13594_v54 = vld [vmem:[#allocation203_spill] sm:$0xff] }
 0x2fa   : > { %3951 = vst [vmem:[%s9237_s29 + $0x778] sm:$0xff] %v2927_v55  ;;  %3952 = vst [vmem:[%s9237_s29 + $0x780] sm:$0xff] %v2928_v26  ;;  %v2880_v30 = vadd.f32 %v9867_v19, %v13593_v47  ;;  %v2881_v55 = vadd.f32 %v9867_v19, %v13594_v54  ;;  %v13595_v5 = vld [vmem:[#allocation204_spill] sm:$0xff]  ;;  %v13596_v26 = vld [vmem:[#allocation205_spill] sm:$0xff] }
 0x2fb   : > { %3953 = vst [vmem:[%s9237_s29 + $0x788] sm:$0xff] %v2929_v45  ;;  %3954 = vst [vmem:[%s9237_s29 + $0x790] sm:$0xff] %v2930_v42  ;;  %v2882_v2 = vadd.f32 %v9867_v19, %v13595_v5  ;;  %v2883_v22 = vadd.f32 %v9867_v19, %v13596_v26  ;;  %v13597_v45 = vld [vmem:[#allocation206_spill] sm:$0xff]  ;;  %v13598_v42 = vld [vmem:[#allocation207_spill] sm:$0xff] }
 0x2fc   : > { %3955 = vst [vmem:[%s9237_s29 + $0x798] sm:$0xff] %v2931_v53  ;;  %3956 = vst [vmem:[%s9237_s29 + $0x7a0] sm:$0xff] %v2932_v34  ;;  %v2884_v46 = vadd.f32 %v9867_v19, %v13597_v45  ;;  %v2885_v1 = vadd.f32 %v9867_v19, %v13598_v42  ;;  %v13599_v53 = vld [vmem:[#allocation208_spill] sm:$0xff]  ;;  %v13600_v34 = vld [vmem:[#allocation209_spill] sm:$0xff] }
 0x2fd   : > { %3957 = vst [vmem:[%s9237_s29 + $0x7a8] sm:$0xff] %v2933_v37  ;;  %3958 = vst [vmem:[%s9237_s29 + $0x7b0] sm:$0xff] %v2934_v28  ;;  %v2886_v3 = vadd.f32 %v9867_v19, %v13599_v53  ;;  %v2887_v25 = vadd.f32 %v9867_v19, %v13600_v34  ;;  %v13601_v37 = vld [vmem:[#allocation210_spill] sm:$0xff]  ;;  %v13602_v28 = vld [vmem:[#allocation211_spill] sm:$0xff] }
 0x2fe   : > { %3959 = vst [vmem:[%s9237_s29 + $0x7b8] sm:$0xff] %v2935_v10  ;;  %3960 = vst [vmem:[%s9237_s29 + $0x7c0] sm:$0xff] %v2936_v57  ;;  %v2888_v43 = vadd.f32 %v9867_v19, %v13601_v37  ;;  %v2889_v6 = vadd.f32 %v9867_v19, %v13602_v28  ;;  %v13603_v10 = vld [vmem:[#allocation212_spill] sm:$0xff]  ;;  %v13604_v57 = vld [vmem:[#allocation213_spill] sm:$0xff] }
 0x2ff   : > { %3961 = vst [vmem:[%s9237_s29 + $0x7c8] sm:$0xff] %v2937_v16  ;;  %3962 = vst [vmem:[%s9237_s29 + $0x7d0] sm:$0xff] %v2938_v58  ;;  %v2890_v4 = vadd.f32 %v9867_v19, %v13603_v10  ;;  %v2891_v7 = vadd.f32 %v9867_v19, %v13604_v57  ;;  %v13605_v16 = vld [vmem:[#allocation214_spill] sm:$0xff]  ;;  %v13606_v58 = vld [vmem:[#allocation215_spill] sm:$0xff] }
 0x300   : > { %3963 = vst [vmem:[%s9237_s29 + $0x7d8] sm:$0xff] %v2939_v24  ;;  %3964 = vst [vmem:[%s9237_s29 + $0x7e0] sm:$0xff] %v2940_v29  ;;  %v2892_v23 = vadd.f32 %v9867_v19, %v13605_v16  ;;  %v2893_v40 = vadd.f32 %v9867_v19, %v13606_v58  ;;  %v13607_v24 = vld [vmem:[#allocation216_spill] sm:$0xff]  ;;  %v13608_v29 = vld [vmem:[#allocation217_spill] sm:$0xff] }
 0x301   : > { %3965 = vst [vmem:[%s9237_s29 + $0x7e8] sm:$0xff] %v2941_v15  ;;  %3966 = vst [vmem:[%s9237_s29 + $0x7f0] sm:$0xff] %v2942_v63  ;;  %v2894_v17 = vadd.f32 %v9867_v19, %v13607_v24  ;;  %v2895_v56 = vadd.f32 %v9867_v19, %v13608_v29  ;;  %v13609_v15 = vld [vmem:[#allocation218_spill] sm:$0xff]  ;;  %v13610_v63 = vld [vmem:[#allocation219_spill] sm:$0xff] }
 0x302   : > { %3967 = vst [vmem:[%s9237_s29 + $0x7f8] sm:$0xff] %v2943_v62  ;;  %3904 = vst [vmem:[%s9237_s29 + $0x600] sm:$0xff] %v2880_v30  ;;  %v2896_v27 = vadd.f32 %v9867_v19, %v13609_v15  ;;  %v2897_v49 = vadd.f32 %v9867_v19, %v13610_v63  ;;  %v13611_v62 = vld [vmem:[#allocation220_spill] sm:$0xff]  ;;  %v13612_v30 = vld [vmem:[#allocation221_spill] sm:$0xff] }
 0x303   : > { %3905 = vst [vmem:[%s9237_s29 + $0x608] sm:$0xff] %v2881_v55  ;;  %3906 = vst [vmem:[%s9237_s29 + $0x610] sm:$0xff] %v2882_v2  ;;  %v2898_v47 = vadd.f32 %v9867_v19, %v13611_v62  ;;  %v2899_v54 = vadd.f32 %v9867_v19, %v13612_v30  ;;  %v13613_v55 = vld [vmem:[#allocation222_spill] sm:$0xff]  ;;  %v13614_v2 = vld [vmem:[#allocation223_spill] sm:$0xff] }
 0x304   : > { %3907 = vst [vmem:[%s9237_s29 + $0x618] sm:$0xff] %v2883_v22  ;;  %3908 = vst [vmem:[%s9237_s29 + $0x620] sm:$0xff] %v2884_v46  ;;  %v2900_v5 = vadd.f32 %v9867_v19, %v13613_v55  ;;  %v2901_v26 = vadd.f32 %v9867_v19, %v13614_v2  ;;  %v13615_v22 = vld [vmem:[#allocation224_spill] sm:$0xff]  ;;  %v13616_v46 = vld [vmem:[#allocation225_spill] sm:$0xff] }
 0x305   : > { %3909 = vst [vmem:[%s9237_s29 + $0x628] sm:$0xff] %v2885_v1  ;;  %3910 = vst [vmem:[%s9237_s29 + $0x630] sm:$0xff] %v2886_v3  ;;  %v2902_v45 = vadd.f32 %v9867_v19, %v13615_v22  ;;  %v2903_v42 = vadd.f32 %v9867_v19, %v13616_v46  ;;  %v9965_v1 = vpop.permute.xlu1 %2575  ;;  %v13617_v53 = vld [vmem:[#allocation226_spill] sm:$0xff]  ;;  %v13618_v34 = vld [vmem:[#allocation227_spill] sm:$0xff] }
 0x306   : > { %3911 = vst [vmem:[%s9237_s29 + $0x638] sm:$0xff] %v2887_v25  ;;  %3912 = vst [vmem:[%s9237_s29 + $0x640] sm:$0xff] %v2888_v43  ;;  %v2904_v3 = vadd.f32 %v9867_v19, %v13617_v53  ;;  %v2905_v25 = vadd.f32 %v9867_v19, %v13618_v34  ;;  %v13619_v37 = vld [vmem:[#allocation228_spill] sm:$0xff]  ;;  %v13620_v28 = vld [vmem:[#allocation229_spill] sm:$0xff] }
 0x307   : > { %3913 = vst [vmem:[%s9237_s29 + $0x648] sm:$0xff] %v2889_v6  ;;  %3914 = vst [vmem:[%s9237_s29 + $0x650] sm:$0xff] %v2890_v4  ;;  %v2906_v43 = vadd.f32 %v9867_v19, %v13619_v37  ;;  %v2907_v6 = vadd.f32 %v9867_v19, %v13620_v28  ;;  %v13621_v10 = vld [vmem:[#allocation230_spill] sm:$0xff]  ;;  %v13622_v57 = vld [vmem:[#allocation231_spill] sm:$0xff] }
 0x308   : > { %3915 = vst [vmem:[%s9237_s29 + $0x658] sm:$0xff] %v2891_v7  ;;  %3916 = vst [vmem:[%s9237_s29 + $0x660] sm:$0xff] %v2892_v23  ;;  %v2908_v4 = vadd.f32 %v9867_v19, %v13621_v10  ;;  %v2909_v7 = vadd.f32 %v9867_v19, %v13622_v57  ;;  %v13623_v16 = vld [vmem:[#allocation232_spill] sm:$0xff]  ;;  %v13624_v58 = vld [vmem:[#allocation233_spill] sm:$0xff] }
 0x309   : > { %3917 = vst [vmem:[%s9237_s29 + $0x668] sm:$0xff] %v2893_v40  ;;  %3918 = vst [vmem:[%s9237_s29 + $0x670] sm:$0xff] %v2894_v17  ;;  %v2910_v23 = vadd.f32 %v9867_v19, %v13623_v16  ;;  %v2911_v40 = vadd.f32 %v9867_v19, %v13624_v58  ;;  %v13625_v24 = vld [vmem:[#allocation234_spill] sm:$0xff]  ;;  %v13626_v29 = vld [vmem:[#allocation235_spill] sm:$0xff] }
 0x30a   : > { %3919 = vst [vmem:[%s9237_s29 + $0x678] sm:$0xff] %v2895_v56  ;;  %3920 = vst [vmem:[%s9237_s29 + $0x680] sm:$0xff] %v2896_v27  ;;  %v2976_v17 = vadd.f32 %v9965_v1, %v13625_v24  ;;  %v2977_v56 = vadd.f32 %v9965_v1, %v13626_v29  ;;  %v13627_v15 = vld [vmem:[#allocation236_spill] sm:$0xff]  ;;  %v13628_v27 = vld [vmem:[#allocation237_spill] sm:$0xff] }
 0x30b   : > { %3921 = vst [vmem:[%s9237_s29 + $0x688] sm:$0xff] %v2897_v49  ;;  %3922 = vst [vmem:[%s9237_s29 + $0x690] sm:$0xff] %v2898_v47  ;;  %v2978_v19 = vadd.f32 %v9965_v1, %v13627_v15  ;;  %v2979_v63 = vadd.f32 %v9965_v1, %v13628_v27  ;;  %v13629_v49 = vld [vmem:[#allocation238_spill] sm:$0xff]  ;;  %v13630_v47 = vld [vmem:[#allocation239_spill] sm:$0xff] }
 0x30c   : > { %3923 = vst [vmem:[%s9237_s29 + $0x698] sm:$0xff] %v2899_v54  ;;  %3924 = vst [vmem:[%s9237_s29 + $0x6a0] sm:$0xff] %v2900_v5  ;;  %v2980_v62 = vadd.f32 %v9965_v1, %v13629_v49  ;;  %v2981_v30 = vadd.f32 %v9965_v1, %v13630_v47  ;;  %v13631_v54 = vld [vmem:[#allocation240_spill] sm:$0xff]  ;;  %v13632_v5 = vld [vmem:[#allocation241_spill] sm:$0xff] }
 0x30d   : > { %3925 = vst [vmem:[%s9237_s29 + $0x6a8] sm:$0xff] %v2901_v26  ;;  %3926 = vst [vmem:[%s9237_s29 + $0x6b0] sm:$0xff] %v2902_v45  ;;  %v2982_v55 = vadd.f32 %v9965_v1, %v13631_v54  ;;  %v2983_v2 = vadd.f32 %v9965_v1, %v13632_v5  ;;  %v13633_v26 = vld [vmem:[#allocation242_spill] sm:$0xff]  ;;  %v13634_v45 = vld [vmem:[#allocation243_spill] sm:$0xff] }
 0x30e   : > { %3927 = vst [vmem:[%s9237_s29 + $0x6b8] sm:$0xff] %v2903_v42  ;;  %3928 = vst [vmem:[%s9237_s29 + $0x6c0] sm:$0xff] %v2904_v3  ;;  %v2984_v22 = vadd.f32 %v9965_v1, %v13633_v26  ;;  %v2985_v46 = vadd.f32 %v9965_v1, %v13634_v45  ;;  %v13635_v42 = vld [vmem:[#allocation244_spill] sm:$0xff]  ;;  %v13636_v3 = vld [vmem:[#allocation245_spill] sm:$0xff] }
 0x30f   : > { %3929 = vst [vmem:[%s9237_s29 + $0x6c8] sm:$0xff] %v2905_v25  ;;  %3930 = vst [vmem:[%s9237_s29 + $0x6d0] sm:$0xff] %v2906_v43  ;;  %v2986_v53 = vadd.f32 %v9965_v1, %v13635_v42  ;;  %v2987_v34 = vadd.f32 %v9965_v1, %v13636_v3  ;;  %v13637_v25 = vld [vmem:[#allocation246_spill] sm:$0xff]  ;;  %v13638_v43 = vld [vmem:[#allocation247_spill] sm:$0xff] }
 0x310   : > { %3931 = vst [vmem:[%s9237_s29 + $0x6d8] sm:$0xff] %v2907_v6  ;;  %3932 = vst [vmem:[%s9237_s29 + $0x6e0] sm:$0xff] %v2908_v4  ;;  %v2988_v37 = vadd.f32 %v9965_v1, %v13637_v25  ;;  %v2989_v28 = vadd.f32 %v9965_v1, %v13638_v43  ;;  %v13639_v6 = vld [vmem:[#allocation248_spill] sm:$0xff]  ;;  %v13640_v4 = vld [vmem:[#allocation249_spill] sm:$0xff] }
 0x311   : > { %3933 = vst [vmem:[%s9237_s29 + $0x6e8] sm:$0xff] %v2909_v7  ;;  %3934 = vst [vmem:[%s9237_s29 + $0x6f0] sm:$0xff] %v2910_v23  ;;  %v2990_v10 = vadd.f32 %v9965_v1, %v13639_v6  ;;  %v2991_v57 = vadd.f32 %v9965_v1, %v13640_v4  ;;  %v13641_v7 = vld [vmem:[#allocation250_spill] sm:$0xff]  ;;  %v13642_v23 = vld [vmem:[#allocation251_spill] sm:$0xff] }
 0x312   : > { %3935 = vst [vmem:[%s9237_s29 + $0x6f8] sm:$0xff] %v2911_v40  ;;  %4000 = vst [vmem:[%s9237_s29 + $0x900] sm:$0xff] %v2976_v17  ;;  %v2992_v16 = vadd.f32 %v9965_v1, %v13641_v7  ;;  %v2993_v58 = vadd.f32 %v9965_v1, %v13642_v23  ;;  %v13643_v40 = vld [vmem:[#allocation252_spill] sm:$0xff]  ;;  %v13644_v17 = vld [vmem:[#allocation253_spill] sm:$0xff] }
 0x313   : > { %4001 = vst [vmem:[%s9237_s29 + $0x908] sm:$0xff] %v2977_v56  ;;  %4002 = vst [vmem:[%s9237_s29 + $0x910] sm:$0xff] %v2978_v19  ;;  %v2994_v24 = vadd.f32 %v9965_v1, %v13643_v40  ;;  %v2995_v29 = vadd.f32 %v9965_v1, %v13644_v17  ;;  %v13645_v56 = vld [vmem:[#allocation254_spill] sm:$0xff]  ;;  %v13646_v19 = vld [vmem:[#allocation255_spill] sm:$0xff] }
 0x314   : > { %4003 = vst [vmem:[%s9237_s29 + $0x918] sm:$0xff] %v2979_v63  ;;  %4004 = vst [vmem:[%s9237_s29 + $0x920] sm:$0xff] %v2980_v62  ;;  %v2996_v15 = vadd.f32 %v9965_v1, %v13645_v56  ;;  %v2997_v27 = vadd.f32 %v9965_v1, %v13646_v19  ;;  %v13647_v63 = vld [vmem:[#allocation256_spill] sm:$0xff]  ;;  %v13648_v62 = vld [vmem:[#allocation257_spill] sm:$0xff] }
 0x315   : > { %4005 = vst [vmem:[%s9237_s29 + $0x928] sm:$0xff] %v2981_v30  ;;  %4006 = vst [vmem:[%s9237_s29 + $0x930] sm:$0xff] %v2982_v55  ;;  %v2998_v49 = vadd.f32 %v9965_v1, %v13647_v63  ;;  %v2999_v47 = vadd.f32 %v9965_v1, %v13648_v62  ;;  %v10063_v30 = vpop.permute.xlu0 %2570  ;;  %v13649_v54 = vld [vmem:[#allocation258_spill] sm:$0xff]  ;;  %v13650_v5 = vld [vmem:[#allocation259_spill] sm:$0xff] }
 0x316   : > { %4007 = vst [vmem:[%s9237_s29 + $0x938] sm:$0xff] %v2983_v2  ;;  %4008 = vst [vmem:[%s9237_s29 + $0x940] sm:$0xff] %v2984_v22  ;;  %v3000_v55 = vadd.f32 %v9965_v1, %v13649_v54  ;;  %v3001_v2 = vadd.f32 %v9965_v1, %v13650_v5  ;;  %v13651_v26 = vld [vmem:[#allocation260_spill] sm:$0xff]  ;;  %v13652_v45 = vld [vmem:[#allocation261_spill] sm:$0xff] }
 0x317   : > { %4009 = vst [vmem:[%s9237_s29 + $0x948] sm:$0xff] %v2985_v46  ;;  %4010 = vst [vmem:[%s9237_s29 + $0x950] sm:$0xff] %v2986_v53  ;;  %v3002_v22 = vadd.f32 %v9965_v1, %v13651_v26  ;;  %v3003_v46 = vadd.f32 %v9965_v1, %v13652_v45  ;;  %v13653_v42 = vld [vmem:[#allocation262_spill] sm:$0xff]  ;;  %v13654_v3 = vld [vmem:[#allocation263_spill] sm:$0xff] }
 0x318   : > { %4011 = vst [vmem:[%s9237_s29 + $0x958] sm:$0xff] %v2987_v34  ;;  %4012 = vst [vmem:[%s9237_s29 + $0x960] sm:$0xff] %v2988_v37  ;;  %v3004_v53 = vadd.f32 %v9965_v1, %v13653_v42  ;;  %v3005_v34 = vadd.f32 %v9965_v1, %v13654_v3  ;;  %v13655_v25 = vld [vmem:[#allocation264_spill] sm:$0xff]  ;;  %v13656_v43 = vld [vmem:[#allocation265_spill] sm:$0xff] }
 0x319   : > { %4013 = vst [vmem:[%s9237_s29 + $0x968] sm:$0xff] %v2989_v28  ;;  %4014 = vst [vmem:[%s9237_s29 + $0x970] sm:$0xff] %v2990_v10  ;;  %v3006_v37 = vadd.f32 %v9965_v1, %v13655_v25  ;;  %v3007_v28 = vadd.f32 %v9965_v1, %v13656_v43  ;;  %v13657_v6 = vld [vmem:[#allocation266_spill] sm:$0xff]  ;;  %v13658_v4 = vld [vmem:[#allocation267_spill] sm:$0xff] }
 0x31a   : > { %4015 = vst [vmem:[%s9237_s29 + $0x978] sm:$0xff] %v2991_v57  ;;  %4016 = vst [vmem:[%s9237_s29 + $0x980] sm:$0xff] %v2992_v16  ;;  %v2944_v10 = vadd.f32 %v10063_v30, %v13657_v6  ;;  %v2945_v57 = vadd.f32 %v10063_v30, %v13658_v4  ;;  %v13659_v7 = vld [vmem:[#allocation268_spill] sm:$0xff]  ;;  %v13660_v16 = vld [vmem:[#allocation269_spill] sm:$0xff] }
 0x31b   : > { %4017 = vst [vmem:[%s9237_s29 + $0x988] sm:$0xff] %v2993_v58  ;;  %4018 = vst [vmem:[%s9237_s29 + $0x990] sm:$0xff] %v2994_v24  ;;  %v2946_v1 = vadd.f32 %v10063_v30, %v13659_v7  ;;  %v2947_v23 = vadd.f32 %v10063_v30, %v13660_v16  ;;  %v13661_v58 = vld [vmem:[#allocation270_spill] sm:$0xff]  ;;  %v13662_v24 = vld [vmem:[#allocation271_spill] sm:$0xff] }
 0x31c   : > { %4019 = vst [vmem:[%s9237_s29 + $0x998] sm:$0xff] %v2995_v29  ;;  %4020 = vst [vmem:[%s9237_s29 + $0x9a0] sm:$0xff] %v2996_v15  ;;  %v2948_v40 = vadd.f32 %v10063_v30, %v13661_v58  ;;  %v2949_v17 = vadd.f32 %v10063_v30, %v13662_v24  ;;  %v13663_v29 = vld [vmem:[#allocation272_spill] sm:$0xff]  ;;  %v13664_v15 = vld [vmem:[#allocation273_spill] sm:$0xff] }
 0x31d   : > { %4021 = vst [vmem:[%s9237_s29 + $0x9a8] sm:$0xff] %v2997_v27  ;;  %4022 = vst [vmem:[%s9237_s29 + $0x9b0] sm:$0xff] %v2998_v49  ;;  %v2950_v56 = vadd.f32 %v10063_v30, %v13663_v29  ;;  %v2951_v19 = vadd.f32 %v10063_v30, %v13664_v15  ;;  %v13665_v27 = vld [vmem:[#allocation274_spill] sm:$0xff]  ;;  %v13666_v49 = vld [vmem:[#allocation275_spill] sm:$0xff] }
 0x31e   : > { %4023 = vst [vmem:[%s9237_s29 + $0x9b8] sm:$0xff] %v2999_v47  ;;  %4024 = vst [vmem:[%s9237_s29 + $0x9c0] sm:$0xff] %v3000_v55  ;;  %v2952_v63 = vadd.f32 %v10063_v30, %v13665_v27  ;;  %v2953_v62 = vadd.f32 %v10063_v30, %v13666_v49  ;;  %v13667_v47 = vld [vmem:[#allocation276_spill] sm:$0xff]  ;;  %v13668_v55 = vld [vmem:[#allocation277_spill] sm:$0xff] }
 0x31f   : > { %4025 = vst [vmem:[%s9237_s29 + $0x9c8] sm:$0xff] %v3001_v2  ;;  %4026 = vst [vmem:[%s9237_s29 + $0x9d0] sm:$0xff] %v3002_v22  ;;  %v2954_v54 = vadd.f32 %v10063_v30, %v13667_v47  ;;  %v2955_v5 = vadd.f32 %v10063_v30, %v13668_v55  ;;  %v13669_v2 = vld [vmem:[#allocation278_spill] sm:$0xff]  ;;  %v13670_v22 = vld [vmem:[#allocation279_spill] sm:$0xff] }
 0x320   : > { %4027 = vst [vmem:[%s9237_s29 + $0x9d8] sm:$0xff] %v3003_v46  ;;  %4028 = vst [vmem:[%s9237_s29 + $0x9e0] sm:$0xff] %v3004_v53  ;;  %v2956_v26 = vadd.f32 %v10063_v30, %v13669_v2  ;;  %v2957_v45 = vadd.f32 %v10063_v30, %v13670_v22  ;;  %v13671_v46 = vld [vmem:[#allocation280_spill] sm:$0xff]  ;;  %v13672_v53 = vld [vmem:[#allocation281_spill] sm:$0xff] }
 0x321   : > { %4029 = vst [vmem:[%s9237_s29 + $0x9e8] sm:$0xff] %v3005_v34  ;;  %4030 = vst [vmem:[%s9237_s29 + $0x9f0] sm:$0xff] %v3006_v37  ;;  %v2958_v42 = vadd.f32 %v10063_v30, %v13671_v46  ;;  %v2959_v3 = vadd.f32 %v10063_v30, %v13672_v53  ;;  %v13673_v34 = vld [vmem:[#allocation282_spill] sm:$0xff]  ;;  %v13674_v37 = vld [vmem:[#allocation283_spill] sm:$0xff] }
 0x322   : > { %4031 = vst [vmem:[%s9237_s29 + $0x9f8] sm:$0xff] %v3007_v28  ;;  %3968 = vst [vmem:[%s9237_s29 + $0x800] sm:$0xff] %v2944_v10  ;;  %v2960_v25 = vadd.f32 %v10063_v30, %v13673_v34  ;;  %v2961_v43 = vadd.f32 %v10063_v30, %v13674_v37  ;;  %v13675_v28 = vld [vmem:[#allocation284_spill] sm:$0xff]  ;;  %v13676_v10 = vld [vmem:[#allocation285_spill] sm:$0xff] }
 0x323   : > { %3969 = vst [vmem:[%s9237_s29 + $0x808] sm:$0xff] %v2945_v57  ;;  %3970 = vst [vmem:[%s9237_s29 + $0x810] sm:$0xff] %v2946_v1  ;;  %v2962_v6 = vadd.f32 %v10063_v30, %v13675_v28  ;;  %v2963_v4 = vadd.f32 %v10063_v30, %v13676_v10  ;;  %v13677_v57 = vld [vmem:[#allocation286_spill] sm:$0xff]  ;;  %v13678_v1 = vld [vmem:[#allocation287_spill] sm:$0xff] }
 0x324   : > { %3971 = vst [vmem:[%s9237_s29 + $0x818] sm:$0xff] %v2947_v23  ;;  %3972 = vst [vmem:[%s9237_s29 + $0x820] sm:$0xff] %v2948_v40  ;;  %v2964_v7 = vadd.f32 %v10063_v30, %v13677_v57  ;;  %v2965_v16 = vadd.f32 %v10063_v30, %v13678_v1  ;;  %v13679_v23 = vld [vmem:[#allocation288_spill] sm:$0xff]  ;;  %v13680_v40 = vld [vmem:[#allocation289_spill] sm:$0xff] }
 0x325   : > { %3973 = vst [vmem:[%s9237_s29 + $0x828] sm:$0xff] %v2949_v17  ;;  %3974 = vst [vmem:[%s9237_s29 + $0x830] sm:$0xff] %v2950_v56  ;;  %v2966_v58 = vadd.f32 %v10063_v30, %v13679_v23  ;;  %v2967_v24 = vadd.f32 %v10063_v30, %v13680_v40  ;;  %v10161_v17 = vpop.permute.xlu1 %2585  ;;  %v13681_v29 = vld [vmem:[#allocation290_spill] sm:$0xff]  ;;  %v13682_v15 = vld [vmem:[#allocation291_spill] sm:$0xff] }
 0x326   : > { %3975 = vst [vmem:[%s9237_s29 + $0x838] sm:$0xff] %v2951_v19  ;;  %3976 = vst [vmem:[%s9237_s29 + $0x840] sm:$0xff] %v2952_v63  ;;  %v2968_v56 = vadd.f32 %v10063_v30, %v13681_v29  ;;  %v2969_v19 = vadd.f32 %v10063_v30, %v13682_v15  ;;  %v13683_v27 = vld [vmem:[#allocation292_spill] sm:$0xff]  ;;  %v13684_v49 = vld [vmem:[#allocation293_spill] sm:$0xff] }
 0x327   : > { %3977 = vst [vmem:[%s9237_s29 + $0x848] sm:$0xff] %v2953_v62  ;;  %3978 = vst [vmem:[%s9237_s29 + $0x850] sm:$0xff] %v2954_v54  ;;  %v2970_v63 = vadd.f32 %v10063_v30, %v13683_v27  ;;  %v2971_v62 = vadd.f32 %v10063_v30, %v13684_v49  ;;  %v13685_v47 = vld [vmem:[#allocation294_spill] sm:$0xff]  ;;  %v13686_v55 = vld [vmem:[#allocation295_spill] sm:$0xff] }
 0x328   : > { %3979 = vst [vmem:[%s9237_s29 + $0x858] sm:$0xff] %v2955_v5  ;;  %3980 = vst [vmem:[%s9237_s29 + $0x860] sm:$0xff] %v2956_v26  ;;  %v2972_v54 = vadd.f32 %v10063_v30, %v13685_v47  ;;  %v2973_v5 = vadd.f32 %v10063_v30, %v13686_v55  ;;  %v13687_v2 = vld [vmem:[#allocation296_spill] sm:$0xff]  ;;  %v13688_v22 = vld [vmem:[#allocation297_spill] sm:$0xff] }
 0x329   : > { %3981 = vst [vmem:[%s9237_s29 + $0x868] sm:$0xff] %v2957_v45  ;;  %3982 = vst [vmem:[%s9237_s29 + $0x870] sm:$0xff] %v2958_v42  ;;  %v2974_v26 = vadd.f32 %v10063_v30, %v13687_v2  ;;  %v2975_v45 = vadd.f32 %v10063_v30, %v13688_v22  ;;  %v13689_v46 = vld [vmem:[#allocation298_spill] sm:$0xff]  ;;  %v13690_v53 = vld [vmem:[#allocation299_spill] sm:$0xff] }
 0x32a   : > { %3983 = vst [vmem:[%s9237_s29 + $0x878] sm:$0xff] %v2959_v3  ;;  %3984 = vst [vmem:[%s9237_s29 + $0x880] sm:$0xff] %v2960_v25  ;;  %v3040_v42 = vadd.f32 %v10161_v17, %v13689_v46  ;;  %v3041_v3 = vadd.f32 %v10161_v17, %v13690_v53  ;;  %v13691_v34 = vld [vmem:[#allocation300_spill] sm:$0xff]  ;;  %v13692_v25 = vld [vmem:[#allocation301_spill] sm:$0xff] }
 0x32b   : > { %3985 = vst [vmem:[%s9237_s29 + $0x888] sm:$0xff] %v2961_v43  ;;  %3986 = vst [vmem:[%s9237_s29 + $0x890] sm:$0xff] %v2962_v6  ;;  %v3042_v30 = vadd.f32 %v10161_v17, %v13691_v34  ;;  %v3043_v37 = vadd.f32 %v10161_v17, %v13692_v25  ;;  %v13693_v43 = vld [vmem:[#allocation302_spill] sm:$0xff]  ;;  %v13694_v6 = vld [vmem:[#allocation303_spill] sm:$0xff] }
 0x32c   : > { %3987 = vst [vmem:[%s9237_s29 + $0x898] sm:$0xff] %v2963_v4  ;;  %3988 = vst [vmem:[%s9237_s29 + $0x8a0] sm:$0xff] %v2964_v7  ;;  %v3044_v28 = vadd.f32 %v10161_v17, %v13693_v43  ;;  %v3045_v10 = vadd.f32 %v10161_v17, %v13694_v6  ;;  %v13695_v4 = vld [vmem:[#allocation304_spill] sm:$0xff]  ;;  %v13696_v7 = vld [vmem:[#allocation305_spill] sm:$0xff] }
 0x32d   : > { %3989 = vst [vmem:[%s9237_s29 + $0x8a8] sm:$0xff] %v2965_v16  ;;  %3990 = vst [vmem:[%s9237_s29 + $0x8b0] sm:$0xff] %v2966_v58  ;;  %v3046_v57 = vadd.f32 %v10161_v17, %v13695_v4  ;;  %v3047_v1 = vadd.f32 %v10161_v17, %v13696_v7  ;;  %v13697_v16 = vld [vmem:[#allocation306_spill] sm:$0xff]  ;;  %v13698_v58 = vld [vmem:[#allocation307_spill] sm:$0xff] }
 0x32e   : > { %3991 = vst [vmem:[%s9237_s29 + $0x8b8] sm:$0xff] %v2967_v24  ;;  %3992 = vst [vmem:[%s9237_s29 + $0x8c0] sm:$0xff] %v2968_v56  ;;  %v3048_v23 = vadd.f32 %v10161_v17, %v13697_v16  ;;  %v3049_v40 = vadd.f32 %v10161_v17, %v13698_v58  ;;  %v13699_v24 = vld [vmem:[#allocation308_spill] sm:$0xff]  ;;  %v13700_v56 = vld [vmem:[#allocation309_spill] sm:$0xff] }
 0x32f   : > { %3993 = vst [vmem:[%s9237_s29 + $0x8c8] sm:$0xff] %v2969_v19  ;;  %3994 = vst [vmem:[%s9237_s29 + $0x8d0] sm:$0xff] %v2970_v63  ;;  %v3050_v29 = vadd.f32 %v10161_v17, %v13699_v24  ;;  %v3051_v15 = vadd.f32 %v10161_v17, %v13700_v56  ;;  %v13701_v19 = vld [vmem:[#allocation310_spill] sm:$0xff]  ;;  %v13702_v63 = vld [vmem:[#allocation311_spill] sm:$0xff] }
 0x330   : > { %3995 = vst [vmem:[%s9237_s29 + $0x8d8] sm:$0xff] %v2971_v62  ;;  %3996 = vst [vmem:[%s9237_s29 + $0x8e0] sm:$0xff] %v2972_v54  ;;  %v3052_v27 = vadd.f32 %v10161_v17, %v13701_v19  ;;  %v3053_v49 = vadd.f32 %v10161_v17, %v13702_v63  ;;  %v13703_v62 = vld [vmem:[#allocation312_spill] sm:$0xff]  ;;  %v13704_v54 = vld [vmem:[#allocation313_spill] sm:$0xff] }
 0x331   : > { %3997 = vst [vmem:[%s9237_s29 + $0x8e8] sm:$0xff] %v2973_v5  ;;  %3998 = vst [vmem:[%s9237_s29 + $0x8f0] sm:$0xff] %v2974_v26  ;;  %v3054_v47 = vadd.f32 %v10161_v17, %v13703_v62  ;;  %v3055_v55 = vadd.f32 %v10161_v17, %v13704_v54  ;;  %v13705_v5 = vld [vmem:[#allocation314_spill] sm:$0xff]  ;;  %v13706_v26 = vld [vmem:[#allocation315_spill] sm:$0xff] }
 0x332   : > { %3999 = vst [vmem:[%s9237_s29 + $0x8f8] sm:$0xff] %v2975_v45  ;;  %4064 = vst [vmem:[%s9237_s29 + $0xb00] sm:$0xff] %v3040_v42  ;;  %v3056_v2 = vadd.f32 %v10161_v17, %v13705_v5  ;;  %v3057_v22 = vadd.f32 %v10161_v17, %v13706_v26  ;;  %v13707_v45 = vld [vmem:[#allocation316_spill] sm:$0xff]  ;;  %v13708_v42 = vld [vmem:[#allocation317_spill] sm:$0xff] }
 0x333   : > { %4065 = vst [vmem:[%s9237_s29 + $0xb08] sm:$0xff] %v3041_v3  ;;  %4066 = vst [vmem:[%s9237_s29 + $0xb10] sm:$0xff] %v3042_v30  ;;  %v3058_v46 = vadd.f32 %v10161_v17, %v13707_v45  ;;  %v3059_v53 = vadd.f32 %v10161_v17, %v13708_v42  ;;  %v13709_v3 = vld [vmem:[#allocation318_spill] sm:$0xff]  ;;  %v13710_v30 = vld [vmem:[#allocation319_spill] sm:$0xff] }
 0x334   : > { %4067 = vst [vmem:[%s9237_s29 + $0xb18] sm:$0xff] %v3043_v37  ;;  %4068 = vst [vmem:[%s9237_s29 + $0xb20] sm:$0xff] %v3044_v28  ;;  %v3060_v34 = vadd.f32 %v10161_v17, %v13709_v3  ;;  %v3061_v25 = vadd.f32 %v10161_v17, %v13710_v30  ;;  %v13711_v37 = vld [vmem:[#allocation320_spill] sm:$0xff]  ;;  %v13712_v28 = vld [vmem:[#allocation321_spill] sm:$0xff] }
 0x335   : > { %4069 = vst [vmem:[%s9237_s29 + $0xb28] sm:$0xff] %v3045_v10  ;;  %4070 = vst [vmem:[%s9237_s29 + $0xb30] sm:$0xff] %v3046_v57  ;;  %v3062_v43 = vadd.f32 %v10161_v17, %v13711_v37  ;;  %v3063_v6 = vadd.f32 %v10161_v17, %v13712_v28  ;;  %v10259_v10 = vpop.permute.xlu0 %2580  ;;  %v13713_v4 = vld [vmem:[#allocation322_spill] sm:$0xff]  ;;  %v13714_v7 = vld [vmem:[#allocation323_spill] sm:$0xff] }
 0x336   : > { %4071 = vst [vmem:[%s9237_s29 + $0xb38] sm:$0xff] %v3047_v1  ;;  %4072 = vst [vmem:[%s9237_s29 + $0xb40] sm:$0xff] %v3048_v23  ;;  %v3064_v57 = vadd.f32 %v10161_v17, %v13713_v4  ;;  %v3065_v1 = vadd.f32 %v10161_v17, %v13714_v7  ;;  %v13715_v16 = vld [vmem:[#allocation324_spill] sm:$0xff]  ;;  %v13716_v58 = vld [vmem:[#allocation325_spill] sm:$0xff] }
 0x337   : > { %4073 = vst [vmem:[%s9237_s29 + $0xb48] sm:$0xff] %v3049_v40  ;;  %4074 = vst [vmem:[%s9237_s29 + $0xb50] sm:$0xff] %v3050_v29  ;;  %v3066_v23 = vadd.f32 %v10161_v17, %v13715_v16  ;;  %v3067_v40 = vadd.f32 %v10161_v17, %v13716_v58  ;;  %v13717_v24 = vld [vmem:[#allocation326_spill] sm:$0xff]  ;;  %v13718_v56 = vld [vmem:[#allocation327_spill] sm:$0xff] }
 0x338   : > { %4075 = vst [vmem:[%s9237_s29 + $0xb58] sm:$0xff] %v3051_v15  ;;  %4076 = vst [vmem:[%s9237_s29 + $0xb60] sm:$0xff] %v3052_v27  ;;  %v3068_v29 = vadd.f32 %v10161_v17, %v13717_v24  ;;  %v3069_v15 = vadd.f32 %v10161_v17, %v13718_v56  ;;  %v13719_v19 = vld [vmem:[#allocation328_spill] sm:$0xff]  ;;  %v13720_v63 = vld [vmem:[#allocation329_spill] sm:$0xff] }
 0x339   : > { %4077 = vst [vmem:[%s9237_s29 + $0xb68] sm:$0xff] %v3053_v49  ;;  %4078 = vst [vmem:[%s9237_s29 + $0xb70] sm:$0xff] %v3054_v47  ;;  %v3070_v27 = vadd.f32 %v10161_v17, %v13719_v19  ;;  %v3071_v49 = vadd.f32 %v10161_v17, %v13720_v63  ;;  %v13721_v62 = vld [vmem:[#allocation330_spill] sm:$0xff]  ;;  %v13722_v54 = vld [vmem:[#allocation331_spill] sm:$0xff] }
 0x33a   : > { %4079 = vst [vmem:[%s9237_s29 + $0xb78] sm:$0xff] %v3055_v55  ;;  %4080 = vst [vmem:[%s9237_s29 + $0xb80] sm:$0xff] %v3056_v2  ;;  %v3008_v47 = vadd.f32 %v10259_v10, %v13721_v62  ;;  %v3009_v55 = vadd.f32 %v10259_v10, %v13722_v54  ;;  %v13723_v5 = vld [vmem:[#allocation332_spill] sm:$0xff]  ;;  %v13724_v2 = vld [vmem:[#allocation333_spill] sm:$0xff] }
 0x33b   : > { %4081 = vst [vmem:[%s9237_s29 + $0xb88] sm:$0xff] %v3057_v22  ;;  %4082 = vst [vmem:[%s9237_s29 + $0xb90] sm:$0xff] %v3058_v46  ;;  %v3010_v17 = vadd.f32 %v10259_v10, %v13723_v5  ;;  %v3011_v26 = vadd.f32 %v10259_v10, %v13724_v2  ;;  %v13725_v22 = vld [vmem:[#allocation334_spill] sm:$0xff]  ;;  %v13726_v46 = vld [vmem:[#allocation335_spill] sm:$0xff] }
 0x33c   : > { %4083 = vst [vmem:[%s9237_s29 + $0xb98] sm:$0xff] %v3059_v53  ;;  %4084 = vst [vmem:[%s9237_s29 + $0xba0] sm:$0xff] %v3060_v34  ;;  %v3012_v45 = vadd.f32 %v10259_v10, %v13725_v22  ;;  %v3013_v42 = vadd.f32 %v10259_v10, %v13726_v46  ;;  %v13727_v53 = vld [vmem:[#allocation336_spill] sm:$0xff]  ;;  %v13728_v34 = vld [vmem:[#allocation337_spill] sm:$0xff] }
 0x33d   : > { %4085 = vst [vmem:[%s9237_s29 + $0xba8] sm:$0xff] %v3061_v25  ;;  %4086 = vst [vmem:[%s9237_s29 + $0xbb0] sm:$0xff] %v3062_v43  ;;  %v3014_v3 = vadd.f32 %v10259_v10, %v13727_v53  ;;  %v3015_v30 = vadd.f32 %v10259_v10, %v13728_v34  ;;  %v13729_v25 = vld [vmem:[#allocation338_spill] sm:$0xff]  ;;  %v13730_v43 = vld [vmem:[#allocation339_spill] sm:$0xff] }
 0x33e   : > { %4087 = vst [vmem:[%s9237_s29 + $0xbb8] sm:$0xff] %v3063_v6  ;;  %4088 = vst [vmem:[%s9237_s29 + $0xbc0] sm:$0xff] %v3064_v57  ;;  %v3016_v37 = vadd.f32 %v10259_v10, %v13729_v25  ;;  %v3017_v28 = vadd.f32 %v10259_v10, %v13730_v43  ;;  %v13731_v6 = vld [vmem:[#allocation340_spill] sm:$0xff]  ;;  %v13732_v57 = vld [vmem:[#allocation341_spill] sm:$0xff] }
 0x33f   : > { %4089 = vst [vmem:[%s9237_s29 + $0xbc8] sm:$0xff] %v3065_v1  ;;  %4090 = vst [vmem:[%s9237_s29 + $0xbd0] sm:$0xff] %v3066_v23  ;;  %v3018_v4 = vadd.f32 %v10259_v10, %v13731_v6  ;;  %v3019_v7 = vadd.f32 %v10259_v10, %v13732_v57  ;;  %v13733_v1 = vld [vmem:[#allocation342_spill] sm:$0xff]  ;;  %v13734_v23 = vld [vmem:[#allocation343_spill] sm:$0xff] }
 0x340   : > { %4091 = vst [vmem:[%s9237_s29 + $0xbd8] sm:$0xff] %v3067_v40  ;;  %4092 = vst [vmem:[%s9237_s29 + $0xbe0] sm:$0xff] %v3068_v29  ;;  %v3020_v16 = vadd.f32 %v10259_v10, %v13733_v1  ;;  %v3021_v58 = vadd.f32 %v10259_v10, %v13734_v23  ;;  %v13735_v40 = vld [vmem:[#allocation344_spill] sm:$0xff]  ;;  %v13736_v29 = vld [vmem:[#allocation345_spill] sm:$0xff] }
 0x341   : > { %4093 = vst [vmem:[%s9237_s29 + $0xbe8] sm:$0xff] %v3069_v15  ;;  %4094 = vst [vmem:[%s9237_s29 + $0xbf0] sm:$0xff] %v3070_v27  ;;  %v3022_v24 = vadd.f32 %v10259_v10, %v13735_v40  ;;  %v3023_v56 = vadd.f32 %v10259_v10, %v13736_v29  ;;  %v13737_v15 = vld [vmem:[#allocation346_spill] sm:$0xff]  ;;  %v13738_v27 = vld [vmem:[#allocation347_spill] sm:$0xff] }
 0x342   : > { %4095 = vst [vmem:[%s9237_s29 + $0xbf8] sm:$0xff] %v3071_v49  ;;  %4032 = vst [vmem:[%s9237_s29 + $0xa00] sm:$0xff] %v3008_v47  ;;  %v3024_v19 = vadd.f32 %v10259_v10, %v13737_v15  ;;  %v3025_v63 = vadd.f32 %v10259_v10, %v13738_v27  ;;  %v13739_v49 = vld [vmem:[#allocation348_spill] sm:$0xff]  ;;  %v13740_v47 = vld [vmem:[#allocation349_spill] sm:$0xff] }
 0x343   : > { %4033 = vst [vmem:[%s9237_s29 + $0xa08] sm:$0xff] %v3009_v55  ;;  %4034 = vst [vmem:[%s9237_s29 + $0xa10] sm:$0xff] %v3010_v17  ;;  %v3026_v62 = vadd.f32 %v10259_v10, %v13739_v49  ;;  %v3027_v54 = vadd.f32 %v10259_v10, %v13740_v47  ;;  %v13741_v55 = vld [vmem:[#allocation350_spill] sm:$0xff]  ;;  %v13742_v17 = vld [vmem:[#allocation351_spill] sm:$0xff] }
 0x344   : > { %4035 = vst [vmem:[%s9237_s29 + $0xa18] sm:$0xff] %v3011_v26  ;;  %4036 = vst [vmem:[%s9237_s29 + $0xa20] sm:$0xff] %v3012_v45  ;;  %v3028_v5 = vadd.f32 %v10259_v10, %v13741_v55  ;;  %v3029_v2 = vadd.f32 %v10259_v10, %v13742_v17  ;;  %v13743_v26 = vld [vmem:[#allocation352_spill] sm:$0xff]  ;;  %v13744_v45 = vld [vmem:[#allocation353_spill] sm:$0xff] }
 0x345   : > { %4037 = vst [vmem:[%s9237_s29 + $0xa28] sm:$0xff] %v3013_v42  ;;  %4038 = vst [vmem:[%s9237_s29 + $0xa30] sm:$0xff] %v3014_v3  ;;  %v3030_v22 = vadd.f32 %v10259_v10, %v13743_v26  ;;  %v3031_v46 = vadd.f32 %v10259_v10, %v13744_v45  ;;  %v10357_v42 = vpop.permute.xlu1 %2595  ;;  %v13745_v53 = vld [vmem:[#allocation354_spill] sm:$0xff]  ;;  %v13746_v34 = vld [vmem:[#allocation355_spill] sm:$0xff] }
 0x346   : > { %4039 = vst [vmem:[%s9237_s29 + $0xa38] sm:$0xff] %v3015_v30  ;;  %4040 = vst [vmem:[%s9237_s29 + $0xa40] sm:$0xff] %v3016_v37  ;;  %v3032_v3 = vadd.f32 %v10259_v10, %v13745_v53  ;;  %v3033_v30 = vadd.f32 %v10259_v10, %v13746_v34  ;;  %v13747_v25 = vld [vmem:[#allocation356_spill] sm:$0xff]  ;;  %v13748_v43 = vld [vmem:[#allocation357_spill] sm:$0xff] }
 0x347   : > { %4041 = vst [vmem:[%s9237_s29 + $0xa48] sm:$0xff] %v3017_v28  ;;  %4042 = vst [vmem:[%s9237_s29 + $0xa50] sm:$0xff] %v3018_v4  ;;  %v3034_v37 = vadd.f32 %v10259_v10, %v13747_v25  ;;  %v3035_v28 = vadd.f32 %v10259_v10, %v13748_v43  ;;  %v13749_v6 = vld [vmem:[#allocation358_spill] sm:$0xff]  ;;  %v13750_v57 = vld [vmem:[#allocation359_spill] sm:$0xff] }
 0x348   : > { %4043 = vst [vmem:[%s9237_s29 + $0xa58] sm:$0xff] %v3019_v7  ;;  %4044 = vst [vmem:[%s9237_s29 + $0xa60] sm:$0xff] %v3020_v16  ;;  %v3036_v4 = vadd.f32 %v10259_v10, %v13749_v6  ;;  %v3037_v7 = vadd.f32 %v10259_v10, %v13750_v57  ;;  %v13751_v1 = vld [vmem:[#allocation360_spill] sm:$0xff]  ;;  %v13752_v23 = vld [vmem:[#allocation361_spill] sm:$0xff] }
 0x349   : > { %4045 = vst [vmem:[%s9237_s29 + $0xa68] sm:$0xff] %v3021_v58  ;;  %4046 = vst [vmem:[%s9237_s29 + $0xa70] sm:$0xff] %v3022_v24  ;;  %v3038_v16 = vadd.f32 %v10259_v10, %v13751_v1  ;;  %v3039_v58 = vadd.f32 %v10259_v10, %v13752_v23  ;;  %v13753_v40 = vld [vmem:[#allocation362_spill] sm:$0xff]  ;;  %v13754_v29 = vld [vmem:[#allocation363_spill] sm:$0xff] }
 0x34a   : > { %4047 = vst [vmem:[%s9237_s29 + $0xa78] sm:$0xff] %v3023_v56  ;;  %4048 = vst [vmem:[%s9237_s29 + $0xa80] sm:$0xff] %v3024_v19  ;;  %v3104_v24 = vadd.f32 %v10357_v42, %v13753_v40  ;;  %v3105_v56 = vadd.f32 %v10357_v42, %v13754_v29  ;;  %v13755_v15 = vld [vmem:[#allocation364_spill] sm:$0xff]  ;;  %v13756_v19 = vld [vmem:[#allocation365_spill] sm:$0xff] }
 0x34b   : > { %4049 = vst [vmem:[%s9237_s29 + $0xa88] sm:$0xff] %v3025_v63  ;;  %4050 = vst [vmem:[%s9237_s29 + $0xa90] sm:$0xff] %v3026_v62  ;;  %v3106_v10 = vadd.f32 %v10357_v42, %v13755_v15  ;;  %v3107_v27 = vadd.f32 %v10357_v42, %v13756_v19  ;;  %v13757_v63 = vld [vmem:[#allocation366_spill] sm:$0xff]  ;;  %v13758_v62 = vld [vmem:[#allocation367_spill] sm:$0xff] }
 0x34c   : > { %4051 = vst [vmem:[%s9237_s29 + $0xa98] sm:$0xff] %v3027_v54  ;;  %4052 = vst [vmem:[%s9237_s29 + $0xaa0] sm:$0xff] %v3028_v5  ;;  %v3108_v49 = vadd.f32 %v10357_v42, %v13757_v63  ;;  %v3109_v47 = vadd.f32 %v10357_v42, %v13758_v62  ;;  %v13759_v54 = vld [vmem:[#allocation368_spill] sm:$0xff]  ;;  %v13760_v5 = vld [vmem:[#allocation369_spill] sm:$0xff] }
 0x34d   : > { %4053 = vst [vmem:[%s9237_s29 + $0xaa8] sm:$0xff] %v3029_v2  ;;  %4054 = vst [vmem:[%s9237_s29 + $0xab0] sm:$0xff] %v3030_v22  ;;  %v3110_v55 = vadd.f32 %v10357_v42, %v13759_v54  ;;  %v3111_v17 = vadd.f32 %v10357_v42, %v13760_v5  ;;  %v13761_v2 = vld [vmem:[#allocation370_spill] sm:$0xff]  ;;  %v13762_v22 = vld [vmem:[#allocation371_spill] sm:$0xff] }
 0x34e   : > { %4055 = vst [vmem:[%s9237_s29 + $0xab8] sm:$0xff] %v3031_v46  ;;  %4056 = vst [vmem:[%s9237_s29 + $0xac0] sm:$0xff] %v3032_v3  ;;  %v3112_v26 = vadd.f32 %v10357_v42, %v13761_v2  ;;  %v3113_v45 = vadd.f32 %v10357_v42, %v13762_v22  ;;  %v13763_v46 = vld [vmem:[#allocation372_spill] sm:$0xff]  ;;  %v13764_v3 = vld [vmem:[#allocation373_spill] sm:$0xff] }
 0x34f   : > { %4057 = vst [vmem:[%s9237_s29 + $0xac8] sm:$0xff] %v3033_v30  ;;  %4058 = vst [vmem:[%s9237_s29 + $0xad0] sm:$0xff] %v3034_v37  ;;  %v3114_v53 = vadd.f32 %v10357_v42, %v13763_v46  ;;  %v3115_v34 = vadd.f32 %v10357_v42, %v13764_v3  ;;  %v13765_v30 = vld [vmem:[#allocation374_spill] sm:$0xff]  ;;  %v13766_v37 = vld [vmem:[#allocation375_spill] sm:$0xff] }
 0x350   : > { %4059 = vst [vmem:[%s9237_s29 + $0xad8] sm:$0xff] %v3035_v28  ;;  %4060 = vst [vmem:[%s9237_s29 + $0xae0] sm:$0xff] %v3036_v4  ;;  %v3116_v25 = vadd.f32 %v10357_v42, %v13765_v30  ;;  %v3117_v43 = vadd.f32 %v10357_v42, %v13766_v37  ;;  %v13767_v28 = vld [vmem:[#allocation376_spill] sm:$0xff]  ;;  %v13768_v4 = vld [vmem:[#allocation377_spill] sm:$0xff] }
 0x351   : > { %4061 = vst [vmem:[%s9237_s29 + $0xae8] sm:$0xff] %v3037_v7  ;;  %4062 = vst [vmem:[%s9237_s29 + $0xaf0] sm:$0xff] %v3038_v16  ;;  %v3118_v6 = vadd.f32 %v10357_v42, %v13767_v28  ;;  %v3119_v57 = vadd.f32 %v10357_v42, %v13768_v4  ;;  %v13769_v7 = vld [vmem:[#allocation378_spill] sm:$0xff]  ;;  %v13770_v16 = vld [vmem:[#allocation379_spill] sm:$0xff] }
 0x352   : > { %4063 = vst [vmem:[%s9237_s29 + $0xaf8] sm:$0xff] %v3039_v58  ;;  %4128 = vst [vmem:[%s9237_s29 + $0xd00] sm:$0xff] %v3104_v24  ;;  %v3120_v1 = vadd.f32 %v10357_v42, %v13769_v7  ;;  %v3121_v23 = vadd.f32 %v10357_v42, %v13770_v16  ;;  %v13771_v58 = vld [vmem:[#allocation380_spill] sm:$0xff]  ;;  %v13772_v24 = vld [vmem:[#allocation381_spill] sm:$0xff] }
 0x353   : > { %4129 = vst [vmem:[%s9237_s29 + $0xd08] sm:$0xff] %v3105_v56  ;;  %4130 = vst [vmem:[%s9237_s29 + $0xd10] sm:$0xff] %v3106_v10  ;;  %v3122_v40 = vadd.f32 %v10357_v42, %v13771_v58  ;;  %v3123_v29 = vadd.f32 %v10357_v42, %v13772_v24  ;;  %v13773_v56 = vld [vmem:[#allocation382_spill] sm:$0xff]  ;;  %v13774_v10 = vld [vmem:[#allocation383_spill] sm:$0xff] }
 0x354   : > { %4131 = vst [vmem:[%s9237_s29 + $0xd18] sm:$0xff] %v3107_v27  ;;  %4132 = vst [vmem:[%s9237_s29 + $0xd20] sm:$0xff] %v3108_v49  ;;  %v3124_v15 = vadd.f32 %v10357_v42, %v13773_v56  ;;  %v3125_v19 = vadd.f32 %v10357_v42, %v13774_v10  ;;  %v13775_v27 = vld [vmem:[#allocation384_spill] sm:$0xff]  ;;  %v13776_v49 = vld [vmem:[#allocation385_spill] sm:$0xff] }
 0x355   : > { %4133 = vst [vmem:[%s9237_s29 + $0xd28] sm:$0xff] %v3109_v47  ;;  %4134 = vst [vmem:[%s9237_s29 + $0xd30] sm:$0xff] %v3110_v55  ;;  %v3126_v63 = vadd.f32 %v10357_v42, %v13775_v27  ;;  %v3127_v62 = vadd.f32 %v10357_v42, %v13776_v49  ;;  %v10455_v47 = vpop.permute.xlu0 %2590  ;;  %v13777_v54 = vld [vmem:[#allocation386_spill] sm:$0xff]  ;;  %v13778_v5 = vld [vmem:[#allocation387_spill] sm:$0xff] }
 0x356   : > { %4135 = vst [vmem:[%s9237_s29 + $0xd38] sm:$0xff] %v3111_v17  ;;  %4136 = vst [vmem:[%s9237_s29 + $0xd40] sm:$0xff] %v3112_v26  ;;  %v3128_v55 = vadd.f32 %v10357_v42, %v13777_v54  ;;  %v3129_v17 = vadd.f32 %v10357_v42, %v13778_v5  ;;  %v13779_v2 = vld [vmem:[#allocation388_spill] sm:$0xff]  ;;  %v13780_v22 = vld [vmem:[#allocation389_spill] sm:$0xff] }
 0x357   : > { %4137 = vst [vmem:[%s9237_s29 + $0xd48] sm:$0xff] %v3113_v45  ;;  %4138 = vst [vmem:[%s9237_s29 + $0xd50] sm:$0xff] %v3114_v53  ;;  %v3130_v26 = vadd.f32 %v10357_v42, %v13779_v2  ;;  %v3131_v45 = vadd.f32 %v10357_v42, %v13780_v22  ;;  %v13781_v46 = vld [vmem:[#allocation390_spill] sm:$0xff]  ;;  %v13782_v3 = vld [vmem:[#allocation391_spill] sm:$0xff] }
 0x358   : > { %4139 = vst [vmem:[%s9237_s29 + $0xd58] sm:$0xff] %v3115_v34  ;;  %4140 = vst [vmem:[%s9237_s29 + $0xd60] sm:$0xff] %v3116_v25  ;;  %v3132_v53 = vadd.f32 %v10357_v42, %v13781_v46  ;;  %v3133_v34 = vadd.f32 %v10357_v42, %v13782_v3  ;;  %v13783_v30 = vld [vmem:[#allocation392_spill] sm:$0xff]  ;;  %v13784_v37 = vld [vmem:[#allocation393_spill] sm:$0xff] }
 0x359   : > { %4141 = vst [vmem:[%s9237_s29 + $0xd68] sm:$0xff] %v3117_v43  ;;  %4142 = vst [vmem:[%s9237_s29 + $0xd70] sm:$0xff] %v3118_v6  ;;  %v3134_v25 = vadd.f32 %v10357_v42, %v13783_v30  ;;  %v3135_v43 = vadd.f32 %v10357_v42, %v13784_v37  ;;  %v13785_v28 = vld [vmem:[#allocation394_spill] sm:$0xff]  ;;  %v13786_v4 = vld [vmem:[#allocation395_spill] sm:$0xff] }
 0x35a   : > { %4143 = vst [vmem:[%s9237_s29 + $0xd78] sm:$0xff] %v3119_v57  ;;  %4144 = vst [vmem:[%s9237_s29 + $0xd80] sm:$0xff] %v3120_v1  ;;  %v3072_v6 = vadd.f32 %v10455_v47, %v13785_v28  ;;  %v3073_v57 = vadd.f32 %v10455_v47, %v13786_v4  ;;  %v13787_v7 = vld [vmem:[#allocation396_spill] sm:$0xff]  ;;  %v13788_v1 = vld [vmem:[#allocation397_spill] sm:$0xff] }
 0x35b   : > { %4145 = vst [vmem:[%s9237_s29 + $0xd88] sm:$0xff] %v3121_v23  ;;  %4146 = vst [vmem:[%s9237_s29 + $0xd90] sm:$0xff] %v3122_v40  ;;  %v3074_v42 = vadd.f32 %v10455_v47, %v13787_v7  ;;  %v3075_v16 = vadd.f32 %v10455_v47, %v13788_v1  ;;  %v13789_v23 = vld [vmem:[#allocation398_spill] sm:$0xff]  ;;  %v13790_v40 = vld [vmem:[#allocation399_spill] sm:$0xff] }
 0x35c   : > { %4147 = vst [vmem:[%s9237_s29 + $0xd98] sm:$0xff] %v3123_v29  ;;  %4148 = vst [vmem:[%s9237_s29 + $0xda0] sm:$0xff] %v3124_v15  ;;  %v3076_v58 = vadd.f32 %v10455_v47, %v13789_v23  ;;  %v3077_v24 = vadd.f32 %v10455_v47, %v13790_v40  ;;  %v13791_v29 = vld [vmem:[#allocation400_spill] sm:$0xff]  ;;  %v13792_v15 = vld [vmem:[#allocation401_spill] sm:$0xff] }
 0x35d   : > { %4149 = vst [vmem:[%s9237_s29 + $0xda8] sm:$0xff] %v3125_v19  ;;  %4150 = vst [vmem:[%s9237_s29 + $0xdb0] sm:$0xff] %v3126_v63  ;;  %v3078_v56 = vadd.f32 %v10455_v47, %v13791_v29  ;;  %v3079_v10 = vadd.f32 %v10455_v47, %v13792_v15  ;;  %v13793_v19 = vld [vmem:[#allocation402_spill] sm:$0xff]  ;;  %v13794_v63 = vld [vmem:[#allocation403_spill] sm:$0xff] }
 0x35e   : > { %4151 = vst [vmem:[%s9237_s29 + $0xdb8] sm:$0xff] %v3127_v62  ;;  %4152 = vst [vmem:[%s9237_s29 + $0xdc0] sm:$0xff] %v3128_v55  ;;  %v3080_v27 = vadd.f32 %v10455_v47, %v13793_v19  ;;  %v3081_v49 = vadd.f32 %v10455_v47, %v13794_v63  ;;  %v13795_v62 = vld [vmem:[#allocation404_spill] sm:$0xff]  ;;  %v13796_v55 = vld [vmem:[#allocation405_spill] sm:$0xff] }
 0x35f   : > { %4153 = vst [vmem:[%s9237_s29 + $0xdc8] sm:$0xff] %v3129_v17  ;;  %4154 = vst [vmem:[%s9237_s29 + $0xdd0] sm:$0xff] %v3130_v26  ;;  %v3082_v54 = vadd.f32 %v10455_v47, %v13795_v62  ;;  %v3083_v5 = vadd.f32 %v10455_v47, %v13796_v55  ;;  %v13797_v17 = vld [vmem:[#allocation406_spill] sm:$0xff]  ;;  %v13798_v26 = vld [vmem:[#allocation407_spill] sm:$0xff] }
 0x360   : > { %4155 = vst [vmem:[%s9237_s29 + $0xdd8] sm:$0xff] %v3131_v45  ;;  %4156 = vst [vmem:[%s9237_s29 + $0xde0] sm:$0xff] %v3132_v53  ;;  %v3084_v2 = vadd.f32 %v10455_v47, %v13797_v17  ;;  %v3085_v22 = vadd.f32 %v10455_v47, %v13798_v26  ;;  %v13799_v45 = vld [vmem:[#allocation408_spill] sm:$0xff]  ;;  %v13800_v53 = vld [vmem:[#allocation409_spill] sm:$0xff] }
 0x361   : > { %4157 = vst [vmem:[%s9237_s29 + $0xde8] sm:$0xff] %v3133_v34  ;;  %4158 = vst [vmem:[%s9237_s29 + $0xdf0] sm:$0xff] %v3134_v25  ;;  %v3086_v46 = vadd.f32 %v10455_v47, %v13799_v45  ;;  %v3087_v3 = vadd.f32 %v10455_v47, %v13800_v53  ;;  %v13801_v34 = vld [vmem:[#allocation410_spill] sm:$0xff]  ;;  %v13802_v25 = vld [vmem:[#allocation411_spill] sm:$0xff] }
 0x362   : > { %4159 = vst [vmem:[%s9237_s29 + $0xdf8] sm:$0xff] %v3135_v43  ;;  %4096 = vst [vmem:[%s9237_s29 + $0xc00] sm:$0xff] %v3072_v6  ;;  %v3088_v30 = vadd.f32 %v10455_v47, %v13801_v34  ;;  %v3089_v37 = vadd.f32 %v10455_v47, %v13802_v25  ;;  %v13803_v43 = vld [vmem:[#allocation412_spill] sm:$0xff]  ;;  %v13804_v6 = vld [vmem:[#allocation413_spill] sm:$0xff] }
 0x363   : > { %4097 = vst [vmem:[%s9237_s29 + $0xc08] sm:$0xff] %v3073_v57  ;;  %4098 = vst [vmem:[%s9237_s29 + $0xc10] sm:$0xff] %v3074_v42  ;;  %v3090_v28 = vadd.f32 %v10455_v47, %v13803_v43  ;;  %v3091_v4 = vadd.f32 %v10455_v47, %v13804_v6  ;;  %v13805_v57 = vld [vmem:[#allocation414_spill] sm:$0xff]  ;;  %v13806_v42 = vld [vmem:[#allocation415_spill] sm:$0xff] }
 0x364   : > { %4099 = vst [vmem:[%s9237_s29 + $0xc18] sm:$0xff] %v3075_v16  ;;  %4100 = vst [vmem:[%s9237_s29 + $0xc20] sm:$0xff] %v3076_v58  ;;  %v3092_v7 = vadd.f32 %v10455_v47, %v13805_v57  ;;  %v3093_v1 = vadd.f32 %v10455_v47, %v13806_v42  ;;  %v13807_v16 = vld [vmem:[#allocation416_spill] sm:$0xff]  ;;  %v13808_v58 = vld [vmem:[#allocation417_spill] sm:$0xff] }
 0x365   : > { %4101 = vst [vmem:[%s9237_s29 + $0xc28] sm:$0xff] %v3077_v24  ;;  %4102 = vst [vmem:[%s9237_s29 + $0xc30] sm:$0xff] %v3078_v56  ;;  %v3094_v23 = vadd.f32 %v10455_v47, %v13807_v16  ;;  %v3095_v40 = vadd.f32 %v10455_v47, %v13808_v58  ;;  %v10553_v24 = vpop.permute.xlu1 %2605  ;;  %v13809_v29 = vld [vmem:[#allocation418_spill] sm:$0xff]  ;;  %v13810_v15 = vld [vmem:[#allocation419_spill] sm:$0xff] }
 0x366   : > { %4103 = vst [vmem:[%s9237_s29 + $0xc38] sm:$0xff] %v3079_v10  ;;  %4104 = vst [vmem:[%s9237_s29 + $0xc40] sm:$0xff] %v3080_v27  ;;  %v3096_v56 = vadd.f32 %v10455_v47, %v13809_v29  ;;  %v3097_v10 = vadd.f32 %v10455_v47, %v13810_v15  ;;  %v13811_v19 = vld [vmem:[#allocation420_spill] sm:$0xff]  ;;  %v13812_v63 = vld [vmem:[#allocation421_spill] sm:$0xff] }
 0x367   : > { %4105 = vst [vmem:[%s9237_s29 + $0xc48] sm:$0xff] %v3081_v49  ;;  %4106 = vst [vmem:[%s9237_s29 + $0xc50] sm:$0xff] %v3082_v54  ;;  %v3098_v27 = vadd.f32 %v10455_v47, %v13811_v19  ;;  %v3099_v49 = vadd.f32 %v10455_v47, %v13812_v63  ;;  %v13813_v62 = vld [vmem:[#allocation422_spill] sm:$0xff]  ;;  %v13814_v55 = vld [vmem:[#allocation423_spill] sm:$0xff] }
 0x368   : > { %4107 = vst [vmem:[%s9237_s29 + $0xc58] sm:$0xff] %v3083_v5  ;;  %4108 = vst [vmem:[%s9237_s29 + $0xc60] sm:$0xff] %v3084_v2  ;;  %v3100_v54 = vadd.f32 %v10455_v47, %v13813_v62  ;;  %v3101_v5 = vadd.f32 %v10455_v47, %v13814_v55  ;;  %v13815_v17 = vld [vmem:[#allocation424_spill] sm:$0xff]  ;;  %v13816_v26 = vld [vmem:[#allocation425_spill] sm:$0xff] }
 0x369   : > { %4109 = vst [vmem:[%s9237_s29 + $0xc68] sm:$0xff] %v3085_v22  ;;  %4110 = vst [vmem:[%s9237_s29 + $0xc70] sm:$0xff] %v3086_v46  ;;  %v3102_v2 = vadd.f32 %v10455_v47, %v13815_v17  ;;  %v3103_v22 = vadd.f32 %v10455_v47, %v13816_v26  ;;  %v13817_v45 = vld [vmem:[#allocation426_spill] sm:$0xff]  ;;  %v13818_v53 = vld [vmem:[#allocation427_spill] sm:$0xff] }
 0x36a   : > { %4111 = vst [vmem:[%s9237_s29 + $0xc78] sm:$0xff] %v3087_v3  ;;  %4112 = vst [vmem:[%s9237_s29 + $0xc80] sm:$0xff] %v3088_v30  ;;  %v3168_v46 = vadd.f32 %v10553_v24, %v13817_v45  ;;  %v3169_v3 = vadd.f32 %v10553_v24, %v13818_v53  ;;  %v13819_v34 = vld [vmem:[#allocation428_spill] sm:$0xff]  ;;  %v13820_v30 = vld [vmem:[#allocation429_spill] sm:$0xff] }
 0x36b   : > { %4113 = vst [vmem:[%s9237_s29 + $0xc88] sm:$0xff] %v3089_v37  ;;  %4114 = vst [vmem:[%s9237_s29 + $0xc90] sm:$0xff] %v3090_v28  ;;  %v3170_v47 = vadd.f32 %v10553_v24, %v13819_v34  ;;  %v3171_v25 = vadd.f32 %v10553_v24, %v13820_v30  ;;  %v13821_v37 = vld [vmem:[#allocation430_spill] sm:$0xff]  ;;  %v13822_v28 = vld [vmem:[#allocation431_spill] sm:$0xff] }
 0x36c   : > { %4115 = vst [vmem:[%s9237_s29 + $0xc98] sm:$0xff] %v3091_v4  ;;  %4116 = vst [vmem:[%s9237_s29 + $0xca0] sm:$0xff] %v3092_v7  ;;  %v3172_v43 = vadd.f32 %v10553_v24, %v13821_v37  ;;  %v3173_v6 = vadd.f32 %v10553_v24, %v13822_v28  ;;  %v13823_v4 = vld [vmem:[#allocation432_spill] sm:$0xff]  ;;  %v13824_v7 = vld [vmem:[#allocation433_spill] sm:$0xff] }
 0x36d   : > { %4117 = vst [vmem:[%s9237_s29 + $0xca8] sm:$0xff] %v3093_v1  ;;  %4118 = vst [vmem:[%s9237_s29 + $0xcb0] sm:$0xff] %v3094_v23  ;;  %v3174_v57 = vadd.f32 %v10553_v24, %v13823_v4  ;;  %v3175_v42 = vadd.f32 %v10553_v24, %v13824_v7  ;;  %v13825_v1 = vld [vmem:[#allocation434_spill] sm:$0xff]  ;;  %v13826_v23 = vld [vmem:[#allocation435_spill] sm:$0xff] }
 0x36e   : > { %4119 = vst [vmem:[%s9237_s29 + $0xcb8] sm:$0xff] %v3095_v40  ;;  %4120 = vst [vmem:[%s9237_s29 + $0xcc0] sm:$0xff] %v3096_v56  ;;  %v3176_v16 = vadd.f32 %v10553_v24, %v13825_v1  ;;  %v3177_v58 = vadd.f32 %v10553_v24, %v13826_v23  ;;  %v13827_v40 = vld [vmem:[#allocation436_spill] sm:$0xff]  ;;  %v13828_v56 = vld [vmem:[#allocation437_spill] sm:$0xff] }
 0x36f   : > { %4121 = vst [vmem:[%s9237_s29 + $0xcc8] sm:$0xff] %v3097_v10  ;;  %4122 = vst [vmem:[%s9237_s29 + $0xcd0] sm:$0xff] %v3098_v27  ;;  %v3178_v29 = vadd.f32 %v10553_v24, %v13827_v40  ;;  %v3179_v15 = vadd.f32 %v10553_v24, %v13828_v56  ;;  %v13829_v10 = vld [vmem:[#allocation438_spill] sm:$0xff]  ;;  %v13830_v27 = vld [vmem:[#allocation439_spill] sm:$0xff] }
 0x370   : > { %4123 = vst [vmem:[%s9237_s29 + $0xcd8] sm:$0xff] %v3099_v49  ;;  %4124 = vst [vmem:[%s9237_s29 + $0xce0] sm:$0xff] %v3100_v54  ;;  %v3180_v19 = vadd.f32 %v10553_v24, %v13829_v10  ;;  %v3181_v63 = vadd.f32 %v10553_v24, %v13830_v27  ;;  %v13831_v49 = vld [vmem:[#allocation440_spill] sm:$0xff]  ;;  %v13832_v54 = vld [vmem:[#allocation441_spill] sm:$0xff] }
 0x371   : > { %4125 = vst [vmem:[%s9237_s29 + $0xce8] sm:$0xff] %v3101_v5  ;;  %4126 = vst [vmem:[%s9237_s29 + $0xcf0] sm:$0xff] %v3102_v2  ;;  %v3182_v62 = vadd.f32 %v10553_v24, %v13831_v49  ;;  %v3183_v55 = vadd.f32 %v10553_v24, %v13832_v54  ;;  %v13833_v5 = vld [vmem:[#allocation442_spill] sm:$0xff]  ;;  %v13834_v2 = vld [vmem:[#allocation443_spill] sm:$0xff] }
 0x372   : > { %4127 = vst [vmem:[%s9237_s29 + $0xcf8] sm:$0xff] %v3103_v22  ;;  %4192 = vst [vmem:[%s9237_s29 + $0xf00] sm:$0xff] %v3168_v46  ;;  %v3184_v17 = vadd.f32 %v10553_v24, %v13833_v5  ;;  %v3185_v26 = vadd.f32 %v10553_v24, %v13834_v2  ;;  %v13835_v22 = vld [vmem:[#allocation444_spill] sm:$0xff]  ;;  %v13836_v46 = vld [vmem:[#allocation445_spill] sm:$0xff] }
 0x373   : > { %4193 = vst [vmem:[%s9237_s29 + $0xf08] sm:$0xff] %v3169_v3  ;;  %4194 = vst [vmem:[%s9237_s29 + $0xf10] sm:$0xff] %v3170_v47  ;;  %v3186_v45 = vadd.f32 %v10553_v24, %v13835_v22  ;;  %v3187_v53 = vadd.f32 %v10553_v24, %v13836_v46  ;;  %v13837_v3 = vld [vmem:[#allocation446_spill] sm:$0xff]  ;;  %v13838_v47 = vld [vmem:[#allocation447_spill] sm:$0xff] }
 0x374   : > { %4195 = vst [vmem:[%s9237_s29 + $0xf18] sm:$0xff] %v3171_v25  ;;  %4196 = vst [vmem:[%s9237_s29 + $0xf20] sm:$0xff] %v3172_v43  ;;  %v3188_v34 = vadd.f32 %v10553_v24, %v13837_v3  ;;  %v3189_v30 = vadd.f32 %v10553_v24, %v13838_v47  ;;  %v13839_v25 = vld [vmem:[#allocation448_spill] sm:$0xff]  ;;  %v13840_v43 = vld [vmem:[#allocation449_spill] sm:$0xff] }
 0x375   : > { %4197 = vst [vmem:[%s9237_s29 + $0xf28] sm:$0xff] %v3173_v6  ;;  %4198 = vst [vmem:[%s9237_s29 + $0xf30] sm:$0xff] %v3174_v57  ;;  %v3190_v37 = vadd.f32 %v10553_v24, %v13839_v25  ;;  %v3191_v28 = vadd.f32 %v10553_v24, %v13840_v43  ;;  %v10651_v6 = vpop.permute.xlu0 %2600  ;;  %v13841_v4 = vld [vmem:[#allocation450_spill] sm:$0xff]  ;;  %v13842_v7 = vld [vmem:[#allocation451_spill] sm:$0xff] }
 0x376   : > { %4199 = vst [vmem:[%s9237_s29 + $0xf38] sm:$0xff] %v3175_v42  ;;  %4200 = vst [vmem:[%s9237_s29 + $0xf40] sm:$0xff] %v3176_v16  ;;  %v3192_v57 = vadd.f32 %v10553_v24, %v13841_v4  ;;  %v3193_v42 = vadd.f32 %v10553_v24, %v13842_v7  ;;  %v13843_v1 = vld [vmem:[#allocation452_spill] sm:$0xff]  ;;  %v13844_v23 = vld [vmem:[#allocation453_spill] sm:$0xff] }
 0x377   : > { %4201 = vst [vmem:[%s9237_s29 + $0xf48] sm:$0xff] %v3177_v58  ;;  %4202 = vst [vmem:[%s9237_s29 + $0xf50] sm:$0xff] %v3178_v29  ;;  %v3194_v16 = vadd.f32 %v10553_v24, %v13843_v1  ;;  %v3195_v58 = vadd.f32 %v10553_v24, %v13844_v23  ;;  %v13845_v40 = vld [vmem:[#allocation454_spill] sm:$0xff]  ;;  %v13846_v56 = vld [vmem:[#allocation455_spill] sm:$0xff] }
 0x378   : > { %4203 = vst [vmem:[%s9237_s29 + $0xf58] sm:$0xff] %v3179_v15  ;;  %4204 = vst [vmem:[%s9237_s29 + $0xf60] sm:$0xff] %v3180_v19  ;;  %v3196_v29 = vadd.f32 %v10553_v24, %v13845_v40  ;;  %v3197_v15 = vadd.f32 %v10553_v24, %v13846_v56  ;;  %v13847_v10 = vld [vmem:[#allocation456_spill] sm:$0xff]  ;;  %v13848_v27 = vld [vmem:[#allocation457_spill] sm:$0xff] }
 0x379   : > { %4205 = vst [vmem:[%s9237_s29 + $0xf68] sm:$0xff] %v3181_v63  ;;  %4206 = vst [vmem:[%s9237_s29 + $0xf70] sm:$0xff] %v3182_v62  ;;  %v3198_v19 = vadd.f32 %v10553_v24, %v13847_v10  ;;  %v3199_v63 = vadd.f32 %v10553_v24, %v13848_v27  ;;  %v13849_v49 = vld [vmem:[#allocation458_spill] sm:$0xff]  ;;  %v13850_v54 = vld [vmem:[#allocation459_spill] sm:$0xff] }
 0x37a   : > { %4207 = vst [vmem:[%s9237_s29 + $0xf78] sm:$0xff] %v3183_v55  ;;  %4208 = vst [vmem:[%s9237_s29 + $0xf80] sm:$0xff] %v3184_v17  ;;  %v3136_v62 = vadd.f32 %v10651_v6, %v13849_v49  ;;  %v3137_v55 = vadd.f32 %v10651_v6, %v13850_v54  ;;  %v13851_v5 = vld [vmem:[#allocation460_spill] sm:$0xff]  ;;  %v13852_v17 = vld [vmem:[#allocation461_spill] sm:$0xff] }
 0x37b   : > { %4209 = vst [vmem:[%s9237_s29 + $0xf88] sm:$0xff] %v3185_v26  ;;  %4210 = vst [vmem:[%s9237_s29 + $0xf90] sm:$0xff] %v3186_v45  ;;  %v3138_v24 = vadd.f32 %v10651_v6, %v13851_v5  ;;  %v3139_v2 = vadd.f32 %v10651_v6, %v13852_v17  ;;  %v13853_v26 = vld [vmem:[#allocation462_spill] sm:$0xff]  ;;  %v13854_v45 = vld [vmem:[#allocation463_spill] sm:$0xff] }
 0x37c   : > { %4211 = vst [vmem:[%s9237_s29 + $0xf98] sm:$0xff] %v3187_v53  ;;  %4212 = vst [vmem:[%s9237_s29 + $0xfa0] sm:$0xff] %v3188_v34  ;;  %v3140_v22 = vadd.f32 %v10651_v6, %v13853_v26  ;;  %v3141_v46 = vadd.f32 %v10651_v6, %v13854_v45  ;;  %v13855_v53 = vld [vmem:[#allocation464_spill] sm:$0xff]  ;;  %v13856_v34 = vld [vmem:[#allocation465_spill] sm:$0xff] }
 0x37d   : > { %4213 = vst [vmem:[%s9237_s29 + $0xfa8] sm:$0xff] %v3189_v30  ;;  %4214 = vst [vmem:[%s9237_s29 + $0xfb0] sm:$0xff] %v3190_v37  ;;  %v3142_v3 = vadd.f32 %v10651_v6, %v13855_v53  ;;  %v3143_v47 = vadd.f32 %v10651_v6, %v13856_v34  ;;  %v13857_v30 = vld [vmem:[#allocation466_spill] sm:$0xff]  ;;  %v13858_v37 = vld [vmem:[#allocation467_spill] sm:$0xff] }
 0x37e   : > { %4215 = vst [vmem:[%s9237_s29 + $0xfb8] sm:$0xff] %v3191_v28  ;;  %4216 = vst [vmem:[%s9237_s29 + $0xfc0] sm:$0xff] %v3192_v57  ;;  %v3144_v25 = vadd.f32 %v10651_v6, %v13857_v30  ;;  %v3145_v43 = vadd.f32 %v10651_v6, %v13858_v37  ;;  %v13859_v28 = vld [vmem:[#allocation468_spill] sm:$0xff]  ;;  %v13860_v57 = vld [vmem:[#allocation469_spill] sm:$0xff] }
 0x37f   : > { %4217 = vst [vmem:[%s9237_s29 + $0xfc8] sm:$0xff] %v3193_v42  ;;  %4218 = vst [vmem:[%s9237_s29 + $0xfd0] sm:$0xff] %v3194_v16  ;;  %v3146_v4 = vadd.f32 %v10651_v6, %v13859_v28  ;;  %v3147_v7 = vadd.f32 %v10651_v6, %v13860_v57  ;;  %v13861_v42 = vld [vmem:[#allocation470_spill] sm:$0xff]  ;;  %v13862_v16 = vld [vmem:[#allocation471_spill] sm:$0xff] }
 0x380   : > { %4219 = vst [vmem:[%s9237_s29 + $0xfd8] sm:$0xff] %v3195_v58  ;;  %4220 = vst [vmem:[%s9237_s29 + $0xfe0] sm:$0xff] %v3196_v29  ;;  %v3148_v1 = vadd.f32 %v10651_v6, %v13861_v42  ;;  %v3149_v23 = vadd.f32 %v10651_v6, %v13862_v16  ;;  %v13863_v58 = vld [vmem:[#allocation472_spill] sm:$0xff]  ;;  %v13864_v29 = vld [vmem:[#allocation473_spill] sm:$0xff] }
 0x381   : > { %4221 = vst [vmem:[%s9237_s29 + $0xfe8] sm:$0xff] %v3197_v15  ;;  %4222 = vst [vmem:[%s9237_s29 + $0xff0] sm:$0xff] %v3198_v19  ;;  %v3150_v40 = vadd.f32 %v10651_v6, %v13863_v58  ;;  %v3151_v56 = vadd.f32 %v10651_v6, %v13864_v29  ;;  %v13865_v15 = vld [vmem:[#allocation474_spill] sm:$0xff]  ;;  %v13866_v19 = vld [vmem:[#allocation475_spill] sm:$0xff] }
 0x382   : > { %4223 = vst [vmem:[%s9237_s29 + $0xff8] sm:$0xff] %v3199_v63  ;;  %4160 = vst [vmem:[%s9237_s29 + $0xe00] sm:$0xff] %v3136_v62  ;;  %v3152_v10 = vadd.f32 %v10651_v6, %v13865_v15  ;;  %v3153_v27 = vadd.f32 %v10651_v6, %v13866_v19  ;;  %v13867_v63 = vld [vmem:[#allocation476_spill] sm:$0xff]  ;;  %v13868_v62 = vld [vmem:[#allocation477_spill] sm:$0xff] }
 0x383   : > { %4161 = vst [vmem:[%s9237_s29 + $0xe08] sm:$0xff] %v3137_v55  ;;  %4162 = vst [vmem:[%s9237_s29 + $0xe10] sm:$0xff] %v3138_v24  ;;  %v3154_v49 = vadd.f32 %v10651_v6, %v13867_v63  ;;  %v3155_v54 = vadd.f32 %v10651_v6, %v13868_v62  ;;  %v13869_v55 = vld [vmem:[#allocation478_spill] sm:$0xff]  ;;  %v13870_v24 = vld [vmem:[#allocation479_spill] sm:$0xff] }
 0x384   : > { %4163 = vst [vmem:[%s9237_s29 + $0xe18] sm:$0xff] %v3139_v2  ;;  %4164 = vst [vmem:[%s9237_s29 + $0xe20] sm:$0xff] %v3140_v22  ;;  %v3156_v5 = vadd.f32 %v10651_v6, %v13869_v55  ;;  %v3157_v17 = vadd.f32 %v10651_v6, %v13870_v24  ;;  %v13871_v2 = vld [vmem:[#allocation480_spill] sm:$0xff]  ;;  %v13872_v22 = vld [vmem:[#allocation481_spill] sm:$0xff] }
 0x385   : > { %4165 = vst [vmem:[%s9237_s29 + $0xe28] sm:$0xff] %v3141_v46  ;;  %4166 = vst [vmem:[%s9237_s29 + $0xe30] sm:$0xff] %v3142_v3  ;;  %v3158_v26 = vadd.f32 %v10651_v6, %v13871_v2  ;;  %v3159_v45 = vadd.f32 %v10651_v6, %v13872_v22  ;;  %v10749_v46 = vpop.permute.xlu1 %2615  ;;  %v13873_v53 = vld [vmem:[#allocation482_spill] sm:$0xff]  ;;  %v13874_v34 = vld [vmem:[#allocation483_spill] sm:$0xff] }
 0x386   : > { %4167 = vst [vmem:[%s9237_s29 + $0xe38] sm:$0xff] %v3143_v47  ;;  %4168 = vst [vmem:[%s9237_s29 + $0xe40] sm:$0xff] %v3144_v25  ;;  %v3160_v3 = vadd.f32 %v10651_v6, %v13873_v53  ;;  %v3161_v47 = vadd.f32 %v10651_v6, %v13874_v34  ;;  %v13875_v30 = vld [vmem:[#allocation484_spill] sm:$0xff]  ;;  %v13876_v37 = vld [vmem:[#allocation485_spill] sm:$0xff] }
 0x387   : > { %4169 = vst [vmem:[%s9237_s29 + $0xe48] sm:$0xff] %v3145_v43  ;;  %4170 = vst [vmem:[%s9237_s29 + $0xe50] sm:$0xff] %v3146_v4  ;;  %v3162_v25 = vadd.f32 %v10651_v6, %v13875_v30  ;;  %v3163_v43 = vadd.f32 %v10651_v6, %v13876_v37  ;;  %v13877_v28 = vld [vmem:[#allocation486_spill] sm:$0xff]  ;;  %v13878_v57 = vld [vmem:[#allocation487_spill] sm:$0xff] }
 0x388   : > { %4171 = vst [vmem:[%s9237_s29 + $0xe58] sm:$0xff] %v3147_v7  ;;  %4172 = vst [vmem:[%s9237_s29 + $0xe60] sm:$0xff] %v3148_v1  ;;  %v3164_v4 = vadd.f32 %v10651_v6, %v13877_v28  ;;  %v3165_v7 = vadd.f32 %v10651_v6, %v13878_v57  ;;  %v13879_v42 = vld [vmem:[#allocation488_spill] sm:$0xff]  ;;  %v13880_v16 = vld [vmem:[#allocation489_spill] sm:$0xff] }
 0x389   : > { %4173 = vst [vmem:[%s9237_s29 + $0xe68] sm:$0xff] %v3149_v23  ;;  %4174 = vst [vmem:[%s9237_s29 + $0xe70] sm:$0xff] %v3150_v40  ;;  %v3166_v1 = vadd.f32 %v10651_v6, %v13879_v42  ;;  %v3167_v23 = vadd.f32 %v10651_v6, %v13880_v16  ;;  %v13881_v58 = vld [vmem:[#allocation490_spill] sm:$0xff]  ;;  %v13882_v29 = vld [vmem:[#allocation491_spill] sm:$0xff] }
 0x38a   : > { %4175 = vst [vmem:[%s9237_s29 + $0xe78] sm:$0xff] %v3151_v56  ;;  %4176 = vst [vmem:[%s9237_s29 + $0xe80] sm:$0xff] %v3152_v10  ;;  %v3232_v40 = vadd.f32 %v10749_v46, %v13881_v58  ;;  %v3233_v56 = vadd.f32 %v10749_v46, %v13882_v29  ;;  %v13883_v15 = vld [vmem:[#allocation492_spill] sm:$0xff]  ;;  %v13884_v10 = vld [vmem:[#allocation493_spill] sm:$0xff] }
 0x38b   : > { %4177 = vst [vmem:[%s9237_s29 + $0xe88] sm:$0xff] %v3153_v27  ;;  %4178 = vst [vmem:[%s9237_s29 + $0xe90] sm:$0xff] %v3154_v49  ;;  %v3234_v6 = vadd.f32 %v10749_v46, %v13883_v15  ;;  %v3235_v19 = vadd.f32 %v10749_v46, %v13884_v10  ;;  %v13885_v27 = vld [vmem:[#allocation494_spill] sm:$0xff]  ;;  %v13886_v49 = vld [vmem:[#allocation495_spill] sm:$0xff] }
 0x38c   : > { %4179 = vst [vmem:[%s9237_s29 + $0xe98] sm:$0xff] %v3155_v54  ;;  %4180 = vst [vmem:[%s9237_s29 + $0xea0] sm:$0xff] %v3156_v5  ;;  %v3236_v63 = vadd.f32 %v10749_v46, %v13885_v27  ;;  %v3237_v62 = vadd.f32 %v10749_v46, %v13886_v49  ;;  %v13887_v54 = vld [vmem:[#allocation496_spill] sm:$0xff]  ;;  %v13888_v5 = vld [vmem:[#allocation497_spill] sm:$0xff] }
 0x38d   : > { %4181 = vst [vmem:[%s9237_s29 + $0xea8] sm:$0xff] %v3157_v17  ;;  %4182 = vst [vmem:[%s9237_s29 + $0xeb0] sm:$0xff] %v3158_v26  ;;  %v3238_v55 = vadd.f32 %v10749_v46, %v13887_v54  ;;  %v3239_v24 = vadd.f32 %v10749_v46, %v13888_v5  ;;  %v13889_v17 = vld [vmem:[#allocation498_spill] sm:$0xff]  ;;  %v13890_v26 = vld [vmem:[#allocation499_spill] sm:$0xff] }
 0x38e   : > { %4183 = vst [vmem:[%s9237_s29 + $0xeb8] sm:$0xff] %v3159_v45  ;;  %4184 = vst [vmem:[%s9237_s29 + $0xec0] sm:$0xff] %v3160_v3  ;;  %v3240_v2 = vadd.f32 %v10749_v46, %v13889_v17  ;;  %v3241_v22 = vadd.f32 %v10749_v46, %v13890_v26  ;;  %v13891_v45 = vld [vmem:[#allocation500_spill] sm:$0xff]  ;;  %v13892_v3 = vld [vmem:[#allocation501_spill] sm:$0xff] }
 0x38f   : > { %4185 = vst [vmem:[%s9237_s29 + $0xec8] sm:$0xff] %v3161_v47  ;;  %4186 = vst [vmem:[%s9237_s29 + $0xed0] sm:$0xff] %v3162_v25  ;;  %v3242_v53 = vadd.f32 %v10749_v46, %v13891_v45  ;;  %v3243_v34 = vadd.f32 %v10749_v46, %v13892_v3  ;;  %v13893_v47 = vld [vmem:[#allocation502_spill] sm:$0xff]  ;;  %v13894_v25 = vld [vmem:[#allocation503_spill] sm:$0xff] }
 0x390   : > { %4187 = vst [vmem:[%s9237_s29 + $0xed8] sm:$0xff] %v3163_v43  ;;  %4188 = vst [vmem:[%s9237_s29 + $0xee0] sm:$0xff] %v3164_v4  ;;  %v3244_v30 = vadd.f32 %v10749_v46, %v13893_v47  ;;  %v3245_v37 = vadd.f32 %v10749_v46, %v13894_v25  ;;  %v13895_v43 = vld [vmem:[#allocation504_spill] sm:$0xff]  ;;  %v13896_v4 = vld [vmem:[#allocation505_spill] sm:$0xff] }
 0x391   : > { %4189 = vst [vmem:[%s9237_s29 + $0xee8] sm:$0xff] %v3165_v7  ;;  %4190 = vst [vmem:[%s9237_s29 + $0xef0] sm:$0xff] %v3166_v1  ;;  %v3246_v28 = vadd.f32 %v10749_v46, %v13895_v43  ;;  %v3247_v57 = vadd.f32 %v10749_v46, %v13896_v4  ;;  %v13897_v7 = vld [vmem:[#allocation506_spill] sm:$0xff]  ;;  %v13898_v1 = vld [vmem:[#allocation507_spill] sm:$0xff] }
 0x392   : > { %4191 = vst [vmem:[%s9237_s29 + $0xef8] sm:$0xff] %v3167_v23  ;;  %4256 = vst [vmem:[%s9237_s29 + $0x1100] sm:$0xff] %v3232_v40  ;;  %v3248_v42 = vadd.f32 %v10749_v46, %v13897_v7  ;;  %v3249_v16 = vadd.f32 %v10749_v46, %v13898_v1  ;;  %v13899_v23 = vld [vmem:[#allocation508_spill] sm:$0xff]  ;;  %v13900_v40 = vld [vmem:[#allocation509_spill] sm:$0xff] }
 0x393   : > { %4257 = vst [vmem:[%s9237_s29 + $0x1108] sm:$0xff] %v3233_v56  ;;  %4258 = vst [vmem:[%s9237_s29 + $0x1110] sm:$0xff] %v3234_v6  ;;  %v3250_v58 = vadd.f32 %v10749_v46, %v13899_v23  ;;  %v3251_v29 = vadd.f32 %v10749_v46, %v13900_v40  ;;  %v13901_v56 = vld [vmem:[#allocation510_spill] sm:$0xff]  ;;  %v13902_v6 = vld [vmem:[#allocation511_spill] sm:$0xff] }
 0x394   : > { %4259 = vst [vmem:[%s9237_s29 + $0x1118] sm:$0xff] %v3235_v19  ;;  %4260 = vst [vmem:[%s9237_s29 + $0x1120] sm:$0xff] %v3236_v63  ;;  %v3252_v15 = vadd.f32 %v10749_v46, %v13901_v56  ;;  %v3253_v10 = vadd.f32 %v10749_v46, %v13902_v6  ;;  %v13903_v19 = vld [vmem:[#allocation512_spill] sm:$0xff]  ;;  %v13904_v63 = vld [vmem:[#allocation513_spill] sm:$0xff] }
 0x395   : > { %4261 = vst [vmem:[%s9237_s29 + $0x1128] sm:$0xff] %v3237_v62  ;;  %4262 = vst [vmem:[%s9237_s29 + $0x1130] sm:$0xff] %v3238_v55  ;;  %v3254_v27 = vadd.f32 %v10749_v46, %v13903_v19  ;;  %v3255_v49 = vadd.f32 %v10749_v46, %v13904_v63  ;;  %v10847_v62 = vpop.permute.xlu0 %2610  ;;  %v13905_v54 = vld [vmem:[#allocation514_spill] sm:$0xff]  ;;  %v13906_v5 = vld [vmem:[#allocation515_spill] sm:$0xff] }
 0x396   : > { %4263 = vst [vmem:[%s9237_s29 + $0x1138] sm:$0xff] %v3239_v24  ;;  %4264 = vst [vmem:[%s9237_s29 + $0x1140] sm:$0xff] %v3240_v2  ;;  %v3256_v55 = vadd.f32 %v10749_v46, %v13905_v54  ;;  %v3257_v24 = vadd.f32 %v10749_v46, %v13906_v5  ;;  %v13907_v17 = vld [vmem:[#allocation516_spill] sm:$0xff]  ;;  %v13908_v26 = vld [vmem:[#allocation517_spill] sm:$0xff] }
 0x397   : > { %4265 = vst [vmem:[%s9237_s29 + $0x1148] sm:$0xff] %v3241_v22  ;;  %4266 = vst [vmem:[%s9237_s29 + $0x1150] sm:$0xff] %v3242_v53  ;;  %v3258_v2 = vadd.f32 %v10749_v46, %v13907_v17  ;;  %v3259_v22 = vadd.f32 %v10749_v46, %v13908_v26  ;;  %v13909_v45 = vld [vmem:[#allocation518_spill] sm:$0xff]  ;;  %v13910_v3 = vld [vmem:[#allocation519_spill] sm:$0xff] }
 0x398   : > { %4267 = vst [vmem:[%s9237_s29 + $0x1158] sm:$0xff] %v3243_v34  ;;  %4268 = vst [vmem:[%s9237_s29 + $0x1160] sm:$0xff] %v3244_v30  ;;  %v3260_v53 = vadd.f32 %v10749_v46, %v13909_v45  ;;  %v3261_v34 = vadd.f32 %v10749_v46, %v13910_v3  ;;  %v13911_v47 = vld [vmem:[#allocation520_spill] sm:$0xff]  ;;  %v13912_v25 = vld [vmem:[#allocation521_spill] sm:$0xff] }
 0x399   : > { %4269 = vst [vmem:[%s9237_s29 + $0x1168] sm:$0xff] %v3245_v37  ;;  %4270 = vst [vmem:[%s9237_s29 + $0x1170] sm:$0xff] %v3246_v28  ;;  %v3262_v30 = vadd.f32 %v10749_v46, %v13911_v47  ;;  %v3263_v37 = vadd.f32 %v10749_v46, %v13912_v25  ;;  %v13913_v43 = vld [vmem:[#allocation522_spill] sm:$0xff]  ;;  %v13914_v4 = vld [vmem:[#allocation523_spill] sm:$0xff] }
 0x39a   : > { %4271 = vst [vmem:[%s9237_s29 + $0x1178] sm:$0xff] %v3247_v57  ;;  %4272 = vst [vmem:[%s9237_s29 + $0x1180] sm:$0xff] %v3248_v42  ;;  %v3200_v28 = vadd.f32 %v10847_v62, %v13913_v43  ;;  %v3201_v57 = vadd.f32 %v10847_v62, %v13914_v4  ;;  %v13915_v7 = vld [vmem:[#allocation524_spill] sm:$0xff]  ;;  %v13916_v42 = vld [vmem:[#allocation525_spill] sm:$0xff] }
 0x39b   : > { %4273 = vst [vmem:[%s9237_s29 + $0x1188] sm:$0xff] %v3249_v16  ;;  %4274 = vst [vmem:[%s9237_s29 + $0x1190] sm:$0xff] %v3250_v58  ;;  %v3202_v46 = vadd.f32 %v10847_v62, %v13915_v7  ;;  %v3203_v1 = vadd.f32 %v10847_v62, %v13916_v42  ;;  %v13917_v16 = vld [vmem:[#allocation526_spill] sm:$0xff]  ;;  %v13918_v58 = vld [vmem:[#allocation527_spill] sm:$0xff] }
 0x39c   : > { %4275 = vst [vmem:[%s9237_s29 + $0x1198] sm:$0xff] %v3251_v29  ;;  %4276 = vst [vmem:[%s9237_s29 + $0x11a0] sm:$0xff] %v3252_v15  ;;  %v3204_v23 = vadd.f32 %v10847_v62, %v13917_v16  ;;  %v3205_v40 = vadd.f32 %v10847_v62, %v13918_v58  ;;  %v13919_v29 = vld [vmem:[#allocation528_spill] sm:$0xff]  ;;  %v13920_v15 = vld [vmem:[#allocation529_spill] sm:$0xff] }
 0x39d   : > { %4277 = vst [vmem:[%s9237_s29 + $0x11a8] sm:$0xff] %v3253_v10  ;;  %4278 = vst [vmem:[%s9237_s29 + $0x11b0] sm:$0xff] %v3254_v27  ;;  %v3206_v56 = vadd.f32 %v10847_v62, %v13919_v29  ;;  %v3207_v6 = vadd.f32 %v10847_v62, %v13920_v15  ;;  %v13921_v10 = vld [vmem:[#allocation530_spill] sm:$0xff]  ;;  %v13922_v27 = vld [vmem:[#allocation531_spill] sm:$0xff] }
 0x39e   : > { %4279 = vst [vmem:[%s9237_s29 + $0x11b8] sm:$0xff] %v3255_v49  ;;  %4280 = vst [vmem:[%s9237_s29 + $0x11c0] sm:$0xff] %v3256_v55  ;;  %v3208_v19 = vadd.f32 %v10847_v62, %v13921_v10  ;;  %v3209_v63 = vadd.f32 %v10847_v62, %v13922_v27  ;;  %v13923_v49 = vld [vmem:[#allocation532_spill] sm:$0xff]  ;;  %v13924_v55 = vld [vmem:[#allocation533_spill] sm:$0xff] }
 0x39f   : > { %4281 = vst [vmem:[%s9237_s29 + $0x11c8] sm:$0xff] %v3257_v24  ;;  %4282 = vst [vmem:[%s9237_s29 + $0x11d0] sm:$0xff] %v3258_v2  ;;  %v3210_v54 = vadd.f32 %v10847_v62, %v13923_v49  ;;  %v3211_v5 = vadd.f32 %v10847_v62, %v13924_v55  ;;  %v13925_v24 = vld [vmem:[#allocation534_spill] sm:$0xff]  ;;  %v13926_v2 = vld [vmem:[#allocation535_spill] sm:$0xff] }
 0x3a0   : > { %4283 = vst [vmem:[%s9237_s29 + $0x11d8] sm:$0xff] %v3259_v22  ;;  %4284 = vst [vmem:[%s9237_s29 + $0x11e0] sm:$0xff] %v3260_v53  ;;  %v3212_v17 = vadd.f32 %v10847_v62, %v13925_v24  ;;  %v3213_v26 = vadd.f32 %v10847_v62, %v13926_v2  ;;  %v13927_v22 = vld [vmem:[#allocation536_spill] sm:$0xff]  ;;  %v13928_v53 = vld [vmem:[#allocation537_spill] sm:$0xff] }
 0x3a1   : > { %4285 = vst [vmem:[%s9237_s29 + $0x11e8] sm:$0xff] %v3261_v34  ;;  %4286 = vst [vmem:[%s9237_s29 + $0x11f0] sm:$0xff] %v3262_v30  ;;  %v3214_v45 = vadd.f32 %v10847_v62, %v13927_v22  ;;  %v3215_v3 = vadd.f32 %v10847_v62, %v13928_v53  ;;  %v13929_v34 = vld [vmem:[#allocation538_spill] sm:$0xff]  ;;  %v13930_v30 = vld [vmem:[#allocation539_spill] sm:$0xff] }
 0x3a2   : > { %4287 = vst [vmem:[%s9237_s29 + $0x11f8] sm:$0xff] %v3263_v37  ;;  %4224 = vst [vmem:[%s9237_s29 + $0x1000] sm:$0xff] %v3200_v28  ;;  %v3216_v47 = vadd.f32 %v10847_v62, %v13929_v34  ;;  %v3217_v25 = vadd.f32 %v10847_v62, %v13930_v30  ;;  %v13931_v37 = vld [vmem:[#allocation540_spill] sm:$0xff]  ;;  %v13932_v28 = vld [vmem:[#allocation541_spill] sm:$0xff] }
 0x3a3   : > { %4225 = vst [vmem:[%s9237_s29 + $0x1008] sm:$0xff] %v3201_v57  ;;  %4226 = vst [vmem:[%s9237_s29 + $0x1010] sm:$0xff] %v3202_v46  ;;  %v3218_v43 = vadd.f32 %v10847_v62, %v13931_v37  ;;  %v3219_v4 = vadd.f32 %v10847_v62, %v13932_v28  ;;  %v13933_v57 = vld [vmem:[#allocation542_spill] sm:$0xff]  ;;  %v13934_v46 = vld [vmem:[#allocation543_spill] sm:$0xff] }
 0x3a4   : > { %4227 = vst [vmem:[%s9237_s29 + $0x1018] sm:$0xff] %v3203_v1  ;;  %4228 = vst [vmem:[%s9237_s29 + $0x1020] sm:$0xff] %v3204_v23  ;;  %v3220_v7 = vadd.f32 %v10847_v62, %v13933_v57  ;;  %v3221_v42 = vadd.f32 %v10847_v62, %v13934_v46  ;;  %v13935_v1 = vld [vmem:[#allocation544_spill] sm:$0xff]  ;;  %v13936_v23 = vld [vmem:[#allocation545_spill] sm:$0xff] }
 0x3a5   : > { %4229 = vst [vmem:[%s9237_s29 + $0x1028] sm:$0xff] %v3205_v40  ;;  %4230 = vst [vmem:[%s9237_s29 + $0x1030] sm:$0xff] %v3206_v56  ;;  %v3222_v16 = vadd.f32 %v10847_v62, %v13935_v1  ;;  %v3223_v58 = vadd.f32 %v10847_v62, %v13936_v23  ;;  %v10945_v40 = vpop.permute.xlu1 %2625  ;;  %v13937_v29 = vld [vmem:[#allocation546_spill] sm:$0xff]  ;;  %v13938_v15 = vld [vmem:[#allocation547_spill] sm:$0xff] }
 0x3a6   : > { %4231 = vst [vmem:[%s9237_s29 + $0x1038] sm:$0xff] %v3207_v6  ;;  %4232 = vst [vmem:[%s9237_s29 + $0x1040] sm:$0xff] %v3208_v19  ;;  %v3224_v56 = vadd.f32 %v10847_v62, %v13937_v29  ;;  %v3225_v6 = vadd.f32 %v10847_v62, %v13938_v15  ;;  %v13939_v10 = vld [vmem:[#allocation548_spill] sm:$0xff]  ;;  %v13940_v27 = vld [vmem:[#allocation549_spill] sm:$0xff] }
 0x3a7   : > { %4233 = vst [vmem:[%s9237_s29 + $0x1048] sm:$0xff] %v3209_v63  ;;  %4234 = vst [vmem:[%s9237_s29 + $0x1050] sm:$0xff] %v3210_v54  ;;  %v3226_v19 = vadd.f32 %v10847_v62, %v13939_v10  ;;  %v3227_v63 = vadd.f32 %v10847_v62, %v13940_v27  ;;  %v13941_v49 = vld [vmem:[#allocation550_spill] sm:$0xff]  ;;  %v13942_v55 = vld [vmem:[#allocation551_spill] sm:$0xff] }
 0x3a8   : > { %4235 = vst [vmem:[%s9237_s29 + $0x1058] sm:$0xff] %v3211_v5  ;;  %4236 = vst [vmem:[%s9237_s29 + $0x1060] sm:$0xff] %v3212_v17  ;;  %v3228_v54 = vadd.f32 %v10847_v62, %v13941_v49  ;;  %v3229_v5 = vadd.f32 %v10847_v62, %v13942_v55  ;;  %v13943_v24 = vld [vmem:[#allocation552_spill] sm:$0xff]  ;;  %v13944_v2 = vld [vmem:[#allocation553_spill] sm:$0xff] }
 0x3a9   : > { %4237 = vst [vmem:[%s9237_s29 + $0x1068] sm:$0xff] %v3213_v26  ;;  %4238 = vst [vmem:[%s9237_s29 + $0x1070] sm:$0xff] %v3214_v45  ;;  %v3230_v17 = vadd.f32 %v10847_v62, %v13943_v24  ;;  %v3231_v26 = vadd.f32 %v10847_v62, %v13944_v2  ;;  %v13945_v22 = vld [vmem:[#allocation554_spill] sm:$0xff]  ;;  %v13946_v53 = vld [vmem:[#allocation555_spill] sm:$0xff] }
 0x3aa   : > { %4239 = vst [vmem:[%s9237_s29 + $0x1078] sm:$0xff] %v3215_v3  ;;  %4240 = vst [vmem:[%s9237_s29 + $0x1080] sm:$0xff] %v3216_v47  ;;  %v3296_v45 = vadd.f32 %v10945_v40, %v13945_v22  ;;  %v3297_v3 = vadd.f32 %v10945_v40, %v13946_v53  ;;  %v13947_v34 = vld [vmem:[#allocation556_spill] sm:$0xff]  ;;  %v13948_v47 = vld [vmem:[#allocation557_spill] sm:$0xff] }
 0x3ab   : > { %4241 = vst [vmem:[%s9237_s29 + $0x1088] sm:$0xff] %v3217_v25  ;;  %4242 = vst [vmem:[%s9237_s29 + $0x1090] sm:$0xff] %v3218_v43  ;;  %v3298_v62 = vadd.f32 %v10945_v40, %v13947_v34  ;;  %v3299_v30 = vadd.f32 %v10945_v40, %v13948_v47  ;;  %v13949_v25 = vld [vmem:[#allocation558_spill] sm:$0xff]  ;;  %v13950_v43 = vld [vmem:[#allocation559_spill] sm:$0xff] }
 0x3ac   : > { %4243 = vst [vmem:[%s9237_s29 + $0x1098] sm:$0xff] %v3219_v4  ;;  %4244 = vst [vmem:[%s9237_s29 + $0x10a0] sm:$0xff] %v3220_v7  ;;  %v3300_v37 = vadd.f32 %v10945_v40, %v13949_v25  ;;  %v3301_v28 = vadd.f32 %v10945_v40, %v13950_v43  ;;  %v13951_v4 = vld [vmem:[#allocation560_spill] sm:$0xff]  ;;  %v13952_v7 = vld [vmem:[#allocation561_spill] sm:$0xff] }
 0x3ad   : > { %4245 = vst [vmem:[%s9237_s29 + $0x10a8] sm:$0xff] %v3221_v42  ;;  %4246 = vst [vmem:[%s9237_s29 + $0x10b0] sm:$0xff] %v3222_v16  ;;  %v3302_v57 = vadd.f32 %v10945_v40, %v13951_v4  ;;  %v3303_v46 = vadd.f32 %v10945_v40, %v13952_v7  ;;  %v13953_v42 = vld [vmem:[#allocation562_spill] sm:$0xff]  ;;  %v13954_v16 = vld [vmem:[#allocation563_spill] sm:$0xff] }
 0x3ae   : > { %4247 = vst [vmem:[%s9237_s29 + $0x10b8] sm:$0xff] %v3223_v58  ;;  %4248 = vst [vmem:[%s9237_s29 + $0x10c0] sm:$0xff] %v3224_v56  ;;  %v3304_v1 = vadd.f32 %v10945_v40, %v13953_v42  ;;  %v3305_v23 = vadd.f32 %v10945_v40, %v13954_v16  ;;  %v13955_v58 = vld [vmem:[#allocation564_spill] sm:$0xff]  ;;  %v13956_v56 = vld [vmem:[#allocation565_spill] sm:$0xff] }
 0x3af   : > { %4249 = vst [vmem:[%s9237_s29 + $0x10c8] sm:$0xff] %v3225_v6  ;;  %4250 = vst [vmem:[%s9237_s29 + $0x10d0] sm:$0xff] %v3226_v19  ;;  %v3306_v29 = vadd.f32 %v10945_v40, %v13955_v58  ;;  %v3307_v15 = vadd.f32 %v10945_v40, %v13956_v56  ;;  %v13957_v6 = vld [vmem:[#allocation566_spill] sm:$0xff]  ;;  %v13958_v19 = vld [vmem:[#allocation567_spill] sm:$0xff] }
 0x3b0   : > { %4251 = vst [vmem:[%s9237_s29 + $0x10d8] sm:$0xff] %v3227_v63  ;;  %4252 = vst [vmem:[%s9237_s29 + $0x10e0] sm:$0xff] %v3228_v54  ;;  %v3308_v10 = vadd.f32 %v10945_v40, %v13957_v6  ;;  %v3309_v27 = vadd.f32 %v10945_v40, %v13958_v19  ;;  %v13959_v63 = vld [vmem:[#allocation568_spill] sm:$0xff]  ;;  %v13960_v54 = vld [vmem:[#allocation569_spill] sm:$0xff] }
 0x3b1   : > { %4253 = vst [vmem:[%s9237_s29 + $0x10e8] sm:$0xff] %v3229_v5  ;;  %4254 = vst [vmem:[%s9237_s29 + $0x10f0] sm:$0xff] %v3230_v17  ;;  %v3310_v49 = vadd.f32 %v10945_v40, %v13959_v63  ;;  %v3311_v55 = vadd.f32 %v10945_v40, %v13960_v54  ;;  %v13961_v5 = vld [vmem:[#allocation570_spill] sm:$0xff]  ;;  %v13962_v17 = vld [vmem:[#allocation571_spill] sm:$0xff] }
 0x3b2   : > { %4255 = vst [vmem:[%s9237_s29 + $0x10f8] sm:$0xff] %v3231_v26  ;;  %4320 = vst [vmem:[%s9237_s29 + $0x1300] sm:$0xff] %v3296_v45  ;;  %v3312_v24 = vadd.f32 %v10945_v40, %v13961_v5  ;;  %v3313_v2 = vadd.f32 %v10945_v40, %v13962_v17  ;;  %v13963_v26 = vld [vmem:[#allocation572_spill] sm:$0xff]  ;;  %v13964_v45 = vld [vmem:[#allocation573_spill] sm:$0xff] }
 0x3b3   : > { %4321 = vst [vmem:[%s9237_s29 + $0x1308] sm:$0xff] %v3297_v3  ;;  %4322 = vst [vmem:[%s9237_s29 + $0x1310] sm:$0xff] %v3298_v62  ;;  %v3314_v22 = vadd.f32 %v10945_v40, %v13963_v26  ;;  %v3315_v53 = vadd.f32 %v10945_v40, %v13964_v45  ;;  %v13965_v3 = vld [vmem:[#allocation574_spill] sm:$0xff]  ;;  %v13966_v62 = vld [vmem:[#allocation575_spill] sm:$0xff] }
 0x3b4   : > { %4323 = vst [vmem:[%s9237_s29 + $0x1318] sm:$0xff] %v3299_v30  ;;  %4324 = vst [vmem:[%s9237_s29 + $0x1320] sm:$0xff] %v3300_v37  ;;  %v3316_v34 = vadd.f32 %v10945_v40, %v13965_v3  ;;  %v3317_v47 = vadd.f32 %v10945_v40, %v13966_v62  ;;  %v13967_v30 = vld [vmem:[#allocation576_spill] sm:$0xff]  ;;  %v13968_v37 = vld [vmem:[#allocation577_spill] sm:$0xff] }
 0x3b5   : > { %4325 = vst [vmem:[%s9237_s29 + $0x1328] sm:$0xff] %v3301_v28  ;;  %4326 = vst [vmem:[%s9237_s29 + $0x1330] sm:$0xff] %v3302_v57  ;;  %v3318_v25 = vadd.f32 %v10945_v40, %v13967_v30  ;;  %v3319_v43 = vadd.f32 %v10945_v40, %v13968_v37  ;;  %v11043_v28 = vpop.permute.xlu0 %2620  ;;  %v13969_v4 = vld [vmem:[#allocation578_spill] sm:$0xff]  ;;  %v13970_v7 = vld [vmem:[#allocation579_spill] sm:$0xff] }
 0x3b6   : > { %4327 = vst [vmem:[%s9237_s29 + $0x1338] sm:$0xff] %v3303_v46  ;;  %4328 = vst [vmem:[%s9237_s29 + $0x1340] sm:$0xff] %v3304_v1  ;;  %v3320_v57 = vadd.f32 %v10945_v40, %v13969_v4  ;;  %v3321_v46 = vadd.f32 %v10945_v40, %v13970_v7  ;;  %v13971_v42 = vld [vmem:[#allocation580_spill] sm:$0xff]  ;;  %v13972_v16 = vld [vmem:[#allocation581_spill] sm:$0xff] }
 0x3b7   : > { %4329 = vst [vmem:[%s9237_s29 + $0x1348] sm:$0xff] %v3305_v23  ;;  %4330 = vst [vmem:[%s9237_s29 + $0x1350] sm:$0xff] %v3306_v29  ;;  %v3322_v1 = vadd.f32 %v10945_v40, %v13971_v42  ;;  %v3323_v23 = vadd.f32 %v10945_v40, %v13972_v16  ;;  %v13973_v58 = vld [vmem:[#allocation582_spill] sm:$0xff]  ;;  %v13974_v56 = vld [vmem:[#allocation583_spill] sm:$0xff] }
 0x3b8   : > { %4331 = vst [vmem:[%s9237_s29 + $0x1358] sm:$0xff] %v3307_v15  ;;  %4332 = vst [vmem:[%s9237_s29 + $0x1360] sm:$0xff] %v3308_v10  ;;  %v3324_v29 = vadd.f32 %v10945_v40, %v13973_v58  ;;  %v3325_v15 = vadd.f32 %v10945_v40, %v13974_v56  ;;  %v13975_v6 = vld [vmem:[#allocation584_spill] sm:$0xff]  ;;  %v13976_v19 = vld [vmem:[#allocation585_spill] sm:$0xff] }
 0x3b9   : > { %4333 = vst [vmem:[%s9237_s29 + $0x1368] sm:$0xff] %v3309_v27  ;;  %4334 = vst [vmem:[%s9237_s29 + $0x1370] sm:$0xff] %v3310_v49  ;;  %v3326_v10 = vadd.f32 %v10945_v40, %v13975_v6  ;;  %v3327_v27 = vadd.f32 %v10945_v40, %v13976_v19  ;;  %v13977_v63 = vld [vmem:[#allocation586_spill] sm:$0xff]  ;;  %v13978_v54 = vld [vmem:[#allocation587_spill] sm:$0xff] }
 0x3ba   : > { %4335 = vst [vmem:[%s9237_s29 + $0x1378] sm:$0xff] %v3311_v55  ;;  %4336 = vst [vmem:[%s9237_s29 + $0x1380] sm:$0xff] %v3312_v24  ;;  %v3264_v49 = vadd.f32 %v11043_v28, %v13977_v63  ;;  %v3265_v55 = vadd.f32 %v11043_v28, %v13978_v54  ;;  %v13979_v5 = vld [vmem:[#allocation588_spill] sm:$0xff]  ;;  %v13980_v24 = vld [vmem:[#allocation589_spill] sm:$0xff] }
 0x3bb   : > { %4337 = vst [vmem:[%s9237_s29 + $0x1388] sm:$0xff] %v3313_v2  ;;  %4338 = vst [vmem:[%s9237_s29 + $0x1390] sm:$0xff] %v3314_v22  ;;  %v3266_v40 = vadd.f32 %v11043_v28, %v13979_v5  ;;  %v3267_v17 = vadd.f32 %v11043_v28, %v13980_v24  ;;  %v13981_v2 = vld [vmem:[#allocation590_spill] sm:$0xff]  ;;  %v13982_v22 = vld [vmem:[#allocation591_spill] sm:$0xff] }
 0x3bc   : > { %4339 = vst [vmem:[%s9237_s29 + $0x1398] sm:$0xff] %v3315_v53  ;;  %4340 = vst [vmem:[%s9237_s29 + $0x13a0] sm:$0xff] %v3316_v34  ;;  %v3268_v26 = vadd.f32 %v11043_v28, %v13981_v2  ;;  %v3269_v45 = vadd.f32 %v11043_v28, %v13982_v22  ;;  %v13983_v53 = vld [vmem:[#allocation592_spill] sm:$0xff]  ;;  %v13984_v34 = vld [vmem:[#allocation593_spill] sm:$0xff] }
 0x3bd   : > { %4341 = vst [vmem:[%s9237_s29 + $0x13a8] sm:$0xff] %v3317_v47  ;;  %4342 = vst [vmem:[%s9237_s29 + $0x13b0] sm:$0xff] %v3318_v25  ;;  %v3270_v3 = vadd.f32 %v11043_v28, %v13983_v53  ;;  %v3271_v62 = vadd.f32 %v11043_v28, %v13984_v34  ;;  %v13985_v47 = vld [vmem:[#allocation594_spill] sm:$0xff]  ;;  %v13986_v25 = vld [vmem:[#allocation595_spill] sm:$0xff] }
 0x3be   : > { %4343 = vst [vmem:[%s9237_s29 + $0x13b8] sm:$0xff] %v3319_v43  ;;  %4344 = vst [vmem:[%s9237_s29 + $0x13c0] sm:$0xff] %v3320_v57  ;;  %v3272_v30 = vadd.f32 %v11043_v28, %v13985_v47  ;;  %v3273_v37 = vadd.f32 %v11043_v28, %v13986_v25  ;;  %v13987_v43 = vld [vmem:[#allocation596_spill] sm:$0xff]  ;;  %v13988_v57 = vld [vmem:[#allocation597_spill] sm:$0xff] }
 0x3bf   : > { %4345 = vst [vmem:[%s9237_s29 + $0x13c8] sm:$0xff] %v3321_v46  ;;  %4346 = vst [vmem:[%s9237_s29 + $0x13d0] sm:$0xff] %v3322_v1  ;;  %v3274_v4 = vadd.f32 %v11043_v28, %v13987_v43  ;;  %v3275_v7 = vadd.f32 %v11043_v28, %v13988_v57  ;;  %v13989_v46 = vld [vmem:[#allocation598_spill] sm:$0xff]  ;;  %v13990_v1 = vld [vmem:[#allocation599_spill] sm:$0xff] }
 0x3c0   : > { %4347 = vst [vmem:[%s9237_s29 + $0x13d8] sm:$0xff] %v3323_v23  ;;  %4348 = vst [vmem:[%s9237_s29 + $0x13e0] sm:$0xff] %v3324_v29  ;;  %v3276_v42 = vadd.f32 %v11043_v28, %v13989_v46  ;;  %v3277_v16 = vadd.f32 %v11043_v28, %v13990_v1  ;;  %v13991_v23 = vld [vmem:[#allocation600_spill] sm:$0xff]  ;;  %v13992_v29 = vld [vmem:[#allocation601_spill] sm:$0xff] }
 0x3c1   : > { %4349 = vst [vmem:[%s9237_s29 + $0x13e8] sm:$0xff] %v3325_v15  ;;  %4350 = vst [vmem:[%s9237_s29 + $0x13f0] sm:$0xff] %v3326_v10  ;;  %v3278_v58 = vadd.f32 %v11043_v28, %v13991_v23  ;;  %v3279_v56 = vadd.f32 %v11043_v28, %v13992_v29  ;;  %v13993_v15 = vld [vmem:[#allocation602_spill] sm:$0xff]  ;;  %v13994_v10 = vld [vmem:[#allocation603_spill] sm:$0xff] }
 0x3c2   : > { %4351 = vst [vmem:[%s9237_s29 + $0x13f8] sm:$0xff] %v3327_v27  ;;  %4288 = vst [vmem:[%s9237_s29 + $0x1200] sm:$0xff] %v3264_v49  ;;  %v3280_v6 = vadd.f32 %v11043_v28, %v13993_v15  ;;  %v3281_v19 = vadd.f32 %v11043_v28, %v13994_v10  ;;  %v13995_v27 = vld [vmem:[#allocation604_spill] sm:$0xff]  ;;  %v13996_v49 = vld [vmem:[#allocation605_spill] sm:$0xff] }
 0x3c3   : > { %4289 = vst [vmem:[%s9237_s29 + $0x1208] sm:$0xff] %v3265_v55  ;;  %4290 = vst [vmem:[%s9237_s29 + $0x1210] sm:$0xff] %v3266_v40  ;;  %v3282_v63 = vadd.f32 %v11043_v28, %v13995_v27  ;;  %v3283_v54 = vadd.f32 %v11043_v28, %v13996_v49  ;;  %v13997_v55 = vld [vmem:[#allocation606_spill] sm:$0xff]  ;;  %v13998_v40 = vld [vmem:[#allocation607_spill] sm:$0xff] }
 0x3c4   : > { %4291 = vst [vmem:[%s9237_s29 + $0x1218] sm:$0xff] %v3267_v17  ;;  %4292 = vst [vmem:[%s9237_s29 + $0x1220] sm:$0xff] %v3268_v26  ;;  %v3284_v5 = vadd.f32 %v11043_v28, %v13997_v55  ;;  %v3285_v24 = vadd.f32 %v11043_v28, %v13998_v40  ;;  %v13999_v17 = vld [vmem:[#allocation608_spill] sm:$0xff]  ;;  %v14000_v26 = vld [vmem:[#allocation609_spill] sm:$0xff] }
 0x3c5   : > { %4293 = vst [vmem:[%s9237_s29 + $0x1228] sm:$0xff] %v3269_v45  ;;  %4294 = vst [vmem:[%s9237_s29 + $0x1230] sm:$0xff] %v3270_v3  ;;  %v3286_v2 = vadd.f32 %v11043_v28, %v13999_v17  ;;  %v3287_v22 = vadd.f32 %v11043_v28, %v14000_v26  ;;  %v11141_v45 = vpop.permute.xlu1 %2635  ;;  %v14001_v53 = vld [vmem:[#allocation610_spill] sm:$0xff]  ;;  %v14002_v34 = vld [vmem:[#allocation611_spill] sm:$0xff] }
 0x3c6   : > { %4295 = vst [vmem:[%s9237_s29 + $0x1238] sm:$0xff] %v3271_v62  ;;  %4296 = vst [vmem:[%s9237_s29 + $0x1240] sm:$0xff] %v3272_v30  ;;  %v3288_v3 = vadd.f32 %v11043_v28, %v14001_v53  ;;  %v3289_v62 = vadd.f32 %v11043_v28, %v14002_v34  ;;  %v14003_v47 = vld [vmem:[#allocation612_spill] sm:$0xff]  ;;  %v14004_v25 = vld [vmem:[#allocation613_spill] sm:$0xff] }
 0x3c7   : > { %4297 = vst [vmem:[%s9237_s29 + $0x1248] sm:$0xff] %v3273_v37  ;;  %4298 = vst [vmem:[%s9237_s29 + $0x1250] sm:$0xff] %v3274_v4  ;;  %v3290_v30 = vadd.f32 %v11043_v28, %v14003_v47  ;;  %v3291_v37 = vadd.f32 %v11043_v28, %v14004_v25  ;;  %v14005_v43 = vld [vmem:[#allocation614_spill] sm:$0xff]  ;;  %v14006_v57 = vld [vmem:[#allocation615_spill] sm:$0xff] }
 0x3c8   : > { %4299 = vst [vmem:[%s9237_s29 + $0x1258] sm:$0xff] %v3275_v7  ;;  %4300 = vst [vmem:[%s9237_s29 + $0x1260] sm:$0xff] %v3276_v42  ;;  %v3292_v4 = vadd.f32 %v11043_v28, %v14005_v43  ;;  %v3293_v7 = vadd.f32 %v11043_v28, %v14006_v57  ;;  %v14007_v46 = vld [vmem:[#allocation616_spill] sm:$0xff]  ;;  %v14008_v1 = vld [vmem:[#allocation617_spill] sm:$0xff] }
 0x3c9   : > { %4301 = vst [vmem:[%s9237_s29 + $0x1268] sm:$0xff] %v3277_v16  ;;  %4302 = vst [vmem:[%s9237_s29 + $0x1270] sm:$0xff] %v3278_v58  ;;  %v3294_v42 = vadd.f32 %v11043_v28, %v14007_v46  ;;  %v3295_v16 = vadd.f32 %v11043_v28, %v14008_v1  ;;  %v14009_v23 = vld [vmem:[#allocation618_spill] sm:$0xff]  ;;  %v14010_v29 = vld [vmem:[#allocation619_spill] sm:$0xff] }
 0x3ca   : > { %4303 = vst [vmem:[%s9237_s29 + $0x1278] sm:$0xff] %v3279_v56  ;;  %4304 = vst [vmem:[%s9237_s29 + $0x1280] sm:$0xff] %v3280_v6  ;;  %v3360_v58 = vadd.f32 %v11141_v45, %v14009_v23  ;;  %v3361_v56 = vadd.f32 %v11141_v45, %v14010_v29  ;;  %v14011_v15 = vld [vmem:[#allocation620_spill] sm:$0xff]  ;;  %v14012_v6 = vld [vmem:[#allocation621_spill] sm:$0xff] }
 0x3cb   : > { %4305 = vst [vmem:[%s9237_s29 + $0x1288] sm:$0xff] %v3281_v19  ;;  %4306 = vst [vmem:[%s9237_s29 + $0x1290] sm:$0xff] %v3282_v63  ;;  %v3362_v28 = vadd.f32 %v11141_v45, %v14011_v15  ;;  %v3363_v10 = vadd.f32 %v11141_v45, %v14012_v6  ;;  %v14013_v19 = vld [vmem:[#allocation622_spill] sm:$0xff]  ;;  %v14014_v63 = vld [vmem:[#allocation623_spill] sm:$0xff] }
 0x3cc   : > { %4307 = vst [vmem:[%s9237_s29 + $0x1298] sm:$0xff] %v3283_v54  ;;  %4308 = vst [vmem:[%s9237_s29 + $0x12a0] sm:$0xff] %v3284_v5  ;;  %v3364_v27 = vadd.f32 %v11141_v45, %v14013_v19  ;;  %v3365_v49 = vadd.f32 %v11141_v45, %v14014_v63  ;;  %v14015_v54 = vld [vmem:[#allocation624_spill] sm:$0xff]  ;;  %v14016_v5 = vld [vmem:[#allocation625_spill] sm:$0xff] }
 0x3cd   : > { %4309 = vst [vmem:[%s9237_s29 + $0x12a8] sm:$0xff] %v3285_v24  ;;  %4310 = vst [vmem:[%s9237_s29 + $0x12b0] sm:$0xff] %v3286_v2  ;;  %v3366_v55 = vadd.f32 %v11141_v45, %v14015_v54  ;;  %v3367_v40 = vadd.f32 %v11141_v45, %v14016_v5  ;;  %v14017_v24 = vld [vmem:[#allocation626_spill] sm:$0xff]  ;;  %v14018_v2 = vld [vmem:[#allocation627_spill] sm:$0xff] }
 0x3ce   : > { %4311 = vst [vmem:[%s9237_s29 + $0x12b8] sm:$0xff] %v3287_v22  ;;  %4312 = vst [vmem:[%s9237_s29 + $0x12c0] sm:$0xff] %v3288_v3  ;;  %v3368_v17 = vadd.f32 %v11141_v45, %v14017_v24  ;;  %v3369_v26 = vadd.f32 %v11141_v45, %v14018_v2  ;;  %v14019_v22 = vld [vmem:[#allocation628_spill] sm:$0xff]  ;;  %v14020_v3 = vld [vmem:[#allocation629_spill] sm:$0xff] }
 0x3cf   : > { %4313 = vst [vmem:[%s9237_s29 + $0x12c8] sm:$0xff] %v3289_v62  ;;  %4314 = vst [vmem:[%s9237_s29 + $0x12d0] sm:$0xff] %v3290_v30  ;;  %v3370_v53 = vadd.f32 %v11141_v45, %v14019_v22  ;;  %v3371_v34 = vadd.f32 %v11141_v45, %v14020_v3  ;;  %v14021_v62 = vld [vmem:[#allocation630_spill] sm:$0xff]  ;;  %v14022_v30 = vld [vmem:[#allocation631_spill] sm:$0xff] }
 0x3d0   : > { %4315 = vst [vmem:[%s9237_s29 + $0x12d8] sm:$0xff] %v3291_v37  ;;  %4316 = vst [vmem:[%s9237_s29 + $0x12e0] sm:$0xff] %v3292_v4  ;;  %v3372_v47 = vadd.f32 %v11141_v45, %v14021_v62  ;;  %v3373_v25 = vadd.f32 %v11141_v45, %v14022_v30  ;;  %v14023_v37 = vld [vmem:[#allocation632_spill] sm:$0xff]  ;;  %v14024_v4 = vld [vmem:[#allocation633_spill] sm:$0xff] }
 0x3d1   : > { %4317 = vst [vmem:[%s9237_s29 + $0x12e8] sm:$0xff] %v3293_v7  ;;  %4318 = vst [vmem:[%s9237_s29 + $0x12f0] sm:$0xff] %v3294_v42  ;;  %v3374_v43 = vadd.f32 %v11141_v45, %v14023_v37  ;;  %v3375_v57 = vadd.f32 %v11141_v45, %v14024_v4  ;;  %v14025_v7 = vld [vmem:[#allocation634_spill] sm:$0xff]  ;;  %v14026_v42 = vld [vmem:[#allocation635_spill] sm:$0xff] }
 0x3d2   : > { %4319 = vst [vmem:[%s9237_s29 + $0x12f8] sm:$0xff] %v3295_v16  ;;  %4384 = vst [vmem:[%s9237_s29 + $0x1500] sm:$0xff] %v3360_v58  ;;  %v3376_v46 = vadd.f32 %v11141_v45, %v14025_v7  ;;  %v3377_v1 = vadd.f32 %v11141_v45, %v14026_v42  ;;  %v14027_v16 = vld [vmem:[#allocation636_spill] sm:$0xff]  ;;  %v14028_v58 = vld [vmem:[#allocation637_spill] sm:$0xff] }
 0x3d3   : > { %4385 = vst [vmem:[%s9237_s29 + $0x1508] sm:$0xff] %v3361_v56  ;;  %4386 = vst [vmem:[%s9237_s29 + $0x1510] sm:$0xff] %v3362_v28  ;;  %v3378_v23 = vadd.f32 %v11141_v45, %v14027_v16  ;;  %v3379_v29 = vadd.f32 %v11141_v45, %v14028_v58  ;;  %v14029_v56 = vld [vmem:[#allocation638_spill] sm:$0xff]  ;;  %v14030_v28 = vld [vmem:[#allocation639_spill] sm:$0xff] }
 0x3d4   : > { %4387 = vst [vmem:[%s9237_s29 + $0x1518] sm:$0xff] %v3363_v10  ;;  %4388 = vst [vmem:[%s9237_s29 + $0x1520] sm:$0xff] %v3364_v27  ;;  %v3380_v15 = vadd.f32 %v11141_v45, %v14029_v56  ;;  %v3381_v6 = vadd.f32 %v11141_v45, %v14030_v28  ;;  %v14031_v10 = vld [vmem:[#allocation640_spill] sm:$0xff]  ;;  %v14032_v27 = vld [vmem:[#allocation641_spill] sm:$0xff] }
 0x3d5   : > { %4389 = vst [vmem:[%s9237_s29 + $0x1528] sm:$0xff] %v3365_v49  ;;  %4390 = vst [vmem:[%s9237_s29 + $0x1530] sm:$0xff] %v3366_v55  ;;  %v3382_v19 = vadd.f32 %v11141_v45, %v14031_v10  ;;  %v3383_v63 = vadd.f32 %v11141_v45, %v14032_v27  ;;  %v11239_v49 = vpop.permute.xlu0 %2630  ;;  %v14033_v54 = vld [vmem:[#allocation642_spill] sm:$0xff]  ;;  %v14034_v5 = vld [vmem:[#allocation643_spill] sm:$0xff] }
 0x3d6   : > { %4391 = vst [vmem:[%s9237_s29 + $0x1538] sm:$0xff] %v3367_v40  ;;  %4392 = vst [vmem:[%s9237_s29 + $0x1540] sm:$0xff] %v3368_v17  ;;  %v3384_v55 = vadd.f32 %v11141_v45, %v14033_v54  ;;  %v3385_v40 = vadd.f32 %v11141_v45, %v14034_v5  ;;  %v14035_v24 = vld [vmem:[#allocation644_spill] sm:$0xff]  ;;  %v14036_v2 = vld [vmem:[#allocation645_spill] sm:$0xff] }
 0x3d7   : > { %4393 = vst [vmem:[%s9237_s29 + $0x1548] sm:$0xff] %v3369_v26  ;;  %4394 = vst [vmem:[%s9237_s29 + $0x1550] sm:$0xff] %v3370_v53  ;;  %v3386_v17 = vadd.f32 %v11141_v45, %v14035_v24  ;;  %v3387_v26 = vadd.f32 %v11141_v45, %v14036_v2  ;;  %v14037_v22 = vld [vmem:[#allocation646_spill] sm:$0xff]  ;;  %v14038_v3 = vld [vmem:[#allocation647_spill] sm:$0xff] }
 0x3d8   : > { %4395 = vst [vmem:[%s9237_s29 + $0x1558] sm:$0xff] %v3371_v34  ;;  %4396 = vst [vmem:[%s9237_s29 + $0x1560] sm:$0xff] %v3372_v47  ;;  %v3388_v53 = vadd.f32 %v11141_v45, %v14037_v22  ;;  %v3389_v34 = vadd.f32 %v11141_v45, %v14038_v3  ;;  %v14039_v62 = vld [vmem:[#allocation648_spill] sm:$0xff]  ;;  %v14040_v30 = vld [vmem:[#allocation649_spill] sm:$0xff] }
 0x3d9   : > { %4397 = vst [vmem:[%s9237_s29 + $0x1568] sm:$0xff] %v3373_v25  ;;  %4398 = vst [vmem:[%s9237_s29 + $0x1570] sm:$0xff] %v3374_v43  ;;  %v3390_v47 = vadd.f32 %v11141_v45, %v14039_v62  ;;  %v3391_v25 = vadd.f32 %v11141_v45, %v14040_v30  ;;  %v14041_v37 = vld [vmem:[#allocation650_spill] sm:$0xff]  ;;  %v14042_v4 = vld [vmem:[#allocation651_spill] sm:$0xff] }
 0x3da   : > { %4399 = vst [vmem:[%s9237_s29 + $0x1578] sm:$0xff] %v3375_v57  ;;  %4400 = vst [vmem:[%s9237_s29 + $0x1580] sm:$0xff] %v3376_v46  ;;  %v3328_v43 = vadd.f32 %v11239_v49, %v14041_v37  ;;  %v3329_v57 = vadd.f32 %v11239_v49, %v14042_v4  ;;  %v14043_v7 = vld [vmem:[#allocation652_spill] sm:$0xff]  ;;  %v14044_v46 = vld [vmem:[#allocation653_spill] sm:$0xff] }
 0x3db   : > { %4401 = vst [vmem:[%s9237_s29 + $0x1588] sm:$0xff] %v3377_v1  ;;  %4402 = vst [vmem:[%s9237_s29 + $0x1590] sm:$0xff] %v3378_v23  ;;  %v3330_v45 = vadd.f32 %v11239_v49, %v14043_v7  ;;  %v3331_v42 = vadd.f32 %v11239_v49, %v14044_v46  ;;  %v14045_v1 = vld [vmem:[#allocation654_spill] sm:$0xff]  ;;  %v14046_v23 = vld [vmem:[#allocation655_spill] sm:$0xff] }
 0x3dc   : > { %4403 = vst [vmem:[%s9237_s29 + $0x1598] sm:$0xff] %v3379_v29  ;;  %4404 = vst [vmem:[%s9237_s29 + $0x15a0] sm:$0xff] %v3380_v15  ;;  %v3332_v16 = vadd.f32 %v11239_v49, %v14045_v1  ;;  %v3333_v58 = vadd.f32 %v11239_v49, %v14046_v23  ;;  %v14047_v29 = vld [vmem:[#allocation656_spill] sm:$0xff]  ;;  %v14048_v15 = vld [vmem:[#allocation657_spill] sm:$0xff] }
 0x3dd   : > { %4405 = vst [vmem:[%s9237_s29 + $0x15a8] sm:$0xff] %v3381_v6  ;;  %4406 = vst [vmem:[%s9237_s29 + $0x15b0] sm:$0xff] %v3382_v19  ;;  %v3334_v56 = vadd.f32 %v11239_v49, %v14047_v29  ;;  %v3335_v28 = vadd.f32 %v11239_v49, %v14048_v15  ;;  %v14049_v6 = vld [vmem:[#allocation658_spill] sm:$0xff]  ;;  %v14050_v19 = vld [vmem:[#allocation659_spill] sm:$0xff] }
 0x3de   : > { %4407 = vst [vmem:[%s9237_s29 + $0x15b8] sm:$0xff] %v3383_v63  ;;  %4408 = vst [vmem:[%s9237_s29 + $0x15c0] sm:$0xff] %v3384_v55  ;;  %v3336_v10 = vadd.f32 %v11239_v49, %v14049_v6  ;;  %v3337_v27 = vadd.f32 %v11239_v49, %v14050_v19  ;;  %v14051_v63 = vld [vmem:[#allocation660_spill] sm:$0xff]  ;;  %v14052_v55 = vld [vmem:[#allocation661_spill] sm:$0xff] }
 0x3df   : > { %4409 = vst [vmem:[%s9237_s29 + $0x15c8] sm:$0xff] %v3385_v40  ;;  %4410 = vst [vmem:[%s9237_s29 + $0x15d0] sm:$0xff] %v3386_v17  ;;  %v3338_v54 = vadd.f32 %v11239_v49, %v14051_v63  ;;  %v3339_v5 = vadd.f32 %v11239_v49, %v14052_v55  ;;  %v14053_v40 = vld [vmem:[#allocation662_spill] sm:$0xff]  ;;  %v14054_v17 = vld [vmem:[#allocation663_spill] sm:$0xff] }
 0x3e0   : > { %4411 = vst [vmem:[%s9237_s29 + $0x15d8] sm:$0xff] %v3387_v26  ;;  %4412 = vst [vmem:[%s9237_s29 + $0x15e0] sm:$0xff] %v3388_v53  ;;  %v3340_v24 = vadd.f32 %v11239_v49, %v14053_v40  ;;  %v3341_v2 = vadd.f32 %v11239_v49, %v14054_v17  ;;  %v14055_v26 = vld [vmem:[#allocation664_spill] sm:$0xff]  ;;  %v14056_v53 = vld [vmem:[#allocation665_spill] sm:$0xff] }
 0x3e1   : > { %4413 = vst [vmem:[%s9237_s29 + $0x15e8] sm:$0xff] %v3389_v34  ;;  %4414 = vst [vmem:[%s9237_s29 + $0x15f0] sm:$0xff] %v3390_v47  ;;  %v3342_v22 = vadd.f32 %v11239_v49, %v14055_v26  ;;  %v3343_v3 = vadd.f32 %v11239_v49, %v14056_v53  ;;  %v14057_v34 = vld [vmem:[#allocation666_spill] sm:$0xff]  ;;  %v14058_v47 = vld [vmem:[#allocation667_spill] sm:$0xff] }
 0x3e2   : > { %4415 = vst [vmem:[%s9237_s29 + $0x15f8] sm:$0xff] %v3391_v25  ;;  %4352 = vst [vmem:[%s9237_s29 + $0x1400] sm:$0xff] %v3328_v43  ;;  %v3344_v62 = vadd.f32 %v11239_v49, %v14057_v34  ;;  %v3345_v30 = vadd.f32 %v11239_v49, %v14058_v47  ;;  %v14059_v25 = vld [vmem:[#allocation668_spill] sm:$0xff]  ;;  %v14060_v43 = vld [vmem:[#allocation669_spill] sm:$0xff] }
 0x3e3   : > { %4353 = vst [vmem:[%s9237_s29 + $0x1408] sm:$0xff] %v3329_v57  ;;  %4354 = vst [vmem:[%s9237_s29 + $0x1410] sm:$0xff] %v3330_v45  ;;  %v3346_v37 = vadd.f32 %v11239_v49, %v14059_v25  ;;  %v3347_v4 = vadd.f32 %v11239_v49, %v14060_v43  ;;  %v14061_v57 = vld [vmem:[#allocation670_spill] sm:$0xff]  ;;  %v14062_v45 = vld [vmem:[#allocation671_spill] sm:$0xff] }
 0x3e4   : > { %4355 = vst [vmem:[%s9237_s29 + $0x1418] sm:$0xff] %v3331_v42  ;;  %4356 = vst [vmem:[%s9237_s29 + $0x1420] sm:$0xff] %v3332_v16  ;;  %v3348_v7 = vadd.f32 %v11239_v49, %v14061_v57  ;;  %v3349_v46 = vadd.f32 %v11239_v49, %v14062_v45  ;;  %v14063_v42 = vld [vmem:[#allocation672_spill] sm:$0xff]  ;;  %v14064_v16 = vld [vmem:[#allocation673_spill] sm:$0xff] }
 0x3e5   : > { %4357 = vst [vmem:[%s9237_s29 + $0x1428] sm:$0xff] %v3333_v58  ;;  %4358 = vst [vmem:[%s9237_s29 + $0x1430] sm:$0xff] %v3334_v56  ;;  %v3350_v1 = vadd.f32 %v11239_v49, %v14063_v42  ;;  %v3351_v23 = vadd.f32 %v11239_v49, %v14064_v16  ;;  %v11337_v58 = vpop.permute.xlu1 %2645  ;;  %v14065_v29 = vld [vmem:[#allocation674_spill] sm:$0xff]  ;;  %v14066_v15 = vld [vmem:[#allocation675_spill] sm:$0xff] }
 0x3e6   : > { %4359 = vst [vmem:[%s9237_s29 + $0x1438] sm:$0xff] %v3335_v28  ;;  %4360 = vst [vmem:[%s9237_s29 + $0x1440] sm:$0xff] %v3336_v10  ;;  %v3352_v56 = vadd.f32 %v11239_v49, %v14065_v29  ;;  %v3353_v28 = vadd.f32 %v11239_v49, %v14066_v15  ;;  %v14067_v6 = vld [vmem:[#allocation676_spill] sm:$0xff]  ;;  %v14068_v19 = vld [vmem:[#allocation677_spill] sm:$0xff] }
 0x3e7   : > { %4361 = vst [vmem:[%s9237_s29 + $0x1448] sm:$0xff] %v3337_v27  ;;  %4362 = vst [vmem:[%s9237_s29 + $0x1450] sm:$0xff] %v3338_v54  ;;  %v3354_v10 = vadd.f32 %v11239_v49, %v14067_v6  ;;  %v3355_v27 = vadd.f32 %v11239_v49, %v14068_v19  ;;  %v14069_v63 = vld [vmem:[#allocation678_spill] sm:$0xff]  ;;  %v14070_v55 = vld [vmem:[#allocation679_spill] sm:$0xff] }
 0x3e8   : > { %4363 = vst [vmem:[%s9237_s29 + $0x1458] sm:$0xff] %v3339_v5  ;;  %4364 = vst [vmem:[%s9237_s29 + $0x1460] sm:$0xff] %v3340_v24  ;;  %v3356_v54 = vadd.f32 %v11239_v49, %v14069_v63  ;;  %v3357_v5 = vadd.f32 %v11239_v49, %v14070_v55  ;;  %v14071_v40 = vld [vmem:[#allocation680_spill] sm:$0xff]  ;;  %v14072_v17 = vld [vmem:[#allocation681_spill] sm:$0xff] }
 0x3e9   : > { %4365 = vst [vmem:[%s9237_s29 + $0x1468] sm:$0xff] %v3341_v2  ;;  %4366 = vst [vmem:[%s9237_s29 + $0x1470] sm:$0xff] %v3342_v22  ;;  %v3358_v24 = vadd.f32 %v11239_v49, %v14071_v40  ;;  %v3359_v2 = vadd.f32 %v11239_v49, %v14072_v17  ;;  %v14073_v26 = vld [vmem:[#allocation682_spill] sm:$0xff]  ;;  %v14074_v53 = vld [vmem:[#allocation683_spill] sm:$0xff] }
 0x3ea   : > { %4367 = vst [vmem:[%s9237_s29 + $0x1478] sm:$0xff] %v3343_v3  ;;  %4368 = vst [vmem:[%s9237_s29 + $0x1480] sm:$0xff] %v3344_v62  ;;  %v3424_v22 = vadd.f32 %v11337_v58, %v14073_v26  ;;  %v3425_v3 = vadd.f32 %v11337_v58, %v14074_v53  ;;  %v14075_v34 = vld [vmem:[#allocation684_spill] sm:$0xff]  ;;  %v14076_v62 = vld [vmem:[#allocation685_spill] sm:$0xff] }
 0x3eb   : > { %4369 = vst [vmem:[%s9237_s29 + $0x1488] sm:$0xff] %v3345_v30  ;;  %4370 = vst [vmem:[%s9237_s29 + $0x1490] sm:$0xff] %v3346_v37  ;;  %v3426_v49 = vadd.f32 %v11337_v58, %v14075_v34  ;;  %v3427_v47 = vadd.f32 %v11337_v58, %v14076_v62  ;;  %v14077_v30 = vld [vmem:[#allocation686_spill] sm:$0xff]  ;;  %v14078_v37 = vld [vmem:[#allocation687_spill] sm:$0xff] }
 0x3ec   : > { %4371 = vst [vmem:[%s9237_s29 + $0x1498] sm:$0xff] %v3347_v4  ;;  %4372 = vst [vmem:[%s9237_s29 + $0x14a0] sm:$0xff] %v3348_v7  ;;  %v3428_v25 = vadd.f32 %v11337_v58, %v14077_v30  ;;  %v3429_v43 = vadd.f32 %v11337_v58, %v14078_v37  ;;  %v14079_v4 = vld [vmem:[#allocation688_spill] sm:$0xff]  ;;  %v14080_v7 = vld [vmem:[#allocation689_spill] sm:$0xff] }
 0x3ed   : > { %4373 = vst [vmem:[%s9237_s29 + $0x14a8] sm:$0xff] %v3349_v46  ;;  %4374 = vst [vmem:[%s9237_s29 + $0x14b0] sm:$0xff] %v3350_v1  ;;  %v3430_v57 = vadd.f32 %v11337_v58, %v14079_v4  ;;  %v3431_v45 = vadd.f32 %v11337_v58, %v14080_v7  ;;  %v14081_v46 = vld [vmem:[#allocation690_spill] sm:$0xff]  ;;  %v14082_v1 = vld [vmem:[#allocation691_spill] sm:$0xff] }
 0x3ee   : > { %4375 = vst [vmem:[%s9237_s29 + $0x14b8] sm:$0xff] %v3351_v23  ;;  %4376 = vst [vmem:[%s9237_s29 + $0x14c0] sm:$0xff] %v3352_v56  ;;  %v3432_v42 = vadd.f32 %v11337_v58, %v14081_v46  ;;  %v3433_v16 = vadd.f32 %v11337_v58, %v14082_v1  ;;  %v14083_v23 = vld [vmem:[#allocation692_spill] sm:$0xff]  ;;  %v14084_v56 = vld [vmem:[#allocation693_spill] sm:$0xff] }
 0x3ef   : > { %4377 = vst [vmem:[%s9237_s29 + $0x14c8] sm:$0xff] %v3353_v28  ;;  %4378 = vst [vmem:[%s9237_s29 + $0x14d0] sm:$0xff] %v3354_v10  ;;  %v3434_v29 = vadd.f32 %v11337_v58, %v14083_v23  ;;  %v3435_v15 = vadd.f32 %v11337_v58, %v14084_v56  ;;  %v14085_v28 = vld [vmem:[#allocation694_spill] sm:$0xff]  ;;  %v14086_v10 = vld [vmem:[#allocation695_spill] sm:$0xff] }
 0x3f0   : > { %4379 = vst [vmem:[%s9237_s29 + $0x14d8] sm:$0xff] %v3355_v27  ;;  %4380 = vst [vmem:[%s9237_s29 + $0x14e0] sm:$0xff] %v3356_v54  ;;  %v3436_v6 = vadd.f32 %v11337_v58, %v14085_v28  ;;  %v3437_v19 = vadd.f32 %v11337_v58, %v14086_v10  ;;  %v14087_v27 = vld [vmem:[#allocation696_spill] sm:$0xff]  ;;  %v14088_v54 = vld [vmem:[#allocation697_spill] sm:$0xff] }
 0x3f1   : > { %4381 = vst [vmem:[%s9237_s29 + $0x14e8] sm:$0xff] %v3357_v5  ;;  %4382 = vst [vmem:[%s9237_s29 + $0x14f0] sm:$0xff] %v3358_v24  ;;  %v3438_v63 = vadd.f32 %v11337_v58, %v14087_v27  ;;  %v3439_v55 = vadd.f32 %v11337_v58, %v14088_v54  ;;  %v14089_v5 = vld [vmem:[#allocation698_spill] sm:$0xff]  ;;  %v14090_v24 = vld [vmem:[#allocation699_spill] sm:$0xff] }
 0x3f2   : > { %4383 = vst [vmem:[%s9237_s29 + $0x14f8] sm:$0xff] %v3359_v2  ;;  %4448 = vst [vmem:[%s9237_s29 + $0x1700] sm:$0xff] %v3424_v22  ;;  %v3440_v40 = vadd.f32 %v11337_v58, %v14089_v5  ;;  %v3441_v17 = vadd.f32 %v11337_v58, %v14090_v24  ;;  %v14091_v2 = vld [vmem:[#allocation700_spill] sm:$0xff]  ;;  %v14092_v22 = vld [vmem:[#allocation701_spill] sm:$0xff] }
 0x3f3   : > { %4449 = vst [vmem:[%s9237_s29 + $0x1708] sm:$0xff] %v3425_v3  ;;  %4450 = vst [vmem:[%s9237_s29 + $0x1710] sm:$0xff] %v3426_v49  ;;  %v3442_v26 = vadd.f32 %v11337_v58, %v14091_v2  ;;  %v3443_v53 = vadd.f32 %v11337_v58, %v14092_v22  ;;  %v14093_v3 = vld [vmem:[#allocation702_spill] sm:$0xff]  ;;  %v14094_v49 = vld [vmem:[#allocation703_spill] sm:$0xff] }
 0x3f4   : > { %4451 = vst [vmem:[%s9237_s29 + $0x1718] sm:$0xff] %v3427_v47  ;;  %4452 = vst [vmem:[%s9237_s29 + $0x1720] sm:$0xff] %v3428_v25  ;;  %v3444_v34 = vadd.f32 %v11337_v58, %v14093_v3  ;;  %v3445_v62 = vadd.f32 %v11337_v58, %v14094_v49  ;;  %v14095_v47 = vld [vmem:[#allocation704_spill] sm:$0xff]  ;;  %v14096_v25 = vld [vmem:[#allocation705_spill] sm:$0xff] }
 0x3f5   : > { %4453 = vst [vmem:[%s9237_s29 + $0x1728] sm:$0xff] %v3429_v43  ;;  %4454 = vst [vmem:[%s9237_s29 + $0x1730] sm:$0xff] %v3430_v57  ;;  %v3446_v30 = vadd.f32 %v11337_v58, %v14095_v47  ;;  %v3447_v37 = vadd.f32 %v11337_v58, %v14096_v25  ;;  %v11435_v43 = vpop.permute.xlu0 %2640  ;;  %v14097_v4 = vld [vmem:[#allocation706_spill] sm:$0xff]  ;;  %v14098_v7 = vld [vmem:[#allocation707_spill] sm:$0xff] }
 0x3f6   : > { %4455 = vst [vmem:[%s9237_s29 + $0x1738] sm:$0xff] %v3431_v45  ;;  %4456 = vst [vmem:[%s9237_s29 + $0x1740] sm:$0xff] %v3432_v42  ;;  %v3448_v57 = vadd.f32 %v11337_v58, %v14097_v4  ;;  %v3449_v45 = vadd.f32 %v11337_v58, %v14098_v7  ;;  %v14099_v46 = vld [vmem:[#allocation708_spill] sm:$0xff]  ;;  %v14100_v1 = vld [vmem:[#allocation709_spill] sm:$0xff] }
 0x3f7   : > { %4457 = vst [vmem:[%s9237_s29 + $0x1748] sm:$0xff] %v3433_v16  ;;  %4458 = vst [vmem:[%s9237_s29 + $0x1750] sm:$0xff] %v3434_v29  ;;  %v3450_v42 = vadd.f32 %v11337_v58, %v14099_v46  ;;  %v3451_v16 = vadd.f32 %v11337_v58, %v14100_v1  ;;  %v14101_v23 = vld [vmem:[#allocation710_spill] sm:$0xff]  ;;  %v14102_v56 = vld [vmem:[#allocation711_spill] sm:$0xff] }
 0x3f8   : > { %4459 = vst [vmem:[%s9237_s29 + $0x1758] sm:$0xff] %v3435_v15  ;;  %4460 = vst [vmem:[%s9237_s29 + $0x1760] sm:$0xff] %v3436_v6  ;;  %v3452_v29 = vadd.f32 %v11337_v58, %v14101_v23  ;;  %v3453_v15 = vadd.f32 %v11337_v58, %v14102_v56  ;;  %v14103_v28 = vld [vmem:[#allocation712_spill] sm:$0xff]  ;;  %v14104_v10 = vld [vmem:[#allocation713_spill] sm:$0xff] }
 0x3f9   : > { %4461 = vst [vmem:[%s9237_s29 + $0x1768] sm:$0xff] %v3437_v19  ;;  %4462 = vst [vmem:[%s9237_s29 + $0x1770] sm:$0xff] %v3438_v63  ;;  %v3454_v6 = vadd.f32 %v11337_v58, %v14103_v28  ;;  %v3455_v19 = vadd.f32 %v11337_v58, %v14104_v10  ;;  %v14105_v27 = vld [vmem:[#allocation714_spill] sm:$0xff]  ;;  %v14106_v54 = vld [vmem:[#allocation715_spill] sm:$0xff] }
 0x3fa   : > { %4463 = vst [vmem:[%s9237_s29 + $0x1778] sm:$0xff] %v3439_v55  ;;  %4464 = vst [vmem:[%s9237_s29 + $0x1780] sm:$0xff] %v3440_v40  ;;  %v3392_v63 = vadd.f32 %v11435_v43, %v14105_v27  ;;  %v3393_v55 = vadd.f32 %v11435_v43, %v14106_v54  ;;  %v14107_v5 = vld [vmem:[#allocation716_spill] sm:$0xff]  ;;  %v14108_v40 = vld [vmem:[#allocation717_spill] sm:$0xff] }
 0x3fb   : > { %4465 = vst [vmem:[%s9237_s29 + $0x1788] sm:$0xff] %v3441_v17  ;;  %4466 = vst [vmem:[%s9237_s29 + $0x1790] sm:$0xff] %v3442_v26  ;;  %v3394_v58 = vadd.f32 %v11435_v43, %v14107_v5  ;;  %v3395_v24 = vadd.f32 %v11435_v43, %v14108_v40  ;;  %v14109_v17 = vld [vmem:[#allocation718_spill] sm:$0xff]  ;;  %v14110_v26 = vld [vmem:[#allocation719_spill] sm:$0xff] }
 0x3fc   : > { %4467 = vst [vmem:[%s9237_s29 + $0x1798] sm:$0xff] %v3443_v53  ;;  %4468 = vst [vmem:[%s9237_s29 + $0x17a0] sm:$0xff] %v3444_v34  ;;  %v3396_v2 = vadd.f32 %v11435_v43, %v14109_v17  ;;  %v3397_v22 = vadd.f32 %v11435_v43, %v14110_v26  ;;  %v14111_v53 = vld [vmem:[#allocation720_spill] sm:$0xff]  ;;  %v14112_v34 = vld [vmem:[#allocation721_spill] sm:$0xff] }
 0x3fd   : > { %4469 = vst [vmem:[%s9237_s29 + $0x17a8] sm:$0xff] %v3445_v62  ;;  %4470 = vst [vmem:[%s9237_s29 + $0x17b0] sm:$0xff] %v3446_v30  ;;  %v3398_v3 = vadd.f32 %v11435_v43, %v14111_v53  ;;  %v3399_v49 = vadd.f32 %v11435_v43, %v14112_v34  ;;  %v14113_v62 = vld [vmem:[#allocation722_spill] sm:$0xff]  ;;  %v14114_v30 = vld [vmem:[#allocation723_spill] sm:$0xff] }
 0x3fe   : > { %4471 = vst [vmem:[%s9237_s29 + $0x17b8] sm:$0xff] %v3447_v37  ;;  %4472 = vst [vmem:[%s9237_s29 + $0x17c0] sm:$0xff] %v3448_v57  ;;  %v3400_v47 = vadd.f32 %v11435_v43, %v14113_v62  ;;  %v3401_v25 = vadd.f32 %v11435_v43, %v14114_v30  ;;  %v14115_v37 = vld [vmem:[#allocation724_spill] sm:$0xff]  ;;  %v14116_v57 = vld [vmem:[#allocation725_spill] sm:$0xff] }
 0x3ff   : > { %4473 = vst [vmem:[%s9237_s29 + $0x17c8] sm:$0xff] %v3449_v45  ;;  %4474 = vst [vmem:[%s9237_s29 + $0x17d0] sm:$0xff] %v3450_v42  ;;  %v3402_v4 = vadd.f32 %v11435_v43, %v14115_v37  ;;  %v3403_v7 = vadd.f32 %v11435_v43, %v14116_v57  ;;  %v14117_v45 = vld [vmem:[#allocation726_spill] sm:$0xff]  ;;  %v14118_v42 = vld [vmem:[#allocation727_spill] sm:$0xff] }
 0x400   : > { %4475 = vst [vmem:[%s9237_s29 + $0x17d8] sm:$0xff] %v3451_v16  ;;  %4476 = vst [vmem:[%s9237_s29 + $0x17e0] sm:$0xff] %v3452_v29  ;;  %v3404_v46 = vadd.f32 %v11435_v43, %v14117_v45  ;;  %v3405_v1 = vadd.f32 %v11435_v43, %v14118_v42  ;;  %v14119_v16 = vld [vmem:[#allocation728_spill] sm:$0xff]  ;;  %v14120_v29 = vld [vmem:[#allocation729_spill] sm:$0xff] }
 0x401   : > { %4477 = vst [vmem:[%s9237_s29 + $0x17e8] sm:$0xff] %v3453_v15  ;;  %4478 = vst [vmem:[%s9237_s29 + $0x17f0] sm:$0xff] %v3454_v6  ;;  %v3406_v23 = vadd.f32 %v11435_v43, %v14119_v16  ;;  %v3407_v56 = vadd.f32 %v11435_v43, %v14120_v29  ;;  %v14121_v15 = vld [vmem:[#allocation730_spill] sm:$0xff]  ;;  %v14122_v6 = vld [vmem:[#allocation731_spill] sm:$0xff] }
 0x402   : > { %4479 = vst [vmem:[%s9237_s29 + $0x17f8] sm:$0xff] %v3455_v19  ;;  %4416 = vst [vmem:[%s9237_s29 + $0x1600] sm:$0xff] %v3392_v63  ;;  %v3408_v28 = vadd.f32 %v11435_v43, %v14121_v15  ;;  %v3409_v10 = vadd.f32 %v11435_v43, %v14122_v6  ;;  %v14123_v19 = vld [vmem:[#allocation732_spill] sm:$0xff]  ;;  %v14124_v63 = vld [vmem:[#allocation733_spill] sm:$0xff] }
 0x403   : > { %4417 = vst [vmem:[%s9237_s29 + $0x1608] sm:$0xff] %v3393_v55  ;;  %4418 = vst [vmem:[%s9237_s29 + $0x1610] sm:$0xff] %v3394_v58  ;;  %v3410_v27 = vadd.f32 %v11435_v43, %v14123_v19  ;;  %v3411_v54 = vadd.f32 %v11435_v43, %v14124_v63  ;;  %v14125_v55 = vld [vmem:[#allocation734_spill] sm:$0xff]  ;;  %v14126_v58 = vld [vmem:[#allocation735_spill] sm:$0xff] }
 0x404   : > { %4419 = vst [vmem:[%s9237_s29 + $0x1618] sm:$0xff] %v3395_v24  ;;  %4420 = vst [vmem:[%s9237_s29 + $0x1620] sm:$0xff] %v3396_v2  ;;  %v3412_v5 = vadd.f32 %v11435_v43, %v14125_v55  ;;  %v3413_v40 = vadd.f32 %v11435_v43, %v14126_v58  ;;  %v14127_v24 = vld [vmem:[#allocation736_spill] sm:$0xff]  ;;  %v14128_v2 = vld [vmem:[#allocation737_spill] sm:$0xff] }
 0x405   : > { %4421 = vst [vmem:[%s9237_s29 + $0x1628] sm:$0xff] %v3397_v22  ;;  %4422 = vst [vmem:[%s9237_s29 + $0x1630] sm:$0xff] %v3398_v3  ;;  %v3414_v17 = vadd.f32 %v11435_v43, %v14127_v24  ;;  %v3415_v26 = vadd.f32 %v11435_v43, %v14128_v2  ;;  %v11533_v22 = vpop.permute.xlu1 %2655  ;;  %v14129_v53 = vld [vmem:[#allocation738_spill] sm:$0xff]  ;;  %v14130_v34 = vld [vmem:[#allocation739_spill] sm:$0xff] }
 0x406   : > { %4423 = vst [vmem:[%s9237_s29 + $0x1638] sm:$0xff] %v3399_v49  ;;  %4424 = vst [vmem:[%s9237_s29 + $0x1640] sm:$0xff] %v3400_v47  ;;  %v3416_v3 = vadd.f32 %v11435_v43, %v14129_v53  ;;  %v3417_v49 = vadd.f32 %v11435_v43, %v14130_v34  ;;  %v14131_v62 = vld [vmem:[#allocation740_spill] sm:$0xff]  ;;  %v14132_v30 = vld [vmem:[#allocation741_spill] sm:$0xff] }
 0x407   : > { %4425 = vst [vmem:[%s9237_s29 + $0x1648] sm:$0xff] %v3401_v25  ;;  %4426 = vst [vmem:[%s9237_s29 + $0x1650] sm:$0xff] %v3402_v4  ;;  %v3418_v47 = vadd.f32 %v11435_v43, %v14131_v62  ;;  %v3419_v25 = vadd.f32 %v11435_v43, %v14132_v30  ;;  %v14133_v37 = vld [vmem:[#allocation742_spill] sm:$0xff]  ;;  %v14134_v57 = vld [vmem:[#allocation743_spill] sm:$0xff] }
 0x408   : > { %4427 = vst [vmem:[%s9237_s29 + $0x1658] sm:$0xff] %v3403_v7  ;;  %4428 = vst [vmem:[%s9237_s29 + $0x1660] sm:$0xff] %v3404_v46  ;;  %v3420_v4 = vadd.f32 %v11435_v43, %v14133_v37  ;;  %v3421_v7 = vadd.f32 %v11435_v43, %v14134_v57  ;;  %v14135_v45 = vld [vmem:[#allocation744_spill] sm:$0xff]  ;;  %v14136_v42 = vld [vmem:[#allocation745_spill] sm:$0xff] }
 0x409   : > { %4429 = vst [vmem:[%s9237_s29 + $0x1668] sm:$0xff] %v3405_v1  ;;  %4430 = vst [vmem:[%s9237_s29 + $0x1670] sm:$0xff] %v3406_v23  ;;  %v3422_v46 = vadd.f32 %v11435_v43, %v14135_v45  ;;  %v3423_v1 = vadd.f32 %v11435_v43, %v14136_v42  ;;  %v14137_v16 = vld [vmem:[#allocation746_spill] sm:$0xff]  ;;  %v14138_v29 = vld [vmem:[#allocation747_spill] sm:$0xff] }
 0x40a   : > { %4431 = vst [vmem:[%s9237_s29 + $0x1678] sm:$0xff] %v3407_v56  ;;  %4432 = vst [vmem:[%s9237_s29 + $0x1680] sm:$0xff] %v3408_v28  ;;  %v3488_v23 = vadd.f32 %v11533_v22, %v14137_v16  ;;  %v3489_v56 = vadd.f32 %v11533_v22, %v14138_v29  ;;  %v14139_v15 = vld [vmem:[#allocation748_spill] sm:$0xff]  ;;  %v14140_v28 = vld [vmem:[#allocation749_spill] sm:$0xff] }
 0x40b   : > { %4433 = vst [vmem:[%s9237_s29 + $0x1688] sm:$0xff] %v3409_v10  ;;  %4434 = vst [vmem:[%s9237_s29 + $0x1690] sm:$0xff] %v3410_v27  ;;  %v3490_v43 = vadd.f32 %v11533_v22, %v14139_v15  ;;  %v3491_v6 = vadd.f32 %v11533_v22, %v14140_v28  ;;  %v14141_v10 = vld [vmem:[#allocation750_spill] sm:$0xff]  ;;  %v14142_v27 = vld [vmem:[#allocation751_spill] sm:$0xff] }
 0x40c   : > { %4435 = vst [vmem:[%s9237_s29 + $0x1698] sm:$0xff] %v3411_v54  ;;  %4436 = vst [vmem:[%s9237_s29 + $0x16a0] sm:$0xff] %v3412_v5  ;;  %v3492_v19 = vadd.f32 %v11533_v22, %v14141_v10  ;;  %v3493_v63 = vadd.f32 %v11533_v22, %v14142_v27  ;;  %v14143_v54 = vld [vmem:[#allocation752_spill] sm:$0xff]  ;;  %v14144_v5 = vld [vmem:[#allocation753_spill] sm:$0xff] }
 0x40d   : > { %4437 = vst [vmem:[%s9237_s29 + $0x16a8] sm:$0xff] %v3413_v40  ;;  %4438 = vst [vmem:[%s9237_s29 + $0x16b0] sm:$0xff] %v3414_v17  ;;  %v3494_v55 = vadd.f32 %v11533_v22, %v14143_v54  ;;  %v3495_v58 = vadd.f32 %v11533_v22, %v14144_v5  ;;  %v14145_v40 = vld [vmem:[#allocation754_spill] sm:$0xff]  ;;  %v14146_v17 = vld [vmem:[#allocation755_spill] sm:$0xff] }
 0x40e   : > { %4439 = vst [vmem:[%s9237_s29 + $0x16b8] sm:$0xff] %v3415_v26  ;;  %4440 = vst [vmem:[%s9237_s29 + $0x16c0] sm:$0xff] %v3416_v3  ;;  %v3496_v24 = vadd.f32 %v11533_v22, %v14145_v40  ;;  %v3497_v2 = vadd.f32 %v11533_v22, %v14146_v17  ;;  %v14147_v26 = vld [vmem:[#allocation756_spill] sm:$0xff]  ;;  %v14148_v3 = vld [vmem:[#allocation757_spill] sm:$0xff] }
 0x40f   : > { %4441 = vst [vmem:[%s9237_s29 + $0x16c8] sm:$0xff] %v3417_v49  ;;  %4442 = vst [vmem:[%s9237_s29 + $0x16d0] sm:$0xff] %v3418_v47  ;;  %v3498_v53 = vadd.f32 %v11533_v22, %v14147_v26  ;;  %v3499_v34 = vadd.f32 %v11533_v22, %v14148_v3  ;;  %v14149_v49 = vld [vmem:[#allocation758_spill] sm:$0xff]  ;;  %v14150_v47 = vld [vmem:[#allocation759_spill] sm:$0xff] }
 0x410   : > { %4443 = vst [vmem:[%s9237_s29 + $0x16d8] sm:$0xff] %v3419_v25  ;;  %4444 = vst [vmem:[%s9237_s29 + $0x16e0] sm:$0xff] %v3420_v4  ;;  %v3500_v62 = vadd.f32 %v11533_v22, %v14149_v49  ;;  %v3501_v30 = vadd.f32 %v11533_v22, %v14150_v47  ;;  %v14151_v25 = vld [vmem:[#allocation760_spill] sm:$0xff]  ;;  %v14152_v4 = vld [vmem:[#allocation761_spill] sm:$0xff] }
 0x411   : > { %4445 = vst [vmem:[%s9237_s29 + $0x16e8] sm:$0xff] %v3421_v7  ;;  %4446 = vst [vmem:[%s9237_s29 + $0x16f0] sm:$0xff] %v3422_v46  ;;  %v3502_v37 = vadd.f32 %v11533_v22, %v14151_v25  ;;  %v3503_v57 = vadd.f32 %v11533_v22, %v14152_v4  ;;  %v14153_v7 = vld [vmem:[#allocation762_spill] sm:$0xff]  ;;  %v14154_v46 = vld [vmem:[#allocation763_spill] sm:$0xff] }
 0x412   : > { %4447 = vst [vmem:[%s9237_s29 + $0x16f8] sm:$0xff] %v3423_v1  ;;  %4512 = vst [vmem:[%s9237_s29 + $0x1900] sm:$0xff] %v3488_v23  ;;  %v3504_v45 = vadd.f32 %v11533_v22, %v14153_v7  ;;  %v3505_v42 = vadd.f32 %v11533_v22, %v14154_v46  ;;  %v14155_v1 = vld [vmem:[#allocation764_spill] sm:$0xff]  ;;  %v14156_v23 = vld [vmem:[#allocation765_spill] sm:$0xff] }
 0x413   : > { %4513 = vst [vmem:[%s9237_s29 + $0x1908] sm:$0xff] %v3489_v56  ;;  %4514 = vst [vmem:[%s9237_s29 + $0x1910] sm:$0xff] %v3490_v43  ;;  %v3506_v16 = vadd.f32 %v11533_v22, %v14155_v1  ;;  %v3507_v29 = vadd.f32 %v11533_v22, %v14156_v23  ;;  %v14157_v56 = vld [vmem:[#allocation766_spill] sm:$0xff]  ;;  %v14158_v43 = vld [vmem:[#allocation767_spill] sm:$0xff] }
 0x414   : > { %4515 = vst [vmem:[%s9237_s29 + $0x1918] sm:$0xff] %v3491_v6  ;;  %4516 = vst [vmem:[%s9237_s29 + $0x1920] sm:$0xff] %v3492_v19  ;;  %v3508_v15 = vadd.f32 %v11533_v22, %v14157_v56  ;;  %v3509_v28 = vadd.f32 %v11533_v22, %v14158_v43  ;;  %v14159_v6 = vld [vmem:[#allocation768_spill] sm:$0xff]  ;;  %v14160_v19 = vld [vmem:[#allocation769_spill] sm:$0xff] }
 0x415   : > { %4517 = vst [vmem:[%s9237_s29 + $0x1928] sm:$0xff] %v3493_v63  ;;  %4518 = vst [vmem:[%s9237_s29 + $0x1930] sm:$0xff] %v3494_v55  ;;  %v3510_v10 = vadd.f32 %v11533_v22, %v14159_v6  ;;  %v3511_v27 = vadd.f32 %v11533_v22, %v14160_v19  ;;  %v11631_v63 = vpop.permute.xlu0 %2650  ;;  %v14161_v54 = vld [vmem:[#allocation770_spill] sm:$0xff]  ;;  %v14162_v5 = vld [vmem:[#allocation771_spill] sm:$0xff] }
 0x416   : > { %4519 = vst [vmem:[%s9237_s29 + $0x1938] sm:$0xff] %v3495_v58  ;;  %4520 = vst [vmem:[%s9237_s29 + $0x1940] sm:$0xff] %v3496_v24  ;;  %v3512_v55 = vadd.f32 %v11533_v22, %v14161_v54  ;;  %v3513_v58 = vadd.f32 %v11533_v22, %v14162_v5  ;;  %v14163_v40 = vld [vmem:[#allocation772_spill] sm:$0xff]  ;;  %v14164_v17 = vld [vmem:[#allocation773_spill] sm:$0xff] }
 0x417   : > { %4521 = vst [vmem:[%s9237_s29 + $0x1948] sm:$0xff] %v3497_v2  ;;  %4522 = vst [vmem:[%s9237_s29 + $0x1950] sm:$0xff] %v3498_v53  ;;  %v3514_v24 = vadd.f32 %v11533_v22, %v14163_v40  ;;  %v3515_v2 = vadd.f32 %v11533_v22, %v14164_v17  ;;  %v14165_v26 = vld [vmem:[#allocation774_spill] sm:$0xff]  ;;  %v14166_v3 = vld [vmem:[#allocation775_spill] sm:$0xff] }
 0x418   : > { %4523 = vst [vmem:[%s9237_s29 + $0x1958] sm:$0xff] %v3499_v34  ;;  %4524 = vst [vmem:[%s9237_s29 + $0x1960] sm:$0xff] %v3500_v62  ;;  %v3516_v53 = vadd.f32 %v11533_v22, %v14165_v26  ;;  %v3517_v34 = vadd.f32 %v11533_v22, %v14166_v3  ;;  %v14167_v49 = vld [vmem:[#allocation776_spill] sm:$0xff]  ;;  %v14168_v47 = vld [vmem:[#allocation777_spill] sm:$0xff] }
 0x419   : > { %4525 = vst [vmem:[%s9237_s29 + $0x1968] sm:$0xff] %v3501_v30  ;;  %4526 = vst [vmem:[%s9237_s29 + $0x1970] sm:$0xff] %v3502_v37  ;;  %v3518_v62 = vadd.f32 %v11533_v22, %v14167_v49  ;;  %v3519_v30 = vadd.f32 %v11533_v22, %v14168_v47  ;;  %v14169_v25 = vld [vmem:[#allocation778_spill] sm:$0xff]  ;;  %v14170_v4 = vld [vmem:[#allocation779_spill] sm:$0xff] }
 0x41a   : > { %4527 = vst [vmem:[%s9237_s29 + $0x1978] sm:$0xff] %v3503_v57  ;;  %4528 = vst [vmem:[%s9237_s29 + $0x1980] sm:$0xff] %v3504_v45  ;;  %v3456_v37 = vadd.f32 %v11631_v63, %v14169_v25  ;;  %v3457_v57 = vadd.f32 %v11631_v63, %v14170_v4  ;;  %v14171_v7 = vld [vmem:[#allocation780_spill] sm:$0xff]  ;;  %v14172_v45 = vld [vmem:[#allocation781_spill] sm:$0xff] }
 0x41b   : > { %4529 = vst [vmem:[%s9237_s29 + $0x1988] sm:$0xff] %v3505_v42  ;;  %4530 = vst [vmem:[%s9237_s29 + $0x1990] sm:$0xff] %v3506_v16  ;;  %v3458_v22 = vadd.f32 %v11631_v63, %v14171_v7  ;;  %v3459_v46 = vadd.f32 %v11631_v63, %v14172_v45  ;;  %v14173_v42 = vld [vmem:[#allocation782_spill] sm:$0xff]  ;;  %v14174_v16 = vld [vmem:[#allocation783_spill] sm:$0xff] }
 0x41c   : > { %4531 = vst [vmem:[%s9237_s29 + $0x1998] sm:$0xff] %v3507_v29  ;;  %4532 = vst [vmem:[%s9237_s29 + $0x19a0] sm:$0xff] %v3508_v15  ;;  %v3460_v1 = vadd.f32 %v11631_v63, %v14173_v42  ;;  %v3461_v23 = vadd.f32 %v11631_v63, %v14174_v16  ;;  %v14175_v29 = vld [vmem:[#allocation784_spill] sm:$0xff]  ;;  %v14176_v15 = vld [vmem:[#allocation785_spill] sm:$0xff] }
 0x41d   : > { %4533 = vst [vmem:[%s9237_s29 + $0x19a8] sm:$0xff] %v3509_v28  ;;  %4534 = vst [vmem:[%s9237_s29 + $0x19b0] sm:$0xff] %v3510_v10  ;;  %v3462_v56 = vadd.f32 %v11631_v63, %v14175_v29  ;;  %v3463_v43 = vadd.f32 %v11631_v63, %v14176_v15  ;;  %v14177_v28 = vld [vmem:[#allocation786_spill] sm:$0xff]  ;;  %v14178_v10 = vld [vmem:[#allocation787_spill] sm:$0xff] }
 0x41e   : > { %4535 = vst [vmem:[%s9237_s29 + $0x19b8] sm:$0xff] %v3511_v27  ;;  %4536 = vst [vmem:[%s9237_s29 + $0x19c0] sm:$0xff] %v3512_v55  ;;  %v3464_v6 = vadd.f32 %v11631_v63, %v14177_v28  ;;  %v3465_v19 = vadd.f32 %v11631_v63, %v14178_v10  ;;  %v14179_v27 = vld [vmem:[#allocation788_spill] sm:$0xff]  ;;  %v14180_v55 = vld [vmem:[#allocation789_spill] sm:$0xff] }
 0x41f   : > { %4537 = vst [vmem:[%s9237_s29 + $0x19c8] sm:$0xff] %v3513_v58  ;;  %4538 = vst [vmem:[%s9237_s29 + $0x19d0] sm:$0xff] %v3514_v24  ;;  %v3466_v54 = vadd.f32 %v11631_v63, %v14179_v27  ;;  %v3467_v5 = vadd.f32 %v11631_v63, %v14180_v55  ;;  %v14181_v58 = vld [vmem:[#allocation790_spill] sm:$0xff]  ;;  %v14182_v24 = vld [vmem:[#allocation791_spill] sm:$0xff] }
 0x420   : > { %4539 = vst [vmem:[%s9237_s29 + $0x19d8] sm:$0xff] %v3515_v2  ;;  %4540 = vst [vmem:[%s9237_s29 + $0x19e0] sm:$0xff] %v3516_v53  ;;  %v3468_v40 = vadd.f32 %v11631_v63, %v14181_v58  ;;  %v3469_v17 = vadd.f32 %v11631_v63, %v14182_v24  ;;  %v14183_v2 = vld [vmem:[#allocation792_spill] sm:$0xff]  ;;  %v14184_v53 = vld [vmem:[#allocation793_spill] sm:$0xff] }
 0x421   : > { %4541 = vst [vmem:[%s9237_s29 + $0x19e8] sm:$0xff] %v3517_v34  ;;  %4542 = vst [vmem:[%s9237_s29 + $0x19f0] sm:$0xff] %v3518_v62  ;;  %v3470_v26 = vadd.f32 %v11631_v63, %v14183_v2  ;;  %v3471_v3 = vadd.f32 %v11631_v63, %v14184_v53  ;;  %v14185_v34 = vld [vmem:[#allocation794_spill] sm:$0xff]  ;;  %v14186_v62 = vld [vmem:[#allocation795_spill] sm:$0xff] }
 0x422   : > { %4543 = vst [vmem:[%s9237_s29 + $0x19f8] sm:$0xff] %v3519_v30  ;;  %4480 = vst [vmem:[%s9237_s29 + $0x1800] sm:$0xff] %v3456_v37  ;;  %v3472_v49 = vadd.f32 %v11631_v63, %v14185_v34  ;;  %v3473_v47 = vadd.f32 %v11631_v63, %v14186_v62  ;;  %v14187_v30 = vld [vmem:[#allocation796_spill] sm:$0xff]  ;;  %v14188_v37 = vld [vmem:[#allocation797_spill] sm:$0xff] }
 0x423   : > { %4481 = vst [vmem:[%s9237_s29 + $0x1808] sm:$0xff] %v3457_v57  ;;  %4482 = vst [vmem:[%s9237_s29 + $0x1810] sm:$0xff] %v3458_v22  ;;  %v3474_v25 = vadd.f32 %v11631_v63, %v14187_v30  ;;  %v3475_v4 = vadd.f32 %v11631_v63, %v14188_v37  ;;  %v14189_v57 = vld [vmem:[#allocation798_spill] sm:$0xff]  ;;  %v14190_v22 = vld [vmem:[#allocation799_spill] sm:$0xff] }
 0x424   : > { %4483 = vst [vmem:[%s9237_s29 + $0x1818] sm:$0xff] %v3459_v46  ;;  %4484 = vst [vmem:[%s9237_s29 + $0x1820] sm:$0xff] %v3460_v1  ;;  %v3476_v7 = vadd.f32 %v11631_v63, %v14189_v57  ;;  %v3477_v45 = vadd.f32 %v11631_v63, %v14190_v22  ;;  %v14191_v46 = vld [vmem:[#allocation800_spill] sm:$0xff]  ;;  %v14192_v1 = vld [vmem:[#allocation801_spill] sm:$0xff] }
 0x425   : > { %4485 = vst [vmem:[%s9237_s29 + $0x1828] sm:$0xff] %v3461_v23  ;;  %4486 = vst [vmem:[%s9237_s29 + $0x1830] sm:$0xff] %v3462_v56  ;;  %v3478_v42 = vadd.f32 %v11631_v63, %v14191_v46  ;;  %v3479_v16 = vadd.f32 %v11631_v63, %v14192_v1  ;;  %v11729_v23 = vpop.permute.xlu1 %2665  ;;  %v14193_v29 = vld [vmem:[#allocation802_spill] sm:$0xff]  ;;  %v14194_v15 = vld [vmem:[#allocation803_spill] sm:$0xff] }
 0x426   : > { %4487 = vst [vmem:[%s9237_s29 + $0x1838] sm:$0xff] %v3463_v43  ;;  %4488 = vst [vmem:[%s9237_s29 + $0x1840] sm:$0xff] %v3464_v6  ;;  %v3480_v56 = vadd.f32 %v11631_v63, %v14193_v29  ;;  %v3481_v43 = vadd.f32 %v11631_v63, %v14194_v15  ;;  %v14195_v28 = vld [vmem:[#allocation804_spill] sm:$0xff]  ;;  %v14196_v10 = vld [vmem:[#allocation805_spill] sm:$0xff] }
 0x427   : > { %4489 = vst [vmem:[%s9237_s29 + $0x1848] sm:$0xff] %v3465_v19  ;;  %4490 = vst [vmem:[%s9237_s29 + $0x1850] sm:$0xff] %v3466_v54  ;;  %v3482_v6 = vadd.f32 %v11631_v63, %v14195_v28  ;;  %v3483_v19 = vadd.f32 %v11631_v63, %v14196_v10  ;;  %v14197_v27 = vld [vmem:[#allocation806_spill] sm:$0xff]  ;;  %v14198_v55 = vld [vmem:[#allocation807_spill] sm:$0xff] }
 0x428   : > { %4491 = vst [vmem:[%s9237_s29 + $0x1858] sm:$0xff] %v3467_v5  ;;  %4492 = vst [vmem:[%s9237_s29 + $0x1860] sm:$0xff] %v3468_v40  ;;  %v3484_v54 = vadd.f32 %v11631_v63, %v14197_v27  ;;  %v3485_v5 = vadd.f32 %v11631_v63, %v14198_v55  ;;  %v14199_v58 = vld [vmem:[#allocation808_spill] sm:$0xff]  ;;  %v14200_v24 = vld [vmem:[#allocation809_spill] sm:$0xff] }
 0x429   : > { %4493 = vst [vmem:[%s9237_s29 + $0x1868] sm:$0xff] %v3469_v17  ;;  %4494 = vst [vmem:[%s9237_s29 + $0x1870] sm:$0xff] %v3470_v26  ;;  %v3486_v40 = vadd.f32 %v11631_v63, %v14199_v58  ;;  %v3487_v17 = vadd.f32 %v11631_v63, %v14200_v24  ;;  %v14201_v2 = vld [vmem:[#allocation810_spill] sm:$0xff]  ;;  %v14202_v53 = vld [vmem:[#allocation811_spill] sm:$0xff] }
 0x42a   : > { %4495 = vst [vmem:[%s9237_s29 + $0x1878] sm:$0xff] %v3471_v3  ;;  %4496 = vst [vmem:[%s9237_s29 + $0x1880] sm:$0xff] %v3472_v49  ;;  %v3552_v26 = vadd.f32 %v11729_v23, %v14201_v2  ;;  %v3553_v3 = vadd.f32 %v11729_v23, %v14202_v53  ;;  %v14203_v34 = vld [vmem:[#allocation812_spill] sm:$0xff]  ;;  %v14204_v49 = vld [vmem:[#allocation813_spill] sm:$0xff] }
 0x42b   : > { %4497 = vst [vmem:[%s9237_s29 + $0x1888] sm:$0xff] %v3473_v47  ;;  %4498 = vst [vmem:[%s9237_s29 + $0x1890] sm:$0xff] %v3474_v25  ;;  %v3554_v63 = vadd.f32 %v11729_v23, %v14203_v34  ;;  %v3555_v62 = vadd.f32 %v11729_v23, %v14204_v49  ;;  %v14205_v47 = vld [vmem:[#allocation814_spill] sm:$0xff]  ;;  %v14206_v25 = vld [vmem:[#allocation815_spill] sm:$0xff] }
 0x42c   : > { %4499 = vst [vmem:[%s9237_s29 + $0x1898] sm:$0xff] %v3475_v4  ;;  %4500 = vst [vmem:[%s9237_s29 + $0x18a0] sm:$0xff] %v3476_v7  ;;  %v3556_v30 = vadd.f32 %v11729_v23, %v14205_v47  ;;  %v3557_v37 = vadd.f32 %v11729_v23, %v14206_v25  ;;  %v14207_v4 = vld [vmem:[#allocation816_spill] sm:$0xff]  ;;  %v14208_v7 = vld [vmem:[#allocation817_spill] sm:$0xff] }
 0x42d   : > { %4501 = vst [vmem:[%s9237_s29 + $0x18a8] sm:$0xff] %v3477_v45  ;;  %4502 = vst [vmem:[%s9237_s29 + $0x18b0] sm:$0xff] %v3478_v42  ;;  %v3558_v57 = vadd.f32 %v11729_v23, %v14207_v4  ;;  %v3559_v22 = vadd.f32 %v11729_v23, %v14208_v7  ;;  %v14209_v45 = vld [vmem:[#allocation818_spill] sm:$0xff]  ;;  %v14210_v42 = vld [vmem:[#allocation819_spill] sm:$0xff] }
 0x42e   : > { %4503 = vst [vmem:[%s9237_s29 + $0x18b8] sm:$0xff] %v3479_v16  ;;  %4504 = vst [vmem:[%s9237_s29 + $0x18c0] sm:$0xff] %v3480_v56  ;;  %v3560_v46 = vadd.f32 %v11729_v23, %v14209_v45  ;;  %v3561_v1 = vadd.f32 %v11729_v23, %v14210_v42  ;;  %v14211_v16 = vld [vmem:[#allocation820_spill] sm:$0xff]  ;;  %v14212_v56 = vld [vmem:[#allocation821_spill] sm:$0xff] }
 0x42f   : > { %4505 = vst [vmem:[%s9237_s29 + $0x18c8] sm:$0xff] %v3481_v43  ;;  %4506 = vst [vmem:[%s9237_s29 + $0x18d0] sm:$0xff] %v3482_v6  ;;  %v3562_v29 = vadd.f32 %v11729_v23, %v14211_v16  ;;  %v3563_v15 = vadd.f32 %v11729_v23, %v14212_v56  ;;  %v14213_v43 = vld [vmem:[#allocation822_spill] sm:$0xff]  ;;  %v14214_v6 = vld [vmem:[#allocation823_spill] sm:$0xff] }
 0x430   : > { %4507 = vst [vmem:[%s9237_s29 + $0x18d8] sm:$0xff] %v3483_v19  ;;  %4508 = vst [vmem:[%s9237_s29 + $0x18e0] sm:$0xff] %v3484_v54  ;;  %v3564_v28 = vadd.f32 %v11729_v23, %v14213_v43  ;;  %v3565_v10 = vadd.f32 %v11729_v23, %v14214_v6  ;;  %v14215_v19 = vld [vmem:[#allocation824_spill] sm:$0xff]  ;;  %v14216_v54 = vld [vmem:[#allocation825_spill] sm:$0xff] }
 0x431   : > { %4509 = vst [vmem:[%s9237_s29 + $0x18e8] sm:$0xff] %v3485_v5  ;;  %4510 = vst [vmem:[%s9237_s29 + $0x18f0] sm:$0xff] %v3486_v40  ;;  %v3566_v27 = vadd.f32 %v11729_v23, %v14215_v19  ;;  %v3567_v55 = vadd.f32 %v11729_v23, %v14216_v54  ;;  %v14217_v5 = vld [vmem:[#allocation826_spill] sm:$0xff]  ;;  %v14218_v40 = vld [vmem:[#allocation827_spill] sm:$0xff] }
 0x432   : > { %4511 = vst [vmem:[%s9237_s29 + $0x18f8] sm:$0xff] %v3487_v17  ;;  %4576 = vst [vmem:[%s9237_s29 + $0x1b00] sm:$0xff] %v3552_v26  ;;  %v3568_v58 = vadd.f32 %v11729_v23, %v14217_v5  ;;  %v3569_v24 = vadd.f32 %v11729_v23, %v14218_v40  ;;  %v14219_v17 = vld [vmem:[#allocation828_spill] sm:$0xff]  ;;  %v14220_v26 = vld [vmem:[#allocation829_spill] sm:$0xff] }
 0x433   : > { %4577 = vst [vmem:[%s9237_s29 + $0x1b08] sm:$0xff] %v3553_v3  ;;  %4578 = vst [vmem:[%s9237_s29 + $0x1b10] sm:$0xff] %v3554_v63  ;;  %v3570_v2 = vadd.f32 %v11729_v23, %v14219_v17  ;;  %v3571_v53 = vadd.f32 %v11729_v23, %v14220_v26  ;;  %v14221_v3 = vld [vmem:[#allocation830_spill] sm:$0xff]  ;;  %v14222_v63 = vld [vmem:[#allocation831_spill] sm:$0xff] }
 0x434   : > { %4579 = vst [vmem:[%s9237_s29 + $0x1b18] sm:$0xff] %v3555_v62  ;;  %4580 = vst [vmem:[%s9237_s29 + $0x1b20] sm:$0xff] %v3556_v30  ;;  %v3572_v34 = vadd.f32 %v11729_v23, %v14221_v3  ;;  %v3573_v49 = vadd.f32 %v11729_v23, %v14222_v63  ;;  %v14223_v62 = vld [vmem:[#allocation832_spill] sm:$0xff]  ;;  %v14224_v30 = vld [vmem:[#allocation833_spill] sm:$0xff] }
 0x435   : > { %4581 = vst [vmem:[%s9237_s29 + $0x1b28] sm:$0xff] %v3557_v37  ;;  %4582 = vst [vmem:[%s9237_s29 + $0x1b30] sm:$0xff] %v3558_v57  ;;  %v3574_v47 = vadd.f32 %v11729_v23, %v14223_v62  ;;  %v3575_v25 = vadd.f32 %v11729_v23, %v14224_v30  ;;  %v11827_v37 = vpop.permute.xlu0 %2660  ;;  %v14225_v4 = vld [vmem:[#allocation834_spill] sm:$0xff]  ;;  %v14226_v7 = vld [vmem:[#allocation835_spill] sm:$0xff] }
 0x436   : > { %4583 = vst [vmem:[%s9237_s29 + $0x1b38] sm:$0xff] %v3559_v22  ;;  %4584 = vst [vmem:[%s9237_s29 + $0x1b40] sm:$0xff] %v3560_v46  ;;  %v3576_v57 = vadd.f32 %v11729_v23, %v14225_v4  ;;  %v3577_v22 = vadd.f32 %v11729_v23, %v14226_v7  ;;  %v14227_v45 = vld [vmem:[#allocation836_spill] sm:$0xff]  ;;  %v14228_v42 = vld [vmem:[#allocation837_spill] sm:$0xff] }
 0x437   : > { %4585 = vst [vmem:[%s9237_s29 + $0x1b48] sm:$0xff] %v3561_v1  ;;  %4586 = vst [vmem:[%s9237_s29 + $0x1b50] sm:$0xff] %v3562_v29  ;;  %v3578_v46 = vadd.f32 %v11729_v23, %v14227_v45  ;;  %v3579_v1 = vadd.f32 %v11729_v23, %v14228_v42  ;;  %v14229_v16 = vld [vmem:[#allocation838_spill] sm:$0xff]  ;;  %v14230_v56 = vld [vmem:[#allocation839_spill] sm:$0xff] }
 0x438   : > { %4587 = vst [vmem:[%s9237_s29 + $0x1b58] sm:$0xff] %v3563_v15  ;;  %4588 = vst [vmem:[%s9237_s29 + $0x1b60] sm:$0xff] %v3564_v28  ;;  %v3580_v29 = vadd.f32 %v11729_v23, %v14229_v16  ;;  %v3581_v15 = vadd.f32 %v11729_v23, %v14230_v56  ;;  %v14231_v43 = vld [vmem:[#allocation840_spill] sm:$0xff]  ;;  %v14232_v6 = vld [vmem:[#allocation841_spill] sm:$0xff] }
 0x439   : > { %4589 = vst [vmem:[%s9237_s29 + $0x1b68] sm:$0xff] %v3565_v10  ;;  %4590 = vst [vmem:[%s9237_s29 + $0x1b70] sm:$0xff] %v3566_v27  ;;  %v3582_v28 = vadd.f32 %v11729_v23, %v14231_v43  ;;  %v3583_v10 = vadd.f32 %v11729_v23, %v14232_v6  ;;  %v14233_v19 = vld [vmem:[#allocation842_spill] sm:$0xff]  ;;  %v14234_v54 = vld [vmem:[#allocation843_spill] sm:$0xff] }
 0x43a   : > { %4591 = vst [vmem:[%s9237_s29 + $0x1b78] sm:$0xff] %v3567_v55  ;;  %4592 = vst [vmem:[%s9237_s29 + $0x1b80] sm:$0xff] %v3568_v58  ;;  %v3520_v27 = vadd.f32 %v11827_v37, %v14233_v19  ;;  %v3521_v55 = vadd.f32 %v11827_v37, %v14234_v54  ;;  %v14235_v5 = vld [vmem:[#allocation844_spill] sm:$0xff]  ;;  %v14236_v58 = vld [vmem:[#allocation845_spill] sm:$0xff] }
 0x43b   : > { %4593 = vst [vmem:[%s9237_s29 + $0x1b88] sm:$0xff] %v3569_v24  ;;  %4594 = vst [vmem:[%s9237_s29 + $0x1b90] sm:$0xff] %v3570_v2  ;;  %v3522_v23 = vadd.f32 %v11827_v37, %v14235_v5  ;;  %v3523_v40 = vadd.f32 %v11827_v37, %v14236_v58  ;;  %v14237_v24 = vld [vmem:[#allocation846_spill] sm:$0xff]  ;;  %v14238_v2 = vld [vmem:[#allocation847_spill] sm:$0xff] }
 0x43c   : > { %4595 = vst [vmem:[%s9237_s29 + $0x1b98] sm:$0xff] %v3571_v53  ;;  %4596 = vst [vmem:[%s9237_s29 + $0x1ba0] sm:$0xff] %v3572_v34  ;;  %v3524_v17 = vadd.f32 %v11827_v37, %v14237_v24  ;;  %v3525_v26 = vadd.f32 %v11827_v37, %v14238_v2  ;;  %v14239_v53 = vld [vmem:[#allocation848_spill] sm:$0xff]  ;;  %v14240_v34 = vld [vmem:[#allocation849_spill] sm:$0xff] }
 0x43d   : > { %4597 = vst [vmem:[%s9237_s29 + $0x1ba8] sm:$0xff] %v3573_v49  ;;  %4598 = vst [vmem:[%s9237_s29 + $0x1bb0] sm:$0xff] %v3574_v47  ;;  %v3526_v3 = vadd.f32 %v11827_v37, %v14239_v53  ;;  %v3527_v63 = vadd.f32 %v11827_v37, %v14240_v34  ;;  %v14241_v49 = vld [vmem:[#allocation850_spill] sm:$0xff]  ;;  %v14242_v47 = vld [vmem:[#allocation851_spill] sm:$0xff] }
 0x43e   : > { %4599 = vst [vmem:[%s9237_s29 + $0x1bb8] sm:$0xff] %v3575_v25  ;;  %4600 = vst [vmem:[%s9237_s29 + $0x1bc0] sm:$0xff] %v3576_v57  ;;  %v3528_v62 = vadd.f32 %v11827_v37, %v14241_v49  ;;  %v3529_v30 = vadd.f32 %v11827_v37, %v14242_v47  ;;  %v14243_v25 = vld [vmem:[#allocation852_spill] sm:$0xff]  ;;  %v14244_v57 = vld [vmem:[#allocation853_spill] sm:$0xff] }
 0x43f   : > { %4601 = vst [vmem:[%s9237_s29 + $0x1bc8] sm:$0xff] %v3577_v22  ;;  %4602 = vst [vmem:[%s9237_s29 + $0x1bd0] sm:$0xff] %v3578_v46  ;;  %v3530_v4 = vadd.f32 %v11827_v37, %v14243_v25  ;;  %v3531_v7 = vadd.f32 %v11827_v37, %v14244_v57  ;;  %v14245_v22 = vld [vmem:[#allocation854_spill] sm:$0xff]  ;;  %v14246_v46 = vld [vmem:[#allocation855_spill] sm:$0xff] }
 0x440   : > { %4603 = vst [vmem:[%s9237_s29 + $0x1bd8] sm:$0xff] %v3579_v1  ;;  %4604 = vst [vmem:[%s9237_s29 + $0x1be0] sm:$0xff] %v3580_v29  ;;  %v3532_v45 = vadd.f32 %v11827_v37, %v14245_v22  ;;  %v3533_v42 = vadd.f32 %v11827_v37, %v14246_v46  ;;  %v14247_v1 = vld [vmem:[#allocation856_spill] sm:$0xff]  ;;  %v14248_v29 = vld [vmem:[#allocation857_spill] sm:$0xff] }
 0x441   : > { %4605 = vst [vmem:[%s9237_s29 + $0x1be8] sm:$0xff] %v3581_v15  ;;  %4606 = vst [vmem:[%s9237_s29 + $0x1bf0] sm:$0xff] %v3582_v28  ;;  %v3534_v16 = vadd.f32 %v11827_v37, %v14247_v1  ;;  %v3535_v56 = vadd.f32 %v11827_v37, %v14248_v29  ;;  %v14249_v15 = vld [vmem:[#allocation858_spill] sm:$0xff]  ;;  %v14250_v28 = vld [vmem:[#allocation859_spill] sm:$0xff] }
 0x442   : > { %4607 = vst [vmem:[%s9237_s29 + $0x1bf8] sm:$0xff] %v3583_v10  ;;  %4544 = vst [vmem:[%s9237_s29 + $0x1a00] sm:$0xff] %v3520_v27  ;;  %v3536_v43 = vadd.f32 %v11827_v37, %v14249_v15  ;;  %v3537_v6 = vadd.f32 %v11827_v37, %v14250_v28  ;;  %v14251_v10 = vld [vmem:[#allocation860_spill] sm:$0xff]  ;;  %v14252_v27 = vld [vmem:[#allocation861_spill] sm:$0xff] }
 0x443   : > { %4545 = vst [vmem:[%s9237_s29 + $0x1a08] sm:$0xff] %v3521_v55  ;;  %4546 = vst [vmem:[%s9237_s29 + $0x1a10] sm:$0xff] %v3522_v23  ;;  %v3538_v19 = vadd.f32 %v11827_v37, %v14251_v10  ;;  %v3539_v54 = vadd.f32 %v11827_v37, %v14252_v27  ;;  %v14253_v55 = vld [vmem:[#allocation862_spill] sm:$0xff]  ;;  %v14254_v23 = vld [vmem:[#allocation863_spill] sm:$0xff] }
 0x444   : > { %4547 = vst [vmem:[%s9237_s29 + $0x1a18] sm:$0xff] %v3523_v40  ;;  %4548 = vst [vmem:[%s9237_s29 + $0x1a20] sm:$0xff] %v3524_v17  ;;  %v3540_v5 = vadd.f32 %v11827_v37, %v14253_v55  ;;  %v3541_v58 = vadd.f32 %v11827_v37, %v14254_v23  ;;  %v14255_v40 = vld [vmem:[#allocation864_spill] sm:$0xff]  ;;  %v14256_v17 = vld [vmem:[#allocation865_spill] sm:$0xff] }
 0x445   : > { %4549 = vst [vmem:[%s9237_s29 + $0x1a28] sm:$0xff] %v3525_v26  ;;  %4550 = vst [vmem:[%s9237_s29 + $0x1a30] sm:$0xff] %v3526_v3  ;;  %v3542_v24 = vadd.f32 %v11827_v37, %v14255_v40  ;;  %v3543_v2 = vadd.f32 %v11827_v37, %v14256_v17  ;;  %v11925_v26 = vpop.permute.xlu1 %2675  ;;  %v14257_v53 = vld [vmem:[#allocation866_spill] sm:$0xff]  ;;  %v14258_v34 = vld [vmem:[#allocation867_spill] sm:$0xff] }
 0x446   : > { %4551 = vst [vmem:[%s9237_s29 + $0x1a38] sm:$0xff] %v3527_v63  ;;  %4552 = vst [vmem:[%s9237_s29 + $0x1a40] sm:$0xff] %v3528_v62  ;;  %v3544_v3 = vadd.f32 %v11827_v37, %v14257_v53  ;;  %v3545_v63 = vadd.f32 %v11827_v37, %v14258_v34  ;;  %v14259_v49 = vld [vmem:[#allocation868_spill] sm:$0xff]  ;;  %v14260_v47 = vld [vmem:[#allocation869_spill] sm:$0xff]  ;;  %v3616_v1 = vadd.f32 %v11925_v26, %v8972_v8 }
 0x447   : > { %4553 = vst [vmem:[%s9237_s29 + $0x1a48] sm:$0xff] %v3529_v30  ;;  %4554 = vst [vmem:[%s9237_s29 + $0x1a50] sm:$0xff] %v3530_v4  ;;  %v3546_v62 = vadd.f32 %v11827_v37, %v14259_v49  ;;  %v3547_v30 = vadd.f32 %v11827_v37, %v14260_v47  ;;  %v14261_v25 = vld [vmem:[#allocation870_spill] sm:$0xff]  ;;  %v14262_v57 = vld [vmem:[#allocation871_spill] sm:$0xff]  ;;  %v3620_v8 = vadd.f32 %v11925_v26, %v8988_v0 }
 0x448   : > { %4555 = vst [vmem:[%s9237_s29 + $0x1a58] sm:$0xff] %v3531_v7  ;;  %4556 = vst [vmem:[%s9237_s29 + $0x1a60] sm:$0xff] %v3532_v45  ;;  %v3548_v4 = vadd.f32 %v11827_v37, %v14261_v25  ;;  %v3549_v7 = vadd.f32 %v11827_v37, %v14262_v57  ;;  %v14263_v22 = vld [vmem:[#allocation872_spill] sm:$0xff]  ;;  %v14264_v46 = vld [vmem:[#allocation873_spill] sm:$0xff]  ;;  %v3621_v28 = vadd.f32 %v11925_v26, %v8991_v51 }
 0x449   : > { %4557 = vst [vmem:[%s9237_s29 + $0x1a68] sm:$0xff] %v3533_v42  ;;  %4558 = vst [vmem:[%s9237_s29 + $0x1a70] sm:$0xff] %v3534_v16  ;;  %v3550_v45 = vadd.f32 %v11827_v37, %v14263_v22  ;;  %v3551_v42 = vadd.f32 %v11827_v37, %v14264_v46  ;;  %v14265_v16 = vld [vmem:[#allocation874_spill] sm:$0xff]  ;;  %v14267_v15 = vld [vmem:[#allocation876_spill] sm:$0xff] }
 0x44a   : > { %4559 = vst [vmem:[%s9237_s29 + $0x1a78] sm:$0xff] %v3535_v56  ;;  %4560 = vst [vmem:[%s9237_s29 + $0x1a80] sm:$0xff] %v3536_v43  ;;  %v3617_v29 = vadd.f32 %v11925_v26, %v14265_v16  ;;  %v14266_v56 = vld [vmem:[#allocation875_spill] sm:$0xff]  ;;  %v3619_v43 = vadd.f32 %v11925_v26, %v14267_v15  ;;  %v14271_v0 = vld [vmem:[#allocation880_spill] sm:$0xff]  ;;  %v12023_v16 = vpop.permute.xlu0 %2670 }
 0x44b   : > { %4561 = vst [vmem:[%s9237_s29 + $0x1a88] sm:$0xff] %v3537_v6  ;;  %4562 = vst [vmem:[%s9237_s29 + $0x1a90] sm:$0xff] %v3538_v19  ;;  %v3618_v37 = vadd.f32 %v11925_v26, %v14266_v56  ;;  %v14268_v6 = vld [vmem:[#allocation877_spill] sm:$0xff]  ;;  %v14269_v19 = vld [vmem:[#allocation878_spill] sm:$0xff]  ;;  %v3626_v23 = vadd.f32 %v11925_v26, %v14271_v0 }
 0x44c   : > { %4563 = vst [vmem:[%s9237_s29 + $0x1a98] sm:$0xff] %v3539_v54  ;;  %4564 = vst [vmem:[%s9237_s29 + $0x1aa0] sm:$0xff] %v3540_v5  ;;  %v3622_v10 = vadd.f32 %v11925_v26, %v14268_v6  ;;  %v3623_v27 = vadd.f32 %v11925_v26, %v14269_v19  ;;  %v3624_v54 = vadd.f32 %v11925_v26, %v9004_v9  ;;  %v14270_v55 = vld [vmem:[#allocation879_spill] sm:$0xff]  ;;  %v14273_v40 = vld [vmem:[#allocation882_spill] sm:$0xff] }
 0x44d   : > { %4565 = vst [vmem:[%s9237_s29 + $0x1aa8] sm:$0xff] %v3541_v58  ;;  %4566 = vst [vmem:[%s9237_s29 + $0x1ab0] sm:$0xff] %v3542_v24  ;;  %v3625_v5 = vadd.f32 %v11925_v26, %v14270_v55  ;;  %v14272_v58 = vld [vmem:[#allocation881_spill] sm:$0xff]  ;;  %v3628_v9 = vadd.f32 %v11925_v26, %v14273_v40  ;;  %v14274_v24 = vld [vmem:[#allocation883_spill] sm:$0xff] }
 0x44e   : > { %4567 = vst [vmem:[%s9237_s29 + $0x1ab8] sm:$0xff] %v3543_v2  ;;  %4568 = vst [vmem:[%s9237_s29 + $0x1ac0] sm:$0xff] %v3544_v3  ;;  %v3627_v51 = vadd.f32 %v11925_v26, %v14272_v58  ;;  %v3629_v17 = vadd.f32 %v11925_v26, %v14274_v24  ;;  %v14275_v2 = vld [vmem:[#allocation884_spill] sm:$0xff]  ;;  %v14276_v3 = vld [vmem:[#allocation885_spill] sm:$0xff]  ;;  %v3584_v58 = vadd.f32 %v12023_v16, %v9100_v50 }
 0x44f   : > { %4569 = vst [vmem:[%s9237_s29 + $0x1ac8] sm:$0xff] %v3545_v63  ;;  %4570 = vst [vmem:[%s9237_s29 + $0x1ad0] sm:$0xff] %v3546_v62  ;;  %v3630_v53 = vadd.f32 %v11925_v26, %v14275_v2  ;;  %v3631_v34 = vadd.f32 %v11925_v26, %v14276_v3  ;;  %v3632_v63 = vadd.f32 %v11925_v26, %v9032_v13  ;;  %v14277_v49 = vld [vmem:[#allocation886_spill] sm:$0xff]  ;;  %v14278_v47 = vld [vmem:[#allocation887_spill] sm:$0xff] }
 0x450   : > { %4571 = vst [vmem:[%s9237_s29 + $0x1ad8] sm:$0xff] %v3547_v30  ;;  %4572 = vst [vmem:[%s9237_s29 + $0x1ae0] sm:$0xff] %v3548_v4  ;;  %v3633_v62 = vadd.f32 %v11925_v26, %v14277_v49  ;;  %v3634_v30 = vadd.f32 %v11925_v26, %v14278_v47  ;;  %v14279_v25 = vld [vmem:[#allocation888_spill] sm:$0xff]  ;;  %v14280_v57 = vld [vmem:[#allocation889_spill] sm:$0xff]  ;;  %v3592_v47 = vadd.f32 %v12023_v16, %v9130_v52 }
 0x451   : > { %4573 = vst [vmem:[%s9237_s29 + $0x1ae8] sm:$0xff] %v3549_v7  ;;  %4574 = vst [vmem:[%s9237_s29 + $0x1af0] sm:$0xff] %v3550_v45  ;;  %v3635_v4 = vadd.f32 %v11925_v26, %v14279_v25  ;;  %v3636_v7 = vadd.f32 %v11925_v26, %v14280_v57  ;;  %v14281_v13 = vld [vmem:[#allocation890_spill] sm:$0xff]  ;;  %v14282_v45 = vld [vmem:[#allocation891_spill] sm:$0xff]  ;;  %v3596_v52 = vadd.f32 %v12023_v16, %v9145_v59 }
 0x452   : > { %4575 = vst [vmem:[%s9237_s29 + $0x1af8] sm:$0xff] %v3551_v42  ;;  %4640 = vst [vmem:[%s9237_s29 + $0x1d00] sm:$0xff] %v3616_v1  ;;  %v3637_v22 = vadd.f32 %v11925_v26, %v14281_v13  ;;  %v3638_v46 = vadd.f32 %v11925_v26, %v14282_v45  ;;  %v14283_v42 = vld [vmem:[#allocation892_spill] sm:$0xff]  ;;  %v14290_v55 = vld [vmem:[#allocation899_spill] sm:$0xff]  ;;  %v3598_v45 = vadd.f32 %v12023_v16, %v9151_v31 }
 0x453   : > { %4641 = vst [vmem:[%s9237_s29 + $0x1d08] sm:$0xff] %v3617_v29  ;;  %4642 = vst [vmem:[%s9237_s29 + $0x1d10] sm:$0xff] %v3618_v37  ;;  %v3639_v1 = vadd.f32 %v11925_v26, %v14283_v42  ;;  %v14284_v29 = vld [vmem:[#allocation893_spill] sm:$0xff]  ;;  %v14285_v37 = vld [vmem:[#allocation894_spill] sm:$0xff]  ;;  %v3600_v31 = vadd.f32 %v12023_v16, %v9160_v12 }
 0x454   : > { %4643 = vst [vmem:[%s9237_s29 + $0x1d18] sm:$0xff] %v3619_v43  ;;  %4644 = vst [vmem:[%s9237_s29 + $0x1d20] sm:$0xff] %v3620_v8  ;;  %v3640_v56 = vadd.f32 %v11925_v26, %v14284_v29  ;;  %v3641_v15 = vadd.f32 %v11925_v26, %v14285_v37  ;;  %v14286_v43 = vld [vmem:[#allocation895_spill] sm:$0xff]  ;;  %v14291_v0 = vld [vmem:[#allocation900_spill] sm:$0xff]  ;;  %v3602_v37 = vadd.f32 %v12023_v16, %v9166_v38 }
 0x455   : > { %4645 = vst [vmem:[%s9237_s29 + $0x1d28] sm:$0xff] %v3621_v28  ;;  %4646 = vst [vmem:[%s9237_s29 + $0x1d30] sm:$0xff] %v3622_v10  ;;  %v3642_v8 = vadd.f32 %v11925_v26, %v14286_v43  ;;  %v14287_v28 = vld [vmem:[#allocation896_spill] sm:$0xff]  ;;  %v14288_v10 = vld [vmem:[#allocation897_spill] sm:$0xff]  ;;  %v3604_v38 = vadd.f32 %v12023_v16, %v9172_v21 }
 0x456   : > { %4647 = vst [vmem:[%s9237_s29 + $0x1d38] sm:$0xff] %v3623_v27  ;;  %4648 = vst [vmem:[%s9237_s29 + $0x1d40] sm:$0xff] %v3624_v54  ;;  %v3643_v6 = vadd.f32 %v11925_v26, %v14287_v28  ;;  %v3644_v19 = vadd.f32 %v11925_v26, %v14288_v10  ;;  %v14289_v27 = vld [vmem:[#allocation898_spill] sm:$0xff]  ;;  %v14294_v24 = vld [vmem:[#allocation904_spill] sm:$0xff]  ;;  %v3606_v28 = vadd.f32 %v12023_v16, %v9178_v44 }
 0x457   : > { %4649 = vst [vmem:[%s9237_s29 + $0x1d48] sm:$0xff] %v3625_v5  ;;  %4650 = vst [vmem:[%s9237_s29 + $0x1d50] sm:$0xff] %v3626_v23  ;;  %v3645_v54 = vadd.f32 %v11925_v26, %v14289_v27  ;;  %v3646_v5 = vadd.f32 %v11925_v26, %v14290_v55  ;;  %v3647_v23 = vadd.f32 %v11925_v26, %v14291_v0  ;;  %v14295_v2 = vld [vmem:[#allocation905_spill] sm:$0xff]  ;;  %v14298_v49 = vld [vmem:[#allocation908_spill] sm:$0xff] }
 0x458   : > { %4651 = vst [vmem:[%s9237_s29 + $0x1d58] sm:$0xff] %v3627_v51  ;;  %4652 = vst [vmem:[%s9237_s29 + $0x1d60] sm:$0xff] %v3628_v9  ;;  %v14292_v51 = vld [vmem:[#allocation902_spill] sm:$0xff]  ;;  %v14293_v9 = vld [vmem:[#allocation903_spill] sm:$0xff]  ;;  %v3588_v50 = vadd.f32 %v12023_v16, %v14295_v2  ;;  %v3609_v44 = vadd.f32 %v12023_v16, %v9189_v11  ;;  %v3611_v55 = vadd.f32 %v12023_v16, %v9195_v61 }
 0x459   : > { %4653 = vst [vmem:[%s9237_s29 + $0x1d68] sm:$0xff] %v3629_v17  ;;  %4654 = vst [vmem:[%s9237_s29 + $0x1d70] sm:$0xff] %v3630_v53  ;;  %v3585_v40 = vadd.f32 %v12023_v16, %v14292_v51  ;;  %v3586_v26 = vadd.f32 %v12023_v16, %v14293_v9  ;;  %v3587_v17 = vadd.f32 %v12023_v16, %v14294_v24  ;;  %v14296_v53 = vld [vmem:[#allocation906_spill] sm:$0xff]  ;;  %v1248_v59 = vld [vmem:[%s5217_s21 + $0x1f00] sm:$0xff] }
 0x45a   : > { %4655 = vst [vmem:[%s9237_s29 + $0x1d78] sm:$0xff] %v3631_v34  ;;  %4656 = vst [vmem:[%s9237_s29 + $0x1d80] sm:$0xff] %v3632_v63  ;;  %v3589_v3 = vadd.f32 %v12023_v16, %v14296_v53  ;;  %v14297_v34 = vld [vmem:[#allocation907_spill] sm:$0xff]  ;;  %v1252_v12 = vld [vmem:[%s5217_s21 + $0x1f20] sm:$0xff]  ;;  %v3613_v61 = vadd.f32 %v12023_v16, %v9201_v20  ;;  %v3614_v0 = vadd.f32 %v12023_v16, %v9204_v32 }
 0x45b   : > { %4657 = vst [vmem:[%s9237_s29 + $0x1d88] sm:$0xff] %v3633_v62  ;;  %4658 = vst [vmem:[%s9237_s29 + $0x1d90] sm:$0xff] %v3634_v30  ;;  %v3590_v63 = vadd.f32 %v12023_v16, %v14297_v34  ;;  %v3591_v62 = vadd.f32 %v12023_v16, %v14298_v49  ;;  %v14299_v30 = vld [vmem:[#allocation909_spill] sm:$0xff]  ;;  %v1251_v29 = vld [vmem:[%s5217_s21 + $0x1f18] sm:$0xff] }
 0x45c   : > { %4659 = vst [vmem:[%s9237_s29 + $0x1d98] sm:$0xff] %v3635_v4  ;;  %4660 = vst [vmem:[%s9237_s29 + $0x1da0] sm:$0xff] %v3636_v7  ;;  %v3593_v25 = vadd.f32 %v12023_v16, %v14299_v30  ;;  %v14300_v4 = vld [vmem:[#allocation910_spill] sm:$0xff]  ;;  %v14301_v7 = vld [vmem:[#allocation911_spill] sm:$0xff] }
 0x45d   : > { %4661 = vst [vmem:[%s9237_s29 + $0x1da8] sm:$0xff] %v3637_v22  ;;  %4662 = vst [vmem:[%s9237_s29 + $0x1db0] sm:$0xff] %v3638_v46  ;;  %v3594_v57 = vadd.f32 %v12023_v16, %v14300_v4  ;;  %v3595_v13 = vadd.f32 %v12023_v16, %v14301_v7  ;;  %v3597_v22 = vadd.f32 %v12023_v16, %v9148_v48  ;;  %v14302_v46 = vld [vmem:[#allocation912_spill] sm:$0xff]  ;;  %v1250_v48 = vld [vmem:[%s5217_s21 + $0x1f10] sm:$0xff] }
 0x45e   : > { %4663 = vst [vmem:[%s9237_s29 + $0x1db8] sm:$0xff] %v3639_v1  ;;  %4664 = vst [vmem:[%s9237_s29 + $0x1dc0] sm:$0xff] %v3640_v56  ;;  %v3599_v42 = vadd.f32 %v12023_v16, %v14302_v46  ;;  %v1249_v1 = vld [vmem:[%s5217_s21 + $0x1f08] sm:$0xff]  ;;  %v3601_v56 = vadd.f32 %v12023_v16, %v9163_v39  ;;  %v1255_v39 = vld [vmem:[%s5217_s21 + $0x1f38] sm:$0xff] }
 0x45f   : > { %4665 = vst [vmem:[%s9237_s29 + $0x1dc8] sm:$0xff] %v3641_v15  ;;  %4666 = vst [vmem:[%s9237_s29 + $0x1dd0] sm:$0xff] %v3642_v8  ;;  %v3603_v15 = vadd.f32 %v12023_v16, %v9169_v35  ;;  %v1253_v43 = vld [vmem:[%s5217_s21 + $0x1f28] sm:$0xff]  ;;  %v1254_v8 = vld [vmem:[%s5217_s21 + $0x1f30] sm:$0xff]  ;;  %v3605_v35 = vadd.f32 %v12023_v16, %v9175_v14  ;;  %v3608_v14 = vadd.f32 %v12023_v16, %v9186_v41 }
 0x460   : > { %4667 = vst [vmem:[%s9237_s29 + $0x1dd8] sm:$0xff] %v3643_v6  ;;  %4668 = vst [vmem:[%s9237_s29 + $0x1de0] sm:$0xff] %v3644_v19  ;;  %v14303_v6 = vld [vmem:[#allocation913_spill] sm:$0xff]  ;;  %v1256_v21 = vld [vmem:[%s5217_s21 + $0x1f40] sm:$0xff] }
 0x461   : > { %4669 = vst [vmem:[%s9237_s29 + $0x1de8] sm:$0xff] %v3645_v54  ;;  %4670 = vst [vmem:[%s9237_s29 + $0x1df0] sm:$0xff] %v3646_v5  ;;  %v3607_v10 = vadd.f32 %v12023_v16, %v14303_v6  ;;  %v1257_v19 = vld [vmem:[%s5217_s21 + $0x1f48] sm:$0xff]  ;;  %v1258_v27 = vld [vmem:[%s5217_s21 + $0x1f50] sm:$0xff]  ;;  %v3610_v54 = vadd.f32 %v12023_v16, %v9192_v60  ;;  %v3612_v60 = vadd.f32 %v12023_v16, %v9198_v33 }
 0x462   : > { %4671 = vst [vmem:[%s9237_s29 + $0x1df8] sm:$0xff] %v3647_v23  ;;  %4608 = vst [vmem:[%s9237_s29 + $0x1c00] sm:$0xff] %v3584_v58  ;;  %v1259_v41 = vld [vmem:[%s5217_s21 + $0x1f58] sm:$0xff]  ;;  %v1260_v11 = vld [vmem:[%s5217_s21 + $0x1f60] sm:$0xff]  ;;  %v3615_v23 = vadd.f32 %v12023_v16, %v9207_v36 }
 0x463   : > { %4609 = vst [vmem:[%s9237_s29 + $0x1c08] sm:$0xff] %v3585_v40  ;;  %4610 = vst [vmem:[%s9237_s29 + $0x1c10] sm:$0xff] %v3586_v26  ;;  %v1261_v5 = vld [vmem:[%s5217_s21 + $0x1f68] sm:$0xff]  ;;  %v1262_v58 = vld [vmem:[%s5217_s21 + $0x1f70] sm:$0xff] }
 0x464   : > { %4611 = vst [vmem:[%s9237_s29 + $0x1c18] sm:$0xff] %v3587_v17  ;;  %4612 = vst [vmem:[%s9237_s29 + $0x1c20] sm:$0xff] %v3588_v50  ;;  %v1263_v33 = vld [vmem:[%s5217_s21 + $0x1f78] sm:$0xff]  ;;  %v1264_v51 = vld [vmem:[%s5217_s21 + $0x1f80] sm:$0xff] }
 0x465   : > { %4613 = vst [vmem:[%s9237_s29 + $0x1c28] sm:$0xff] %v3589_v3  ;;  %4614 = vst [vmem:[%s9237_s29 + $0x1c30] sm:$0xff] %v3590_v63  ;;  %v1265_v32 = vld [vmem:[%s5217_s21 + $0x1f88] sm:$0xff]  ;;  %v1266_v20 = vld [vmem:[%s5217_s21 + $0x1f90] sm:$0xff] }
 0x466   : > { %4615 = vst [vmem:[%s9237_s29 + $0x1c38] sm:$0xff] %v3591_v62  ;;  %4616 = vst [vmem:[%s9237_s29 + $0x1c40] sm:$0xff] %v3592_v47  ;;  %v1267_v36 = vld [vmem:[%s5217_s21 + $0x1f98] sm:$0xff]  ;;  %v14304_v16 = vld [vmem:[#allocation901_spill] sm:$0xff] }
 0x467   : > { %4617 = vst [vmem:[%s9237_s29 + $0x1c48] sm:$0xff] %v3593_v25  ;;  %4618 = vst [vmem:[%s9237_s29 + $0x1c50] sm:$0xff] %v3594_v57  ;;  %v2464_v40 = vmul.f32 %v14304_v16, %v1248_v59  ;;  %v2465_v9 = vmul.f32 %v14304_v16, %v1249_v1  ;;  %v2466_v26 = vmul.f32 %v14304_v16, %v1250_v48  ;;  %v1268_v17 = vld [vmem:[%s5217_s21 + $0x1fa0] sm:$0xff]  ;;  %v1269_v2 = vld [vmem:[%s5217_s21 + $0x1fa8] sm:$0xff] }
 0x468   : > { %4619 = vst [vmem:[%s9237_s29 + $0x1c58] sm:$0xff] %v3595_v13  ;;  %4620 = vst [vmem:[%s9237_s29 + $0x1c60] sm:$0xff] %v3596_v52  ;;  %v2467_v24 = vmul.f32 %v14304_v16, %v1251_v29  ;;  %v1270_v50 = vld [vmem:[%s5217_s21 + $0x1fb0] sm:$0xff]  ;;  %v2468_v53 = vmul.f32 %v14304_v16, %v1252_v12  ;;  %v2469_v3 = vmul.f32 %v14304_v16, %v1253_v43  ;;  %v1271_v49 = vld [vmem:[%s5217_s21 + $0x1fb8] sm:$0xff] }
 0x469   : > { %4621 = vst [vmem:[%s9237_s29 + $0x1c68] sm:$0xff] %v3597_v22  ;;  %4622 = vst [vmem:[%s9237_s29 + $0x1c70] sm:$0xff] %v3598_v45  ;;  %v2470_v34 = vmul.f32 %v14304_v16, %v1254_v8  ;;  %v2471_v63 = vmul.f32 %v14304_v16, %v1255_v39  ;;  %v1272_v62 = vld [vmem:[%s5217_s21 + $0x1fc0] sm:$0xff]  ;;  %v1273_v47 = vld [vmem:[%s5217_s21 + $0x1fc8] sm:$0xff]  ;;  %v2472_v30 = vmul.f32 %v14304_v16, %v1256_v21 }
 0x46a   : > { %4623 = vst [vmem:[%s9237_s29 + $0x1c78] sm:$0xff] %v3599_v42  ;;  %4624 = vst [vmem:[%s9237_s29 + $0x1c80] sm:$0xff] %v3600_v31  ;;  %v2473_v25 = vmul.f32 %v14304_v16, %v1257_v19  ;;  %v2474_v4 = vmul.f32 %v14304_v16, %v1258_v27  ;;  %v2475_v57 = vmul.f32 %v14304_v16, %v1259_v41  ;;  %v1274_v7 = vld [vmem:[%s5217_s21 + $0x1fd0] sm:$0xff]  ;;  %v1275_v13 = vld [vmem:[%s5217_s21 + $0x1fd8] sm:$0xff] }
 0x46b   : > { %4625 = vst [vmem:[%s9237_s29 + $0x1c88] sm:$0xff] %v3601_v56  ;;  %4626 = vst [vmem:[%s9237_s29 + $0x1c90] sm:$0xff] %v3602_v37  ;;  %v1276_v52 = vld [vmem:[%s5217_s21 + $0x1fe0] sm:$0xff]  ;;  %v2476_v22 = vmul.f32 %v14304_v16, %v1260_v11  ;;  %v2477_v45 = vmul.f32 %v14304_v16, %v1261_v5  ;;  %v2478_v46 = vmul.f32 %v14304_v16, %v1262_v58  ;;  %v1277_v59 = vld [vmem:[%s5217_s21 + $0x1fe8] sm:$0xff] }
 0x46c   : > { %4627 = vst [vmem:[%s9237_s29 + $0x1c98] sm:$0xff] %v3603_v15  ;;  %4628 = vst [vmem:[%s9237_s29 + $0x1ca0] sm:$0xff] %v3604_v38  ;;  %v2479_v42 = vmul.f32 %v14304_v16, %v1263_v33  ;;  %v1278_v1 = vld [vmem:[%s5217_s21 + $0x1ff0] sm:$0xff]  ;;  %v1279_v48 = vld [vmem:[%s5217_s21 + $0x1ff8] sm:$0xff]  ;;  %v2480_v29 = vmul.f32 %v14304_v16, %v1264_v51  ;;  %v2481_v31 = vmul.f32 %v14304_v16, %v1265_v32  ;;  %v12205_v15 = vpop.permute.xlu1 %2685 }
 0x46d   : > { %4629 = vst [vmem:[%s9237_s29 + $0x1ca8] sm:$0xff] %v3605_v35  ;;  %4630 = vst [vmem:[%s9237_s29 + $0x1cb0] sm:$0xff] %v3606_v28  ;;  %v2482_v56 = vmul.f32 %v14304_v16, %v1266_v20  ;;  %v2483_v37 = vmul.f32 %v14304_v16, %v1267_v36  ;;  %v2484_v12 = vmul.f32 %v14304_v16, %v1268_v17  ;;  %v1216_v36 = vld [vmem:[%s5217_s21 + $0x1e00] sm:$0xff] }
 0x46e   : > { %4631 = vst [vmem:[%s9237_s29 + $0x1cb8] sm:$0xff] %v3607_v10  ;;  %4632 = vst [vmem:[%s9237_s29 + $0x1cc0] sm:$0xff] %v3608_v14  ;;  %v2485_v43 = vmul.f32 %v14304_v16, %v1269_v2  ;;  %v2486_v8 = vmul.f32 %v14304_v16, %v1270_v50  ;;  %v2487_v39 = vmul.f32 %v14304_v16, %v1271_v49  ;;  %v1220_v50 = vld [vmem:[%s5217_s21 + $0x1e20] sm:$0xff] }
 0x46f   : > { %4633 = vst [vmem:[%s9237_s29 + $0x1cc8] sm:$0xff] %v3609_v44  ;;  %4634 = vst [vmem:[%s9237_s29 + $0x1cd0] sm:$0xff] %v3610_v54  ;;  %v2488_v38 = vmul.f32 %v14304_v16, %v1272_v62  ;;  %v2489_v35 = vmul.f32 %v14304_v16, %v1273_v47  ;;  %v2490_v28 = vmul.f32 %v14304_v16, %v1274_v7 }
 0x470   : > { %4635 = vst [vmem:[%s9237_s29 + $0x1cd8] sm:$0xff] %v3611_v55  ;;  %4636 = vst [vmem:[%s9237_s29 + $0x1ce0] sm:$0xff] %v3612_v60  ;;  %v2491_v6 = vmul.f32 %v14304_v16, %v1275_v13  ;;  %v12216_v10 = vmul.f32 %v14304_v16, %v1276_v52  ;;  %v12219_v21 = vmul.f32 %v14304_v16, %v1277_v59 }
 0x471   : > { %4637 = vst [vmem:[%s9237_s29 + $0x1ce8] sm:$0xff] %v3613_v61  ;;  %4638 = vst [vmem:[%s9237_s29 + $0x1cf0] sm:$0xff] %v3614_v0  ;;  %v12222_v19 = vmul.f32 %v14304_v16, %v1278_v1  ;;  %v12225_v27 = vmul.f32 %v14304_v16, %v1279_v48  ;;  %v3680_v14 = vadd.f32 %v12205_v15, %v2464_v40  ;;  %v1217_v16 = vld [vmem:[%s5217_s21 + $0x1e08] sm:$0xff]  ;;  %v1218_v40 = vld [vmem:[%s5217_s21 + $0x1e10] sm:$0xff] }
 0x472   : > { %4639 = vst [vmem:[%s9237_s29 + $0x1cf8] sm:$0xff] %v3615_v23  ;;  %v3681_v44 = vadd.f32 %v12205_v15, %v2465_v9  ;;  %v3682_v54 = vadd.f32 %v12205_v15, %v2466_v26  ;;  %v3683_v55 = vadd.f32 %v12205_v15, %v2467_v24  ;;  %v3684_v41 = vadd.f32 %v12205_v15, %v2468_v53  ;;  %v1219_v9 = vld [vmem:[%s5217_s21 + $0x1e18] sm:$0xff]  ;;  %v1221_v53 = vld [vmem:[%s5217_s21 + $0x1e28] sm:$0xff] }
 0x473   : > { %v3685_v11 = vadd.f32 %v12205_v15, %v2469_v3  ;;  %v3686_v5 = vadd.f32 %v12205_v15, %v2470_v34  ;;  %v3687_v60 = vadd.f32 %v12205_v15, %v2471_v63  ;;  %v3688_v61 = vadd.f32 %v12205_v15, %v2472_v30  ;;  %4704 = vst [vmem:[%s9237_s29 + $0x1f00] sm:$0xff] %v3680_v14  ;;  %v1222_v3 = vld [vmem:[%s5217_s21 + $0x1e30] sm:$0xff]  ;;  %v1223_v34 = vld [vmem:[%s5217_s21 + $0x1e38] sm:$0xff]  ;;  %v1224_v30 = vld [vmem:[%s5217_s21 + $0x1e40] sm:$0xff] }
 0x474   : > { %v3689_v0 = vadd.f32 %v12205_v15, %v2473_v25  ;;  %v3690_v23 = vadd.f32 %v12205_v15, %v2474_v4  ;;  %v3691_v58 = vadd.f32 %v12205_v15, %v2475_v57  ;;  %4705 = vst [vmem:[%s9237_s29 + $0x1f08] sm:$0xff] %v3681_v44  ;;  %4706 = vst [vmem:[%s9237_s29 + $0x1f10] sm:$0xff] %v3682_v54  ;;  %v1225_v25 = vld [vmem:[%s5217_s21 + $0x1e48] sm:$0xff]  ;;  %v1226_v4 = vld [vmem:[%s5217_s21 + $0x1e50] sm:$0xff] }
 0x475   : > { %4707 = vst [vmem:[%s9237_s29 + $0x1f18] sm:$0xff] %v3683_v55  ;;  %v3692_v33 = vadd.f32 %v12205_v15, %v2476_v22  ;;  %v3693_v51 = vadd.f32 %v12205_v15, %v2477_v45  ;;  %v3694_v32 = vadd.f32 %v12205_v15, %v2478_v46  ;;  %v3695_v20 = vadd.f32 %v12205_v15, %v2479_v42  ;;  %v1227_v22 = vld [vmem:[%s5217_s21 + $0x1e58] sm:$0xff]  ;;  %v1228_v45 = vld [vmem:[%s5217_s21 + $0x1e60] sm:$0xff]  ;;  %v1229_v46 = vld [vmem:[%s5217_s21 + $0x1e68] sm:$0xff] }
 0x476   : > { %4708 = vst [vmem:[%s9237_s29 + $0x1f20] sm:$0xff] %v3684_v41  ;;  %4709 = vst [vmem:[%s9237_s29 + $0x1f28] sm:$0xff] %v3685_v11  ;;  %v3696_v26 = vadd.f32 %v12205_v15, %v2480_v29  ;;  %v3697_v24 = vadd.f32 %v12205_v15, %v2481_v31  ;;  %v3698_v17 = vadd.f32 %v12205_v15, %v2482_v56  ;;  %v1230_v29 = vld [vmem:[%s5217_s21 + $0x1e70] sm:$0xff]  ;;  %v1231_v31 = vld [vmem:[%s5217_s21 + $0x1e78] sm:$0xff] }
 0x477   : > { %4710 = vst [vmem:[%s9237_s29 + $0x1f30] sm:$0xff] %v3686_v5  ;;  %4711 = vst [vmem:[%s9237_s29 + $0x1f38] sm:$0xff] %v3687_v60  ;;  %v3699_v2 = vadd.f32 %v12205_v15, %v2483_v37  ;;  %v3700_v63 = vadd.f32 %v12205_v15, %v2484_v12  ;;  %v3701_v49 = vadd.f32 %v12205_v15, %v2485_v43  ;;  %v1232_v56 = vld [vmem:[%s5217_s21 + $0x1e80] sm:$0xff]  ;;  %v1233_v37 = vld [vmem:[%s5217_s21 + $0x1e88] sm:$0xff] }
 0x478   : > { %4712 = vst [vmem:[%s9237_s29 + $0x1f40] sm:$0xff] %v3688_v61  ;;  %4713 = vst [vmem:[%s9237_s29 + $0x1f48] sm:$0xff] %v3689_v0  ;;  %v3702_v62 = vadd.f32 %v12205_v15, %v2486_v8  ;;  %v3703_v47 = vadd.f32 %v12205_v15, %v2487_v39  ;;  %v3704_v57 = vadd.f32 %v12205_v15, %v2488_v38  ;;  %v1235_v12 = vld [vmem:[%s5217_s21 + $0x1e98] sm:$0xff]  ;;  %v1240_v44 = vld [vmem:[%s5217_s21 + $0x1ec0] sm:$0xff] }
 0x479   : > { %4714 = vst [vmem:[%s9237_s29 + $0x1f50] sm:$0xff] %v3690_v23  ;;  %4715 = vst [vmem:[%s9237_s29 + $0x1f58] sm:$0xff] %v3691_v58  ;;  %v3705_v7 = vadd.f32 %v12205_v15, %v2489_v35  ;;  %v3706_v13 = vadd.f32 %v12205_v15, %v2490_v28  ;;  %v3707_v52 = vadd.f32 %v12205_v15, %v2491_v6  ;;  %v1236_v35 = vld [vmem:[%s5217_s21 + $0x1ea0] sm:$0xff]  ;;  %v1237_v28 = vld [vmem:[%s5217_s21 + $0x1ea8] sm:$0xff] }
 0x47a   : > { %4716 = vst [vmem:[%s9237_s29 + $0x1f60] sm:$0xff] %v3692_v33  ;;  %4717 = vst [vmem:[%s9237_s29 + $0x1f68] sm:$0xff] %v3693_v51  ;;  %v3708_v42 = vadd.f32 %v12205_v15, %v12216_v10  ;;  %v3709_v59 = vadd.f32 %v12205_v15, %v12219_v21  ;;  %v3710_v1 = vadd.f32 %v12205_v15, %v12222_v19  ;;  %v1238_v6 = vld [vmem:[%s5217_s21 + $0x1eb0] sm:$0xff]  ;;  %v1239_v14 = vld [vmem:[%s5217_s21 + $0x1eb8] sm:$0xff] }
 0x47b   : > { %4718 = vst [vmem:[%s9237_s29 + $0x1f70] sm:$0xff] %v3694_v32  ;;  %4719 = vst [vmem:[%s9237_s29 + $0x1f78] sm:$0xff] %v3695_v20  ;;  %v3711_v48 = vadd.f32 %v12205_v15, %v12225_v27  ;;  %v1234_v15 = vld [vmem:[%s5217_s21 + $0x1e90] sm:$0xff]  ;;  %v2432_v43 = vmul.f32 %v9209_v18, %v1216_v36  ;;  %v2433_v8 = vmul.f32 %v9209_v18, %v1217_v16  ;;  %v1241_v54 = vld [vmem:[%s5217_s21 + $0x1ec8] sm:$0xff] }
 0x47c   : > { %4720 = vst [vmem:[%s9237_s29 + $0x1f80] sm:$0xff] %v3696_v26  ;;  %4721 = vst [vmem:[%s9237_s29 + $0x1f88] sm:$0xff] %v3697_v24  ;;  %v2434_v39 = vmul.f32 %v9209_v18, %v1218_v40  ;;  %v2435_v38 = vmul.f32 %v9209_v18, %v1219_v9  ;;  %v2436_v10 = vmul.f32 %v9209_v18, %v1220_v50  ;;  %v1242_v60 = vld [vmem:[%s5217_s21 + $0x1ed0] sm:$0xff]  ;;  %v1243_v61 = vld [vmem:[%s5217_s21 + $0x1ed8] sm:$0xff]  ;;  %v12347_v24 = vpop.permute.xlu0 %2680 }
 0x47d   : > { %4722 = vst [vmem:[%s9237_s29 + $0x1f90] sm:$0xff] %v3698_v17  ;;  %4723 = vst [vmem:[%s9237_s29 + $0x1f98] sm:$0xff] %v3699_v2  ;;  %v2437_v21 = vmul.f32 %v9209_v18, %v1221_v53  ;;  %v2438_v19 = vmul.f32 %v9209_v18, %v1222_v3  ;;  %v2439_v27 = vmul.f32 %v9209_v18, %v1223_v34  ;;  %v1244_v0 = vld [vmem:[%s5217_s21 + $0x1ee0] sm:$0xff]  ;;  %v1245_v32 = vld [vmem:[%s5217_s21 + $0x1ee8] sm:$0xff] }
 0x47e   : > { %4724 = vst [vmem:[%s9237_s29 + $0x1fa0] sm:$0xff] %v3700_v63  ;;  %4725 = vst [vmem:[%s9237_s29 + $0x1fa8] sm:$0xff] %v3701_v49  ;;  %v2440_v55 = vmul.f32 %v9209_v18, %v1224_v30  ;;  %v2441_v41 = vmul.f32 %v9209_v18, %v1225_v25  ;;  %v2442_v11 = vmul.f32 %v9209_v18, %v1226_v4  ;;  %v1246_v20 = vld [vmem:[%s5217_s21 + $0x1ef0] sm:$0xff]  ;;  %v1247_v36 = vld [vmem:[%s5217_s21 + $0x1ef8] sm:$0xff]  ;;  %s5076_s21 = smov [#allocation5]  }
 0x47f   : > { %4726 = vst [vmem:[%s9237_s29 + $0x1fb0] sm:$0xff] %v3702_v62  ;;  %4727 = vst [vmem:[%s9237_s29 + $0x1fb8] sm:$0xff] %v3703_v47  ;;  %v2443_v5 = vmul.f32 %v9209_v18, %v1227_v22  ;;  %v2444_v23 = vmul.f32 %v9209_v18, %v1228_v45  ;;  %v2445_v58 = vmul.f32 %v9209_v18, %v1229_v46  ;;  %s4992_s6 = sshll.u32 %s5076_s21, 4  ;;  %s4993_s6 = int_to_ptr.vmem [resolvable:$false] %s4992_s6 }
 0x480   : > { %4728 = vst [vmem:[%s9237_s29 + $0x1fc0] sm:$0xff] %v3704_v57  ;;  %4729 = vst [vmem:[%s9237_s29 + $0x1fc8] sm:$0xff] %v3705_v7  ;;  %v2446_v33 = vmul.f32 %v9209_v18, %v1230_v29  ;;  %v2447_v51 = vmul.f32 %v9209_v18, %v1231_v31  ;;  %v2448_v16 = vmul.f32 %v9209_v18, %v1232_v56  ;;  %s4994_s8 = scalar_lea.vmem %s4993_s6, 262144  ;;  %p4995_p13 = scmp.lt.s32.totalorder %s12416_s4, %s4993_s6 }
 0x481   : > { %4730 = vst [vmem:[%s9237_s29 + $0x1fd0] sm:$0xff] %v3706_v13  ;;  %4731 = vst [vmem:[%s9237_s29 + $0x1fd8] sm:$0xff] %v3707_v52  ;;  %v2449_v40 = vmul.f32 %v9209_v18, %v1233_v37  ;;  %v2450_v9 = vmul.f32 %v9209_v18, %v1234_v15  ;;  %v2451_v26 = vmul.f32 %v9209_v18, %v1235_v12  ;;  %p4996_p2 = scmp.lt.s32.totalorder %s4994_s8, %s4988_s19 }
 0x482   : > { %4732 = vst [vmem:[%s9237_s29 + $0x1fe0] sm:$0xff] %v3708_v42  ;;  %4733 = vst [vmem:[%s9237_s29 + $0x1fe8] sm:$0xff] %v3709_v59  ;;  %v2452_v17 = vmul.f32 %v9209_v18, %v1236_v35  ;;  %v2453_v2 = vmul.f32 %v9209_v18, %v1237_v28  ;;  %v2454_v50 = vmul.f32 %v9209_v18, %v1238_v6 }
 0x483   : > { %4734 = vst [vmem:[%s9237_s29 + $0x1ff0] sm:$0xff] %v3710_v1  ;;  %4735 = vst [vmem:[%s9237_s29 + $0x1ff8] sm:$0xff] %v3711_v48  ;;  %v2455_v53 = vmul.f32 %v9209_v18, %v1239_v14  ;;  %v2456_v3 = vmul.f32 %v9209_v18, %v1240_v44  ;;  %v2457_v34 = vmul.f32 %v9209_v18, %v1241_v54  ;;  %p4997_p5 = por %p4996_p2, %p4995_p13 }
 0x484   : > { %v2458_v63 = vmul.f32 %v9209_v18, %v1242_v60  ;;  %v2459_v49 = vmul.f32 %v9209_v18, %v1243_v61  ;;  %v2460_v62 = vmul.f32 %v9209_v18, %v1244_v0  ;;  %v2461_v47 = vmul.f32 %v9209_v18, %v1245_v32 }
 0x485   : > { %v2462_v30 = vmul.f32 %v9209_v18, %v1246_v20  ;;  %v2463_v25 = vmul.f32 %v9209_v18, %v1247_v36  ;;  %v3648_v4 = vadd.f32 %v12347_v24, %v2432_v43  ;;  %v3649_v57 = vadd.f32 %v12347_v24, %v2433_v8  ;;  %p4998_p4 = pnand %p4997_p5, %p4991_p6 }
 0x486   : > { %v3650_v7 = vadd.f32 %v12347_v24, %v2434_v39  ;;  %v3651_v13 = vadd.f32 %v12347_v24, %v2435_v38  ;;  %v3652_v52 = vadd.f32 %v12347_v24, %v2436_v10  ;;  %v3653_v22 = vadd.f32 %v12347_v24, %v2437_v21 }
 0x487   : > { %v3654_v45 = vadd.f32 %v12347_v24, %v2438_v19  ;;  %v3655_v18 = vadd.f32 %v12347_v24, %v2439_v27  ;;  %v3656_v46 = vadd.f32 %v12347_v24, %v2440_v55  ;;  %v3657_v42 = vadd.f32 %v12347_v24, %v2441_v41  ;;  %4672 = vst [vmem:[%s9237_s29 + $0x1e00] sm:$0xff] %v3648_v4 }
 0x488   : > { %v3658_v59 = vadd.f32 %v12347_v24, %v2442_v11  ;;  %v3659_v1 = vadd.f32 %v12347_v24, %v2443_v5  ;;  %4673 = vst [vmem:[%s9237_s29 + $0x1e08] sm:$0xff] %v3649_v57  ;;  %4674 = vst [vmem:[%s9237_s29 + $0x1e10] sm:$0xff] %v3650_v7  ;;  %v3660_v48 = vadd.f32 %v12347_v24, %v2444_v23 }
 0x489   : > { %4675 = vst [vmem:[%s9237_s29 + $0x1e18] sm:$0xff] %v3651_v13  ;;  %v3661_v29 = vadd.f32 %v12347_v24, %v2445_v58  ;;  %v3662_v31 = vadd.f32 %v12347_v24, %v2446_v33  ;;  %v3663_v56 = vadd.f32 %v12347_v24, %v2447_v51  ;;  %4676 = vst [vmem:[%s9237_s29 + $0x1e20] sm:$0xff] %v3652_v52 }
 0x48a   : > { %4677 = vst [vmem:[%s9237_s29 + $0x1e28] sm:$0xff] %v3653_v22  ;;  %4678 = vst [vmem:[%s9237_s29 + $0x1e30] sm:$0xff] %v3654_v45  ;;  %v3664_v37 = vadd.f32 %v12347_v24, %v2448_v16  ;;  %v3665_v15 = vadd.f32 %v12347_v24, %v2449_v40  ;;  %v3666_v12 = vadd.f32 %v12347_v24, %v2450_v9 }
 0x48b   : > { %4679 = vst [vmem:[%s9237_s29 + $0x1e38] sm:$0xff] %v3655_v18  ;;  %v3667_v43 = vadd.f32 %v12347_v24, %v2451_v26  ;;  %4680 = vst [vmem:[%s9237_s29 + $0x1e40] sm:$0xff] %v3656_v46  ;;  %v3668_v8 = vadd.f32 %v12347_v24, %v2452_v17  ;;  %v3669_v39 = vadd.f32 %v12347_v24, %v2453_v2 }
 0x48c   : > { %4681 = vst [vmem:[%s9237_s29 + $0x1e48] sm:$0xff] %v3657_v42  ;;  %4682 = vst [vmem:[%s9237_s29 + $0x1e50] sm:$0xff] %v3658_v59  ;;  %v3670_v38 = vadd.f32 %v12347_v24, %v2454_v50  ;;  %v3671_v35 = vadd.f32 %v12347_v24, %v2455_v53  ;;  %v3672_v28 = vadd.f32 %v12347_v24, %v2456_v3 }
 0x48d   : > { %4683 = vst [vmem:[%s9237_s29 + $0x1e58] sm:$0xff] %v3659_v1  ;;  %4684 = vst [vmem:[%s9237_s29 + $0x1e60] sm:$0xff] %v3660_v48  ;;  %v3673_v6 = vadd.f32 %v12347_v24, %v2457_v34  ;;  %v3674_v10 = vadd.f32 %v12347_v24, %v2458_v63  ;;  %v3675_v21 = vadd.f32 %v12347_v24, %v2459_v49 }
 0x48e   : > { %4685 = vst [vmem:[%s9237_s29 + $0x1e68] sm:$0xff] %v3661_v29  ;;  %4686 = vst [vmem:[%s9237_s29 + $0x1e70] sm:$0xff] %v3662_v31  ;;  %v3676_v19 = vadd.f32 %v12347_v24, %v2460_v62  ;;  %v3677_v27 = vadd.f32 %v12347_v24, %v2461_v47  ;;  %v3678_v14 = vadd.f32 %v12347_v24, %v2462_v30 }
 0x48f   : > { %4687 = vst [vmem:[%s9237_s29 + $0x1e78] sm:$0xff] %v3663_v56  ;;  %4688 = vst [vmem:[%s9237_s29 + $0x1e80] sm:$0xff] %v3664_v37  ;;  %v3679_v44 = vadd.f32 %v12347_v24, %v2463_v25 }
 0x490   : > { %4689 = vst [vmem:[%s9237_s29 + $0x1e88] sm:$0xff] %v3665_v15  ;;  %4690 = vst [vmem:[%s9237_s29 + $0x1e90] sm:$0xff] %v3666_v12 }
 0x491   : > { %4691 = vst [vmem:[%s9237_s29 + $0x1e98] sm:$0xff] %v3667_v43  ;;  %4692 = vst [vmem:[%s9237_s29 + $0x1ea0] sm:$0xff] %v3668_v8 }
 0x492   : > { %4693 = vst [vmem:[%s9237_s29 + $0x1ea8] sm:$0xff] %v3669_v39  ;;  %4694 = vst [vmem:[%s9237_s29 + $0x1eb0] sm:$0xff] %v3670_v38 }
 0x493   : > { %4695 = vst [vmem:[%s9237_s29 + $0x1eb8] sm:$0xff] %v3671_v35  ;;  %4696 = vst [vmem:[%s9237_s29 + $0x1ec0] sm:$0xff] %v3672_v28 }
 0x494   : > { %4697 = vst [vmem:[%s9237_s29 + $0x1ec8] sm:$0xff] %v3673_v6  ;;  %4698 = vst [vmem:[%s9237_s29 + $0x1ed0] sm:$0xff] %v3674_v10 }
 0x495   : > { %4699 = vst [vmem:[%s9237_s29 + $0x1ed8] sm:$0xff] %v3675_v21  ;;  %4700 = vst [vmem:[%s9237_s29 + $0x1ee0] sm:$0xff] %v3676_v19 }
 0x496   : > { %4701 = vst [vmem:[%s9237_s29 + $0x1ee8] sm:$0xff] %v3677_v27  ;;  %4702 = vst [vmem:[%s9237_s29 + $0x1ef0] sm:$0xff] %v3678_v14 }
 0x497   : > { %4703 = vst [vmem:[%s9237_s29 + $0x1ef8] sm:$0xff] %v3679_v44 }
 0x498   : > { %5001 = shalt.err (!%p4998_p4)
}
 0x499   : > { %s5002_s9 = scalar_lea.hbm %s12414_s7, 131072  ;;  %s5006_s24 = scalar_lea.hbm %s12484_s3, 262144 }
 0x49a   : > { %p5003_p7 = scmp.ne.s32.totalorder %s12414_s7, %s5002_s9  ;;  %p5007_p1 = scmp.lt.u32.totalorder %s12414_s7, %s12484_s3 }
 0x49b   : > { %p5008_p3 = scmp.lt.u32.totalorder %s5006_s24, %s5002_s9  ;;  %p5010_p8 = scmp.lt.u32.totalorder %s5002_s9, %s12414_s7 }
 0x49c   : > { %p5004_p10 = pnand %p5003_p7, %p14305_p11 }
 0x49d   : > { %p5009_p9 = por %p5008_p3, %p5007_p1 }
 0x49e   : > { %p5005_p12 = pneg %p5004_p10 }
 0x49f   : > { %p5011_p0 = por %p5010_p8, %p5009_p9 }
 0x4a1   : > { %p5012_p6 = pnand %p5011_p0, %p5005_p12 }
 0x4a3   : > { %5015 = shalt.err (!%p5012_p6)
}
 0x4a4   : > { %s5077_s29 = smov 4096   ;;  %s5078_s30 = smov 256  }
 0x4a5   : > { %4891 = dma.vmem_to_hbm [thread:$0]  (%p14305_p11), %s12416_s4, 131072, %s12414_s7, %s4737_s18, %s5077_s29, %s5077_s29, %s5078_s30  }
 0x4a6 PF: > { %s4768_s15 = sand.u32 1, %s5050_s12   ;;  %p14306_p13 = scmp.ne.s32.totalorder %s12490_s27, 0 }
 0x4a7   : > { %p14307_p2 = scmp.ge.s32.totalorder %s5070_s17, 2  ;;  %s4769_s5 = scalar_lea.sflag [#allocation4], %s4768_s15 }
 0x4a9   : > { %p4898_p5 = pnand %p14307_p2, %p14306_p13 }
 0x4ab   : > { %5045 = dma.done.wait (!%p4898_p5), %s4769_s5, 131072  }
 0x4ac   : > { %5047 = vsyncadd (!%p4898_p5), %s4769_s5, 4294836224  ;;  %s19_s17 = sadd.s32 1, %s5070_s17   ;;  %s14308_s12 = smov %s5054_s13 }
 0x4ad   : > { %p16_p4 = scmp.ge.s32.totalorder %s19_s17, 4   ;;  %s14309_s13 = smov %s5058_s14 }
 0x4ae   : > { %s14310_s14 = smov %s5155_s26  ;;  %s14311_s15 = smov %s5066_s16 }
 0x4af   : > { %s14312_s16 = smov %s14314_s20  ;;  %18 = sbr.rel (!%p16_p4) target bundleno = 6 (0x6), region = 83 }
 0x4b6   :  { %4774 = vsyncpa [#allocation3], 1 }
 0x4b7   :  { %4776 = vsyncpa [#allocation3 + $0x1], 1 }
 0x4b8   :  { %4777 = vsyncpa [#allocation4], 1 }
 0x4b9   :  { %4779 = vsyncpa [#allocation4 + $0x1], 1 }

</bundles_post_ra>
